<compile_context>
chip_gen: v7x
topology: tpu7x:2x2x1
jax: 0.10.0
libtpu: 0.0.40
codegen_flags: <defaults>
</compile_context>

<pallas_src>
import functools
import numpy as np
import jax
import jax.numpy as jnp
from jax import lax
from jax.experimental import pallas as pl
from jax.experimental.pallas import tpu as pltpu

# ----------------------------- config -----------------------------------
EMBED_DIM = 32       # d_model
NHEAD = 4
NUM_LAYERS = 2
DIM_FF = 2048        # PyTorch default dim_feedforward
BATCH = 2
SEQ = 8
LN_EPS = 1e-5
FF_CHUNK = 512       # FFN hidden chunk size (caps h1 live range)


# --------------------------- pallas kernel -------------------------------
def _layernorm(x, gamma, beta):
    # x: (rows, D); gamma/beta: (1, D); biased variance like torch LayerNorm
    mu = jnp.mean(x, axis=-1, keepdims=True)
    xc = x - mu
    var = jnp.mean(xc * xc, axis=-1, keepdims=True)
    return xc * lax.rsqrt(var + LN_EPS) * gamma + beta


def fused_encoder_kernel(x_ref,
                         wqkv_ref, bqkv_ref, wo_ref, bo_ref,
                         ln1w_ref, ln1b_ref, ln2w_ref, ln2b_ref,
                         w1_ref, b1_ref, w2_ref, b2_ref,
                         out_ref, x_scr, *, batch, seq, nhead):
    layer = pl.program_id(0)
    D = x_ref.shape[-1]
    dh = D // nhead
    rows = batch * seq

    @pl.when(layer == 0)
    def _():
        x_scr[...] = x_ref[...]

    x = x_scr[...]                                            # (B*S, D)

    # ---------------- multi-head self-attention ----------------
    # 1/sqrt(dh) is pre-folded into the Q columns of wqkv/bqkv (host-side).
    qkv = jnp.dot(x, wqkv_ref[...],
                  preferred_element_type=jnp.float32) + bqkv_ref[...]   # (B*S, 3D)

    # Gather heads onto the leading axis so scores/softmax/AV run as single
    # (H*B)-batched ops (one MXU/EUP/XLU launch set instead of one per head).
    qs, ks, vs = [], [], []
    for h in range(nhead):
        lo = h * dh
        qs.append(qkv[:, lo:lo + dh].reshape(batch, seq, dh))
        ks.append(qkv[:, D + lo:D + lo + dh].reshape(batch, seq, dh))
        vs.append(qkv[:, 2 * D + lo:2 * D + lo + dh].reshape(batch, seq, dh))
    q_all = jnp.concatenate(qs, axis=0)                       # (H*B, S, dh)
    k_all = jnp.concatenate(ks, axis=0)
    v_all = jnp.concatenate(vs, axis=0)

    s = jnp.einsum("gqd,gkd->gqk", q_all, k_all,
                   preferred_element_type=jnp.float32)        # (H*B, S, S)
    s = s - jnp.max(s, axis=-1, keepdims=True)
    p = jnp.exp(s)
    p = p * pl.reciprocal(jnp.sum(p, axis=-1, keepdims=True), approx=True)
    o_all = jnp.einsum("gqk,gkd->gqd", p, v_all,
                       preferred_element_type=jnp.float32)    # (H*B, S, dh)

    # Output projection: fold each head's dh slice into the matching wo rows
    # (same math as one (B*S,D)@(D,D) dot, split along K; balanced add tree).
    wo = wo_ref[...]
    parts = []
    for h in range(nhead):
        oh = o_all[h * batch:(h + 1) * batch].reshape(rows, dh)
        parts.append(jnp.dot(oh, wo[h * dh:(h + 1) * dh, :],
                             preferred_element_type=jnp.float32))
    while len(parts) > 1:
        parts = [parts[i] + parts[i + 1] if i + 1 < len(parts) else parts[i]
                 for i in range(0, len(parts), 2)]
    attn = parts[0] + bo_ref[...]

    # residual + layernorm 1 (dropout = identity in eval mode)
    x1 = _layernorm(x + attn, ln1w_ref[...], ln1b_ref[...])

    # ---------------- feed-forward, chunked over dim_ff ----------------
    n_chunks = w1_ref.shape[-1] // FF_CHUNK

    def ffn_chunk(c, acc):
        off = pl.multiple_of(c * FF_CHUNK, FF_CHUNK)
        h1 = jnp.dot(x1, w1_ref[:, pl.ds(off, FF_CHUNK)],
                     preferred_element_type=jnp.float32)
        h1 = jnp.maximum(h1 + b1_ref[:, pl.ds(off, FF_CHUNK)], 0.0)      # ReLU
        # K=2048 contraction is the only accuracy-critical dot -> HIGHEST.
        return acc + jnp.dot(h1, w2_ref[pl.ds(off, FF_CHUNK), :],
                             precision=jax.lax.Precision.HIGHEST,
                             preferred_element_type=jnp.float32)

    ff = lax.fori_loop(0, n_chunks, ffn_chunk,
                       jnp.zeros((rows, D), jnp.float32), unroll=True)
    ff = ff + b2_ref[...]

    # residual + layernorm 2
    x_new = _layernorm(x1 + ff, ln2w_ref[...], ln2b_ref[...])
    x_scr[...] = x_new

    # epilogue: mean over the sequence axis -> (B, D)
    @pl.when(layer == pl.num_programs(0) - 1)
    def _():
        out_ref[...] = jnp.mean(x_new.reshape(batch, seq, D), axis=1)


# ----------------------------- wrapper ------------------------------------
def transformer_encoder(x, layer_params):
    """x: (B, S, D); layer_params: list (per layer) of weight tuples."""
    B, S, D = x.shape
    num_layers = len(layer_params)

    # Stack every parameter across layers on a leading layer axis.
    (wqkv, bqkv, wo, bo, ln1w, ln1b, ln2w, ln2b,
     w1, b1, w2, b2) = [jnp.stack(p) for p in zip(*layer_params)]
    # Fold the attention scale 1/sqrt(dh) into the Q projection (free, host-side).
    scale = 1.0 / np.sqrt(D // NHEAD)
    wqkv = wqkv.at[:, :, :D].multiply(scale)
    bqkv = bqkv.at[:, :, :D].multiply(scale)
    stacked = (wqkv, bqkv, wo, bo, ln1w, ln1b, ln2w, ln2b, w1, b1, w2, b2)

    def layer_spec(a):
        # One layer slice per grid step (leading layer axis squeezed away).
        # Pallas double-buffers these blocks, so layer l+1's weight DMA is
        # overlapped with layer l's compute.
        return pl.BlockSpec((None,) + a.shape[1:],
                            lambda l: (l,) + (0,) * (a.ndim - 1))

    kernel = functools.partial(fused_encoder_kernel,
                               batch=B, seq=S, nhead=NHEAD)

    flops = num_layers * (2 * (B * S) * D * (4 * D + 2 * DIM_FF)
                          + 4 * NHEAD * B * S * S * (D // NHEAD))
    bytes_accessed = 4 * (B * S * D + B * D
                          + sum(int(np.prod(a.shape)) for a in stacked))

    return pl.pallas_call(
        kernel,
        out_shape=jax.ShapeDtypeStruct((B, D), jnp.float32),
        grid_spec=pltpu.PrefetchScalarGridSpec(
            num_scalar_prefetch=0,
            grid=(num_layers,),
            in_specs=[pl.BlockSpec((B * S, D), lambda l: (0, 0))]
                     + [layer_spec(a) for a in stacked],
            out_specs=pl.BlockSpec((B, D), lambda l: (0, 0)),
            scratch_shapes=[pltpu.VMEM((B * S, D), jnp.float32)]),
        compiler_params=pltpu.CompilerParams(
            dimension_semantics=("arbitrary",)),
        cost_estimate=pl.CostEstimate(
            flops=int(flops),
            transcendentals=int(num_layers * (NHEAD * B * S * S + 4 * B * S)),
            bytes_accessed=int(bytes_accessed)),
    )(x.reshape(B * S, D), *stacked)


# ------------------------- deterministic init -----------------------------
def init_layer_params(key, d_model, dim_ff):
    ks = jax.random.split(key, 6)
    std = 0.02
    # PyTorch shapes: in_proj_weight (3D, D), out_proj.weight (D, D),
    # linear1.weight (FF, D), linear2.weight (D, FF).  Stored transposed so
    # the kernel computes x @ W.
    wqkv = (jax.random.normal(ks[0], (3 * d_model, d_model), jnp.float32) * std).T
    bqkv = jax.random.normal(ks[1], (3 * d_model,), jnp.float32) * std
    wo = (jax.random.normal(ks[2], (d_model, d_model), jnp.float32) * std).T
    bo = jax.random.normal(ks[3], (d_model,), jnp.float32) * std
    w1 = (jax.random.normal(ks[4], (dim_ff, d_model), jnp.float32) * std).T
    b1 = jnp.zeros((dim_ff,), jnp.float32)
    w2 = (jax.random.normal(ks[5], (d_model, dim_ff), jnp.float32) * std).T
    b2 = jnp.zeros((d_model,), jnp.float32)
    ln1w = jnp.ones((d_model,), jnp.float32)
    ln1b = jnp.zeros((d_model,), jnp.float32)
    ln2w = jnp.ones((d_model,), jnp.float32)
    ln2b = jnp.zeros((d_model,), jnp.float32)
    # 1-D params reshaped to (1, N) so they broadcast cleanly in VMEM.
    return (jnp.asarray(wqkv), bqkv.reshape(1, -1),
            jnp.asarray(wo), bo.reshape(1, -1),
            ln1w.reshape(1, -1), ln1b.reshape(1, -1),
            ln2w.reshape(1, -1), ln2b.reshape(1, -1),
            jnp.asarray(w1), b1.reshape(1, -1),
            jnp.asarray(w2), b2.reshape(1, -1))


# --------------------------- pure-JAX reference ----------------------------
def ref_layer(x, params):
    (wqkv, bqkv, wo, bo, ln1w, ln1b, ln2w, ln2b, w1, b1, w2, b2) = params
    B, S, D = x.shape
    dh = D // NHEAD
    P = jax.lax.Precision.HIGHEST

    def ln(z, g, bta):
        mu = jnp.mean(z, -1, keepdims=True)
        var = jnp.mean((z - mu) ** 2, -1, keepdims=True)
        return (z - mu) / jnp.sqrt(var + LN_EPS) * g + bta

    qkv = jnp.einsum("bsd,de->bse", x, wqkv, precision=P) + bqkv
    q, k, v = jnp.split(qkv, 3, axis=-1)
    q = q.reshape(B, S, NHEAD, dh).transpose(0, 2, 1, 3) / np.sqrt(dh)
    k = k.reshape(B, S, NHEAD, dh).transpose(0, 2, 1, 3)
    v = v.reshape(B, S, NHEAD, dh).transpose(0, 2, 1, 3)
    p = jax.nn.softmax(jnp.einsum("bhqd,bhkd->bhqk", q, k, precision=P), axis=-1)
    a = jnp.einsum("bhqk,bhkd->bhqd", p, v,
                   precision=P).transpose(0, 2, 1, 3).reshape(B, S, D)
    x1 = ln(x + jnp.einsum("bsd,de->bse", a, wo, precision=P) + bo, ln1w, ln1b)
    h1 = jnp.maximum(jnp.einsum("bsd,df->bsf", x1, w1, precision=P) + b1, 0.0)
    ff = jnp.einsum("bsf,fd->bsd", h1, w2, precision=P) + b2
    return ln(x1 + ff, ln2w, ln2b)


def ref_forward(x, layer_params):
    for p in layer_params:
        x = ref_layer(x, p)
    return x.mean(axis=1)


# -------------------------------- main -------------------------------------
if __name__ == "__main__":
    key = jax.random.PRNGKey(0)
    kx, *kl = jax.random.split(key, NUM_LAYERS + 1)
    x = jax.random.normal(kx, (BATCH, SEQ, EMBED_DIM), jnp.float32)
    layer_params = [init_layer_params(k, EMBED_DIM, DIM_FF) for k in kl]

    out = jax.block_until_ready(transformer_encoder(x, layer_params))
    assert out.shape == (BATCH, EMBED_DIM)

    ref = ref_forward(x, layer_params)
    np.testing.assert_allclose(np.asarray(out), np.asarray(ref),
                               rtol=1e-3, atol=1e-3)
    print("KERNEL_OK")
</pallas_src>

<mosaic_0001>
module attributes {stable_mosaic.version = 11 : i64} {
  func.func @fused_encoder_kernel(%arg0: i32, %arg1: memref<16x32xf32, #tpu.memory_space<vmem>>, %arg2: memref<1x32x96xf32, #tpu.memory_space<vmem>>, %arg3: memref<1x1x96xf32, #tpu.memory_space<vmem>>, %arg4: memref<1x32x32xf32, #tpu.memory_space<vmem>>, %arg5: memref<1x1x32xf32, #tpu.memory_space<vmem>>, %arg6: memref<1x1x32xf32, #tpu.memory_space<vmem>>, %arg7: memref<1x1x32xf32, #tpu.memory_space<vmem>>, %arg8: memref<1x1x32xf32, #tpu.memory_space<vmem>>, %arg9: memref<1x1x32xf32, #tpu.memory_space<vmem>>, %arg10: memref<1x32x2048xf32, #tpu.memory_space<vmem>>, %arg11: memref<1x1x2048xf32, #tpu.memory_space<vmem>>, %arg12: memref<1x2048x32xf32, #tpu.memory_space<vmem>>, %arg13: memref<1x1x32xf32, #tpu.memory_space<vmem>>, %arg14: memref<2x32xf32, #tpu.memory_space<vmem>>, %arg15: memref<16x32xf32, #tpu.memory_space<vmem>>) attributes {dimension_semantics = [#tpu.dimension_semantics<arbitrary>], iteration_bounds = array<i64: 2>, scalar_prefetch = 0 : i64, scratch_operands = 1 : i64, tpu.core_type = #tpu.core_type<tc>, window_params = [{pipeline_mode = #tpu.pipeline_mode<synchronous>, transform_indices = @transform_0, window_bounds = array<i64: 16, 32>}, {transform_indices = @transform_1, window_bounds = array<i64: 1, 32, 96>}, {transform_indices = @transform_2, window_bounds = array<i64: 1, 1, 96>}, {transform_indices = @transform_3, window_bounds = array<i64: 1, 32, 32>}, {transform_indices = @transform_4, window_bounds = array<i64: 1, 1, 32>}, {transform_indices = @transform_5, window_bounds = array<i64: 1, 1, 32>}, {transform_indices = @transform_6, window_bounds = array<i64: 1, 1, 32>}, {transform_indices = @transform_7, window_bounds = array<i64: 1, 1, 32>}, {transform_indices = @transform_8, window_bounds = array<i64: 1, 1, 32>}, {transform_indices = @transform_9, window_bounds = array<i64: 1, 32, 2048>}, {transform_indices = @transform_10, window_bounds = array<i64: 1, 1, 2048>}, {transform_indices = @transform_11, window_bounds = array<i64: 1, 2048, 32>}, {transform_indices = @transform_12, window_bounds = array<i64: 1, 1, 32>}, {pipeline_mode = #tpu.pipeline_mode<synchronous>, transform_indices = @transform_13, window_bounds = array<i64: 2, 32>}]} {
    %c0_i32 = arith.constant 0 : i32
    %0 = arith.cmpi eq, %arg0, %c0_i32 : i32
    %1 = arith.extui %0 : i1 to i32
    %c0_i32_0 = arith.constant 0 : i32
    %2 = arith.cmpi ne, %1, %c0_i32_0 : i32
    scf.if %2 {
      %c0_92 = arith.constant 0 : index
      %c0_93 = arith.constant 0 : index
      %206 = vector.load %arg1[%c0_92, %c0_93] : memref<16x32xf32, #tpu.memory_space<vmem>>, vector<16x32xf32>
      %c0_94 = arith.constant 0 : index
      %c0_95 = arith.constant 0 : index
      %207 = vector.load %arg15[%c0_94, %c0_95] : memref<16x32xf32, #tpu.memory_space<vmem>>, vector<16x32xf32>
      tpu.vector_store %arg15[%c0_94, %c0_95], %206 {strides = array<i32>} : memref<16x32xf32, #tpu.memory_space<vmem>>, vector<16x32xf32>,
    } else {
    }
    %c0 = arith.constant 0 : index
    %c0_1 = arith.constant 0 : index
    %3 = vector.load %arg15[%c0, %c0_1] : memref<16x32xf32, #tpu.memory_space<vmem>>, vector<16x32xf32>
    %c0_2 = arith.constant 0 : index
    %c0_3 = arith.constant 0 : index
    %c0_4 = arith.constant 0 : index
    %4 = vector.load %arg2[%c0_2, %c0_3, %c0_4] : memref<1x32x96xf32, #tpu.memory_space<vmem>>, vector<1x32x96xf32>
    %5 = vector.shape_cast %4 : vector<1x32x96xf32> to vector<32x96xf32>
    %cst = arith.constant dense<0.000000e+00> : vector<16x96xf32>
    %6 = tpu.matmul %3, %5, %cst {dimension_numbers = #tpu.dot_dimension_numbers<[1], [0], [0], [1], [0, 0, 1, 1], [], []>} : vector<16x32xf32>, vector<32x96xf32>, vector<16x96xf32> -> vector<16x96xf32>
    %c0_5 = arith.constant 0 : index
    %c0_6 = arith.constant 0 : index
    %c0_7 = arith.constant 0 : index
    %7 = vector.load %arg3[%c0_5, %c0_6, %c0_7] : memref<1x1x96xf32, #tpu.memory_space<vmem>>, vector<1x1x96xf32>
    %8 = vector.shape_cast %7 : vector<1x1x96xf32> to vector<1x96xf32>
    %9 = vector.broadcast %8 : vector<1x96xf32> to vector<16x96xf32>
    %10 = arith.addf %6, %9 : vector<16x96xf32>
    %11 = vector.extract_strided_slice %10 {offsets = [0, 0], sizes = [16, 8], strides = [1, 1]} : vector<16x96xf32> to vector<16x8xf32>
    %12 = vector.shape_cast %11 : vector<16x8xf32> to vector<2x8x8xf32>
    %13 = vector.extract_strided_slice %10 {offsets = [0, 32], sizes = [16, 8], strides = [1, 1]} : vector<16x96xf32> to vector<16x8xf32>
    %14 = vector.shape_cast %13 : vector<16x8xf32> to vector<2x8x8xf32>
    %15 = vector.extract_strided_slice %10 {offsets = [0, 64], sizes = [16, 8], strides = [1, 1]} : vector<16x96xf32> to vector<16x8xf32>
    %16 = vector.shape_cast %15 : vector<16x8xf32> to vector<2x8x8xf32>
    %17 = vector.extract_strided_slice %10 {offsets = [0, 8], sizes = [16, 8], strides = [1, 1]} : vector<16x96xf32> to vector<16x8xf32>
    %18 = vector.shape_cast %17 : vector<16x8xf32> to vector<2x8x8xf32>
    %19 = vector.extract_strided_slice %10 {offsets = [0, 40], sizes = [16, 8], strides = [1, 1]} : vector<16x96xf32> to vector<16x8xf32>
    %20 = vector.shape_cast %19 : vector<16x8xf32> to vector<2x8x8xf32>
    %21 = vector.extract_strided_slice %10 {offsets = [0, 72], sizes = [16, 8], strides = [1, 1]} : vector<16x96xf32> to vector<16x8xf32>
    %22 = vector.shape_cast %21 : vector<16x8xf32> to vector<2x8x8xf32>
    %23 = vector.extract_strided_slice %10 {offsets = [0, 16], sizes = [16, 8], strides = [1, 1]} : vector<16x96xf32> to vector<16x8xf32>
    %24 = vector.shape_cast %23 : vector<16x8xf32> to vector<2x8x8xf32>
    %25 = vector.extract_strided_slice %10 {offsets = [0, 48], sizes = [16, 8], strides = [1, 1]} : vector<16x96xf32> to vector<16x8xf32>
    %26 = vector.shape_cast %25 : vector<16x8xf32> to vector<2x8x8xf32>
    %27 = vector.extract_strided_slice %10 {offsets = [0, 80], sizes = [16, 8], strides = [1, 1]} : vector<16x96xf32> to vector<16x8xf32>
    %28 = vector.shape_cast %27 : vector<16x8xf32> to vector<2x8x8xf32>
    %29 = vector.extract_strided_slice %10 {offsets = [0, 24], sizes = [16, 8], strides = [1, 1]} : vector<16x96xf32> to vector<16x8xf32>
    %30 = vector.shape_cast %29 : vector<16x8xf32> to vector<2x8x8xf32>
    %31 = vector.extract_strided_slice %10 {offsets = [0, 56], sizes = [16, 8], strides = [1, 1]} : vector<16x96xf32> to vector<16x8xf32>
    %32 = vector.shape_cast %31 : vector<16x8xf32> to vector<2x8x8xf32>
    %33 = vector.extract_strided_slice %10 {offsets = [0, 88], sizes = [16, 8], strides = [1, 1]} : vector<16x96xf32> to vector<16x8xf32>
    %34 = vector.shape_cast %33 : vector<16x8xf32> to vector<2x8x8xf32>
    %35 = tpu.concatenate %12, %18, %24, %30 in 0 : vector<2x8x8xf32>, vector<2x8x8xf32>, vector<2x8x8xf32>, vector<2x8x8xf32> -> vector<8x8x8xf32>
    %36 = tpu.concatenate %14, %20, %26, %32 in 0 : vector<2x8x8xf32>, vector<2x8x8xf32>, vector<2x8x8xf32>, vector<2x8x8xf32> -> vector<8x8x8xf32>
    %37 = tpu.concatenate %16, %22, %28, %34 in 0 : vector<2x8x8xf32>, vector<2x8x8xf32>, vector<2x8x8xf32>, vector<2x8x8xf32> -> vector<8x8x8xf32>
    "tpu.trace_start"() <{level = 10 : i32, message = "gqd,gkd->gqk"}> : () -> ()
    %cst_8 = arith.constant dense<0.000000e+00> : vector<8x8x8xf32>
    %38 = tpu.matmul %35, %36, %cst_8 {dimension_numbers = #tpu.dot_dimension_numbers<[2], [2], [1], [1], [0, 0, 0, 1, 1, 1], [0], [0]>} : vector<8x8x8xf32>, vector<8x8x8xf32>, vector<8x8x8xf32> -> vector<8x8x8xf32>
    "tpu.trace_stop"() : () -> ()
    %cst_9 = arith.constant dense<0xFF800000> : vector<8x8xf32>
    %39 = vector.multi_reduction <maximumf>, %38, %cst_9 [2] : vector<8x8x8xf32> to vector<8x8xf32>
    %40 = vector.shape_cast %39 : vector<8x8xf32> to vector<8x8x1xf32>
    %41 = vector.broadcast %40 : vector<8x8x1xf32> to vector<8x8x8xf32>
    %42 = arith.subf %38, %41 : vector<8x8x8xf32>
    %43 = math.exp %42 : vector<8x8x8xf32>
    %cst_10 = arith.constant dense<0.000000e+00> : vector<8x8xf32>
    %44 = vector.multi_reduction <add>, %43, %cst_10 [2] : vector<8x8x8xf32> to vector<8x8xf32>
    %45 = vector.shape_cast %44 : vector<8x8xf32> to vector<8x8x1xf32>
    %46 = tpu.reciprocal %45 {approx = true} : vector<8x8x1xf32> -> vector<8x8x1xf32>
    %47 = vector.broadcast %46 : vector<8x8x1xf32> to vector<8x8x8xf32>
    %48 = arith.mulf %43, %47 : vector<8x8x8xf32>
    "tpu.trace_start"() <{level = 10 : i32, message = "gqk,gkd->gqd"}> : () -> ()
    %cst_11 = arith.constant dense<0.000000e+00> : vector<8x8x8xf32>
    %49 = tpu.matmul %48, %37, %cst_11 {dimension_numbers = #tpu.dot_dimension_numbers<[2], [1], [1], [2], [0, 0, 0, 1, 1, 2], [0], [0]>} : vector<8x8x8xf32>, vector<8x8x8xf32>, vector<8x8x8xf32> -> vector<8x8x8xf32>
    "tpu.trace_stop"() : () -> ()
    %c0_12 = arith.constant 0 : index
    %c0_13 = arith.constant 0 : index
    %c0_14 = arith.constant 0 : index
    %50 = vector.load %arg4[%c0_12, %c0_13, %c0_14] : memref<1x32x32xf32, #tpu.memory_space<vmem>>, vector<1x32x32xf32>
    %51 = vector.shape_cast %50 : vector<1x32x32xf32> to vector<32x32xf32>
    %52 = vector.extract_strided_slice %49 {offsets = [0, 0, 0], sizes = [2, 8, 8], strides = [1, 1, 1]} : vector<8x8x8xf32> to vector<2x8x8xf32>
    %53 = vector.shape_cast %52 : vector<2x8x8xf32> to vector<16x8xf32>
    %54 = vector.extract_strided_slice %51 {offsets = [0, 0], sizes = [8, 32], strides = [1, 1]} : vector<32x32xf32> to vector<8x32xf32>
    %cst_15 = arith.constant dense<0.000000e+00> : vector<16x32xf32>
    %55 = tpu.matmul %53, %54, %cst_15 {dimension_numbers = #tpu.dot_dimension_numbers<[1], [0], [0], [1], [0, 0, 1, 1], [], []>} : vector<16x8xf32>, vector<8x32xf32>, vector<16x32xf32> -> vector<16x32xf32>
    %56 = vector.extract_strided_slice %49 {offsets = [2, 0, 0], sizes = [2, 8, 8], strides = [1, 1, 1]} : vector<8x8x8xf32> to vector<2x8x8xf32>
    %57 = vector.shape_cast %56 : vector<2x8x8xf32> to vector<16x8xf32>
    %58 = vector.extract_strided_slice %51 {offsets = [8, 0], sizes = [8, 32], strides = [1, 1]} : vector<32x32xf32> to vector<8x32xf32>
    %cst_16 = arith.constant dense<0.000000e+00> : vector<16x32xf32>
    %59 = tpu.matmul %57, %58, %cst_16 {dimension_numbers = #tpu.dot_dimension_numbers<[1], [0], [0], [1], [0, 0, 1, 1], [], []>} : vector<16x8xf32>, vector<8x32xf32>, vector<16x32xf32> -> vector<16x32xf32>
    %60 = vector.extract_strided_slice %49 {offsets = [4, 0, 0], sizes = [2, 8, 8], strides = [1, 1, 1]} : vector<8x8x8xf32> to vector<2x8x8xf32>
    %61 = vector.shape_cast %60 : vector<2x8x8xf32> to vector<16x8xf32>
    %62 = vector.extract_strided_slice %51 {offsets = [16, 0], sizes = [8, 32], strides = [1, 1]} : vector<32x32xf32> to vector<8x32xf32>
    %cst_17 = arith.constant dense<0.000000e+00> : vector<16x32xf32>
    %63 = tpu.matmul %61, %62, %cst_17 {dimension_numbers = #tpu.dot_dimension_numbers<[1], [0], [0], [1], [0, 0, 1, 1], [], []>} : vector<16x8xf32>, vector<8x32xf32>, vector<16x32xf32> -> vector<16x32xf32>
    %64 = vector.extract_strided_slice %49 {offsets = [6, 0, 0], sizes = [2, 8, 8], strides = [1, 1, 1]} : vector<8x8x8xf32> to vector<2x8x8xf32>
    %65 = vector.shape_cast %64 : vector<2x8x8xf32> to vector<16x8xf32>
    %66 = vector.extract_strided_slice %51 {offsets = [24, 0], sizes = [8, 32], strides = [1, 1]} : vector<32x32xf32> to vector<8x32xf32>
    %cst_18 = arith.constant dense<0.000000e+00> : vector<16x32xf32>
    %67 = tpu.matmul %65, %66, %cst_18 {dimension_numbers = #tpu.dot_dimension_numbers<[1], [0], [0], [1], [0, 0, 1, 1], [], []>} : vector<16x8xf32>, vector<8x32xf32>, vector<16x32xf32> -> vector<16x32xf32>
    %68 = arith.addf %55, %59 : vector<16x32xf32>
    %69 = arith.addf %63, %67 : vector<16x32xf32>
    %70 = arith.addf %68, %69 : vector<16x32xf32>
    %c0_19 = arith.constant 0 : index
    %c0_20 = arith.constant 0 : index
    %c0_21 = arith.constant 0 : index
    %71 = vector.load %arg5[%c0_19, %c0_20, %c0_21] : memref<1x1x32xf32, #tpu.memory_space<vmem>>, vector<1x1x32xf32>
    %72 = vector.shape_cast %71 : vector<1x1x32xf32> to vector<1x32xf32>
    %73 = vector.broadcast %72 : vector<1x32xf32> to vector<16x32xf32>
    %74 = arith.addf %70, %73 : vector<16x32xf32>
    %75 = arith.addf %3, %74 : vector<16x32xf32>
    %c0_22 = arith.constant 0 : index
    %c0_23 = arith.constant 0 : index
    %c0_24 = arith.constant 0 : index
    %76 = vector.load %arg6[%c0_22, %c0_23, %c0_24] : memref<1x1x32xf32, #tpu.memory_space<vmem>>, vector<1x1x32xf32>
    %77 = vector.shape_cast %76 : vector<1x1x32xf32> to vector<1x32xf32>
    %c0_25 = arith.constant 0 : index
    %c0_26 = arith.constant 0 : index
    %c0_27 = arith.constant 0 : index
    %78 = vector.load %arg7[%c0_25, %c0_26, %c0_27] : memref<1x1x32xf32, #tpu.memory_space<vmem>>, vector<1x1x32xf32>
    %79 = vector.shape_cast %78 : vector<1x1x32xf32> to vector<1x32xf32>
    %cst_28 = arith.constant dense<0.000000e+00> : vector<16xf32>
    %80 = vector.multi_reduction <add>, %75, %cst_28 [1] : vector<16x32xf32> to vector<16xf32>
    %81 = vector.shape_cast %80 : vector<16xf32> to vector<16x1xf32>
    %cst_29 = arith.constant 3.200000e+01 : f32
    %82 = vector.broadcast %cst_29 : f32 to vector<16x1xf32>
    %83 = arith.divf %81, %82 : vector<16x1xf32>
    %84 = vector.broadcast %83 : vector<16x1xf32> to vector<16x32xf32>
    %85 = arith.subf %75, %84 : vector<16x32xf32>
    %86 = arith.mulf %85, %85 : vector<16x32xf32>
    %cst_30 = arith.constant dense<0.000000e+00> : vector<16xf32>
    %87 = vector.multi_reduction <add>, %86, %cst_30 [1] : vector<16x32xf32> to vector<16xf32>
    %88 = vector.shape_cast %87 : vector<16xf32> to vector<16x1xf32>
    %cst_31 = arith.constant 3.200000e+01 : f32
    %89 = vector.broadcast %cst_31 : f32 to vector<16x1xf32>
    %90 = arith.divf %88, %89 : vector<16x1xf32>
    %cst_32 = arith.constant 9.99999974E-6 : f32
    %91 = vector.broadcast %cst_32 : f32 to vector<16x1xf32>
    %92 = arith.addf %90, %91 : vector<16x1xf32>
    %93 = math.rsqrt %92 : vector<16x1xf32>
    %94 = vector.broadcast %93 : vector<16x1xf32> to vector<16x32xf32>
    %95 = arith.mulf %85, %94 : vector<16x32xf32>
    %96 = vector.broadcast %77 : vector<1x32xf32> to vector<16x32xf32>
    %97 = arith.mulf %95, %96 : vector<16x32xf32>
    %98 = vector.broadcast %79 : vector<1x32xf32> to vector<16x32xf32>
    %99 = arith.addf %97, %98 : vector<16x32xf32>
    %cst_33 = arith.constant 0.000000e+00 : f32
    %100 = vector.broadcast %cst_33 : f32 to vector<16x32xf32>
    %c0_i32_34 = arith.constant 0 : i32
    %c512_i32 = arith.constant 512 : i32
    %101 = arith.muli %c0_i32_34, %c512_i32 : i32
    %102 = tpu.assume_multiple %101, 512 : i32
    %c0_35 = arith.constant 0 : index
    %c0_36 = arith.constant 0 : index
    %103 = arith.index_cast %102 : i32 to index
    %104 = vector.load %arg10[%c0_35, %c0_36, %103] : memref<1x32x2048xf32, #tpu.memory_space<vmem>>, vector<1x32x512xf32>
    %105 = vector.shape_cast %104 : vector<1x32x512xf32> to vector<32x512xf32>
    %cst_37 = arith.constant dense<0.000000e+00> : vector<16x512xf32>
    %106 = tpu.matmul %99, %105, %cst_37 {dimension_numbers = #tpu.dot_dimension_numbers<[1], [0], [0], [1], [0, 0, 1, 1], [], []>} : vector<16x32xf32>, vector<32x512xf32>, vector<16x512xf32> -> vector<16x512xf32>
    %c0_38 = arith.constant 0 : index
    %c0_39 = arith.constant 0 : index
    %107 = arith.index_cast %102 : i32 to index
    %108 = vector.load %arg11[%c0_38, %c0_39, %107] : memref<1x1x2048xf32, #tpu.memory_space<vmem>>, vector<1x1x512xf32>
    %109 = vector.shape_cast %108 : vector<1x1x512xf32> to vector<1x512xf32>
    %110 = vector.broadcast %109 : vector<1x512xf32> to vector<16x512xf32>
    %111 = arith.addf %106, %110 : vector<16x512xf32>
    %cst_40 = arith.constant 0.000000e+00 : f32
    %112 = vector.broadcast %cst_40 : f32 to vector<16x512xf32>
    %113 = arith.maximumf %111, %112 : vector<16x512xf32>
    %c0_41 = arith.constant 0 : index
    %114 = arith.index_cast %102 : i32 to index
    %c0_42 = arith.constant 0 : index
    %115 = vector.load %arg12[%c0_41, %114, %c0_42] : memref<1x2048x32xf32, #tpu.memory_space<vmem>>, vector<1x512x32xf32>
    %116 = vector.shape_cast %115 : vector<1x512x32xf32> to vector<512x32xf32>
    %cst_43 = arith.constant dense<0.000000e+00> : vector<16x32xf32>
    %117 = tpu.matmul %113, %116, %cst_43 {dimension_numbers = #tpu.dot_dimension_numbers<[1], [0], [0], [1], [0, 0, 1, 1], [], []>, precision = #tpu.contract_precision<fp32>} : vector<16x512xf32>, vector<512x32xf32>, vector<16x32xf32> -> vector<16x32xf32>
    %118 = arith.addf %100, %117 : vector<16x32xf32>
    %c1_i32 = arith.constant 1 : i32
    %c512_i32_44 = arith.constant 512 : i32
    %119 = arith.muli %c1_i32, %c512_i32_44 : i32
    %120 = tpu.assume_multiple %119, 512 : i32
    %c0_45 = arith.constant 0 : index
    %c0_46 = arith.constant 0 : index
    %121 = arith.index_cast %120 : i32 to index
    %122 = vector.load %arg10[%c0_45, %c0_46, %121] : memref<1x32x2048xf32, #tpu.memory_space<vmem>>, vector<1x32x512xf32>
    %123 = vector.shape_cast %122 : vector<1x32x512xf32> to vector<32x512xf32>
    %cst_47 = arith.constant dense<0.000000e+00> : vector<16x512xf32>
    %124 = tpu.matmul %99, %123, %cst_47 {dimension_numbers = #tpu.dot_dimension_numbers<[1], [0], [0], [1], [0, 0, 1, 1], [], []>} : vector<16x32xf32>, vector<32x512xf32>, vector<16x512xf32> -> vector<16x512xf32>
    %c0_48 = arith.constant 0 : index
    %c0_49 = arith.constant 0 : index
    %125 = arith.index_cast %120 : i32 to index
    %126 = vector.load %arg11[%c0_48, %c0_49, %125] : memref<1x1x2048xf32, #tpu.memory_space<vmem>>, vector<1x1x512xf32>
    %127 = vector.shape_cast %126 : vector<1x1x512xf32> to vector<1x512xf32>
    %128 = vector.broadcast %127 : vector<1x512xf32> to vector<16x512xf32>
    %129 = arith.addf %124, %128 : vector<16x512xf32>
    %cst_50 = arith.constant 0.000000e+00 : f32
    %130 = vector.broadcast %cst_50 : f32 to vector<16x512xf32>
    %131 = arith.maximumf %129, %130 : vector<16x512xf32>
    %c0_51 = arith.constant 0 : index
    %132 = arith.index_cast %120 : i32 to index
    %c0_52 = arith.constant 0 : index
    %133 = vector.load %arg12[%c0_51, %132, %c0_52] : memref<1x2048x32xf32, #tpu.memory_space<vmem>>, vector<1x512x32xf32>
    %134 = vector.shape_cast %133 : vector<1x512x32xf32> to vector<512x32xf32>
    %cst_53 = arith.constant dense<0.000000e+00> : vector<16x32xf32>
    %135 = tpu.matmul %131, %134, %cst_53 {dimension_numbers = #tpu.dot_dimension_numbers<[1], [0], [0], [1], [0, 0, 1, 1], [], []>, precision = #tpu.contract_precision<fp32>} : vector<16x512xf32>, vector<512x32xf32>, vector<16x32xf32> -> vector<16x32xf32>
    %136 = arith.addf %118, %135 : vector<16x32xf32>
    %c2_i32 = arith.constant 2 : i32
    %c512_i32_54 = arith.constant 512 : i32
    %137 = arith.muli %c2_i32, %c512_i32_54 : i32
    %138 = tpu.assume_multiple %137, 512 : i32
    %c0_55 = arith.constant 0 : index
    %c0_56 = arith.constant 0 : index
    %139 = arith.index_cast %138 : i32 to index
    %140 = vector.load %arg10[%c0_55, %c0_56, %139] : memref<1x32x2048xf32, #tpu.memory_space<vmem>>, vector<1x32x512xf32>
    %141 = vector.shape_cast %140 : vector<1x32x512xf32> to vector<32x512xf32>
    %cst_57 = arith.constant dense<0.000000e+00> : vector<16x512xf32>
    %142 = tpu.matmul %99, %141, %cst_57 {dimension_numbers = #tpu.dot_dimension_numbers<[1], [0], [0], [1], [0, 0, 1, 1], [], []>} : vector<16x32xf32>, vector<32x512xf32>, vector<16x512xf32> -> vector<16x512xf32>
    %c0_58 = arith.constant 0 : index
    %c0_59 = arith.constant 0 : index
    %143 = arith.index_cast %138 : i32 to index
    %144 = vector.load %arg11[%c0_58, %c0_59, %143] : memref<1x1x2048xf32, #tpu.memory_space<vmem>>, vector<1x1x512xf32>
    %145 = vector.shape_cast %144 : vector<1x1x512xf32> to vector<1x512xf32>
    %146 = vector.broadcast %145 : vector<1x512xf32> to vector<16x512xf32>
    %147 = arith.addf %142, %146 : vector<16x512xf32>
    %cst_60 = arith.constant 0.000000e+00 : f32
    %148 = vector.broadcast %cst_60 : f32 to vector<16x512xf32>
    %149 = arith.maximumf %147, %148 : vector<16x512xf32>
    %c0_61 = arith.constant 0 : index
    %150 = arith.index_cast %138 : i32 to index
    %c0_62 = arith.constant 0 : index
    %151 = vector.load %arg12[%c0_61, %150, %c0_62] : memref<1x2048x32xf32, #tpu.memory_space<vmem>>, vector<1x512x32xf32>
    %152 = vector.shape_cast %151 : vector<1x512x32xf32> to vector<512x32xf32>
    %cst_63 = arith.constant dense<0.000000e+00> : vector<16x32xf32>
    %153 = tpu.matmul %149, %152, %cst_63 {dimension_numbers = #tpu.dot_dimension_numbers<[1], [0], [0], [1], [0, 0, 1, 1], [], []>, precision = #tpu.contract_precision<fp32>} : vector<16x512xf32>, vector<512x32xf32>, vector<16x32xf32> -> vector<16x32xf32>
    %154 = arith.addf %136, %153 : vector<16x32xf32>
    %c3_i32 = arith.constant 3 : i32
    %c512_i32_64 = arith.constant 512 : i32
    %155 = arith.muli %c3_i32, %c512_i32_64 : i32
    %156 = tpu.assume_multiple %155, 512 : i32
    %c0_65 = arith.constant 0 : index
    %c0_66 = arith.constant 0 : index
    %157 = arith.index_cast %156 : i32 to index
    %158 = vector.load %arg10[%c0_65, %c0_66, %157] : memref<1x32x2048xf32, #tpu.memory_space<vmem>>, vector<1x32x512xf32>
    %159 = vector.shape_cast %158 : vector<1x32x512xf32> to vector<32x512xf32>
    %cst_67 = arith.constant dense<0.000000e+00> : vector<16x512xf32>
    %160 = tpu.matmul %99, %159, %cst_67 {dimension_numbers = #tpu.dot_dimension_numbers<[1], [0], [0], [1], [0, 0, 1, 1], [], []>} : vector<16x32xf32>, vector<32x512xf32>, vector<16x512xf32> -> vector<16x512xf32>
    %c0_68 = arith.constant 0 : index
    %c0_69 = arith.constant 0 : index
    %161 = arith.index_cast %156 : i32 to index
    %162 = vector.load %arg11[%c0_68, %c0_69, %161] : memref<1x1x2048xf32, #tpu.memory_space<vmem>>, vector<1x1x512xf32>
    %163 = vector.shape_cast %162 : vector<1x1x512xf32> to vector<1x512xf32>
    %164 = vector.broadcast %163 : vector<1x512xf32> to vector<16x512xf32>
    %165 = arith.addf %160, %164 : vector<16x512xf32>
    %cst_70 = arith.constant 0.000000e+00 : f32
    %166 = vector.broadcast %cst_70 : f32 to vector<16x512xf32>
    %167 = arith.maximumf %165, %166 : vector<16x512xf32>
    %c0_71 = arith.constant 0 : index
    %168 = arith.index_cast %156 : i32 to index
    %c0_72 = arith.constant 0 : index
    %169 = vector.load %arg12[%c0_71, %168, %c0_72] : memref<1x2048x32xf32, #tpu.memory_space<vmem>>, vector<1x512x32xf32>
    %170 = vector.shape_cast %169 : vector<1x512x32xf32> to vector<512x32xf32>
    %cst_73 = arith.constant dense<0.000000e+00> : vector<16x32xf32>
    %171 = tpu.matmul %167, %170, %cst_73 {dimension_numbers = #tpu.dot_dimension_numbers<[1], [0], [0], [1], [0, 0, 1, 1], [], []>, precision = #tpu.contract_precision<fp32>} : vector<16x512xf32>, vector<512x32xf32>, vector<16x32xf32> -> vector<16x32xf32>
    %172 = arith.addf %154, %171 : vector<16x32xf32>
    %c4_i32 = arith.constant 4 : i32
    %c0_74 = arith.constant 0 : index
    %c0_75 = arith.constant 0 : index
    %c0_76 = arith.constant 0 : index
    %173 = vector.load %arg13[%c0_74, %c0_75, %c0_76] : memref<1x1x32xf32, #tpu.memory_space<vmem>>, vector<1x1x32xf32>
    %174 = vector.shape_cast %173 : vector<1x1x32xf32> to vector<1x32xf32>
    %175 = vector.broadcast %174 : vector<1x32xf32> to vector<16x32xf32>
    %176 = arith.addf %172, %175 : vector<16x32xf32>
    %177 = arith.addf %99, %176 : vector<16x32xf32>
    %c0_77 = arith.constant 0 : index
    %c0_78 = arith.constant 0 : index
    %c0_79 = arith.constant 0 : index
    %178 = vector.load %arg8[%c0_77, %c0_78, %c0_79] : memref<1x1x32xf32, #tpu.memory_space<vmem>>, vector<1x1x32xf32>
    %179 = vector.shape_cast %178 : vector<1x1x32xf32> to vector<1x32xf32>
    %c0_80 = arith.constant 0 : index
    %c0_81 = arith.constant 0 : index
    %c0_82 = arith.constant 0 : index
    %180 = vector.load %arg9[%c0_80, %c0_81, %c0_82] : memref<1x1x32xf32, #tpu.memory_space<vmem>>, vector<1x1x32xf32>
    %181 = vector.shape_cast %180 : vector<1x1x32xf32> to vector<1x32xf32>
    %cst_83 = arith.constant dense<0.000000e+00> : vector<16xf32>
    %182 = vector.multi_reduction <add>, %177, %cst_83 [1] : vector<16x32xf32> to vector<16xf32>
    %183 = vector.shape_cast %182 : vector<16xf32> to vector<16x1xf32>
    %cst_84 = arith.constant 3.200000e+01 : f32
    %184 = vector.broadcast %cst_84 : f32 to vector<16x1xf32>
    %185 = arith.divf %183, %184 : vector<16x1xf32>
    %186 = vector.broadcast %185 : vector<16x1xf32> to vector<16x32xf32>
    %187 = arith.subf %177, %186 : vector<16x32xf32>
    %188 = arith.mulf %187, %187 : vector<16x32xf32>
    %cst_85 = arith.constant dense<0.000000e+00> : vector<16xf32>
    %189 = vector.multi_reduction <add>, %188, %cst_85 [1] : vector<16x32xf32> to vector<16xf32>
    %190 = vector.shape_cast %189 : vector<16xf32> to vector<16x1xf32>
    %cst_86 = arith.constant 3.200000e+01 : f32
    %191 = vector.broadcast %cst_86 : f32 to vector<16x1xf32>
    %192 = arith.divf %190, %191 : vector<16x1xf32>
    %cst_87 = arith.constant 9.99999974E-6 : f32
    %193 = vector.broadcast %cst_87 : f32 to vector<16x1xf32>
    %194 = arith.addf %192, %193 : vector<16x1xf32>
    %195 = math.rsqrt %194 : vector<16x1xf32>
    %196 = vector.broadcast %195 : vector<16x1xf32> to vector<16x32xf32>
    %197 = arith.mulf %187, %196 : vector<16x32xf32>
    %198 = vector.broadcast %179 : vector<1x32xf32> to vector<16x32xf32>
    %199 = arith.mulf %197, %198 : vector<16x32xf32>
    %200 = vector.broadcast %181 : vector<1x32xf32> to vector<16x32xf32>
    %201 = arith.addf %199, %200 : vector<16x32xf32>
    %c0_88 = arith.constant 0 : index
    %c0_89 = arith.constant 0 : index
    %202 = vector.load %arg15[%c0_88, %c0_89] : memref<16x32xf32, #tpu.memory_space<vmem>>, vector<16x32xf32>
    tpu.vector_store %arg15[%c0_88, %c0_89], %201 {strides = array<i32>} : memref<16x32xf32, #tpu.memory_space<vmem>>, vector<16x32xf32>,
    %c1_i32_90 = arith.constant 1 : i32
    %203 = arith.cmpi eq, %arg0, %c1_i32_90 : i32
    %204 = arith.extui %203 : i1 to i32
    %c0_i32_91 = arith.constant 0 : i32
    %205 = arith.cmpi ne, %204, %c0_i32_91 : i32
    scf.if %205 {
      %206 = vector.shape_cast %201 : vector<16x32xf32> to vector<2x8x32xf32>
      %cst_92 = arith.constant dense<0.000000e+00> : vector<2x32xf32>
      %207 = vector.multi_reduction <add>, %206, %cst_92 [1] : vector<2x8x32xf32> to vector<2x32xf32>
      %cst_93 = arith.constant 8.000000e+00 : f32
      %208 = vector.broadcast %cst_93 : f32 to vector<2x32xf32>
      %209 = arith.divf %207, %208 : vector<2x32xf32>
      %c0_94 = arith.constant 0 : index
      %c0_95 = arith.constant 0 : index
      %210 = vector.load %arg14[%c0_94, %c0_95] : memref<2x32xf32, #tpu.memory_space<vmem>>, vector<2x32xf32>
      tpu.vector_store %arg14[%c0_94, %c0_95], %209 {strides = array<i32>} : memref<2x32xf32, #tpu.memory_space<vmem>>, vector<2x32xf32>,
    } else {
    }
    return
  }
  func.func @transform_0(%arg0: i32) -> (i32, i32) {
    %c0_i32 = arith.constant 0 : i32
    %c0_i32_0 = arith.constant 0 : i32
    %c0_i32_1 = arith.constant 0 : i32
    return %c0_i32, %c0_i32_0 : i32, i32
  }
  func.func @transform_1(%arg0: i32) -> (i32, i32, i32) {
    %c0_i32 = arith.constant 0 : i32
    %c0_i32_0 = arith.constant 0 : i32
    %c0_i32_1 = arith.constant 0 : i32
    return %arg0, %c0_i32, %c0_i32_0 : i32, i32, i32
  }
  func.func @transform_2(%arg0: i32) -> (i32, i32, i32) {
    %c0_i32 = arith.constant 0 : i32
    %c0_i32_0 = arith.constant 0 : i32
    %c0_i32_1 = arith.constant 0 : i32
    return %arg0, %c0_i32, %c0_i32_0 : i32, i32, i32
  }
  func.func @transform_3(%arg0: i32) -> (i32, i32, i32) {
    %c0_i32 = arith.constant 0 : i32
    %c0_i32_0 = arith.constant 0 : i32
    %c0_i32_1 = arith.constant 0 : i32
    return %arg0, %c0_i32, %c0_i32_0 : i32, i32, i32
  }
  func.func @transform_4(%arg0: i32) -> (i32, i32, i32) {
    %c0_i32 = arith.constant 0 : i32
    %c0_i32_0 = arith.constant 0 : i32
    %c0_i32_1 = arith.constant 0 : i32
    return %arg0, %c0_i32, %c0_i32_0 : i32, i32, i32
  }
  func.func @transform_5(%arg0: i32) -> (i32, i32, i32) {
    %c0_i32 = arith.constant 0 : i32
    %c0_i32_0 = arith.constant 0 : i32
    %c0_i32_1 = arith.constant 0 : i32
    return %arg0, %c0_i32, %c0_i32_0 : i32, i32, i32
  }
  func.func @transform_6(%arg0: i32) -> (i32, i32, i32) {
    %c0_i32 = arith.constant 0 : i32
    %c0_i32_0 = arith.constant 0 : i32
    %c0_i32_1 = arith.constant 0 : i32
    return %arg0, %c0_i32, %c0_i32_0 : i32, i32, i32
  }
  func.func @transform_7(%arg0: i32) -> (i32, i32, i32) {
    %c0_i32 = arith.constant 0 : i32
    %c0_i32_0 = arith.constant 0 : i32
    %c0_i32_1 = arith.constant 0 : i32
    return %arg0, %c0_i32, %c0_i32_0 : i32, i32, i32
  }
  func.func @transform_8(%arg0: i32) -> (i32, i32, i32) {
    %c0_i32 = arith.constant 0 : i32
    %c0_i32_0 = arith.constant 0 : i32
    %c0_i32_1 = arith.constant 0 : i32
    return %arg0, %c0_i32, %c0_i32_0 : i32, i32, i32
  }
  func.func @transform_9(%arg0: i32) -> (i32, i32, i32) {
    %c0_i32 = arith.constant 0 : i32
    %c0_i32_0 = arith.constant 0 : i32
    %c0_i32_1 = arith.constant 0 : i32
    return %arg0, %c0_i32, %c0_i32_0 : i32, i32, i32
  }
  func.func @transform_10(%arg0: i32) -> (i32, i32, i32) {
    %c0_i32 = arith.constant 0 : i32
    %c0_i32_0 = arith.constant 0 : i32
    %c0_i32_1 = arith.constant 0 : i32
    return %arg0, %c0_i32, %c0_i32_0 : i32, i32, i32
  }
  func.func @transform_11(%arg0: i32) -> (i32, i32, i32) {
    %c0_i32 = arith.constant 0 : i32
    %c0_i32_0 = arith.constant 0 : i32
    %c0_i32_1 = arith.constant 0 : i32
    return %arg0, %c0_i32, %c0_i32_0 : i32, i32, i32
  }
  func.func @transform_12(%arg0: i32) -> (i32, i32, i32) {
    %c0_i32 = arith.constant 0 : i32
    %c0_i32_0 = arith.constant 0 : i32
    %c0_i32_1 = arith.constant 0 : i32
    return %arg0, %c0_i32, %c0_i32_0 : i32, i32, i32
  }
  func.func @transform_13(%arg0: i32) -> (i32, i32) {
    %c0_i32 = arith.constant 0 : i32
    %c0_i32_0 = arith.constant 0 : i32
    %c0_i32_1 = arith.constant 0 : i32
    return %c0_i32, %c0_i32_0 : i32, i32
  }
}

</mosaic_0001>

<bundles_post_ra>
// kernel: tpu_custom_call.1
= control target key start
LH: loop header
LB: loop body
LE: loop exit
PB: predicated region body
PF: predicated region fallthrough
CT: control target
= control target key end

     0   :  { %s21670_s0 = inlined_call_operand.vmem [shape: f32[16,32], index: 0, kind: input, shape index: {}]   ;;  %s21671_s1 = inlined_call_operand.vmem [shape: f32[2,32,96], index: 1, kind: input, shape index: {}]   ;;  %s21672_s2 = inlined_call_operand.vmem [shape: f32[2,1,96], index: 2, kind: input, shape index: {}]   ;;  %s21673_s3 = inlined_call_operand.vmem [shape: f32[2,32,32], index: 3, kind: input, shape index: {}]   ;;  %s21674_s4 = inlined_call_operand.vmem [shape: f32[2,1,32], index: 4, kind: input, shape index: {}]   ;;  %s21675_s5 = inlined_call_operand.vmem [shape: f32[2,1,32], index: 5, kind: input, shape index: {}]   ;;  %s21676_s6 = inlined_call_operand.vmem [shape: f32[2,1,32], index: 6, kind: input, shape index: {}]   ;;  %s21677_s7 = inlined_call_operand.vmem [shape: f32[2,1,32], index: 7, kind: input, shape index: {}]   ;;  %s21678_s8 = inlined_call_operand.vmem [shape: f32[2,1,32], index: 8, kind: input, shape index: {}]   ;;  %s21679_s9 = inlined_call_operand.vmem [shape: f32[2,32,2048], index: 9, kind: input, shape index: {}]   ;;  %s21680_s10 = inlined_call_operand.vmem [shape: f32[2,1,2048], index: 10, kind: input, shape index: {}]   ;;  %s21681_s11 = inlined_call_operand.vmem [shape: f32[2,2048,32], index: 11, kind: input, shape index: {}]   ;;  %s21682_s12 = inlined_call_operand.vmem [shape: f32[2,1,32], index: 12, kind: input, shape index: {}]   ;;  %s21683_s13 = inlined_call_operand.hbm [shape: f32[2,32], index: 13, kind: output, shape index: {}]  }
   0x1   :  { %22294 = sst [smem:[#allocation97_spill]] %s21670_s0 }
   0x2   :  { %22295 = sst [smem:[#allocation98_spill]] %s21671_s1 }
   0x3   :  { %22296 = sst [smem:[#allocation99_spill]] %s21673_s3 }
   0x4   :  { %22297 = sst [smem:[#allocation100_spill]] %s21683_s13 }
   0x5   :  { %18 = vsyncpa [#allocation4], 0  ;;  %s15173_s25 = smov 0  }
   0x6 LB: > { %22298 = sst [smem:[#allocation6_spill]] %s15093_s25  ;;  %s15179_s26 = sadd.s32 4294967295, %s15093_s25   ;;  %s15093_s25 = sphi %s15173_s25, %s24_s25  }
   0x7   : > { %p11075_p0 = scmp.ge.s32.totalorder %s15093_s25, 1  ;;  %p478_p1 = scmp.lt.s32.totalorder %s15093_s25, 3 }
   0x9   : > { %p479_p2 = pnand %p11075_p0, %p478_p1 }
   0xb   : > { %482 = sbr.rel (%p479_p2) target bundleno = 3782 (0xec6), region = 72 }
  0x12   : > { %p557_p3 = scmp.lt.s32.totalorder %s15179_s26, 1  ;;  %s22299_s1 = sld [smem:[#allocation98_spill]] }
  0x13   : > { %s22300_s3 = sld [smem:[#allocation99_spill]]  ;;  %p11085_p4 = scmp.ne.s32.totalorder %s15179_s26, 0 }
  0x14   : > { %s15185_s27 = scalar_select %p557_p3, %s15179_s26, 1 }
  0x15   : > { %605 = sbr.rel (%p11085_p4) target bundleno = 29 (0x1d), region = 76  ;;  %s22301_s21 = sld [smem:[#allocation97_spill]] (!%p11085_p4)  ;;  %vm608_vm0 = vcmask (!%p11085_p4), 261120  }
  0x16   : > { %s11391_s28 = sshll.u32 %s15185_s27, 5  ;;  %s572_s23 = scalar_lea.vmem %s21674_s4, %s15185_s27 }
  0x17   : > { %s581_s16 = scalar_lea.vmem %s21677_s7, %s15185_s27  ;;  %s11393_s19 = sshll.u32 %s15185_s27, 9 }
  0x18   : > { %s561_s17 = scalar_lea.vmem %s22299_s1, %s11391_s28  ;;  %s15224_s22 = scalar_lea.vmem %s21679_s9, %s11393_s19 }
  0x19   : > { %s15198_s20 = scalar_lea.vmem %s22300_s3, %s11391_s28  ;;  %s11082_s25 = sshll.u32 %s15185_s27, 4 }
  0x1a   : > { %s15230_s0 = scalar_lea.vmem %s21680_s10, %s11082_s25  ;;  %s11394_s29 = sshll.u32 %s15185_s27, 11 }
  0x1b   : > { %s15236_s15 = scalar_lea.vmem %s21681_s11, %s11394_s29  ;;  %s601_s28 = scalar_lea.vmem %s21682_s12, %s15185_s27  ;;  %v606_v0 = vld [vmem:[%s22301_s21] sm:$0xff] (!%p11085_p4)  ;;  %v607_v1 = vld [vmem:[%s22301_s21 + $0x8] sm:$0xff] (!%p11085_p4) }
  0x1c   : > { %609 = vst.msk [vmem:[#allocation2] sm:$0xff] %vm608_vm0, %v606_v0  ;;  %610 = vst.msk [vmem:[#allocation2 + $0x8] sm:$0xff] %vm608_vm0, %v607_v1 }
  0x1d PF: > { %v613_v2 = vld [vmem:[%s561_s17] sm:$0xff]  ;;  %v614_v3 = vld [vmem:[%s561_s17 + $0x8] sm:$0xff]  ;;  %v615_v4 = vld [vmem:[%s561_s17 + $0x10] sm:$0xff]  ;;  %vm624_vm1 = vcmask 261120   ;;  %s22302_s29 = scalar_lea.vmem %s21672_s2, %s15185_s27  ;;  %v21708_v12 = vmov 0.0   ;;  %s15097_s14 = smov 120  }
  0x1e   : > { %v13380_v5 = vpack.c.bf16 %v614_v3, %v613_v2  ;;  %v616_v6 = vld [vmem:[%s561_s17 + $0x18] sm:$0xff]  ;;  %v11086_v10 = vld [vmem:[%s22302_s29] ss:$0 sm:$0xff]  ;;  %13280 = vmatprep.subr.mxu1 %v21708_v12  ;;  %s15096_s17 = smov 112   ;;  %vm15098_vm2 = vmmov 0   ;;  %s15099_s1 = smov 104  }
  0x1f   : > { %v13384_v8 = vpack.c.bf16 %v616_v6, %v615_v4  ;;  %13282 = vmatprep.mubr.msk.f32.mxu1 %vm15098_vm2, %v21708_v12  ;;  %s15100_s18 = smov 96   ;;  %vm722_vm3 = vcmask 64512   ;;  %s15101_s3 = smov 64  }
  0x20   : > { %13381 = vmatprep.subr.bf16.mxu0 %v13380_v5  ;;  %s22303_s25 = scalar_lea.vmem %s21675_s5, %s15185_s27  ;;  %s22304_s29 = scalar_lea.vmem %s21676_s6, %s15185_s27 }
  0x21   : > { %13383 = vmatpush3.bf16.msra.mxu0 %v13380_v5  ;;  %p11386_p5 = scmp.ne.s32.totalorder %s15179_s26, 1 }
  0x22   : > { %13385 = vmatprep.subr.bf16.mxu0 %v13384_v8  ;;  %vm10910_vm4 = vcmask (!%p11386_p5), 1041409   ;;  %vm10913_vm5 = vcmask (!%p11386_p5), 254976  }
  0x23   : > { %v15249_v7 = vld [vmem:[#allocation2] sm:$0xff]  ;;  %v15253_v9 = vld [vmem:[#allocation2 + $0x8] sm:$0xff] }
  0x24   : > { %13277 = vmatprep.mubr.msk.f32.mxu0 %vm624_vm1, %v15249_v7 }
  0x25   : > { %13387 = vmatpush3.bf16.msra.mxu0 %v13384_v8 }
  0x26   : > { %13290 = vmatprep.subr.mxu0 %v21708_v12 }
  0x28   : > { %13278 = vmatmul.mubr.msk.f32.vlgmr.msra.gmra.mrb[0].mxu0 %vm624_vm1, %v15253_v9 }
  0x29   : > { %13292 = vmatprep.mubr.msk.f32.mxu0 %vm15098_vm2, %v21708_v12 }
  0xfb   : > { %v13279_v11 = vpop.f32.mrb[0].mxu0 }
  0xfc   : > { %v697_v13 = vpop.f32.mrb[1].mxu0  ;;  %v15272_v15 = vadd.f32 %v13279_v11, %v11086_v10 }
  0xfd   : > { %v15264_v14 = vadd.f32 %v11086_v10, %v697_v13 }
  0xff   : > { %712 = vrot.lane.b32.xlu1 %v15264_v14, %s15096_s17  ;;  %708 = vrot.lane.b32.xlu0 %v15264_v14, %s15097_s14 }
 0x103   : > { %714 = vrot.lane.b32.xlu1 %v15272_v15, %s15096_s17  ;;  %710 = vrot.lane.b32.xlu0 %v15272_v15, %s15097_s14 }
 0x107   : > { %718 = vrot.lane.b32.xlu1 %v15272_v15, %s15099_s1  ;;  %716 = vrot.lane.b32.xlu0 %v15264_v14, %s15099_s1  ;;  %s23817_s1 = scalar_lea.vmem %s21678_s8, %s15185_s27 }
 0x10b   : > { %797 = vrot.lane.b32.xlu1 %v15272_v15, %s15100_s18  ;;  %720 = vrot.lane.b32.xlu0 %v15264_v14, %s15100_s18 }
 0x171   : > { %v15280_v16 = vpop.permute.xlu1 %712  ;;  %v15282_v17 = vpop.permute.xlu0 %708 }
 0x172   : > { %873 = vrot.lane.b32.xlu0 %v15282_v17, %s15100_s18 }
 0x175   : > { %v15285_v18 = vpop.permute.xlu1 %714  ;;  %v15287_v19 = vpop.permute.xlu0 %710 }
 0x176   : > { %1025 = vrot.lane.b32.xlu0 %v15280_v16, %s15100_s18  ;;  %949 = vrot.lane.b32.xlu1 %v15287_v19, %s15100_s18 }
 0x179   : > { %v15291_v20 = vpop.permute.xlu0 %716  ;;  %v15295_v21 = vpop.permute.xlu1 %718 }
 0x17a   : > { %1101 = vrot.lane.b32.xlu1 %v15285_v18, %s15100_s18  ;;  %1177 = vrot.lane.b32.xlu0 %v15291_v20, %s15100_s18 }
 0x17d   : > { %v721_v22 = vpop.permute.xlu0 %720  ;;  %v798_v23 = vpop.permute.xlu1 %797 }
 0x17e   : > { %1253 = vrot.lane.b32.xlu1 %v15295_v21, %s15100_s18  ;;  %13281 = vmatpush3.xpose.msk.msra.mxu1 %vm722_vm3, %v721_v22 }
 0x17f   : > { %13285 = vmatprep.subr.mxu1 %v21708_v12 }
 0x181   : > { %13283 = vmatmul.mubr.msk.f32.vlgmr.msra.gmra.mrb[0].mxu1 %vm722_vm3, %v15264_v14 }
 0x182   : > { %13286 = vmatpush3.xpose.msk.msra.mxu1 %vm722_vm3, %v798_v23  ;;  %13287 = vmatprep.mubr.msk.f32.mxu1 %vm15098_vm2, %v21708_v12 }
 0x183   : > { %13295 = vmatprep.subr.mxu1 %v21708_v12 }
 0x185   : > { %13288 = vmatmul.mubr.msk.f32.vlgmr.msra.gmra.mrb[2].mxu1 %vm722_vm3, %v15272_v15 }
 0x186   : > { %13297 = vmatprep.mubr.msk.f32.mxu1 %vm15098_vm2, %v21708_v12 }
 0x1e4   : > { %v874_v24 = vpop.permute.xlu0 %873 }
 0x1e5   : > { %13291 = vmatpush3.xpose.msk.msra.mxu0 %vm722_vm3, %v874_v24 }
 0x1e6   : > { %13300 = vmatprep.subr.mxu0 %v21708_v12 }
 0x1e8   : > { %v950_v25 = vpop.permute.xlu1 %949  ;;  %13293 = vmatmul.mubr.msk.f32.vlgmr.msra.gmra.mrb[2].mxu0 %vm722_vm3, %v15282_v17  ;;  %v1026_v26 = vpop.permute.xlu0 %1025 }
 0x1e9   : > { %13296 = vmatpush3.xpose.msk.msra.mxu1 %vm722_vm3, %v950_v25  ;;  %13301 = vmatpush3.xpose.msk.msra.mxu0 %vm722_vm3, %v1026_v26 }
 0x1ea   : > { %13302 = vmatprep.mubr.msk.f32.mxu0 %vm15098_vm2, %v21708_v12  ;;  %13305 = vmatprep.subr.mxu1 %v21708_v12 }
 0x1eb   : > { %13310 = vmatprep.subr.mxu0 %v21708_v12 }
 0x1ec   : > { %v1102_v27 = vpop.permute.xlu1 %1101  ;;  %13298 = vmatmul.mubr.msk.f32.vlgmr.msra.gmra.mrb[4].mxu1 %vm722_vm3, %v15287_v19  ;;  %13303 = vmatmul.mubr.msk.f32.vlgmr.msra.gmra.mrb[4].mxu0 %vm722_vm3, %v15280_v16  ;;  %v1178_v28 = vpop.permute.xlu0 %1177 }
 0x1ed   : > { %13306 = vmatpush3.xpose.msk.msra.mxu1 %vm722_vm3, %v1102_v27  ;;  %13311 = vmatpush3.xpose.msk.msra.mxu0 %vm722_vm3, %v1178_v28 }
 0x1ee   : > { %13307 = vmatprep.mubr.msk.f32.mxu1 %vm15098_vm2, %v21708_v12  ;;  %13312 = vmatprep.mubr.msk.f32.mxu0 %vm15098_vm2, %v21708_v12 }
 0x1ef   : > { %13315 = vmatprep.subr.mxu1 %v21708_v12  ;;  %13320 = vmatprep.subr.mxu0 %v21708_v12 }
 0x1f0   : > { %v1254_v29 = vpop.permute.xlu1 %1253  ;;  %13308 = vmatmul.mubr.msk.f32.vlgmr.msra.gmra.mrb[6].mxu1 %vm722_vm3, %v15285_v18  ;;  %13313 = vmatmul.mubr.msk.f32.vlgmr.msra.gmra.mrb[6].mxu0 %vm722_vm3, %v15291_v20 }
 0x1f1   : > { %13316 = vmatpush3.xpose.msk.msra.mxu1 %vm722_vm3, %v1254_v29  ;;  %13317 = vmatprep.mubr.msk.f32.mxu1 %vm15098_vm2, %v21708_v12 }
 0x1f2   : > { %13325 = vmatprep.subr.mxu1 %v21708_v12  ;;  %13322 = vmatprep.mubr.msk.f32.mxu0 %vm15098_vm2, %v21708_v12 }
 0x1f4   : > { %13318 = vmatmul.mubr.msk.f32.vlgmr.msra.gmra.mrb[8].mxu1 %vm722_vm3, %v15295_v21 }
 0x1f5   : > { %13327 = vmatprep.mubr.msk.f32.mxu1 %vm15098_vm2, %v21708_v12 }
 0x254   : > { %v793_v30 = vpop.f32.mrb[0].mxu1 }
 0x255   : > { %v13284_v31 = vpop.f32.mrb[1].mxu1  ;;  %v1329_v32 = vsel %vm722_vm3, %v793_v30, -inf }
 0x256   : > { %1330 = vmax.xlane.f32.xlu0 %v1329_v32 }
 0x258   : > { %v869_v33 = vpop.f32.mrb[2].mxu1 }
 0x259   : > { %v13289_v34 = vpop.f32.mrb[3].mxu1  ;;  %v1332_v35 = vsel %vm722_vm3, %v869_v33, -inf }
 0x25a   : > { %1333 = vmax.xlane.f32.xlu1 %v1332_v35 }
 0x2bb   : > { %v945_v36 = vpop.f32.mrb[2].mxu0 }
 0x2bc   : > { %v13294_v37 = vpop.f32.mrb[3].mxu0  ;;  %v1335_v38 = vsel %vm722_vm3, %v945_v36, -inf }
 0x2bd   : > { %1336 = vmax.xlane.f32.xlu0 %v1335_v38 }
 0x2bf   : > { %v1021_v39 = vpop.f32.mrb[4].mxu1  ;;  %v1097_v40 = vpop.f32.mrb[4].mxu0 }
 0x2c0   : > { %v13299_v41 = vpop.f32.mrb[5].mxu1  ;;  %v13304_v42 = vpop.f32.mrb[5].mxu0  ;;  %v1338_v43 = vsel %vm722_vm3, %v1021_v39, -inf  ;;  %v1341_v44 = vsel %vm722_vm3, %v1097_v40, -inf }
 0x2c1   : > { %1339 = vmax.xlane.f32.xlu0 %v1338_v43  ;;  %1342 = vmax.xlane.f32.xlu1 %v1341_v44 }
 0x2c3   : > { %v1173_v45 = vpop.f32.mrb[6].mxu1  ;;  %v1249_v46 = vpop.f32.mrb[6].mxu0 }
 0x2c4   : > { %v13309_v47 = vpop.f32.mrb[7].mxu1  ;;  %v13314_v48 = vpop.f32.mrb[7].mxu0  ;;  %v1344_v49 = vsel %vm722_vm3, %v1173_v45, -inf  ;;  %v1347_v50 = vsel %vm722_vm3, %v1249_v46, -inf }
 0x2c5   : > { %1345 = vmax.xlane.f32.xlu0 %v1344_v49  ;;  %1348 = vmax.xlane.f32.xlu1 %v1347_v50 }
 0x2c7   : > { %v1325_v51 = vpop.f32.mrb[8].mxu1 }
 0x2c8   : > { %v13319_v52 = vpop.f32.mrb[9].mxu1  ;;  %v1350_v53 = vsel %vm722_vm3, %v1325_v51, -inf }
 0x2c9   : > { %1351 = vmax.xlane.f32.xlu0 %v1350_v53 }
 0x2d6   : > { %1417 = vrot.lane.b32.xlu1 %v15264_v14, %s15101_s3 }
 0x2da   : > { %1569 = vrot.lane.b32.xlu1 %v15282_v17, %s15101_s3 }
 0x2de   : > { %1645 = vrot.lane.b32.xlu1 %v15287_v19, %s15101_s3 }
 0x2df   : > { %1493 = vrot.lane.b32.xlu0 %v15272_v15, %s15101_s3 }
 0x2e2   : > { %1797 = vrot.lane.b32.xlu1 %v15285_v18, %s15101_s3 }
 0x2e3   : > { %1721 = vrot.lane.b32.xlu0 %v15280_v16, %s15101_s3  ;;  %v1331_v56 = vpop.xlane.xlu0 %1330 }
 0x2e4   : > { %v1353_v57 = vsub.f32 %v793_v30, %v1331_v56 }
 0x2e6   : > { %v1361_v59 = vmul.f32 1.442695, %v1353_v57 }
 0x2e7   : > { %v1334_v54 = vpop.xlane.xlu1 %1333 }
 0x2e8   : > { %v1354_v55 = vsub.f32 %v869_v33, %v1334_v54 }
 0x2ea   : > { %v1363_v58 = vmul.f32 1.442695, %v1354_v55 }
 0x2ec   : > { %15016 = vpow2.f32 %v1363_v58 }
 0x2ed   : > { %15018 = vpow2.f32 %v1361_v59 }
 0x2f6   : > { %v15366_v60 = vpop.eup %15016 }
 0x2f7   : > { %v1380_v61 = vsel %vm722_vm3, %v15366_v60, 0.0  ;;  %v15370_v62 = vpop.eup %15018 }
 0x2f8   : > { %v1377_v63 = vsel %vm722_vm3, %v15370_v62, 0.0 }
 0x302   : > { %1381 = vadd.xlane.f32.xlu0 %v1380_v61 }
 0x306   : > { %1378 = vadd.xlane.f32.xlu1 %v1377_v63 }
 0x34a   : > { %v1337_v0 = vpop.xlane.xlu0 %1336 }
 0x34b   : > { %v1355_v1 = vsub.f32 %v945_v36, %v1337_v0 }
 0x34d   : > { %v1365_v2 = vmul.f32 1.442695, %v1355_v1  ;;  %v2026_v1 = vld [vmem:[%s15198_s20 + $0x8] sm:$0xff] }
 0x34e   : > { %v1343_v3 = vpop.xlane.xlu1 %1342  ;;  %v1340_v4 = vpop.xlane.xlu0 %1339 }
 0x34f   : > { %15020 = vpow2.f32 %v1365_v2  ;;  %v1357_v5 = vsub.f32 %v1097_v40, %v1343_v3  ;;  %v1356_v6 = vsub.f32 %v1021_v39, %v1340_v4  ;;  %v2028_v2 = vld [vmem:[%s15198_s20 + $0x18] sm:$0xff] }
 0x351   : > { %v1369_v8 = vmul.f32 1.442695, %v1357_v5  ;;  %v1367_v10 = vmul.f32 1.442695, %v1356_v6 }
 0x352   : > { %v1349_v11 = vpop.xlane.xlu1 %1348  ;;  %v1346_v13 = vpop.xlane.xlu0 %1345 }
 0x353   : > { %15022 = vpow2.f32 %v1369_v8  ;;  %v1359_v14 = vsub.f32 %v1249_v46, %v1349_v11  ;;  %v1358_v15 = vsub.f32 %v1173_v45, %v1346_v13 }
 0x354   : > { %15024 = vpow2.f32 %v1367_v10 }
 0x355   : > { %v1373_v16 = vmul.f32 1.442695, %v1359_v14  ;;  %v1371_v17 = vmul.f32 1.442695, %v1358_v15  ;;  %v2025_v15 = vld [vmem:[%s15198_s20] sm:$0xff] }
 0x356   : > { %v1418_v18 = vpop.permute.xlu1 %1417  ;;  %v1352_v19 = vpop.xlane.xlu0 %1351 }
 0x357   : > { %15026 = vpow2.f32 %v1373_v16  ;;  %v1360_v22 = vsub.f32 %v1325_v51, %v1352_v19  ;;  %13321 = vmatpush3.msra.mxu0 %v1418_v18 }
 0x358   : > { %15028 = vpow2.f32 %v1371_v17  ;;  %13330 = vmatprep.subr.mxu0 %v21708_v12 }
 0x359   : > { %v15021_v23 = vpop.eup %15020  ;;  %v1375_v24 = vmul.f32 1.442695, %v1360_v22 }
 0x35a   : > { %v1494_v25 = vpop.permute.xlu0 %1493  ;;  %v1383_v26 = vsel %vm722_vm3, %v15021_v23, 0.0  ;;  %v1570_v37 = vpop.permute.xlu1 %1569 }
 0x35b   : > { %15030 = vpow2.f32 %v1375_v24  ;;  %1384 = vadd.xlane.f32.xlu1 %v1383_v26  ;;  %13326 = vmatpush3.msra.mxu1 %v1494_v25  ;;  %v2027_v24 = vld [vmem:[%s15198_s20 + $0x10] sm:$0xff]  ;;  %v11121_v26 = vld [vmem:[%s572_s23] ss:$0 sm:$0xff] }
 0x35c   : > { %13335 = vmatprep.subr.mxu1 %v21708_v12 }
 0x35d   : > { %v15023_v27 = vpop.eup %15022 }
 0x35e   : > { %v15025_v28 = vpop.eup %15024  ;;  %v1389_v29 = vsel %vm722_vm3, %v15023_v27, 0.0  ;;  %v1646_v38 = vpop.permute.xlu1 %1645 }
 0x35f   : > { %1390 = vadd.xlane.f32.xlu1 %v1389_v29  ;;  %v1386_v30 = vsel %vm722_vm3, %v15025_v28, 0.0  ;;  %v1722_v39 = vpop.permute.xlu0 %1721 }
 0x360   : > { %1387 = vadd.xlane.f32.xlu0 %v1386_v30 }
 0x361   : > { %v15027_v31 = vpop.eup %15026 }
 0x362   : > { %v15029_v32 = vpop.eup %15028  ;;  %v1395_v33 = vsel %vm722_vm3, %v15027_v31, 0.0  ;;  %v1798_v40 = vpop.permute.xlu1 %1797 }
 0x363   : > { %1396 = vadd.xlane.f32.xlu1 %v1395_v33  ;;  %v1392_v34 = vsel %vm722_vm3, %v15029_v32, 0.0 }
 0x364   : > { %1393 = vadd.xlane.f32.xlu0 %v1392_v34 }
 0x365   : > { %v15381_v35 = vpop.eup %15030 }
 0x366   : > { %v1398_v36 = vsel %vm722_vm3, %v15381_v35, 0.0 }
 0x368   : > { %1399 = vadd.xlane.f32.xlu0 %v1398_v36 }
 0x374   : > { %1949 = vrot.lane.b32.xlu1 %v15295_v21, %s15101_s3 }
 0x37e   : > { %1873 = vrot.lane.b32.xlu0 %v15291_v20, %s15101_s3 }
 0x38f   : > { %v1382_v41 = vpop.xlane.xlu0 %1381 }
 0x390   : > { %15032 = vrcp.f32 %v1382_v41 }
 0x393   : > { %v1379_v42 = vpop.xlane.xlu1 %1378 }
 0x394   : > { %15034 = vrcp.f32 %v1379_v42 }
 0x39a   : > { %v15033_v43 = vpop.eup %15032 }
 0x39b   : > { %v1410_v44 = vmul.f32 %v15033_v43, %v15366_v60  ;;  %v2412_v43 = vld [vmem:[%s15224_s22 + $0x8] sm:$0xff] }
 0x39d   : > { %13328 = vmatmul.mubr.msk.f32.vlgmr.msra.gmra.mrb[10].mxu1 %vm722_vm3, %v1410_v44  ;;  %v2416_v44 = vld [vmem:[%s15224_s22 + $0x88] sm:$0xff] }
 0x39e   : > { %v15035_v45 = vpop.eup %15034  ;;  %13336 = vmatpush3.msra.mxu1 %v1646_v38  ;;  %13337 = vmatprep.mubr.msk.f32.mxu1 %vm15098_vm2, %v21708_v12 }
 0x39f   : > { %v1409_v20 = vmul.f32 %v15035_v45, %v15370_v62  ;;  %13345 = vmatprep.subr.mxu1 %v21708_v12  ;;  %v11129_v45 = vld [vmem:[%s15224_s22 + $0x28] sm:$0xff] }
 0x3a1   : > { %13323 = vmatmul.mubr.msk.f32.vlgmr.msra.gmra.mrb[8].mxu0 %vm722_vm3, %v1409_v20  ;;  %v13388_v20 = vpack.c.bf16 %v2416_v44, %v2412_v43 }
 0x3a2   : > { %13331 = vmatpush3.msra.mxu0 %v1570_v37  ;;  %13332 = vmatprep.mubr.msk.f32.mxu0 %vm15098_vm2, %v21708_v12 }
 0x3a3   : > { %13340 = vmatprep.subr.mxu0 %v21708_v12 }
 0x3e8   : > { %v1385_v21 = vpop.xlane.xlu1 %1384 }
 0x3e9   : > { %15036 = vrcp.f32 %v1385_v21  ;;  %v11133_v21 = vld [vmem:[%s15224_s22 + $0xa8] sm:$0xff] }
 0x3ec   : > { %v1391_v46 = vpop.xlane.xlu1 %1390 }
 0x3ed   : > { %15038 = vrcp.f32 %v1391_v46  ;;  %v1388_v47 = vpop.xlane.xlu0 %1387  ;;  %v2411_v46 = vld [vmem:[%s15224_s22] sm:$0xff] }
 0x3ee   : > { %15040 = vrcp.f32 %v1388_v47  ;;  %v2415_v47 = vld [vmem:[%s15224_s22 + $0x80] sm:$0xff] }
 0x3f0   : > { %v1397_v48 = vpop.xlane.xlu1 %1396 }
 0x3f1   : > { %15042 = vrcp.f32 %v1397_v48  ;;  %v1394_v49 = vpop.xlane.xlu0 %1393  ;;  %v13404_v48 = vpack.c.bf16 %v11133_v21, %v11129_v45  ;;  %v15546_v21 = vld [vmem:[%s15224_s22 + $0x30] sm:$0xff] }
 0x3f2   : > { %15044 = vrcp.f32 %v1394_v49  ;;  %v13390_v49 = vpack.c.bf16 %v2415_v47, %v2411_v46  ;;  %v15550_v47 = vld [vmem:[%s15236_s15 + $0x2a0] sm:$0xff] }
 0x3f3   : > { %v15037_v50 = vpop.eup %15036 }
 0x3f4   : > { %v1411_v51 = vmul.f32 %v15037_v50, %v15021_v23  ;;  %v1950_v62 = vpop.permute.xlu1 %1949  ;;  %v11128_v50 = vld [vmem:[%s15224_s22 + $0x20] sm:$0xff] }
 0x3f5   : > { %v1400_v52 = vpop.xlane.xlu0 %1399 }
 0x3f6   : > { %15046 = vrcp.f32 %v1400_v52  ;;  %13333 = vmatmul.mubr.msk.f32.vlgmr.msra.gmra.mrb[10].mxu0 %vm722_vm3, %v1411_v51  ;;  %v11132_v51 = vld [vmem:[%s15224_s22 + $0xa0] sm:$0xff] }
 0x3f7   : > { %v15039_v53 = vpop.eup %15038  ;;  %13341 = vmatpush3.msra.mxu0 %v1722_v39  ;;  %13342 = vmatprep.mubr.msk.f32.mxu0 %vm15098_vm2, %v21708_v12  ;;  %v13406_v52 = vpack.c.bf16 %v11132_v51, %v11128_v50  ;;  %v15557_v50 = vld [vmem:[%s15224_s22 + $0xb0] sm:$0xff]  ;;  %v15560_v51 = vld [vmem:[%s15224_s22 + $0x138] sm:$0xff] }
 0x3f8   : > { %v15041_v54 = vpop.eup %15040  ;;  %v1413_v55 = vmul.f32 %v15039_v53, %v15023_v27  ;;  %13350 = vmatprep.subr.mxu0 %v21708_v12  ;;  %v2420_v53 = vld [vmem:[%s15224_s22 + $0x108] sm:$0xff] }
 0x3f9   : > { %v1412_v56 = vmul.f32 %v15041_v54, %v15025_v28  ;;  %v1874_v57 = vpop.permute.xlu0 %1873  ;;  %v2424_v54 = vld [vmem:[%s15224_s22 + $0x188] sm:$0xff] }
 0x3fa   : > { %13343 = vmatmul.mubr.msk.f32.vlgmr.msra.gmra.mrb[12].mxu0 %vm722_vm3, %v1413_v55  ;;  %v11137_v55 = vld [vmem:[%s15224_s22 + $0x128] sm:$0xff] }
 0x3fb   : > { %v15043_v58 = vpop.eup %15042  ;;  %13338 = vmatmul.mubr.msk.f32.vlgmr.msra.gmra.mrb[12].mxu1 %vm722_vm3, %v1412_v56  ;;  %13351 = vmatpush3.msra.mxu0 %v1874_v57  ;;  %v13392_v56 = vpack.c.bf16 %v2424_v54, %v2420_v53  ;;  %v11141_v57 = vld [vmem:[%s15224_s22 + $0x1a8] sm:$0xff] }
 0x3fc   : > { %v15045_v59 = vpop.eup %15044  ;;  %v1415_v60 = vmul.f32 %v15043_v58, %v15027_v31  ;;  %13346 = vmatpush3.msra.mxu1 %v1798_v40  ;;  %13347 = vmatprep.mubr.msk.f32.mxu1 %vm15098_vm2, %v21708_v12  ;;  %v2419_v58 = vld [vmem:[%s15224_s22 + $0x100] sm:$0xff] }
 0x3fd   : > { %v1414_v61 = vmul.f32 %v15045_v59, %v15029_v32  ;;  %13352 = vmatprep.mubr.msk.f32.mxu0 %vm15098_vm2, %v21708_v12  ;;  %13355 = vmatprep.subr.mxu1 %v21708_v12  ;;  %v2423_v59 = vld [vmem:[%s15224_s22 + $0x180] sm:$0xff] }
 0x3fe   : > { %13353 = vmatmul.mubr.msk.f32.vlgmr.msra.gmra.mrb[14].mxu0 %vm722_vm3, %v1415_v60  ;;  %13360 = vmatprep.subr.mxu0 %v2026_v1  ;;  %v13408_v60 = vpack.c.bf16 %v11141_v57, %v11137_v55  ;;  %v15569_v55 = vld [vmem:[%s15224_s22 + $0x130] sm:$0xff] }
 0x3ff   : > { %13348 = vmatmul.mubr.msk.f32.vlgmr.msra.gmra.mrb[14].mxu1 %vm722_vm3, %v1414_v61  ;;  %13361 = vmatpush3.msra.mxu0 %v2026_v1  ;;  %v13394_v61 = vpack.c.bf16 %v2423_v59, %v2419_v58  ;;  %v2414_v1 = vld [vmem:[%s15224_s22 + $0x18] sm:$0xff] }
 0x400   : > { %v15047_v63 = vpop.eup %15046  ;;  %13356 = vmatpush3.msra.mxu1 %v1950_v62  ;;  %13357 = vmatprep.mubr.msk.f32.mxu1 %vm15098_vm2, %v21708_v12  ;;  %v11136_v62 = vld [vmem:[%s15224_s22 + $0x120] sm:$0xff] }
 0x401   : > { %v1416_v0 = vmul.f32 %v15047_v63, %v15381_v35  ;;  %13365 = vmatprep.subr.mxu0 %v2028_v2  ;;  %13389 = vmatprep.subr.bf16.mxu1 %v13388_v20  ;;  %v11140_v63 = vld [vmem:[%s15224_s22 + $0x1a0] sm:$0xff]  ;;  %v15543_v20 = vld [vmem:[%s15224_s22 + $0xb8] sm:$0xff] }
 0x403   : > { %13358 = vmatmul.mubr.msk.f32.vlgmr.msra.gmra.mrb[16].mxu1 %vm722_vm3, %v1416_v0  ;;  %v13410_v0 = vpack.c.bf16 %v11140_v63, %v11136_v62  ;;  %v11122_v62 = vld [vmem:[%s22303_s25] ss:$0 sm:$0xff] }
 0x404   : > { %2519 = vmatprep.mubr.f32.mxu1 %v21708_v12  ;;  %13391 = vmatpush1.bf16.msra.mxu1 %v13390_v49 }
 0x405   : > { %13393 = vmatprep.subr.bf16.mxu1 %v13392_v56  ;;  %v15572_v56 = vld [vmem:[%s15224_s22 + $0x1b0] sm:$0xff] }
 0x408   : > { %13395 = vmatpush1.bf16.msra.mxu1 %v13394_v61 }
 0x470   : > { %v1565_v3 = vpop.f32.mrb[10].mxu1 }
 0x471   : > { %v13329_v4 = vpop.f32.mrb[11].mxu1 }
 0x472   : > { %v11165_v4 = vld [vmem:[%s15236_s15 + $0x280] sm:$0xff] }
 0x474   : > { %v1489_v5 = vpop.f32.mrb[8].mxu0 }
 0x475   : > { %v13324_v6 = vpop.f32.mrb[9].mxu0 }
 0x476   : > { %v2997_v6 = vand.u32 4294901760, %v11165_v4 }
 0x4c9   : > { %v1641_v8 = vpop.f32.mrb[10].mxu0 }
 0x4ca   : > { %v13334_v10 = vpop.f32.mrb[11].mxu0  ;;  %13362 = vmatprep.mubr.msk.f32.mxu0 %vm722_vm3, %v1641_v8 }
 0x4cb   : > { %v15469_v10 = vsub.f32 %v11165_v4, %v2997_v6 }
 0x4cd   : > { %v1793_v11 = vpop.f32.mrb[12].mxu0  ;;  %v21689_v43 = vand.u32 4294901760, %v15469_v10 }
 0x4ce   : > { %v1717_v13 = vpop.f32.mrb[12].mxu1  ;;  %v13344_v14 = vpop.f32.mrb[13].mxu0 }
 0x4cf   : > { %v13339_v16 = vpop.f32.mrb[13].mxu1  ;;  %13363 = vmatmul.mubr.msk.f32.vlgmr.msra.gmra.mrb[16].mxu0 %vm722_vm3, %v1717_v13  ;;  %v15592_v63 = vsub.f32 %v15469_v10, %v21689_v43 }
 0x4d0   : > { %13366 = vmatpush3.msra.mxu0 %v2028_v2  ;;  %v2418_v2 = vld [vmem:[%s15224_s22 + $0x98] sm:$0xff]  ;;  %v15477_v16 = vld [vmem:[%s15236_s15 + $0x200] sm:$0xff] }
 0x4d1   : > { %v1945_v17 = vpop.f32.mrb[14].mxu0  ;;  %13370 = vmatprep.subr.mxu0 %v2025_v15  ;;  %v3192_v43 = vand.u32 4294901760, %v15592_v63 }
 0x4d2   : > { %v1869_v18 = vpop.f32.mrb[14].mxu1  ;;  %v13354_v19 = vpop.f32.mrb[15].mxu0  ;;  %13367 = vmatprep.mubr.msk.f32.mxu0 %vm722_vm3, %v1945_v17 }
 0x4d3   : > { %v13349_v22 = vpop.f32.mrb[15].mxu1  ;;  %v15483_v19 = vld [vmem:[%s15236_s15 + $0x290] sm:$0xff] }
 0x4d6   : > { %v2021_v23 = vpop.f32.mrb[16].mxu1 }
 0x4d7   : > { %v13359_v25 = vpop.f32.mrb[17].mxu1  ;;  %13368 = vmatmul.mubr.msk.f32.vlgmr.msra.gmra.mrb[16].mxu0 %vm722_vm3, %v2021_v23  ;;  %v15486_v23 = vld [vmem:[%s15236_s15 + $0x298] sm:$0xff] }
 0x4d8   : > { %13371 = vmatpush3.msra.mxu0 %v2025_v15  ;;  %13372 = vmatprep.mubr.msk.f32.mxu0 %vm722_vm3, %v1489_v5  ;;  %v11166_v5 = vld [vmem:[%s15236_s15 + $0x288] sm:$0xff]  ;;  %v2949_v25 = vand.u32 4294901760, %v15477_v16 }
 0x4d9   : > { %13375 = vmatprep.subr.mxu0 %v2027_v24  ;;  %v3000_v8 = vand.u32 4294901760, %v11166_v5 }
 0x4db   : > { %v15473_v13 = vpack.c.bf16 %v3000_v8, %v2997_v6 }
 0x4df   : > { %13373 = vmatmul.mubr.msk.f32.vlgmr.msra.gmra.mrb[16].mxu0 %vm722_vm3, %v1565_v3  ;;  %v13396_v3 = vpack.c.bf16 %v2418_v2, %v2414_v1  ;;  %v21693_v2 = vand.u32 4294901760, %v15550_v47 }
 0x4e0   : > { %13376 = vmatpush3.msra.mxu0 %v2027_v24  ;;  %13377 = vmatprep.mubr.msk.f32.mxu0 %vm722_vm3, %v1793_v11  ;;  %v15471_v11 = vsub.f32 %v11166_v5, %v3000_v8  ;;  %v11123_v8 = vld [vmem:[%s22304_s29] ss:$0 sm:$0xff] }
 0x4e1   : > { %13405 = vmatprep.subr.bf16.mxu0 %v13404_v48  ;;  %13397 = vmatprep.subr.bf16.mxu1 %v13396_v3 }
 0x4e2   : > { %v21687_v46 = vand.u32 4294901760, %v15471_v11 }
 0x4e4   : > { %v15609_v6 = vsub.f32 %v15471_v11, %v21687_v46  ;;  %v15638_v46 = vld [vmem:[%s15236_s15 + $0x2b0] sm:$0xff] }
 0x4e6   : > { %v3199_v4 = vand.u32 4294901760, %v15609_v6  ;;  %v15690_v6 = vld [vmem:[%s15236_s15 + $0x238] sm:$0xff] }
 0x4e7   : > { %13378 = vmatmul.mubr.msk.f32.vlgmr.msra.gmra.mrb[16].mxu0 %vm722_vm3, %v1869_v18  ;;  %v15480_v18 = vld [vmem:[%s15236_s15 + $0x208] sm:$0xff] }
 0x4e8   : > { %2785 = vmatprep.mubr.f32.mxu0 %v21708_v12  ;;  %13407 = vmatpush1.bf16.msra.mxu0 %v13406_v52  ;;  %v15563_v52 = vld [vmem:[%s15224_s22 + $0x1b8] sm:$0xff] }
 0x4e9   : > { %13409 = vmatprep.subr.bf16.mxu0 %v13408_v60  ;;  %v15582_v60 = vld [vmem:[%s15236_s15 + $0x2a8] sm:$0xff] }
 0x4ec   : > { %13411 = vmatpush1.bf16.msra.mxu0 %v13410_v0 }
 0x4ed   : > { %13421 = vmatprep.subr.bf16.mxu0 %v15473_v13 }
 0x5ba   : > { %v13379_v27 = vpop.f32.mrb[16].mxu0 }
 0x5bb   : > { %v2363_v28 = vadd.f32 %v13379_v27, %v11121_v26  ;;  %v2344_v29 = vpop.f32.mrb[17].mxu0  ;;  %v3003_v27 = vand.u32 4294901760, %v15483_v19 }
 0x5bc   : > { %v2362_v30 = vadd.f32 %v11121_v26, %v2344_v29  ;;  %v2952_v26 = vand.u32 4294901760, %v15480_v18  ;;  %v3006_v29 = vand.u32 4294901760, %v15486_v23 }
 0x5bd   : > { %v2365_v31 = vadd.f32 %v2363_v28, %v15253_v9 }
 0x5be   : > { %v2364_v32 = vadd.f32 %v2362_v30, %v15249_v7  ;;  %v15493_v30 = vld [vmem:[%s15236_s15 + $0x210] sm:$0xff]  ;;  %v15539_v44 = vsub.f32 %v15486_v23, %v3006_v29  ;;  %v15725_v23 = vld [vmem:[%s15236_s15 + $0x2c8] sm:$0xff] }
 0x5bf   : > { %v2371_v33 = vsel %vm624_vm1, %v2365_v31, 0.0 }
 0x5c0   : > { %2372 = vadd.xlane.f32.xlu1 %v2371_v33  ;;  %v2368_v34 = vsel %vm624_vm1, %v2364_v32, 0.0  ;;  %v15504_v33 = vsub.f32 %v15477_v16, %v2949_v25  ;;  %v21692_v0 = vand.u32 4294901760, %v15539_v44 }
 0x5c1   : > { %2369 = vadd.xlane.f32.xlu0 %v2368_v34  ;;  %v15507_v34 = vld [vmem:[%s15224_s22 + $0x90] sm:$0xff] }
 0x5c2   : > { %v21688_v53 = vand.u32 4294901760, %v15504_v33 }
 0x64d   : > { %v2373_v35 = vpop.xlane.xlu1 %2372 }
 0x64e   : > { %v2376_v36 = vmul.f32 0.03125, %v2373_v35  ;;  %v2370_v37 = vpop.xlane.xlu0 %2369  ;;  %v15510_v35 = vld [vmem:[%s15224_s22 + $0x118] sm:$0xff] }
 0x64f   : > { %v2375_v38 = vmul.f32 0.03125, %v2370_v37  ;;  %v15518_v37 = vsub.f32 %v15480_v18, %v2952_v26 }
 0x650   : > { %v15439_v39 = vsub.f32 %v2365_v31, %v2376_v36  ;;  %v15496_v31 = vld [vmem:[%s15236_s15 + $0x218] sm:$0xff] }
 0x651   : > { %v15441_v9 = vsub.f32 %v2364_v32, %v2375_v38  ;;  %v15499_v32 = vld [vmem:[%s15224_s22 + $0x10] sm:$0xff]  ;;  %v15513_v36 = vld [vmem:[%s15224_s22 + $0x198] sm:$0xff]  ;;  %v15523_v38 = vsub.f32 %v15483_v19, %v3003_v27  ;;  %v2958_v45 = vand.u32 4294901760, %v15496_v31  ;;  %v21690_v57 = vand.u32 4294901760, %v15518_v37  ;;  %v15722_v19 = vld [vmem:[%s15236_s15 + $0x2c0] sm:$0xff] }
 0x652   : > { %v2380_v41 = vmul.f32 %v15439_v39, %v15439_v39  ;;  %v13398_v48 = vpack.c.bf16 %v15507_v34, %v15499_v32  ;;  %v13400_v49 = vpack.c.bf16 %v15513_v36, %v15510_v35 }
 0x653   : > { %v2379_v7 = vmul.f32 %v15441_v9, %v15441_v9  ;;  %v21691_v58 = vand.u32 4294901760, %v15523_v38  ;;  %v15598_v1 = vsub.f32 %v15496_v31, %v2958_v45  ;;  %v22307_v31 = vand.u32 4294901760, %v15550_v47 }
 0x654   : > { %v2384_v42 = vsel %vm624_vm1, %v2380_v41, 0.0  ;;  %v15530_v41 = vld [vmem:[%s15224_s22 + $0x190] sm:$0xff] }
 0x655   : > { %v2381_v40 = vsel %vm624_vm1, %v2379_v7, 0.0  ;;  %v2955_v7 = vand.u32 4294901760, %v15493_v30  ;;  %v3205_v32 = vsub.f32 %v15523_v38, %v21691_v58  ;;  %v15651_v58 = vld [vmem:[%s15236_s15 + $0x2b8] sm:$0xff] }
 0x656   : > { %2382 = vadd.xlane.f32.xlu0 %v2381_v40  ;;  %v15527_v40 = vld [vmem:[%s15224_s22 + $0x110] sm:$0xff]  ;;  %v3018_v18 = vand.u32 4294901760, %v15651_v58 }
 0x657   : > { %v15579_v59 = vsub.f32 %v15493_v30, %v2955_v7  ;;  %v15719_v36 = vpack.c.bf16 %v2958_v45, %v2955_v7  ;;  %v2970_v30 = vand.u32 4294901760, %v15690_v6  ;;  %v22308_v45 = vpack.c.bf16 %v15530_v41, %v15527_v40 }
 0x658   : > { %v21705_v41 = vand.u32 4294901760, %v15722_v19 }
 0x659   : > { %v21701_v34 = vand.u32 4294901760, %v15579_v59 }
 0x65a   : > { %2385 = vadd.xlane.f32.xlu0 %v2384_v42  ;;  %v15533_v42 = vld [vmem:[%s15224_s22 + $0x38] sm:$0xff] }
 0x65b   : > { %v15676_v16 = vsub.f32 %v15579_v59, %v21701_v34 }
 0x6e3   : > { %v2383_v14 = vpop.xlane.xlu0 %2382 }
 0x6e4   : > { %v2387_v15 = vmul.f32 0.03125, %v2383_v14 }
 0x6e6   : > { %v2389_v17 = vadd.f32 1e-05, %v2387_v15  ;;  %v3079_v15 = vsub.f32 %v15504_v33, %v21688_v53 }
 0x6e7   : > { %v2386_v22 = vpop.xlane.xlu0 %2385 }
 0x6e8   : > { %15048 = vrsqrt.f32 %v2389_v17  ;;  %v2388_v24 = vmul.f32 0.03125, %v2386_v22  ;;  %v3012_v17 = vand.u32 4294901760, %v15582_v60  ;;  %v15625_v22 = vld [vmem:[%s15236_s15 + $0x220] sm:$0xff] }
 0x6e9   : > { %v2961_v63 = vand.u32 4294901760, %v15625_v22 }
 0x6ea   : > { %v2390_v28 = vadd.f32 1e-05, %v2388_v24  ;;  %v15659_v54 = vsub.f32 %v15582_v60, %v3012_v17  ;;  %v15738_v7 = vpack.c.bf16 %v3012_v17, %v22307_v31 }
 0x6ec   : > { %15050 = vrsqrt.f32 %v2390_v28  ;;  %v3086_v28 = vsub.f32 %v15518_v37, %v21690_v57  ;;  %v15648_v57 = vsub.f32 %v15550_v47, %v21693_v2  ;;  %v3015_v2 = vand.u32 4294901760, %v15638_v46 }
 0x6ed   : > { %v22309_v47 = vpack.c.bf16 %v15543_v20, %v15533_v42 }
 0x6ee   : > { %v15713_v35 = vsub.f32 %v15638_v46, %v3015_v2  ;;  %v13452_v46 = vpack.c.bf16 %v3199_v4, %v3192_v43  ;;  %v21704_v43 = vand.u32 4294901760, %v15725_v23  ;;  %v15760_v4 = vld [vmem:[%s15236_s15 + $0x240] sm:$0xff] }
 0x6f0   : > { %v21699_v20 = vand.u32 4294901760, %v15713_v35 }
 0x6f2   : > { %v15049_v61 = vpop.eup %15048 }
 0x6f3   : > { %v2393_v3 = vmul.f32 %v15049_v61, %v15441_v9  ;;  %v15635_v61 = vld [vmem:[%s15236_s15 + $0x228] sm:$0xff]  ;;  %v21694_v9 = vand.u32 4294901760, %v15598_v1 }
 0x6f5   : > { %v2401_v24 = vmul.f32 %v11122_v62, %v2393_v3  ;;  %v3212_v3 = vsub.f32 %v15539_v44, %v21692_v0  ;;  %v15665_v0 = vpack.c.bf16 %v2952_v26, %v2949_v25  ;;  %v3087_v25 = vand.u32 4294901760, %v3086_v28 }
 0x6f6   : > { %v15051_v53 = vpop.eup %15050  ;;  %v3206_v26 = vand.u32 4294901760, %v3205_v32  ;;  %v15683_v60 = vsub.f32 %v15598_v1, %v21694_v9  ;;  %v15699_v28 = vsub.f32 %v15625_v22, %v2961_v63  ;;  %v15705_v32 = vpack.c.bf16 %v3006_v29, %v3003_v27 }
 0x6f7   : > { %v15653_v14 = vadd.f32 %v11123_v8, %v2401_v24  ;;  %v2394_v5 = vmul.f32 %v15051_v53, %v15439_v39  ;;  %v2964_v24 = vand.u32 4294901760, %v15635_v61  ;;  %v3080_v53 = vand.u32 4294901760, %v3079_v15 }
 0x6f8   : > { %v21695_v9 = vand.u32 4294901760, %v15659_v54  ;;  %v15732_v27 = vsub.f32 %v15651_v58, %v3018_v18  ;;  %v3094_v58 = vand.u32 4294901760, %v15676_v16  ;;  %v21696_v40 = vand.u32 4294901760, %v15699_v28  ;;  %v15777_v16 = vld [vmem:[%s15236_s15 + $0x2d8] sm:$0xff] }
 0x6f9   : > { %22305 = vst [vmem:[#allocation7_spill] sm:$0xff] %v15653_v14  ;;  %v2402_v39 = vmul.f32 %v11122_v62, %v2394_v5  ;;  %11124 = vmatmul.mubr.msk.f32.vlgmr.msra.gmra.mrb[18].mxu1 %vm624_vm1, %v15653_v14  ;;  %11145 = vmatmul.mubr.msk.f32.vlgmr.msra.gmra.mrb[18].mxu0 %vm624_vm1, %v15653_v14  ;;  %v21697_v62 = vand.u32 4294901760, %v15648_v57  ;;  %v15687_v5 = vld [vmem:[%s15236_s15 + $0x230] sm:$0xff]  ;;  %v3101_v31 = vand.u32 4294901760, %v15683_v60 }
 0x6fa   : > { %13399 = vmatpush1.bf16.msra.mxu1 %v13398_v48  ;;  %2525 = vmatprep.mubr.f32.mxu1 %v21708_v12  ;;  %v3213_v48 = vand.u32 4294901760, %v3212_v3  ;;  %v2967_v29 = vand.u32 4294901760, %v15687_v5  ;;  %v3226_v3 = vsub.f32 %v15659_v54, %v21695_v9  ;;  %v15814_v60 = vld [vmem:[%s15236_s15 + $0x250] sm:$0xff]  ;;  %v3233_v9 = vsub.f32 %v15713_v35, %v21699_v20 }
 0x6fb   : > { %v15692_v15 = vadd.f32 %v11123_v8, %v2402_v39  ;;  %2791 = vmatprep.mubr.f32.mxu0 %v21708_v12  ;;  %13401 = vmatprep.subr.bf16.mxu1 %v13400_v49  ;;  %v15710_v8 = vsub.f32 %v15635_v61, %v2964_v24  ;;  %v15744_v49 = vpack.c.bf16 %v3087_v25, %v3080_v53  ;;  %v15763_v61 = vld [vmem:[%s15236_s15 + $0x248] sm:$0xff]  ;;  %v15774_v53 = vld [vmem:[%s15236_s15 + $0x2d0] sm:$0xff]  ;;  %v21698_v25 = vand.u32 4294901760, %v15732_v27 }
 0x6fc   : > { %13423 = vmatpush3.bf16.msra.mxu0 %v15665_v0  ;;  %v3219_v22 = vsub.f32 %v15648_v57, %v21697_v62  ;;  %v15753_v17 = vpack.c.bf16 %v3213_v48, %v3206_v26  ;;  %v15771_v39 = vpack.c.bf16 %v2964_v24, %v2961_v63  ;;  %v15783_v26 = vsub.f32 %v15687_v5, %v2967_v29 }
 0x6fd   : > { %22306 = vst [vmem:[#allocation8_spill] sm:$0xff] %v15692_v15  ;;  %11125 = vmatmul.mubr.msk.f32.gmra.mrb[20].mxu1 %vm624_vm1, %v15692_v15  ;;  %11146 = vmatmul.mubr.msk.f32.gmra.mrb[20].mxu0 %vm624_vm1, %v15692_v15  ;;  %v21700_v42 = vand.u32 4294901760, %v15710_v8  ;;  %v15786_v48 = vsub.f32 %v15690_v6, %v2970_v30  ;;  %v15789_v63 = vpack.c.bf16 %v3018_v18, %v3015_v2  ;;  %v21703_v5 = vand.u32 4294901760, %v15760_v4 }
 0x6fe   : > { %13403 = vmatpush1.bf16.msra.mxu1 %v22308_v45  ;;  %2596 = vmatprep.mubr.f32.mxu1 %v21708_v12  ;;  %v22310_v24 = vpack.c.bf16 %v15557_v50, %v15546_v21  ;;  %v3220_v45 = vand.u32 4294901760, %v3219_v22  ;;  %v22311_v6 = vpack.c.bf16 %v15563_v52, %v15560_v51  ;;  %v15804_v2 = vsub.f32 %v15722_v19, %v21705_v41  ;;  %v15817_v22 = vld [vmem:[%s15236_s15 + $0x258] sm:$0xff] }
 0x6ff   : > { %13413 = vmatprep.subr.bf16.mxu1 %v22309_v47  ;;  %13425 = vmatprep.subr.bf16.mxu0 %v15705_v32  ;;  %v21702_v47 = vand.u32 4294901760, %v15763_v61  ;;  %v15809_v21 = vsub.f32 %v15725_v23, %v21704_v43  ;;  %v21706_v50 = vand.u32 4294901760, %v15774_v53  ;;  %v21707_v18 = vand.u32 4294901760, %v15777_v16 }
 0x700   : > { %13427 = vmatpush3.bf16.msra.mxu0 %v15719_v36  ;;  %22312 = vst [vmem:[#allocation9_spill] sm:$0xff] %v15804_v2  ;;  %v3227_v51 = vand.u32 4294901760, %v3226_v3  ;;  %v3107_v52 = vsub.f32 %v15699_v28, %v21696_v40  ;;  %v3240_v3 = vsub.f32 %v15732_v27, %v21698_v25  ;;  %v21711_v40 = vand.u32 4294901760, %v15783_v26 }
 0x701   : > { %11126 = vmatmul.mubr.msk.f32.vlgmr.msra.gmra.mrb[22].mxu1 %vm624_vm1, %v15653_v14  ;;  %13429 = vmatprep.subr.bf16.mxu0 %v15738_v7  ;;  %22313 = vst [vmem:[#allocation10_spill] sm:$0xff] %v15809_v21  ;;  %v21710_v62 = vand.u32 4294901760, %v15786_v48  ;;  %v15851_v25 = vsub.f32 %v15763_v61, %v21702_v47  ;;  %v21714_v20 = vand.u32 4294901760, %v15814_v60  ;;  %v15865_v34 = vsub.f32 %v15777_v16, %v21707_v18 }
 0x702   : > { %13415 = vmatpush1.bf16.msra.mxu1 %v22310_v24  ;;  %2602 = vmatprep.mubr.f32.mxu1 %v21708_v12  ;;  %v3114_v24 = vsub.f32 %v15710_v8, %v21700_v42  ;;  %v21712_v42 = vand.u32 4294901760, %v15817_v22  ;;  %v13458_v47 = vpack.c.bf16 %v3101_v31, %v3094_v58  ;;  %v3108_v43 = vand.u32 4294901760, %v3107_v52 }
 0x703   : > { %13417 = vmatprep.subr.bf16.mxu1 %v22311_v6  ;;  %v15826_v6 = vpack.c.bf16 %v2970_v30, %v2967_v29  ;;  %v22314_v29 = vpack.c.bf16 %v15572_v56, %v15569_v55  ;;  %v15846_v30 = vsub.f32 %v15760_v4, %v21703_v5  ;;  %22316 = vst [vmem:[#allocation12_spill] sm:$0xff] %v15851_v25  ;;  %v21713_v55 = vand.u32 4294901760, %v15804_v2 }
 0x704   : > { %13431 = vmatpush3.bf16.msra.mxu0 %v15771_v39  ;;  %22318 = vst [vmem:[#allocation14_spill] sm:$0xff] %v15865_v34  ;;  %v13460_v5 = vpack.c.bf16 %v3227_v51, %v3220_v45  ;;  %v3115_v41 = vand.u32 4294901760, %v3114_v24  ;;  %v3241_v56 = vand.u32 4294901760, %v3240_v3  ;;  %v3128_v18 = vsub.f32 %v15786_v48, %v21710_v62 }
 0x705   : > { %11127 = vmatmul.mubr.msk.f32.gmra.mrb[24].mxu1 %vm624_vm1, %v15692_v15  ;;  %13433 = vmatprep.subr.bf16.mxu0 %v15789_v63  ;;  %22315 = vst [vmem:[#allocation11_spill] sm:$0xff] %v15846_v30  ;;  %v21718_v58 = vand.u32 4294901760, %v15846_v30  ;;  %v21715_v31 = vand.u32 4294901760, %v15851_v25  ;;  %v15888_v45 = vsub.f32 %v15817_v22, %v21712_v42  ;;  %v22321_v51 = vand.u32 4294901760, %v15809_v21 }
 0x706   : > { %13419 = vmatpush1.bf16.msra.mxu1 %v22314_v29  ;;  %2862 = vmatprep.mubr.f32.mxu1 %v21708_v12  ;;  %v15860_v29 = vsub.f32 %v15774_v53, %v21706_v50  ;;  %v3121_v50 = vsub.f32 %v15783_v26, %v21711_v40  ;;  %v3129_v42 = vand.u32 4294901760, %v3128_v18 }
 0x707   : > { %13453 = vmatprep.subr.bf16.mxu1 %v13452_v46  ;;  %v3234_v46 = vand.u32 4294901760, %v3233_v9  ;;  %v15883_v9 = vsub.f32 %v15814_v60, %v21714_v20  ;;  %22320 = vst [vmem:[#allocation16_spill] sm:$0xff] %v15888_v45  ;;  %v3254_v52 = vsub.f32 %v15809_v21, %v22321_v51  ;;  %v3142_v51 = vsub.f32 %v15851_v25, %v21715_v31 }
 0x708   : > { %22317 = vst [vmem:[#allocation13_spill] sm:$0xff] %v15860_v29  ;;  %13435 = vmatpush3.bf16.msra.mxu0 %v15826_v6  ;;  %v3122_v40 = vand.u32 4294901760, %v3121_v50  ;;  %v21716_v20 = vand.u32 4294901760, %v15888_v45 }
 0x709   : > { %11147 = vmatmul.mubr.msk.f32.vlgmr.msra.gmra.mrb[26].mxu1 %vm624_vm1, %v15653_v14  ;;  %22319 = vst [vmem:[#allocation15_spill] sm:$0xff] %v15883_v9  ;;  %v13464_v62 = vpack.c.bf16 %v3241_v56, %v3234_v46  ;;  %v3255_v24 = vand.u32 4294901760, %v3254_v52  ;;  %v3143_v46 = vand.u32 4294901760, %v3142_v51 }
 0x70a   : > { %2868 = vmatprep.mubr.f32.mxu1 %v21708_v12  ;;  %13455 = vmatpush3.bf16.msra.mxu1 %v15744_v49  ;;  %v3247_v49 = vsub.f32 %v15804_v2, %v21713_v55  ;;  %v13462_v12 = vpack.c.bf16 %v3115_v41, %v3108_v43  ;;  %v21717_v55 = vand.u32 4294901760, %v15883_v9  ;;  %v22322_v41 = vand.u32 4294901760, %v15860_v29 }
 0x70b   : > { %13457 = vmatprep.subr.bf16.mxu1 %v15753_v17  ;;  %v3135_v17 = vsub.f32 %v15846_v30, %v21718_v58  ;;  %v13466_v18 = vpack.c.bf16 %v3129_v42, %v3122_v40  ;;  %v22324_v2 = vand.u32 4294901760, %v15722_v19 }
 0x70c   : > { %v3248_v3 = vand.u32 4294901760, %v3247_v49  ;;  %v3261_v43 = vsub.f32 %v15860_v29, %v22322_v41  ;;  %v3149_v31 = vsub.f32 %v15883_v9, %v21717_v55 }
 0x70d   : > { %11148 = vmatmul.mubr.msk.f32.gmra.mrb[28].mxu1 %vm624_vm1, %v15692_v15  ;;  %v3136_v56 = vand.u32 4294901760, %v3135_v17 }
 0x70e   : > { %13459 = vmatpush3.bf16.msra.mxu1 %v13458_v47  ;;  %v22323_v47 = vand.u32 4294901760, %v15865_v34  ;;  %v13468_v49 = vpack.c.bf16 %v3255_v24, %v3248_v3  ;;  %v3262_v52 = vand.u32 4294901760, %v3261_v43  ;;  %v3150_v40 = vand.u32 4294901760, %v3149_v31  ;;  %v11161_v31 = vld [vmem:[%s15236_s15 + $0x260] sm:$0xff]  ;;  %v11162_v43 = vld [vmem:[%s15236_s15 + $0x268] sm:$0xff] }
 0x70f   : > { %13461 = vmatprep.subr.bf16.mxu1 %v13460_v5  ;;  %v3156_v5 = vsub.f32 %v15888_v45, %v21716_v20  ;;  %v11164_v20 = vld [vmem:[%s15236_s15 + $0x278] sm:$0xff] }
 0x710   : > { %v3268_v50 = vsub.f32 %v15865_v34, %v22323_v47  ;;  %v15922_v47 = vld [vmem:[%s15236_s15 + $0x2e0] sm:$0xff]  ;;  %v2994_v58 = vand.u32 4294901760, %v11164_v20 }
 0x711   : > { %v3157_v42 = vand.u32 4294901760, %v3156_v5  ;;  %v3033_v24 = vand.u32 4294901760, %v15922_v47 }
 0x712   : > { %13463 = vmatpush3.bf16.msra.mxu1 %v13462_v12  ;;  %v3269_v41 = vand.u32 4294901760, %v3268_v50  ;;  %v13470_v12 = vpack.c.bf16 %v3143_v46, %v3136_v56  ;;  %v2985_v50 = vand.u32 4294901760, %v11161_v31  ;;  %v15967_v29 = vsub.f32 %v11164_v20, %v2994_v58 }
 0x713   : > { %13465 = vmatprep.subr.bf16.mxu1 %v13464_v62  ;;  %v13474_v51 = vpack.c.bf16 %v3157_v42, %v3150_v40  ;;  %v15925_v62 = vld [vmem:[%s15236_s15 + $0x2e8] sm:$0xff]  ;;  %v15932_v56 = vsub.f32 %v15922_v47, %v3033_v24 }
 0x714   : > { %v13472_v17 = vpack.c.bf16 %v3269_v41, %v3262_v52  ;;  %v3036_v3 = vand.u32 4294901760, %v15925_v62  ;;  %v15937_v5 = vsub.f32 %v11161_v31, %v2985_v50  ;;  %v11179_v52 = vld [vmem:[%s15236_s15 + $0x2f0] sm:$0xff]  ;;  %v11180_v41 = vld [vmem:[%s15236_s15 + $0x2f8] sm:$0xff] }
 0x715   : > { %v3039_v42 = vand.u32 4294901760, %v11179_v52 }
 0x716   : > { %13467 = vmatpush3.bf16.msra.mxu1 %v13466_v18  ;;  %v2988_v18 = vand.u32 4294901760, %v11162_v43  ;;  %v15935_v46 = vsub.f32 %v15925_v62, %v3036_v3  ;;  %v21739_v47 = vand.u32 4294901760, %v15937_v5 }
 0x717   : > { %13469 = vmatprep.subr.bf16.mxu1 %v13468_v49  ;;  %v15955_v15 = vsub.f32 %v11179_v52, %v3039_v42 }
 0x718   : > { %v15939_v49 = vsub.f32 %v11162_v43, %v2988_v18  ;;  %v21734_v40 = vand.u32 4294901760, %v15935_v46  ;;  %v3163_v45 = vsub.f32 %v15937_v5, %v21739_v47  ;;  %v21743_v47 = vand.u32 4294901760, %v15967_v29 }
 0x71a   : > { %13471 = vmatpush3.bf16.msra.mxu1 %v13470_v12  ;;  %v21731_v12 = vand.u32 4294901760, %v15932_v56  ;;  %v21742_v55 = vand.u32 4294901760, %v15939_v49  ;;  %v3282_v43 = vsub.f32 %v15935_v46, %v21734_v40  ;;  %v21745_v40 = vand.u32 4294901760, %v15955_v15 }
 0x71b   : > { %13473 = vmatprep.subr.bf16.mxu1 %v13472_v17  ;;  %v3042_v17 = vand.u32 4294901760, %v11180_v41 }
 0x71c   : > { %v3275_v31 = vsub.f32 %v15932_v56, %v21731_v12  ;;  %v3170_v9 = vsub.f32 %v15939_v49, %v21742_v55  ;;  %v3283_v25 = vand.u32 4294901760, %v3282_v43  ;;  %v22325_v55 = vand.u32 4294901760, %v15725_v23 }
 0x71d   : > { %v15957_v14 = vsub.f32 %v11180_v41, %v3042_v17  ;;  %v3164_v41 = vand.u32 4294901760, %v3163_v45  ;;  %v22326_v43 = vand.u32 4294901760, %v15760_v4  ;;  %v22327_v45 = vand.u32 4294901760, %v15763_v61 }
 0x71e   : > { %13475 = vmatpush3.bf16.msra.mxu1 %v13474_v51  ;;  %v11163_v51 = vld [vmem:[%s15236_s15 + $0x270] sm:$0xff]  ;;  %v3276_v12 = vand.u32 4294901760, %v3275_v31  ;;  %v3171_v30 = vand.u32 4294901760, %v3170_v9  ;;  %v3289_v31 = vsub.f32 %v15955_v15, %v21745_v40  ;;  %v3184_v61 = vsub.f32 %v15967_v29, %v21743_v47 }
 0x71f   : > { %v2991_v62 = vand.u32 4294901760, %v11163_v51  ;;  %v21744_v52 = vand.u32 4294901760, %v15957_v14  ;;  %v15986_v9 = vpack.c.bf16 %v22327_v45, %v22326_v43  ;;  %v22334_v43 = vand.u32 4294901760, %v15817_v22 }
 0x720   : > { %v13476_v20 = vpack.c.bf16 %v3283_v25, %v3276_v12  ;;  %v13478_v21 = vpack.c.bf16 %v3171_v30, %v3164_v41  ;;  %v3290_v23 = vand.u32 4294901760, %v3289_v31  ;;  %v22330_v30 = vand.u32 4294901760, %v15774_v53 }
 0x721   : > { %v15965_v34 = vsub.f32 %v11163_v51, %v2991_v62  ;;  %v15977_v51 = vpack.c.bf16 %v22325_v55, %v22324_v2  ;;  %22328 = vst [vmem:[#allocation17_spill] sm:$0xff] %v15986_v9  ;;  %v3296_v19 = vsub.f32 %v15957_v14, %v21744_v52  ;;  %v22331_v55 = vand.u32 4294901760, %v15777_v16 }
 0x722   : > { %13477 = vmatprep.subr.bf16.mxu1 %v13476_v20  ;;  %v22333_v31 = vand.u32 4294901760, %v15814_v60  ;;  %v16013_v53 = vpack.c.bf16 %v3036_v3, %v3033_v24  ;;  %v16015_v16 = vpack.c.bf16 %v2988_v18, %v2985_v50  ;;  %v16020_v60 = vpack.c.bf16 %v3042_v17, %v3039_v42 }
 0x723   : > { %13437 = vmatprep.subr.bf16.mxu0 %v15977_v51  ;;  %v22329_v25 = vand.u32 4294901760, %v15965_v34  ;;  %13479 = vmatpush3.bf16.msra.mxu1 %v13478_v21  ;;  %v3297_v4 = vand.u32 4294901760, %v3296_v19  ;;  %v16003_v12 = vpack.c.bf16 %v22331_v55, %v22330_v30  ;;  %v3185_v21 = vand.u32 4294901760, %v3184_v61 }
 0x724   : > { %13439 = vmatpush3.bf16.msra.mxu0 %v15986_v9  ;;  %v16009_v45 = vpack.c.bf16 %v22334_v43, %v22333_v31  ;;  %22336 = vst [vmem:[#allocation20_spill] sm:$0xff] %v16013_v53  ;;  %22337 = vst [vmem:[#allocation21_spill] sm:$0xff] %v16015_v16  ;;  %v16022_v22 = vpack.c.bf16 %v2994_v58, %v2991_v62  ;;  %v13484_v24 = vpack.c.bf16 %v15471_v11, %v15469_v10  ;;  %v2429_v42 = vlaneseq }
 0x725   : > { %v3177_v2 = vsub.f32 %v15965_v34, %v22329_v25  ;;  %22332 = vst [vmem:[#allocation18_spill] sm:$0xff] %v16003_v12  ;;  %v13480_v20 = vpack.c.bf16 %v3297_v4, %v3290_v23  ;;  %13441 = vmatprep.subr.bf16.mxu0 %v16003_v12  ;;  %22338 = vst [vmem:[#allocation22_spill] sm:$0xff] %v16020_v60  ;;  %v11144_v23 = vld [vmem:[%s15230_s0 + $0x4] sm:$0xf] }
 0x726   : > { %22335 = vst [vmem:[#allocation19_spill] sm:$0xff] %v16009_v45  ;;  %22339 = vst [vmem:[#allocation23_spill] sm:$0xff] %v16022_v22  ;;  %v2430_v17 = vshrl.u32 %v2429_v42, 7 }
 0x727   : > { %v3178_v41 = vand.u32 4294901760, %v3177_v2  ;;  %13481 = vmatprep.subr.bf16.mxu1 %v13480_v20 }
 0x728   : > { %13443 = vmatpush3.bf16.msra.mxu0 %v16009_v45  ;;  %v16036_v62 = vsub.s32 0, %v2430_v17  ;;  %v16039_v25 = vsub.s32 1, %v2430_v17 }
 0x729   : > { %v13482_v19 = vpack.c.bf16 %v3185_v21, %v3178_v41  ;;  %13445 = vmatprep.subr.bf16.mxu0 %v16013_v53 }
 0x72a   : > { %22340 = vst [vmem:[#allocation24_spill] sm:$0xff] %v16036_v62  ;;  %22341 = vst [vmem:[#allocation25_spill] sm:$0xff] %v16039_v25  ;;  %v2704_v2 = vrot.slane %v11144_v23, %v16036_v62  ;;  %v2708_v4 = vrot.slane %v11144_v23, %v16039_v25 }
 0x72b   : > { %13483 = vmatpush3.bf16.msra.mxu1 %v13482_v19 }
 0x72c   : > { %13517 = vmatprep.subr.bf16.mxu1 %v15473_v13  ;;  %13447 = vmatpush3.bf16.msra.mxu0 %v16015_v16 }
 0x72d   : > { %13449 = vmatprep.subr.bf16.mxu0 %v16020_v60 }
 0x730   : > { %13451 = vmatpush3.bf16.msra.mxu0 %v16022_v22 }
 0x731   : > { %13485 = vmatprep.subr.bf16.mxu0 %v13484_v24 }
 0x7cc   : > { %v16043_v61 = vpop.f32.mrb[18].mxu1  ;;  %v2787_v30 = vpop.f32.mrb[18].mxu0 }
 0x7cd   : > { %22342 = vst [vmem:[#allocation26_spill] sm:$0xff] %v16043_v61  ;;  %v2788_v55 = vadd.f32 %v2787_v30, %v2704_v2  ;;  %v16045_v41 = vpop.f32.mrb[19].mxu1  ;;  %v2789_v20 = vpop.f32.mrb[19].mxu0 }
 0x7ce   : > { %22343 = vst [vmem:[#allocation27_spill] sm:$0xff] %v16045_v41  ;;  %v2790_v31 = vadd.f32 %v2789_v20, %v2708_v4 }
 0x7cf   : > { %v2875_v43 = vmax.f32 %v2788_v55, 0.0 }
 0x7d0   : > { %v2876_v21 = vmax.f32 %v2790_v31, 0.0  ;;  %v16047_v19 = vpop.f32.mrb[20].mxu1  ;;  %v2793_v24 = vpop.f32.mrb[20].mxu0 }
 0x7d1   : > { %22344 = vst [vmem:[#allocation28_spill] sm:$0xff] %v16047_v19  ;;  %v16049_v42 = vand.u32 4294901760, %v2875_v43  ;;  %v2794_v47 = vadd.f32 %v2793_v24, %v2704_v2  ;;  %v16051_v52 = vpop.f32.mrb[21].mxu1  ;;  %v2795_v40 = vpop.f32.mrb[21].mxu0 }
 0x7d2   : > { %22346 = vst [vmem:[#allocation30_spill] sm:$0xff] %v16051_v52  ;;  %v16053_v58 = vand.u32 4294901760, %v2876_v21  ;;  %v2796_v18 = vadd.f32 %v2795_v40, %v2708_v4 }
 0x7d3   : > { %22345 = vst [vmem:[#allocation29_spill] sm:$0xff] %v16049_v42  ;;  %v16056_v30 = vsub.f32 %v2875_v43, %v16049_v42  ;;  %v2879_v50 = vmax.f32 %v2794_v47, 0.0  ;;  %v16080_v43 = vsub.s32 3, %v2430_v17 }
 0x7d4   : > { %v2880_v3 = vmax.f32 %v2796_v18, 0.0  ;;  %v16058_v20 = vpop.f32.mrb[22].mxu1  ;;  %3300 = vmatprep.mubr.f32.mxu1 %v16053_v58  ;;  %v3045_v55 = vsub.f32 %v2876_v21, %v16053_v58  ;;  %v16074_v18 = vsub.s32 2, %v2430_v17 }
 0x7d5   : > { %22347 = vst [vmem:[#allocation31_spill] sm:$0xff] %v16058_v20  ;;  %v16062_v31 = vand.u32 4294901760, %v2879_v50  ;;  %v16064_v2 = vpop.f32.mrb[23].mxu1  ;;  %3302 = vmatmul.mubr.f32.vlgmr.msra.gmra.mrb[30].mxu1 %v16049_v42  ;;  %22352 = vst [vmem:[#allocation36_spill] sm:$0xff] %v16080_v43  ;;  %v16170_v42 = vld [vmem:[%s15236_s15 + $0x3f0] sm:$0xff] }
 0x7d6   : > { %22349 = vst [vmem:[#allocation33_spill] sm:$0xff] %v16064_v2  ;;  %v16068_v40 = vand.u32 4294901760, %v2880_v3  ;;  %13519 = vmatpush3.bf16.msra.mxu1 %v15665_v0  ;;  %22351 = vst [vmem:[#allocation35_spill] sm:$0xff] %v16074_v18  ;;  %v3046_v20 = vand.u32 4294901760, %v3045_v55  ;;  %v22355_v2 = vand.u32 4294901760, %v16056_v30 }
 0x7d7   : > { %22348 = vst [vmem:[#allocation32_spill] sm:$0xff] %v16062_v31  ;;  %v16072_v47 = vsub.f32 %v2879_v50, %v16062_v31  ;;  %13521 = vmatprep.subr.bf16.mxu1 %v15705_v32  ;;  %v2712_v50 = vrot.slane %v11144_v23, %v16074_v18  ;;  %22372 = vst [vmem:[#allocation49_spill] sm:$0xff] %v16170_v42 }
 0x7d8   : > { %22350 = vst [vmem:[#allocation34_spill] sm:$0xff] %v16068_v40  ;;  %v16078_v4 = vsub.f32 %v2880_v3, %v16068_v40  ;;  %v16082_v21 = vpop.f32.mrb[24].mxu1  ;;  %3307 = vmatprep.mubr.f32.mxu1 %v16068_v40  ;;  %v3053_v19 = vsub.f32 %v16056_v30, %v22355_v2  ;;  %v2716_v3 = vrot.slane %v11144_v23, %v16080_v43 }
 0x7d9   : > { %22353 = vst [vmem:[#allocation37_spill] sm:$0xff] %v16082_v21  ;;  %v16085_v24 = vpop.f32.mrb[25].mxu1  ;;  %3309 = vmatmul.mubr.f32.gmra.mrb[32].mxu1 %v16062_v31  ;;  %v3047_v21 = vsub.f32 %v3045_v55, %v3046_v20  ;;  %v13486_v23 = vpack.c.bf16 %v15518_v37, %v15504_v33  ;;  %v13488_v43 = vpack.c.bf16 %v15539_v44, %v15523_v38  ;;  %v22358_v25 = vand.u32 4294901760, %v16072_v47 }
 0x7da   : > { %22354 = vst [vmem:[#allocation38_spill] sm:$0xff] %v16085_v24  ;;  %13523 = vmatpush3.bf16.msra.mxu1 %v15719_v36  ;;  %v21754_v17 = vand.u32 4294901760, %v16078_v4  ;;  %3560 = vmatprep.mubr.f32.mxu1 %v3046_v20  ;;  %v3054_v20 = vand.u32 4294901760, %v3053_v19  ;;  %v13490_v19 = vpack.c.bf16 %v15598_v1, %v15579_v59 }
 0x7db   : > { %13525 = vmatprep.subr.bf16.mxu1 %v15738_v7  ;;  %v3048_v2 = vand.u32 4294901760, %v3047_v21 }
 0x7dc   : > { %v2864_v52 = vpop.f32.mrb[26].mxu1  ;;  %v3062_v18 = vsub.f32 %v16078_v4, %v21754_v17  ;;  %v3068_v17 = vsub.f32 %v16072_v47, %v22358_v25  ;;  %v13492_v25 = vpack.c.bf16 %v15659_v54, %v15648_v57 }
 0x7dd   : > { %v16100_v61 = vadd.f32 %v2864_v52, %v2712_v50  ;;  %v2866_v62 = vpop.f32.mrb[27].mxu1  ;;  %3049 = vmatprep.mubr.f32.mxu0 %v3048_v2 }
 0x7de   : > { %v16106_v41 = vadd.f32 %v2866_v62, %v2716_v3  ;;  %13527 = vmatpush3.bf16.msra.mxu1 %v15771_v39  ;;  %v3063_v24 = vand.u32 4294901760, %v3062_v18  ;;  %3055 = vmatmul.mubr.f32.vlgmr.msra.gmra.mrb[22].mxu0 %v3054_v20  ;;  %v16146_v20 = vld [vmem:[%s15236_s15 + $0x360] sm:$0xff] }
 0x7df   : > { %22356 = vst [vmem:[#allocation39_spill] sm:$0xff] %v16100_v61  ;;  %13529 = vmatprep.subr.bf16.mxu1 %v15789_v63  ;;  %13487 = vmatpush3.bf16.msra.mxu0 %v13486_v23  ;;  %v3069_v61 = vand.u32 4294901760, %v3068_v17  ;;  %v16138_v23 = vld [vmem:[%s15236_s15 + $0x3e0] sm:$0xff]  ;;  %22365 = vst [vmem:[#allocation47_spill] sm:$0xff] %v16146_v20 }
 0x7e0   : > { %22357 = vst [vmem:[#allocation40_spill] sm:$0xff] %v16106_v41  ;;  %v2870_v52 = vpop.f32.mrb[28].mxu1  ;;  %3064 = vmatprep.mubr.f32.mxu0 %v3063_v24  ;;  %13489 = vmatprep.subr.bf16.mxu0 %v13488_v43  ;;  %v16127_v24 = vld [vmem:[%s15236_s15 + $0x358] sm:$0xff]  ;;  %v13494_v43 = vpack.c.bf16 %v15710_v8, %v15699_v28  ;;  %22363 = vst [vmem:[#allocation45_spill] sm:$0xff] %v16138_v23 }
 0x7e1   : > { %v16113_v21 = vadd.f32 %v2870_v52, %v2712_v50  ;;  %v2872_v62 = vpop.f32.mrb[29].mxu1  ;;  %v16124_v50 = vld [vmem:[%s15236_s15 + $0x350] sm:$0xff]  ;;  %22362 = vst [vmem:[#allocation44_spill] sm:$0xff] %v16127_v24  ;;  %v16149_v52 = vld [vmem:[%s15236_s15 + $0x368] sm:$0xff]  ;;  %v16173_v41 = vld [vmem:[%s15236_s15 + $0x3f8] sm:$0xff] }
 0x7e2   : > { %v16117_v18 = vadd.f32 %v2872_v62, %v2716_v3  ;;  %13531 = vmatpush3.bf16.msra.mxu1 %v15826_v6  ;;  %22361 = vst [vmem:[#allocation43_spill] sm:$0xff] %v16124_v50  ;;  %3070 = vmatmul.mubr.f32.gmra.mrb[24].mxu0 %v3069_v61  ;;  %v13496_v3 = vpack.c.bf16 %v15732_v27, %v15713_v35  ;;  %v21761_v17 = vand.u32 4294901760, %v16124_v50  ;;  %v16141_v61 = vld [vmem:[%s15236_s15 + $0x3e8] sm:$0xff]  ;;  %22366 = vst [vmem:[#allocation48_spill] sm:$0xff] %v16149_v52 }
 0x7e3   : > { %22359 = vst [vmem:[#allocation41_spill] sm:$0xff] %v16113_v21  ;;  %13533 = vmatprep.subr.bf16.mxu1 %v15977_v51  ;;  %13491 = vmatpush3.bf16.msra.mxu0 %v13490_v19  ;;  %22364 = vst [vmem:[#allocation46_spill] sm:$0xff] %v16141_v61  ;;  %v22367_v62 = vld [vmem:[#allocation9_spill] sm:$0xff]  ;;  %v22368_v19 = vld [vmem:[#allocation10_spill] sm:$0xff] }
 0x7e4   : > { %22360 = vst [vmem:[#allocation42_spill] sm:$0xff] %v16117_v18  ;;  %3444 = vmatprep.mubr.f32.mxu0 %v3045_v55  ;;  %13493 = vmatprep.subr.bf16.mxu0 %v13492_v25  ;;  %v13498_v55 = vpack.c.bf16 %v15786_v48, %v15783_v26  ;;  %v13500_v25 = vpack.c.bf16 %v22368_v19, %v22367_v62  ;;  %22373 = vst [vmem:[#allocation50_spill] sm:$0xff] %v16173_v41  ;;  %v22379_v18 = vld [vmem:[#allocation14_spill] sm:$0xff] }
 0x7e5   : > { %v16157_v2 = vsub.f32 %v16124_v50, %v21761_v17  ;;  %v22374_v17 = vld [vmem:[#allocation11_spill] sm:$0xff]  ;;  %v22375_v50 = vld [vmem:[#allocation12_spill] sm:$0xff] }
 0x7e6   : > { %13535 = vmatpush3.bf16.msra.mxu1 %v15986_v9  ;;  %v22385_v9 = vld [vmem:[#allocation15_spill] sm:$0xff] }
 0x7e7   : > { %13537 = vmatprep.subr.bf16.mxu1 %v16003_v12  ;;  %13495 = vmatpush3.bf16.msra.mxu0 %v13494_v43  ;;  %22369 = vst [vmem:[#allocation9_spill] sm:$0xff] %v16157_v2  ;;  %v22370_v43 = vand.u32 4294901760, %v16127_v24 }
 0x7e8   : > { %13497 = vmatprep.subr.bf16.mxu0 %v13496_v3  ;;  %v22378_v3 = vld [vmem:[#allocation13_spill] sm:$0xff] }
 0x7e9   : > { %v16162_v21 = vsub.f32 %v16127_v24, %v22370_v43  ;;  %v16178_v43 = vld [vmem:[%s15236_s15 + $0x370] sm:$0xff]  ;;  %v16181_v24 = vld [vmem:[%s15236_s15 + $0x378] sm:$0xff]  ;;  %v13504_v31 = vpack.c.bf16 %v22379_v18, %v22378_v3  ;;  %v22384_v18 = vand.u32 4294901760, %v16149_v52 }
 0x7ea   : > { %13539 = vmatpush3.bf16.msra.mxu1 %v16009_v45  ;;  %v13502_v45 = vpack.c.bf16 %v22375_v50, %v22374_v17  ;;  %22376 = vst [vmem:[#allocation11_spill] sm:$0xff] %v16178_v43  ;;  %22377 = vst [vmem:[#allocation12_spill] sm:$0xff] %v16181_v24 }
 0x7eb   : > { %22371 = vst [vmem:[#allocation10_spill] sm:$0xff] %v16162_v21  ;;  %13541 = vmatprep.subr.bf16.mxu1 %v16013_v53  ;;  %13499 = vmatpush3.bf16.msra.mxu0 %v13498_v55  ;;  %v22380_v55 = vand.u32 4294901760, %v16138_v23  ;;  %v22383_v53 = vand.u32 4294901760, %v16146_v20 }
 0x7ec   : > { %13501 = vmatprep.subr.bf16.mxu0 %v13500_v25  ;;  %v22381_v25 = vand.u32 4294901760, %v16141_v61 }
 0x7ed   : > { %v16192_v12 = vsub.f32 %v16138_v23, %v22380_v55  ;;  %v16209_v55 = vsub.f32 %v16149_v52, %v22384_v18  ;;  %v22388_v18 = vand.u32 4294901760, %v16162_v21  ;;  %v16227_v23 = vld [vmem:[%s15236_s15 + $0x388] sm:$0xff] }
 0x7ee   : > { %13543 = vmatpush3.bf16.msra.mxu1 %v16015_v16  ;;  %v16197_v16 = vsub.f32 %v16141_v61, %v22381_v25  ;;  %v22386_v61 = vld [vmem:[#allocation16_spill] sm:$0xff] }
 0x7ef   : > { %13545 = vmatprep.subr.bf16.mxu1 %v16020_v60  ;;  %v16204_v60 = vsub.f32 %v16146_v20, %v22383_v53  ;;  %13503 = vmatpush3.bf16.msra.mxu0 %v13502_v45  ;;  %v13506_v40 = vpack.c.bf16 %v22386_v61, %v22385_v9  ;;  %v16217_v53 = vld [vmem:[%s15236_s15 + $0x380] sm:$0xff]  ;;  %v22387_v20 = vand.u32 4294901760, %v16157_v2  ;;  %v16233_v45 = vld [vmem:[%s15236_s15 + $0x308] sm:$0xff]  ;;  %v22390_v61 = vand.u32 4294901760, %v16170_v42 }
 0x7f0   : > { %22382 = vst [vmem:[#allocation51_spill] sm:$0xff] %v16197_v16  ;;  %13505 = vmatprep.subr.bf16.mxu0 %v13504_v31  ;;  %v16230_v25 = vld [vmem:[%s15236_s15 + $0x300] sm:$0xff]  ;;  %v22397_v21 = vand.u32 4294901760, %v16192_v12  ;;  %v22398_v31 = vand.u32 4294901760, %v16197_v16 }
 0x7f1   : > { %v16223_v52 = vpack.c.bf16 %v22388_v18, %v22387_v20  ;;  %v16240_v2 = vsub.f32 %v16170_v42, %v22390_v61  ;;  %v22391_v20 = vand.u32 4294901760, %v16173_v41  ;;  %v22394_v61 = vand.u32 4294901760, %v16181_v24 }
 0x7f2   : > { %13547 = vmatpush3.bf16.msra.mxu1 %v16022_v22  ;;  %v22392_v22 = vand.u32 4294901760, %v16178_v43  ;;  %v16272_v3 = vpack.c.bf16 %v22398_v31, %v22397_v21  ;;  %v22408_v31 = vand.u32 4294901760, %v15471_v11 }
 0x7f3   : > { %22389 = vst [vmem:[#allocation52_spill] sm:$0xff] %v16223_v52  ;;  %13581 = vmatprep.subr.bf16.mxu1 %v15473_v13  ;;  %v16245_v18 = vsub.f32 %v16173_v41, %v22391_v20  ;;  %v16248_v13 = vld [vmem:[%s15236_s15 + $0x390] sm:$0xff]  ;;  %v16251_v52 = vld [vmem:[%s15236_s15 + $0x398] sm:$0xff]  ;;  %v16263_v42 = vsub.f32 %v16181_v24, %v22394_v61  ;;  %13507 = vmatpush3.bf16.msra.mxu0 %v13506_v40  ;;  %v22396_v20 = vand.u32 4294901760, %v16056_v30  ;;  %v22401_v61 = vand.u32 4294901760, %v16078_v4 }
 0x7f4   : > { %v16258_v9 = vsub.f32 %v16178_v43, %v22392_v22  ;;  %22399 = vst [vmem:[#allocation55_spill] sm:$0xff] %v16272_v3  ;;  %v22400_v22 = vpack.c.bf16 %v15935_v46, %v15932_v56  ;;  %v22402_v41 = vand.u32 4294901760, %v16204_v60  ;;  %v22403_v43 = vand.u32 4294901760, %v16209_v55  ;;  %v16295_v24 = vld [vmem:[%s15236_s15 + $0x310] sm:$0xff] }
 0x7f5   : > { %22395 = vst [vmem:[#allocation54_spill] sm:$0xff] %v16263_v42  ;;  %3564 = vmatmul.mubr.f32.vlgmr.msra.gmra.mrb[34].mxu1 %v22396_v20  ;;  %v22411_v40 = vand.u32 4294901760, %v16245_v18  ;;  %v22431_v3 = vand.u32 4294901760, %v15539_v44 }
 0x7f6   : > { %22393 = vst [vmem:[#allocation53_spill] sm:$0xff] %v16258_v9  ;;  %13509 = vmatprep.subr.bf16.mxu0 %v22400_v22  ;;  %3571 = vmatprep.mubr.f32.mxu1 %v22401_v61  ;;  %v16286_v16 = vpack.c.bf16 %v22403_v43, %v22402_v41  ;;  %v21785_v22 = vand.u32 4294901760, %v16240_v2  ;;  %v22405_v41 = vpack.c.bf16 %v15939_v49, %v15937_v5  ;;  %v22407_v43 = vand.u32 4294901760, %v15469_v10 }
 0x7f7   : > { %13583 = vmatpush3.bf16.msra.mxu1 %v15665_v0  ;;  %v22406_v0 = vand.u32 4294901760, %v16072_v47  ;;  %v22414_v10 = vand.u32 4294901760, %v16227_v23 }
 0x7f8   : > { %22404 = vst [vmem:[#allocation56_spill] sm:$0xff] %v16286_v16  ;;  %13585 = vmatprep.subr.bf16.mxu1 %v15705_v32  ;;  %13511 = vmatpush3.bf16.msra.mxu0 %v22405_v41  ;;  %v13548_v21 = vpack.c.bf16 %v22408_v31, %v22407_v43  ;;  %v22409_v32 = vand.u32 4294901760, %v16217_v53  ;;  %v16317_v20 = vpack.c.bf16 %v22411_v40, %v21785_v22  ;;  %v22416_v31 = vand.u32 4294901760, %v16230_v25 }
 0x7f9   : > { %3575 = vmatmul.mubr.f32.gmra.mrb[36].mxu1 %v22406_v0  ;;  %v22413_v41 = vpack.c.bf16 %v15957_v14, %v15955_v15  ;;  %v16326_v11 = vsub.f32 %v16227_v23, %v22414_v10  ;;  %v22418_v40 = vand.u32 4294901760, %v16258_v9  ;;  %v22419_v43 = vand.u32 4294901760, %v16263_v42  ;;  %v16372_v9 = vld [vmem:[%s15236_s15 + $0x318] sm:$0xff] }
 0x7fa   : > { %v16311_v61 = vsub.f32 %v16217_v53, %v22409_v32  ;;  %22412 = vst [vmem:[#allocation58_spill] sm:$0xff] %v16317_v20  ;;  %3852 = vmatprep.mubr.f32.mxu1 %v16053_v58  ;;  %v16331_v0 = vsub.f32 %v16230_v25, %v22416_v31  ;;  %v22423_v22 = vand.u32 4294901760, %v16248_v13  ;;  %v22425_v20 = vand.u32 4294901760, %v16251_v52 }
 0x7fb   : > { %13513 = vmatprep.subr.bf16.mxu0 %v22413_v41  ;;  %22415 = vst [vmem:[#allocation59_spill] sm:$0xff] %v16326_v11  ;;  %v16337_v32 = vpack.c.bf16 %v22419_v43, %v22418_v40  ;;  %13587 = vmatpush3.bf16.msra.mxu1 %v15719_v36  ;;  %v22421_v41 = vand.u32 4294901760, %v16233_v45  ;;  %v22427_v36 = vpack.c.bf16 %v15967_v29, %v15965_v34  ;;  %v22428_v43 = vand.u32 4294901760, %v15504_v33  ;;  %v16378_v33 = vld [vmem:[%s15236_s15 + $0x3a8] sm:$0xff] }
 0x7fc   : > { %22410 = vst [vmem:[#allocation57_spill] sm:$0xff] %v16311_v61  ;;  %22417 = vst [vmem:[#allocation60_spill] sm:$0xff] %v16331_v0  ;;  %v16348_v31 = vsub.f32 %v16248_v13, %v22423_v22  ;;  %v16353_v16 = vsub.f32 %v16251_v52, %v22425_v20  ;;  %13589 = vmatprep.subr.bf16.mxu1 %v15738_v7  ;;  %v22430_v22 = vand.u32 4294901760, %v15523_v38  ;;  %v21791_v42 = vand.u32 4294901760, %v16311_v61 }
 0x7fd   : > { %22420 = vst [vmem:[#allocation61_spill] sm:$0xff] %v16337_v32  ;;  %v16343_v10 = vsub.f32 %v16233_v45, %v22421_v41  ;;  %13515 = vmatpush3.bf16.msra.mxu0 %v22427_v36  ;;  %v22429_v41 = vand.u32 4294901760, %v15518_v37  ;;  %v21790_v40 = vand.u32 4294901760, %v16326_v11  ;;  %v16375_v36 = vld [vmem:[%s15236_s15 + $0x3a0] sm:$0xff]  ;;  %v22437_v38 = vand.u32 4294901760, %v15659_v54 }
 0x7fe   : > { %22424 = vst [vmem:[#allocation63_spill] sm:$0xff] %v16348_v31  ;;  %22426 = vst [vmem:[#allocation64_spill] sm:$0xff] %v16353_v16  ;;  %13549 = vmatprep.subr.bf16.mxu0 %v13548_v21  ;;  %v13552_v20 = vpack.c.bf16 %v22431_v3, %v22430_v22  ;;  %v22432_v3 = vand.u32 4294901760, %v16295_v24  ;;  %v22436_v22 = vand.u32 4294901760, %v15648_v57  ;;  %v22438_v37 = vand.u32 4294901760, %v15699_v28 }
 0x7ff   : > { %22422 = vst [vmem:[#allocation62_spill] sm:$0xff] %v16343_v10  ;;  %v13550_v32 = vpack.c.bf16 %v22429_v41, %v22428_v43  ;;  %13591 = vmatpush3.bf16.msra.mxu1 %v15771_v39  ;;  %v22434_v43 = vand.u32 4294901760, %v15579_v59  ;;  %v22435_v39 = vand.u32 4294901760, %v15598_v1  ;;  %v22441_v59 = vand.u32 4294901760, %v15732_v27 }
 0x800   : > { %v16387_v21 = vsub.f32 %v16295_v24, %v22432_v3  ;;  %3447 = vmatmul.mubr.f32.vlgmr.msra.gmra.mrb[26].mxu0 %v16056_v30  ;;  %13593 = vmatprep.subr.bf16.mxu1 %v15789_v63  ;;  %v13556_v44 = vpack.c.bf16 %v22437_v38, %v22436_v22  ;;  %v22439_v3 = vand.u32 4294901760, %v15710_v8  ;;  %v22440_v63 = vand.u32 4294901760, %v15713_v35  ;;  %v16427_v38 = vld [vmem:[%s15236_s15 + $0x320] sm:$0xff] }
 0x801   : > { %v13554_v41 = vpack.c.bf16 %v22435_v39, %v22434_v43  ;;  %3453 = vmatprep.mubr.f32.mxu0 %v16078_v4  ;;  %13551 = vmatpush3.bf16.msra.mxu0 %v13550_v32  ;;  %v21794_v30 = vand.u32 4294901760, %v16372_v9  ;;  %v21793_v57 = vand.u32 4294901760, %v16375_v36  ;;  %v21792_v54 = vand.u32 4294901760, %v16378_v33 }
 0x802   : > { %22433 = vst [vmem:[#allocation65_spill] sm:$0xff] %v16387_v21  ;;  %v13558_v7 = vpack.c.bf16 %v22439_v3, %v22438_v37  ;;  %v13560_v1 = vpack.c.bf16 %v22441_v59, %v22440_v63  ;;  %13553 = vmatprep.subr.bf16.mxu0 %v13552_v20  ;;  %v22442_v28 = vand.u32 4294901760, %v15783_v26  ;;  %v22443_v8 = vand.u32 4294901760, %v15786_v48  ;;  %v16441_v63 = vld [vmem:[%s15236_s15 + $0x328] sm:$0xff] }
 0x803   : > { %v4109_v35 = vsub.f32 %v16311_v61, %v21791_v42  ;;  %v4116_v27 = vsub.f32 %v16326_v11, %v21790_v40  ;;  %v22444_v4 = vand.u32 4294901760, %v16331_v0  ;;  %13595 = vmatpush3.bf16.msra.mxu1 %v15826_v6  ;;  %v22445_v26 = vand.u32 4294901760, %v16343_v10  ;;  %v22454_v40 = vld [vmem:[#allocation14_spill] sm:$0xff] }
 0x804   : > { %v16415_v37 = vpack.c.bf16 %v22443_v8, %v22442_v28  ;;  %v22446_v20 = vand.u32 4294901760, %v16348_v31  ;;  %v22447_v39 = vand.u32 4294901760, %v16353_v16  ;;  %3456 = vmatmul.mubr.f32.gmra.mrb[28].mxu0 %v16072_v47  ;;  %13597 = vmatprep.subr.bf16.mxu1 %v15977_v51  ;;  %v22448_v6 = vand.u32 4294901760, %v22367_v62 }
 0x805   : > { %v3997_v32 = vsub.f32 %v16331_v0, %v22444_v4  ;;  %v4004_v48 = vsub.f32 %v16343_v10, %v22445_v26  ;;  %v22449_v59 = vand.u32 4294901760, %v22368_v19  ;;  %v22450_v8 = vand.u32 4294901760, %v22374_v17  ;;  %13555 = vmatpush3.bf16.msra.mxu0 %v13554_v41  ;;  %3741 = vmatprep.mubr.f32.mxu0 %v16053_v58  ;;  %v16479_v17 = vld [vmem:[%s15236_s15 + $0x3b0] sm:$0xff]  ;;  %v16482_v58 = vld [vmem:[%s15236_s15 + $0x3b8] sm:$0xff] }
 0x806   : > { %v4123_v43 = vsub.f32 %v16348_v31, %v22446_v20  ;;  %v4130_v22 = vsub.f32 %v16353_v16, %v22447_v39  ;;  %v22451_v4 = vand.u32 4294901760, %v22375_v50  ;;  %v22452_v20 = vld [vmem:[#allocation13_spill] sm:$0xff]  ;;  %v22455_v42 = vand.u32 4294901760, %v22454_v40  ;;  %13557 = vmatprep.subr.bf16.mxu0 %v13556_v44  ;;  %v22461_v44 = vld [vmem:[#allocation18_spill] sm:$0xff]  ;;  %v16510_v41 = vld [vmem:[%s15236_s15 + $0x338] sm:$0xff] }
 0x807   : > { %v13564_v28 = vpack.c.bf16 %v22449_v59, %v22448_v6  ;;  %v22453_v39 = vand.u32 4294901760, %v22452_v20  ;;  %v16465_v51 = vsub.f32 %v16372_v9, %v21794_v30  ;;  %v16470_v47 = vsub.f32 %v16375_v36, %v21793_v57  ;;  %v22459_v6 = vld [vmem:[#allocation17_spill] sm:$0xff]  ;;  %v22483_v16 = vld [vmem:[#allocation40_spill] sm:$0xff] }
 0x808   : > { %v16453_v26 = vpack.c.bf16 %v22451_v4, %v22450_v8  ;;  %v16475_v50 = vsub.f32 %v16378_v33, %v21792_v54  ;;  %v4110_v62 = vand.u32 4294901760, %v4109_v35  ;;  %v4117_v19 = vand.u32 4294901760, %v4116_v27  ;;  %13599 = vmatpush3.bf16.msra.mxu1 %v22459_v6  ;;  %v16492_v54 = vld [vmem:[%s15236_s15 + $0x330] sm:$0xff] }
 0x809   : > { %v16459_v3 = vpack.c.bf16 %v22455_v42, %v22453_v39  ;;  %22456 = vst [vmem:[#allocation13_spill] sm:$0xff] %v16465_v51  ;;  %22457 = vst [vmem:[#allocation14_spill] sm:$0xff] %v16470_v47  ;;  %v21795_v42 = vand.u32 4294901760, %v16427_v38  ;;  %v3998_v40 = vand.u32 4294901760, %v3997_v32  ;;  %v4005_v59 = vand.u32 4294901760, %v4004_v48  ;;  %13601 = vmatprep.subr.bf16.mxu1 %v22461_v44  ;;  %v22462_v35 = vld [vmem:[#allocation15_spill] sm:$0xff]  ;;  %13559 = vmatpush3.bf16.msra.mxu0 %v13558_v7 }
 0x80a   : > { %22458 = vst [vmem:[#allocation66_spill] sm:$0xff] %v16475_v50  ;;  %v4124_v8 = vand.u32 4294901760, %v4123_v43  ;;  %v4131_v4 = vand.u32 4294901760, %v4130_v22  ;;  %v22460_v20 = vand.u32 4294901760, %v16387_v21  ;;  %v22463_v27 = vand.u32 4294901760, %v22462_v35  ;;  %v22464_v32 = vld [vmem:[#allocation16_spill] sm:$0xff]  ;;  %13561 = vmatprep.subr.bf16.mxu0 %v13560_v1 }
 0x80b   : > { %v22465_v57 = vand.u32 4294901760, %v22464_v32  ;;  %v22466_v48 = vand.u32 4294901760, %v15932_v56  ;;  %v22467_v43 = vand.u32 4294901760, %v15935_v46  ;;  %v21796_v6 = vand.u32 4294901760, %v16479_v17  ;;  %v16521_v46 = vld [vmem:[%s15236_s15 + $0x3c0] sm:$0xff]  ;;  %v22473_v44 = vld [vmem:[#allocation19_spill] sm:$0xff] }
 0x80c   : > { %v16489_v39 = vsub.f32 %v16387_v21, %v22460_v20  ;;  %v16518_v56 = vsub.f32 %v16427_v38, %v21795_v42  ;;  %v13644_v32 = vpack.c.bf16 %v4117_v19, %v4110_v62  ;;  %v22469_v7 = vand.u32 4294901760, %v15937_v5  ;;  %13603 = vmatpush3.bf16.msra.mxu1 %v22473_v44  ;;  %v16546_v62 = vld [vmem:[%s15236_s15 + $0x340] sm:$0xff]  ;;  %v16549_v19 = vld [vmem:[%s15236_s15 + $0x348] sm:$0xff]  ;;  %v16568_v44 = vld [vmem:[%s15236_s15 + $0x3d8] sm:$0xff] }
 0x80d   : > { %v16499_v30 = vpack.c.bf16 %v22465_v57, %v22463_v27  ;;  %v16505_v22 = vpack.c.bf16 %v22467_v43, %v22466_v48  ;;  %v16524_v27 = vld [vmem:[%s15236_s15 + $0x3c8] sm:$0xff]  ;;  %v22470_v48 = vand.u32 4294901760, %v15939_v49  ;;  %v22471_v57 = vand.u32 4294901760, %v16441_v63  ;;  %22478 = vst [vmem:[#allocation19_spill] sm:$0xff] %v16568_v44  ;;  %13563 = vmatpush3.bf16.msra.mxu0 %v16415_v37 }
 0x80e   : > { %22468 = vst [vmem:[#allocation17_spill] sm:$0xff] %v16518_v56  ;;  %v16539_v20 = vpack.c.bf16 %v4005_v59, %v3998_v40  ;;  %v16541_v1 = vpack.c.bf16 %v4131_v4, %v4124_v8  ;;  %v4012_v5 = vand.u32 4294901760, %v16489_v39  ;;  %v22476_v40 = vand.u32 4294901760, %v16482_v58  ;;  %v16565_v39 = vld [vmem:[%s15236_s15 + $0x3d0] sm:$0xff]  ;;  %13565 = vmatprep.subr.bf16.mxu0 %v13564_v28 }
 0x80f   : > { %v16530_v43 = vpack.c.bf16 %v22470_v48, %v22469_v7  ;;  %v16535_v35 = vsub.f32 %v16441_v63, %v22471_v57  ;;  %v22474_v7 = vld [vmem:[#allocation20_spill] sm:$0xff]  ;;  %v16555_v57 = vsub.f32 %v16479_v17, %v21796_v6  ;;  %22477 = vst [vmem:[#allocation16_spill] sm:$0xff] %v16565_v39  ;;  %v22479_v48 = vand.u32 4294901760, %v16465_v51 }
 0x810   : > { %13605 = vmatprep.subr.bf16.mxu1 %v22474_v7  ;;  %v16560_v59 = vsub.f32 %v16482_v58, %v22476_v40  ;;  %v22480_v6 = vand.u32 4294901760, %v16470_v47  ;;  %v22481_v40 = vand.u32 4294901760, %v16475_v50  ;;  %v22482_v21 = vand.u32 4294901760, %v16492_v54 }
 0x811   : > { %22472 = vst [vmem:[#allocation18_spill] sm:$0xff] %v16535_v35  ;;  %22475 = vst [vmem:[#allocation15_spill] sm:$0xff] %v16555_v57  ;;  %v4018_v7 = vsub.f32 %v16465_v51, %v22479_v48  ;;  %v22487_v51 = vand.u32 4294901760, %v16521_v46  ;;  %13567 = vmatpush3.bf16.msra.mxu0 %v16453_v26  ;;  %v22490_v48 = vand.u32 4294901760, %v16535_v35  ;;  %v22492_v26 = vand.u32 4294901760, %v16549_v19 }
 0x812   : > { %v4137_v49 = vsub.f32 %v16470_v47, %v22480_v6  ;;  %v4144_v8 = vsub.f32 %v16475_v50, %v22481_v40  ;;  %v16585_v37 = vsub.f32 %v16492_v54, %v22482_v21  ;;  %v2878_v6 = vmax.f32 %v22483_v16, 0.0  ;;  %v22484_v47 = vld [vmem:[#allocation21_spill] sm:$0xff]  ;;  %v22486_v50 = vld [vmem:[#allocation22_spill] sm:$0xff]  ;;  %13569 = vmatprep.subr.bf16.mxu0 %v16459_v3 }
 0x813   : > { %13607 = vmatpush3.bf16.msra.mxu1 %v22484_v47  ;;  %v22485_v40 = vand.u32 4294901760, %v16510_v41  ;;  %v16604_v16 = vsub.f32 %v16521_v46, %v22487_v51  ;;  %v22488_v47 = vand.u32 4294901760, %v16524_v27  ;;  %v4019_v28 = vand.u32 4294901760, %v4018_v7  ;;  %v22493_v7 = vld [vmem:[#allocation23_spill] sm:$0xff] }
 0x814   : > { %13609 = vmatprep.subr.bf16.mxu1 %v22486_v50  ;;  %v4138_v42 = vand.u32 4294901760, %v4137_v49  ;;  %v4145_v31 = vand.u32 4294901760, %v4144_v8  ;;  %v22489_v50 = vand.u32 4294901760, %v16518_v56  ;;  %v4032_v51 = vsub.f32 %v16535_v35, %v22490_v48 }
 0x815   : > { %v16594_v4 = vsub.f32 %v16510_v41, %v22485_v40  ;;  %v16609_v40 = vsub.f32 %v16524_v27, %v22488_v47  ;;  %v22491_v47 = vand.u32 4294901760, %v16546_v62  ;;  %v16628_v49 = vsub.f32 %v16549_v19, %v22492_v26  ;;  %13571 = vmatpush3.bf16.msra.mxu0 %v16499_v30 }
 0x816   : > { %v4025_v21 = vsub.f32 %v16518_v56, %v22489_v50  ;;  %v16630_v8 = vand.u32 4294901760, %v2878_v6  ;;  %v22494_v48 = vand.u32 4294901760, %v16565_v39  ;;  %v22495_v10 = vand.u32 4294901760, %v16568_v44  ;;  %13573 = vmatprep.subr.bf16.mxu0 %v16505_v22 }
 0x817   : > { %v16623_v0 = vsub.f32 %v16546_v62, %v22491_v47  ;;  %13611 = vmatpush3.bf16.msra.mxu1 %v22493_v7  ;;  %v22497_v26 = vand.u32 4294901760, %v16555_v57  ;;  %v22498_v56 = vand.u32 4294901760, %v16560_v59  ;;  %v21825_v30 = vand.u32 4294901760, %v16628_v49 }
 0x818   : > { %v16637_v50 = vsub.f32 %v16565_v39, %v22494_v48  ;;  %v16642_v47 = vsub.f32 %v16568_v44, %v22495_v10  ;;  %13645 = vmatprep.subr.bf16.mxu1 %v13644_v32  ;;  %v22499_v48 = vand.u32 4294901760, %v15955_v15  ;;  %v22500_v10 = vand.u32 4294901760, %v15957_v14  ;;  %v22503_v14 = vld [vmem:[#allocation34_spill] sm:$0xff] }
 0x819   : > { %v4151_v35 = vsub.f32 %v16555_v57, %v22497_v26  ;;  %v4158_v7 = vsub.f32 %v16560_v59, %v22498_v56  ;;  %v13650_v32 = vpack.c.bf16 %v4019_v28, %v4012_v5  ;;  %v13652_v44 = vpack.c.bf16 %v4145_v31, %v4138_v42  ;;  %v22501_v26 = vld [vmem:[#allocation29_spill] sm:$0xff]  ;;  %13575 = vmatpush3.bf16.msra.mxu0 %v16530_v43 }
 0x81a   : > { %22496 = vst [vmem:[#allocation20_spill] sm:$0xff] %v16642_v47  ;;  %v13576_v61 = vpack.c.bf16 %v22500_v10, %v22499_v48  ;;  %v4026_v39 = vand.u32 4294901760, %v4025_v21  ;;  %3854 = vmatmul.mubr.f32.vlgmr.msra.gmra.mrb[38].mxu1 %v22501_v26  ;;  %v4033_v57 = vand.u32 4294901760, %v4032_v51  ;;  %v22502_v56 = vand.u32 4294901760, %v16585_v37 }
 0x81b   : > { %v21826_v11 = vand.u32 4294901760, %v16623_v0  ;;  %v16665_v15 = vsub.f32 %v2878_v6, %v16630_v8  ;;  %3859 = vmatprep.mubr.f32.mxu1 %v22503_v14  ;;  %13647 = vmatpush3.bf16.msra.mxu1 %v16539_v20  ;;  %v22504_v31 = vand.u32 4294901760, %v16594_v4  ;;  %v4152_v28 = vand.u32 4294901760, %v4151_v35 }
 0x81c   : > { %v4039_v3 = vsub.f32 %v16585_v37, %v22502_v56  ;;  %13649 = vmatprep.subr.bf16.mxu1 %v16541_v1  ;;  %v4159_v21 = vand.u32 4294901760, %v4158_v7  ;;  %v22505_v51 = vand.u32 4294901760, %v16604_v16  ;;  %v22506_v48 = vand.u32 4294901760, %v16609_v40  ;;  %13577 = vmatprep.subr.bf16.mxu0 %v13576_v61  ;;  %v22511_v7 = vld [vmem:[#allocation32_spill] sm:$0xff] }
 0x81d   : > { %v4046_v42 = vsub.f32 %v16594_v4, %v22504_v31  ;;  %v22507_v10 = vand.u32 4294901760, %v15965_v34  ;;  %v22508_v56 = vand.u32 4294901760, %v15967_v29  ;;  %v22509_v5 = vand.u32 4294901760, %v16217_v53 }
 0x81e   : > { %v4165_v6 = vsub.f32 %v16604_v16, %v22505_v51  ;;  %v4172_v20 = vsub.f32 %v16609_v40, %v22506_v48  ;;  %v22510_v35 = vand.u32 4294901760, %v16227_v23  ;;  %3861 = vmatmul.mubr.f32.gmra.mrb[40].mxu1 %v22511_v7  ;;  %v13654_v51 = vpack.c.bf16 %v4033_v57, %v4026_v39 }
 0x81f   : > { %v13578_v31 = vpack.c.bf16 %v22508_v56, %v22507_v10  ;;  %v4040_v22 = vand.u32 4294901760, %v4039_v3  ;;  %v4053_v43 = vsub.f32 %v16623_v0, %v21826_v11  ;;  %v4060_v34 = vsub.f32 %v16628_v49, %v21825_v30  ;;  %13651 = vmatpush3.bf16.msra.mxu1 %v13650_v32  ;;  %4218 = vmatprep.mubr.f32.mxu1 %v16630_v8 }
 0x820   : > { %v16690_v1 = vpack.c.bf16 %v22510_v35, %v22509_v5  ;;  %v3964_v29 = vand.u32 4294901760, %v16665_v15  ;;  %v4047_v23 = vand.u32 4294901760, %v4046_v42  ;;  %v22512_v53 = vand.u32 4294901760, %v16637_v50  ;;  %13653 = vmatprep.subr.bf16.mxu1 %v13652_v44 }
 0x821   : > { %v22513_v57 = vand.u32 4294901760, %v16642_v47  ;;  %v13656_v3 = vpack.c.bf16 %v4159_v21, %v4152_v28  ;;  %v4166_v5 = vand.u32 4294901760, %v4165_v6  ;;  %v4173_v48 = vand.u32 4294901760, %v4172_v20  ;;  %13579 = vmatpush3.bf16.msra.mxu0 %v13578_v31  ;;  %v22518_v28 = vld [vmem:[#allocation9_spill] sm:$0xff]  ;;  %v22520_v20 = vld [vmem:[#allocation10_spill] sm:$0xff] }
 0x822   : > { %v4179_v61 = vsub.f32 %v16637_v50, %v22512_v53  ;;  %v22514_v32 = vand.u32 4294901760, %v16230_v25  ;;  %v22515_v10 = vand.u32 4294901760, %v16233_v45  ;;  %v22516_v42 = vand.u32 4294901760, %v16248_v13  ;;  %13613 = vmatprep.subr.bf16.mxu0 %v16690_v1 }
 0x823   : > { %v4186_v39 = vsub.f32 %v16642_v47, %v22513_v57  ;;  %v22517_v35 = vand.u32 4294901760, %v16251_v52  ;;  %v4054_v57 = vand.u32 4294901760, %v4053_v43  ;;  %v4061_v44 = vand.u32 4294901760, %v4060_v34  ;;  %13655 = vmatpush3.bf16.msra.mxu1 %v13654_v51 }
 0x824   : > { %v16711_v56 = vpack.c.bf16 %v22515_v10, %v22514_v32  ;;  %v22519_v21 = vand.u32 4294901760, %v22518_v28  ;;  %v22521_v25 = vand.u32 4294901760, %v22520_v20  ;;  %v3965_v13 = vsub.f32 %v16665_v15, %v3964_v29  ;;  %3743 = vmatmul.mubr.f32.vlgmr.msra.gmra.mrb[30].mxu0 %v22501_v26  ;;  %13657 = vmatprep.subr.bf16.mxu1 %v13656_v3 }
 0x825   : > { %v16717_v53 = vpack.c.bf16 %v22517_v35, %v22516_v42  ;;  %v13658_v52 = vpack.c.bf16 %v4047_v23, %v4040_v22  ;;  %v4180_v31 = vand.u32 4294901760, %v4179_v61  ;;  %v4187_v32 = vand.u32 4294901760, %v4186_v39  ;;  %v22523_v42 = vld [vmem:[#allocation51_spill] sm:$0xff]  ;;  %3748 = vmatprep.mubr.f32.mxu0 %v22503_v14 }
 0x826   : > { %v4067_v6 = vsub.f32 %v22518_v28, %v22519_v21  ;;  %v4074_v45 = vsub.f32 %v22520_v20, %v22521_v25  ;;  %v13660_v43 = vpack.c.bf16 %v4173_v48, %v4166_v5  ;;  %v22522_v34 = vand.u32 4294901760, %v16192_v12  ;;  %13615 = vmatpush3.bf16.msra.mxu0 %v16711_v56 }
 0x827   : > { %v22524_v35 = vand.u32 4294901760, %v22523_v42  ;;  %v22525_v22 = vand.u32 4294901760, %v16295_v24  ;;  %v22526_v51 = vand.u32 4294901760, %v16372_v9  ;;  %13617 = vmatprep.subr.bf16.mxu0 %v16717_v53  ;;  %v22527_v26 = vand.u32 4294901760, %v16375_v36  ;;  %13659 = vmatpush3.bf16.msra.mxu1 %v13658_v52 }
 0x828   : > { %v4193_v10 = vsub.f32 %v16192_v12, %v22522_v34  ;;  %v22528_v61 = vand.u32 4294901760, %v16378_v33  ;;  %v13662_v3 = vpack.c.bf16 %v4061_v44, %v4054_v57  ;;  %v4068_v5 = vand.u32 4294901760, %v4067_v6  ;;  %3750 = vmatmul.mubr.f32.gmra.mrb[32].mxu0 %v22511_v7  ;;  %13661 = vmatprep.subr.bf16.mxu1 %v13660_v43 }
 0x829   : > { %v4200_v21 = vsub.f32 %v22523_v42, %v22524_v35  ;;  %v16742_v23 = vpack.c.bf16 %v22526_v51, %v22525_v22  ;;  %v4075_v48 = vand.u32 4294901760, %v4074_v45  ;;  %v3966_v14 = vand.u32 4294901760, %v3965_v13  ;;  %v22537_v51 = vld [vmem:[#allocation53_spill] sm:$0xff] }
 0x82a   : > { %v16749_v39 = vpack.c.bf16 %v22528_v61, %v22527_v26  ;;  %v13664_v25 = vpack.c.bf16 %v4187_v32, %v4180_v31  ;;  %v22529_v24 = vand.u32 4294901760, %v16204_v60  ;;  %v22530_v34 = vand.u32 4294901760, %v16209_v55  ;;  %v22539_v61 = vld [vmem:[#allocation54_spill] sm:$0xff] }
 0x82b   : > { %v4194_v36 = vand.u32 4294901760, %v4193_v10  ;;  %v4201_v33 = vand.u32 4294901760, %v4200_v21  ;;  %v22531_v57 = vand.u32 4294901760, %v16240_v2  ;;  %v22532_v6 = vand.u32 4294901760, %v16245_v18  ;;  %13619 = vmatpush3.bf16.msra.mxu0 %v16742_v23  ;;  %3967 = vmatprep.mubr.f32.mxu0 %v3966_v14 }
 0x82c   : > { %v4081_v9 = vsub.f32 %v16204_v60, %v22529_v24  ;;  %v4088_v35 = vsub.f32 %v16209_v55, %v22530_v34  ;;  %v22533_v13 = vand.u32 4294901760, %v16427_v38  ;;  %v22534_v52 = vand.u32 4294901760, %v16441_v63  ;;  %13621 = vmatprep.subr.bf16.mxu0 %v16749_v39  ;;  %13663 = vmatpush3.bf16.msra.mxu1 %v13662_v3 }
 0x82d   : > { %v4207_v44 = vsub.f32 %v16240_v2, %v22531_v57  ;;  %v4214_v45 = vsub.f32 %v16245_v18, %v22532_v6  ;;  %v22535_v7 = vand.u32 4294901760, %v16479_v17  ;;  %v22536_v32 = vand.u32 4294901760, %v16482_v58  ;;  %13665 = vmatprep.subr.bf16.mxu1 %v13664_v25 }
 0x82e   : > { %v16769_v31 = vpack.c.bf16 %v22534_v52, %v22533_v13  ;;  %v13666_v10 = vpack.c.bf16 %v4075_v48, %v4068_v5  ;;  %v4082_v21 = vand.u32 4294901760, %v4081_v9  ;;  %v4089_v22 = vand.u32 4294901760, %v4088_v35  ;;  %v22544_v48 = vld [vmem:[#allocation39_spill] sm:$0xff] }
 0x82f   : > { %v16776_v43 = vpack.c.bf16 %v22536_v32, %v22535_v7  ;;  %v22538_v26 = vand.u32 4294901760, %v22537_v51  ;;  %v22540_v63 = vand.u32 4294901760, %v22539_v61  ;;  %v13668_v24 = vpack.c.bf16 %v4201_v33, %v4194_v36  ;;  %v22548_v36 = vld [vmem:[#allocation42_spill] sm:$0xff]  ;;  %v22553_v32 = vld [vmem:[#allocation16_spill] sm:$0xff] }
 0x830   : > { %v4208_v34 = vand.u32 4294901760, %v4207_v44  ;;  %v4215_v17 = vand.u32 4294901760, %v4214_v45  ;;  %13623 = vmatpush3.bf16.msra.mxu0 %v16769_v31  ;;  %v22541_v58 = vand.u32 4294901760, %v16492_v54  ;;  %v22542_v3 = vand.u32 4294901760, %v16510_v41  ;;  %13667 = vmatpush3.bf16.msra.mxu1 %v13666_v10 }
 0x831   : > { %v4095_v38 = vsub.f32 %v22537_v51, %v22538_v26  ;;  %v4102_v14 = vsub.f32 %v22539_v61, %v22540_v63  ;;  %v2877_v9 = vmax.f32 %v22544_v48, 0.0  ;;  %13625 = vmatprep.subr.bf16.mxu0 %v16776_v43  ;;  %v22545_v35 = vand.u32 4294901760, %v16521_v46  ;;  %13669 = vmatprep.subr.bf16.mxu1 %v13668_v24 }
 0x832   : > { %v16789_v5 = vpack.c.bf16 %v22542_v3, %v22541_v58  ;;  %v22546_v57 = vand.u32 4294901760, %v16524_v27  ;;  %v2882_v33 = vmax.f32 %v22548_v36, 0.0  ;;  %v13670_v44 = vpack.c.bf16 %v4089_v22, %v4082_v21  ;;  %v22552_v27 = vld [vmem:[#allocation41_spill] sm:$0xff]  ;;  %v22555_v21 = vld [vmem:[#allocation19_spill] sm:$0xff] }
 0x833   : > { %v4096_v6 = vand.u32 4294901760, %v4095_v38  ;;  %v4103_v54 = vand.u32 4294901760, %v4102_v14  ;;  %v13672_v41 = vpack.c.bf16 %v4215_v17, %v4208_v34  ;;  %v22549_v45 = vand.u32 4294901760, %v16546_v62  ;;  %v22560_v14 = vld [vmem:[#allocation44_spill] sm:$0xff]  ;;  %v22563_v3 = vld [vmem:[#allocation45_spill] sm:$0xff] }
 0x834   : > { %22543 = vst [vmem:[#allocation40_spill] sm:$0xff] %v16789_v5  ;;  %v16797_v25 = vpack.c.bf16 %v22546_v57, %v22545_v35  ;;  %13627 = vmatpush3.bf16.msra.mxu0 %v16789_v5  ;;  %v22550_v13 = vand.u32 4294901760, %v16549_v19  ;;  %v16807_v46 = vand.u32 4294901760, %v2877_v9  ;;  %v2881_v7 = vmax.f32 %v22552_v27, 0.0  ;;  %13671 = vmatpush3.bf16.msra.mxu1 %v13670_v44  ;;  %v22558_v19 = vld [vmem:[#allocation43_spill] sm:$0xff]  ;;  %v22565_v35 = vld [vmem:[#allocation46_spill] sm:$0xff] }
 0x835   : > { %v22554_v10 = vand.u32 4294901760, %v22553_v32  ;;  %v22556_v22 = vand.u32 4294901760, %v22555_v21  ;;  %v16817_v38 = vand.u32 4294901760, %v2882_v33  ;;  %v13674_v62 = vpack.c.bf16 %v4103_v54, %v4096_v6  ;;  %13673 = vmatprep.subr.bf16.mxu1 %v13672_v41  ;;  %v22569_v54 = vld [vmem:[#allocation48_spill] sm:$0xff] }
 0x836   : > { %22547 = vst [vmem:[#allocation21_spill] sm:$0xff] %v16797_v25  ;;  %v16805_v52 = vpack.c.bf16 %v22550_v13, %v22549_v45  ;;  %22551 = vst [vmem:[#allocation22_spill] sm:$0xff] %v16807_v46  ;;  %13629 = vmatprep.subr.bf16.mxu0 %v16797_v25  ;;  %v22559_v63 = vand.u32 4294901760, %v22558_v19  ;;  %v22561_v24 = vand.u32 4294901760, %v22560_v14  ;;  %v16827_v17 = vsub.f32 %v2877_v9, %v16807_v46  ;;  %v22567_v9 = vld [vmem:[#allocation47_spill] sm:$0xff] }
 0x837   : > { %v16815_v26 = vpack.c.bf16 %v22556_v22, %v22554_v10  ;;  %22557 = vst [vmem:[#allocation23_spill] sm:$0xff] %v16817_v38  ;;  %v16829_v58 = vand.u32 4294901760, %v2881_v7  ;;  %v22564_v48 = vand.u32 4294901760, %v22563_v3  ;;  %v22566_v57 = vand.u32 4294901760, %v22565_v35  ;;  %v22573_v10 = vld [vmem:[#allocation50_spill] sm:$0xff]  ;;  %v22580_v35 = vld [vmem:[#allocation59_spill] sm:$0xff] }
 0x838   : > { %13631 = vmatpush3.bf16.msra.mxu0 %v16805_v52  ;;  %v16824_v34 = vpack.c.bf16 %v22561_v24, %v22559_v63  ;;  %v16839_v44 = vsub.f32 %v2882_v33, %v16817_v38  ;;  %13675 = vmatpush3.bf16.msra.mxu1 %v13674_v62  ;;  %v22568_v6 = vand.u32 4294901760, %v22567_v9  ;;  %v22570_v41 = vand.u32 4294901760, %v22569_v54  ;;  %v22571_v33 = vld [vmem:[#allocation49_spill] sm:$0xff]  ;;  %v22577_v63 = vld [vmem:[#allocation12_spill] sm:$0xff] }
 0x839   : > { %22562 = vst [vmem:[#allocation29_spill] sm:$0xff] %v16829_v58  ;;  %13633 = vmatprep.subr.bf16.mxu0 %v16815_v26  ;;  %v16836_v36 = vpack.c.bf16 %v22566_v57, %v22564_v48  ;;  %13709 = vmatprep.subr.bf16.mxu1 %v16690_v1  ;;  %v21828_v13 = vand.u32 4294901760, %v16827_v17  ;;  %v16851_v27 = vsub.f32 %v2881_v7, %v16829_v58  ;;  %v22572_v32 = vand.u32 4294901760, %v22571_v33  ;;  %v22575_v7 = vld [vmem:[#allocation11_spill] sm:$0xff]  ;;  %v22579_v48 = vld [vmem:[#allocation57_spill] sm:$0xff]  ;;  %v22581_v54 = vld [vmem:[#allocation60_spill] sm:$0xff] }
 0x83a   : > { %v16847_v45 = vpack.c.bf16 %v22570_v41, %v22568_v6  ;;  %v22574_v21 = vand.u32 4294901760, %v22573_v10  ;;  %v21827_v62 = vand.u32 4294901760, %v16839_v44  ;;  %v22576_v19 = vand.u32 4294901760, %v22575_v7  ;;  %v22582_v41 = vld [vmem:[#allocation62_spill] sm:$0xff]  ;;  %v16894_v10 = vld [vmem:[%s15236_s15 + $0x38] sm:$0xff] }
 0x83b   : > { %4220 = vmatmul.mubr.f32.vlgmr.msra.gmra.mrb[42].mxu1 %v16807_v46  ;;  %v22578_v14 = vand.u32 4294901760, %v22577_v63  ;;  %v3971_v3 = vsub.f32 %v16827_v17, %v21828_v13  ;;  %v13676_v57 = vpack.c.bf16 %v22580_v35, %v22579_v48  ;;  %v21829_v9 = vand.u32 4294901760, %v16851_v27  ;;  %22584 = vst [vmem:[#allocation32_spill] sm:$0xff] %v16894_v10  ;;  %v22585_v7 = vld [vmem:[#allocation63_spill] sm:$0xff]  ;;  %v16908_v13 = vld [vmem:[%s15236_s15 + $0x40] sm:$0xff]  ;;  %v22596_v46 = vld [vmem:[#allocation18_spill] sm:$0xff] }
 0x83c   : > { %13635 = vmatpush3.bf16.msra.mxu0 %v16824_v34  ;;  %v16859_v22 = vpack.c.bf16 %v22574_v21, %v22572_v32  ;;  %4225 = vmatprep.mubr.f32.mxu1 %v16817_v38  ;;  %v3980_v6 = vsub.f32 %v16839_v44, %v21827_v62  ;;  %v13678_v33 = vpack.c.bf16 %v22582_v41, %v22581_v54  ;;  %v16891_v32 = vld [vmem:[%s15236_s15 + $0x30] sm:$0xff]  ;;  %v21839_v11 = vand.u32 4294901760, %v16894_v10 }
 0x83d   : > { %13637 = vmatprep.subr.bf16.mxu0 %v16836_v36  ;;  %13711 = vmatpush3.bf16.msra.mxu1 %v16711_v56  ;;  %v16870_v24 = vpack.c.bf16 %v22578_v14, %v22576_v19  ;;  %22583 = vst [vmem:[#allocation34_spill] sm:$0xff] %v16891_v32  ;;  %v3972_v21 = vand.u32 4294901760, %v3971_v3  ;;  %v22586_v19 = vld [vmem:[#allocation64_spill] sm:$0xff]  ;;  %v21838_v30 = vand.u32 4294901760, %v16891_v32  ;;  %v22587_v3 = vld [vmem:[#allocation65_spill] sm:$0xff]  ;;  %22589 = vst [vmem:[#allocation9_spill] sm:$0xff] %v16908_v13 }
 0x83e   : > { %13713 = vmatprep.subr.bf16.mxu1 %v16717_v53  ;;  %v13680_v63 = vpack.c.bf16 %v22586_v19, %v22585_v7  ;;  %v3981_v14 = vand.u32 4294901760, %v3980_v6  ;;  %v22591_v6 = vld [vmem:[#allocation14_spill] sm:$0xff] }
 0x83f   : > { %4227 = vmatmul.mubr.f32.gmra.mrb[44].mxu1 %v16829_v58  ;;  %v22592_v38 = vld [vmem:[#allocation66_spill] sm:$0xff] }
 0x840   : > { %13639 = vmatpush3.bf16.msra.mxu0 %v16847_v45  ;;  %4478 = vmatprep.mubr.f32.mxu1 %v3964_v29  ;;  %v3986_v29 = vsub.f32 %v16851_v27, %v21829_v9  ;;  %v16911_v9 = vld [vmem:[%s15236_s15 + $0x48] sm:$0xff] }
 0x841   : > { %13641 = vmatprep.subr.bf16.mxu0 %v16859_v22  ;;  %13715 = vmatpush3.bf16.msra.mxu1 %v16742_v23  ;;  %22590 = vst [vmem:[#allocation10_spill] sm:$0xff] %v16911_v9 }
 0x842   : > { %13717 = vmatprep.subr.bf16.mxu1 %v16749_v39  ;;  %v3987_v58 = vand.u32 4294901760, %v3986_v29  ;;  %v13692_v29 = vpack.c.bf16 %v16609_v40, %v16604_v16 }
 0x844   : > { %13643 = vmatpush3.bf16.msra.mxu0 %v16870_v24 }
 0x845   : > { %13677 = vmatprep.subr.bf16.mxu0 %v13676_v57  ;;  %13719 = vmatpush3.bf16.msra.mxu1 %v16769_v31  ;;  %v22588_v57 = vld [vmem:[#allocation13_spill] sm:$0xff] }
 0x846   : > { %13721 = vmatprep.subr.bf16.mxu1 %v16776_v43  ;;  %v13682_v62 = vpack.c.bf16 %v22588_v57, %v22587_v3 }
 0x847   : > { %3973 = vmatmul.mubr.f32.vlgmr.msra.gmra.mrb[34].mxu0 %v3972_v21  ;;  %v13684_v21 = vpack.c.bf16 %v22592_v38, %v22591_v6 }
 0x848   : > { %3982 = vmatprep.mubr.f32.mxu0 %v3981_v14  ;;  %13679 = vmatpush3.bf16.msra.mxu0 %v13678_v33  ;;  %v16920_v33 = vsub.f32 %v16891_v32, %v21838_v30  ;;  %v16925_v14 = vsub.f32 %v16894_v10, %v21839_v11  ;;  %v13690_v10 = vpack.c.bf16 %v16594_v4, %v16585_v37  ;;  %v16951_v32 = vld [vmem:[%s15230_s0] sm:$0xf] }
 0x849   : > { %13681 = vmatprep.subr.bf16.mxu0 %v13680_v63  ;;  %13723 = vmatpush3.bf16.msra.mxu1 %v16789_v5  ;;  %v22597_v5 = vld [vmem:[#allocation15_spill] sm:$0xff]  ;;  %v22598_v63 = vand.u32 4294901760, %v16908_v13 }
 0x84a   : > { %13725 = vmatprep.subr.bf16.mxu1 %v16797_v25  ;;  %22593 = vst [vmem:[#allocation51_spill] sm:$0xff] %v16920_v33  ;;  %22594 = vst [vmem:[#allocation53_spill] sm:$0xff] %v16925_v14  ;;  %v13688_v30 = vpack.c.bf16 %v16560_v59, %v22597_v5  ;;  %v21846_v11 = vand.u32 4294901760, %v16920_v33  ;;  %v22608_v33 = vld [vmem:[#allocation27_spill] sm:$0xff] }
 0x84b   : > { %3988 = vmatmul.mubr.f32.gmra.mrb[36].mxu0 %v3987_v58  ;;  %v22595_v58 = vld [vmem:[#allocation17_spill] sm:$0xff] }
 0x84c   : > { %13683 = vmatpush3.bf16.msra.mxu0 %v13682_v62  ;;  %4362 = vmatprep.mubr.f32.mxu0 %v16665_v15  ;;  %v13686_v25 = vpack.c.bf16 %v22596_v46, %v22595_v58  ;;  %v16941_v62 = vsub.f32 %v16908_v13, %v22598_v63  ;;  %v22599_v15 = vand.u32 4294901760, %v16911_v9  ;;  %v22601_v63 = vand.u32 4294901760, %v16925_v14 }
 0x84d   : > { %13685 = vmatprep.subr.bf16.mxu0 %v13684_v21  ;;  %13727 = vmatpush3.bf16.msra.mxu1 %v16805_v52  ;;  %v13694_v14 = vpack.c.bf16 %v16628_v49, %v16623_v0 }
 0x84e   : > { %13729 = vmatprep.subr.bf16.mxu1 %v16815_v26  ;;  %v16946_v21 = vsub.f32 %v16911_v9, %v22599_v15  ;;  %v16959_v13 = vpack.c.bf16 %v22601_v63, %v21846_v11  ;;  %v13696_v63 = vpack.c.bf16 %v16642_v47, %v16637_v50 }
 0x850   : > { %22600 = vst [vmem:[#allocation54_spill] sm:$0xff] %v16946_v21  ;;  %13687 = vmatpush3.bf16.msra.mxu0 %v13686_v25  ;;  %22602 = vst [vmem:[#allocation39_spill] sm:$0xff] %v16959_v13  ;;  %v21851_v25 = vand.u32 4294901760, %v16941_v62  ;;  %v21850_v15 = vand.u32 4294901760, %v16946_v21  ;;  %v16981_v13 = vld [vmem:[%s15236_s15 + $0xf0] sm:$0xff] }
 0x851   : > { %13689 = vmatprep.subr.bf16.mxu0 %v13688_v30  ;;  %13731 = vmatpush3.bf16.msra.mxu1 %v16824_v34  ;;  %v22603_v30 = vld [vmem:[#allocation25_spill] sm:$0xff] }
 0x852   : > { %13733 = vmatprep.subr.bf16.mxu1 %v16836_v36  ;;  %v16967_v9 = vrot.slane %v16951_v32, %v22603_v30  ;;  %v16977_v11 = vpack.c.bf16 %v21850_v15, %v21851_v25  ;;  %v16984_v30 = vld [vmem:[%s15236_s15 + $0xf8] sm:$0xff]  ;;  %v13698_v15 = vpack.c.bf16 %v22520_v20, %v22518_v28  ;;  %v13700_v25 = vpack.c.bf16 %v22523_v42, %v16192_v12 }
 0x853   : > { %22605 = vst [vmem:[#allocation41_spill] sm:$0xff] %v16984_v30  ;;  %v21855_v21 = vand.u32 4294901760, %v16984_v30  ;;  %v13702_v12 = vpack.c.bf16 %v16209_v55, %v16204_v60  ;;  %v22609_v20 = vand.u32 4294901760, %v16827_v17  ;;  %v13704_v42 = vpack.c.bf16 %v16245_v18, %v16240_v2  ;;  %v17031_v2 = vld [vmem:[%s15236_s15 + $0x88] sm:$0xff]  ;;  %v17034_v55 = vld [vmem:[%s15236_s15] sm:$0xff] }
 0x854   : > { %13691 = vmatpush3.bf16.msra.mxu0 %v13690_v10  ;;  %22604 = vst [vmem:[#allocation42_spill] sm:$0xff] %v16977_v11  ;;  %v16988_v10 = vld [vmem:[%s15236_s15 + $0x70] sm:$0xff]  ;;  %v16995_v47 = vadd.f32 %v22608_v33, %v16967_v9  ;;  %v21856_v11 = vand.u32 4294901760, %v16981_v13  ;;  %v22610_v60 = vand.u32 4294901760, %v16839_v44 }
 0x855   : > { %13693 = vmatprep.subr.bf16.mxu0 %v13692_v29  ;;  %13735 = vmatpush3.bf16.msra.mxu1 %v16847_v45  ;;  %22606 = vst [vmem:[#allocation16_spill] sm:$0xff] %v16988_v10  ;;  %v16991_v29 = vld [vmem:[%s15236_s15 + $0x78] sm:$0xff]  ;;  %v21854_v33 = vand.u32 4294901760, %v16988_v10 }
 0x856   : > { %13737 = vmatprep.subr.bf16.mxu1 %v16859_v22  ;;  %22607 = vst [vmem:[#allocation19_spill] sm:$0xff] %v16991_v29  ;;  %v2610_v28 = vmax.f32 %v16995_v47, 0.0  ;;  %v17025_v47 = vsub.f32 %v16984_v30, %v21855_v21  ;;  %v22613_v21 = vand.u32 4294901760, %v22580_v35  ;;  %v22617_v35 = vand.u32 4294901760, %v22582_v41 }
 0x857   : > { %v17039_v18 = vsub.f32 %v16988_v10, %v21854_v33  ;;  %v22612_v33 = vand.u32 4294901760, %v22579_v48  ;;  %v22614_v10 = vand.u32 4294901760, %v16851_v27  ;;  %v22619_v30 = vand.u32 4294901760, %v22585_v7  ;;  %v17123_v7 = vld [vmem:[%s15236_s15 + $0xa0] sm:$0xff] }
 0x858   : > { %13695 = vmatpush3.bf16.msra.mxu0 %v13694_v14  ;;  %v21857_v14 = vand.u32 4294901760, %v16991_v29  ;;  %v21861_v48 = vand.u32 4294901760, %v17025_v47  ;;  %v22622_v41 = vand.u32 4294901760, %v17031_v2 }
 0x859   : > { %13697 = vmatprep.subr.bf16.mxu0 %v13696_v63  ;;  %13739 = vmatpush3.bf16.msra.mxu1 %v16870_v24  ;;  %v17015_v63 = vld [vmem:[%s15236_s15 + $0x80] sm:$0xff] }
 0x85a   : > { %13773 = vmatprep.subr.bf16.mxu1 %v16690_v1  ;;  %v17020_v1 = vsub.f32 %v16981_v13, %v21856_v11  ;;  %v13740_v11 = vpack.c.bf16 %v22613_v21, %v22612_v33  ;;  %v22616_v21 = vand.u32 4294901760, %v22581_v54 }
 0x85c   : > { %13699 = vmatpush3.bf16.msra.mxu0 %v13698_v15  ;;  %4482 = vmatmul.mubr.f32.vlgmr.msra.gmra.mrb[46].mxu1 %v22609_v20  ;;  %v17048_v15 = vld [vmem:[%s15236_s15 + $0x8] sm:$0xff]  ;;  %v17053_v20 = vand.u32 4294901760, %v2610_v28 }
 0x85d   : > { %13701 = vmatprep.subr.bf16.mxu0 %v13700_v25  ;;  %4489 = vmatprep.mubr.f32.mxu1 %v22610_v60  ;;  %v17044_v25 = vsub.f32 %v16991_v29, %v21857_v14  ;;  %v13706_v60 = vpack.c.bf16 %v22539_v61, %v22537_v51  ;;  %v17063_v29 = vld [vmem:[%s15236_s15 + $0x98] sm:$0xff]  ;;  %v21862_v61 = vand.u32 4294901760, %v17020_v1 }
 0x85e   : > { %13775 = vmatpush3.bf16.msra.mxu1 %v16711_v56  ;;  %v17051_v56 = vld [vmem:[%s15236_s15 + $0x90] sm:$0xff]  ;;  %22611 = vst [vmem:[#allocation43_spill] sm:$0xff] %v17053_v20  ;;  %v17073_v51 = vld [vmem:[%s15236_s15 + $0x18] sm:$0xff] }
 0x85f   : > { %13777 = vmatprep.subr.bf16.mxu1 %v16717_v53  ;;  %v17066_v53 = vld [vmem:[%s15236_s15 + $0x10] sm:$0xff]  ;;  %v21863_v33 = vand.u32 4294901760, %v17044_v25 }
 0x860   : > { %13703 = vmatpush3.bf16.msra.mxu0 %v13702_v12  ;;  %4493 = vmatmul.mubr.f32.gmra.mrb[48].mxu1 %v22614_v10  ;;  %v21864_v10 = vand.u32 4294901760, %v17039_v18  ;;  %v13742_v12 = vpack.c.bf16 %v22617_v35, %v22616_v21  ;;  %v17115_v35 = vsub.f32 %v17031_v2, %v22622_v41  ;;  %v22624_v21 = vand.u32 4294901760, %v17034_v55 }
 0x861   : > { %13705 = vmatprep.subr.bf16.mxu0 %v13704_v42  ;;  %4770 = vmatprep.mubr.f32.mxu1 %v16630_v8  ;;  %v21865_v42 = vand.u32 4294901760, %v17063_v29 }
 0x862   : > { %13779 = vmatpush3.bf16.msra.mxu1 %v16742_v23  ;;  %v17090_v23 = vpack.c.bf16 %v21861_v48, %v21862_v61  ;;  %v22620_v48 = vand.u32 4294901760, %v22586_v19  ;;  %22623 = vst [vmem:[#allocation46_spill] sm:$0xff] %v17115_v35  ;;  %v22626_v19 = vld [vmem:[#allocation24_spill] sm:$0xff] }
 0x863   : > { %13781 = vmatprep.subr.bf16.mxu1 %v16749_v39  ;;  %v17101_v39 = vpack.c.bf16 %v21863_v33, %v21864_v10  ;;  %v22629_v33 = vand.u32 4294901760, %v17051_v56  ;;  %v17144_v10 = vld [vmem:[%s15236_s15 + $0xa8] sm:$0xff] }
 0x864   : > { %22615 = vst [vmem:[#allocation44_spill] sm:$0xff] %v17090_v23  ;;  %13707 = vmatpush3.bf16.msra.mxu0 %v13706_v60  ;;  %v13744_v61 = vpack.c.bf16 %v22620_v48, %v22619_v30  ;;  %v22621_v60 = vand.u32 4294901760, %v17015_v63  ;;  %v17127_v30 = vrot.slane %v16951_v32, %v22626_v19  ;;  %v17130_v48 = vsub.f32 %v2610_v28, %v17053_v20 }
 0x865   : > { %22618 = vst [vmem:[#allocation45_spill] sm:$0xff] %v17101_v39  ;;  %13741 = vmatprep.subr.bf16.mxu0 %v13740_v11  ;;  %v17120_v11 = vsub.f32 %v17034_v55, %v22624_v21  ;;  %v17141_v21 = vsub.f32 %v17051_v56, %v22629_v33  ;;  %v22631_v32 = vand.u32 4294901760, %v22587_v3  ;;  %v22634_v33 = vand.u32 4294901760, %v17066_v53 }
 0x866   : > { %v17110_v54 = vsub.f32 %v17015_v63, %v22621_v60  ;;  %13783 = vmatpush3.bf16.msra.mxu1 %v16769_v31  ;;  %v22627_v60 = vand.u32 4294901760, %v17048_v15  ;;  %v22632_v31 = vand.u32 4294901760, %v22588_v57  ;;  %v22636_v3 = vand.u32 4294901760, %v22591_v6 }
 0x867   : > { %22625 = vst [vmem:[#allocation47_spill] sm:$0xff] %v17120_v11  ;;  %22630 = vst [vmem:[#allocation49_spill] sm:$0xff] %v17141_v21  ;;  %4365 = vmatmul.mubr.f32.vlgmr.msra.gmra.mrb[38].mxu0 %v16827_v17  ;;  %13785 = vmatprep.subr.bf16.mxu1 %v16776_v43  ;;  %v17160_v14 = vsub.f32 %v17066_v53, %v22634_v33  ;;  %v17163_v17 = vld [vmem:[%s15236_s15 + $0x20] sm:$0xff]  ;;  %v17166_v43 = vld [vmem:[%s15236_s15 + $0x28] sm:$0xff]  ;;  %v22637_v57 = vand.u32 4294901760, %v22592_v38  ;;  %v22640_v33 = vand.u32 4294901760, %v17073_v51 }
 0x868   : > { %v17136_v41 = vsub.f32 %v17048_v15, %v22627_v60  ;;  %v13746_v28 = vpack.c.bf16 %v22632_v31, %v22631_v32  ;;  %v17155_v60 = vsub.f32 %v17063_v29, %v21865_v42  ;;  %4371 = vmatprep.mubr.f32.mxu0 %v16839_v44  ;;  %13743 = vmatpush3.bf16.msra.mxu0 %v13742_v12  ;;  %v22638_v31 = vand.u32 4294901760, %v22595_v58  ;;  %v17188_v58 = vld [vmem:[%s15236_s15 + $0xb0] sm:$0xff] }
 0x869   : > { %22635 = vst [vmem:[#allocation11_spill] sm:$0xff] %v17160_v14  ;;  %v13748_v32 = vpack.c.bf16 %v22637_v57, %v22636_v3  ;;  %v22639_v42 = vand.u32 4294901760, %v22596_v46  ;;  %v17180_v39 = vsub.f32 %v17073_v51, %v22640_v33  ;;  %v21866_v23 = vand.u32 4294901760, %v17123_v7  ;;  %13745 = vmatprep.subr.bf16.mxu0 %v13744_v61  ;;  %v17191_v46 = vld [vmem:[%s15236_s15 + $0xb8] sm:$0xff]  ;;  %v22643_v33 = vld [vmem:[#allocation21_spill] sm:$0xff] }
 0x86a   : > { %22628 = vst [vmem:[#allocation48_spill] sm:$0xff] %v17136_v41  ;;  %22633 = vst [vmem:[#allocation50_spill] sm:$0xff] %v17155_v60  ;;  %v22644_v12 = vand.u32 4294901760, %v22597_v5  ;;  %v22645_v38 = vand.u32 4294901760, %v16560_v59  ;;  %v22646_v44 = vand.u32 4294901760, %v16585_v37  ;;  %v21870_v57 = vand.u32 4294901760, %v17155_v60 }
 0x86b   : > { %v13750_v19 = vpack.c.bf16 %v22639_v42, %v22638_v31  ;;  %22641 = vst [vmem:[#allocation12_spill] sm:$0xff] %v17180_v39  ;;  %v22642_v42 = vld [vmem:[#allocation40_spill] sm:$0xff]  ;;  %v21869_v31 = vand.u32 4294901760, %v17166_v43  ;;  %4374 = vmatmul.mubr.f32.gmra.mrb[40].mxu0 %v16851_v27  ;;  %v17215_v5 = vsub.f32 %v17123_v7, %v21866_v23  ;;  %v22655_v23 = vand.u32 4294901760, %v17141_v21 }
 0x86c   : > { %13787 = vmatpush3.bf16.msra.mxu1 %v22642_v42  ;;  %v13752_v6 = vpack.c.bf16 %v22645_v38, %v22644_v12  ;;  %v22647_v42 = vand.u32 4294901760, %v16594_v4  ;;  %13747 = vmatpush3.bf16.msra.mxu0 %v13746_v28  ;;  %v22649_v4 = vand.u32 4294901760, %v17110_v54  ;;  %v22650_v28 = vand.u32 4294901760, %v17115_v35 }
 0x86d   : > { %13789 = vmatprep.subr.bf16.mxu1 %v22643_v33  ;;  %4659 = vmatprep.mubr.f32.mxu0 %v16630_v8  ;;  %22648 = vst [vmem:[#allocation57_spill] sm:$0xff] %v17215_v5  ;;  %v22651_v38 = vand.u32 4294901760, %v17120_v11  ;;  %v22652_v33 = vand.u32 4294901760, %v17144_v10  ;;  %v22656_v37 = vand.u32 4294901760, %v17163_v17  ;;  %v22661_v27 = vand.u32 4294901760, %v16623_v0 }
 0x86e   : > { %v13754_v3 = vpack.c.bf16 %v22647_v42, %v22646_v44  ;;  %13749 = vmatprep.subr.bf16.mxu0 %v13748_v32  ;;  %v5027_v44 = vsub.f32 %v17110_v54, %v22649_v4  ;;  %v5034_v8 = vsub.f32 %v17115_v35, %v22650_v28  ;;  %v22654_v32 = vand.u32 4294901760, %v17136_v41 }
 0x86f   : > { %v4915_v12 = vsub.f32 %v17120_v11, %v22651_v38  ;;  %v17231_v42 = vsub.f32 %v17144_v10, %v22652_v33  ;;  %v5041_v28 = vsub.f32 %v17141_v21, %v22655_v23  ;;  %v17243_v38 = vsub.f32 %v17163_v17, %v22656_v37 }
 0x870   : > { %13791 = vmatpush3.bf16.msra.mxu1 %v16805_v52  ;;  %v4922_v4 = vsub.f32 %v17136_v41, %v22654_v32  ;;  %v17248_v33 = vsub.f32 %v17166_v43, %v21869_v31  ;;  %v22659_v52 = vand.u32 4294901760, %v16604_v16  ;;  %v22660_v32 = vand.u32 4294901760, %v16609_v40  ;;  %13751 = vmatpush3.bf16.msra.mxu0 %v13750_v19  ;;  %v17283_v19 = vld [vmem:[%s15236_s15 + $0xc8] sm:$0xff] }
 0x871   : > { %22653 = vst [vmem:[#allocation59_spill] sm:$0xff] %v17231_v42  ;;  %22657 = vst [vmem:[#allocation60_spill] sm:$0xff] %v17243_v38  ;;  %13793 = vmatprep.subr.bf16.mxu1 %v16815_v26  ;;  %v22662_v23 = vand.u32 4294901760, %v16628_v49  ;;  %v5048_v37 = vsub.f32 %v17155_v60, %v21870_v57  ;;  %v22663_v21 = vand.u32 4294901760, %v17160_v14  ;;  %v22664_v26 = vand.u32 4294901760, %v17180_v39  ;;  %13753 = vmatprep.subr.bf16.mxu0 %v13752_v6 }
 0x872   : > { %22658 = vst [vmem:[#allocation62_spill] sm:$0xff] %v17248_v33  ;;  %v13756_v59 = vpack.c.bf16 %v22660_v32, %v22659_v52  ;;  %v22665_v0 = vand.u32 4294901760, %v17188_v58  ;;  %v17280_v32 = vld [vmem:[%s15236_s15 + $0xc0] sm:$0xff]  ;;  %v21877_v57 = vand.u32 4294901760, %v17231_v42  ;;  %v5042_v40 = vand.u32 4294901760, %v5041_v28 }
 0x873   : > { %v13758_v61 = vpack.c.bf16 %v22662_v23, %v22661_v27  ;;  %v4929_v31 = vsub.f32 %v17160_v14, %v22663_v21  ;;  %v4936_v16 = vsub.f32 %v17180_v39, %v22664_v26  ;;  %v22667_v27 = vand.u32 4294901760, %v17191_v46  ;;  %v17290_v14 = vld [vmem:[%s15236_s15 + $0xd0] sm:$0xff] }
 0x874   : > { %v17272_v49 = vsub.f32 %v17188_v58, %v22665_v0  ;;  %v5028_v21 = vand.u32 4294901760, %v5027_v44  ;;  %v5035_v23 = vand.u32 4294901760, %v5034_v8  ;;  %v4916_v26 = vand.u32 4294901760, %v4915_v12  ;;  %13795 = vmatpush3.bf16.msra.mxu1 %v16824_v34  ;;  %v17296_v12 = vld [vmem:[%s15236_s15 + $0xd8] sm:$0xff]  ;;  %13755 = vmatpush3.bf16.msra.mxu0 %v13754_v3 }
 0x875   : > { %v17277_v52 = vsub.f32 %v17191_v46, %v22667_v27  ;;  %v4923_v0 = vand.u32 4294901760, %v4922_v4  ;;  %13797 = vmatprep.subr.bf16.mxu1 %v16836_v36  ;;  %v5049_v60 = vand.u32 4294901760, %v5048_v37  ;;  %v4930_v6 = vand.u32 4294901760, %v4929_v31  ;;  %13757 = vmatprep.subr.bf16.mxu0 %v13756_v59  ;;  %v22671_v37 = vld [vmem:[#allocation20_spill] sm:$0xff] }
 0x876   : > { %22666 = vst [vmem:[#allocation63_spill] sm:$0xff] %v17272_v49  ;;  %v4937_v34 = vand.u32 4294901760, %v4936_v16  ;;  %v22669_v4 = vand.u32 4294901760, %v17215_v5  ;;  %v22670_v31 = vand.u32 4294901760, %v16637_v50  ;;  %v22672_v44 = vand.u32 4294901760, %v22671_v37  ;;  %v17321_v37 = vld [vmem:[%s15236_s15 + $0x50] sm:$0xff] }
 0x877   : > { %22668 = vst [vmem:[#allocation64_spill] sm:$0xff] %v17277_v52  ;;  %v5062_v3 = vsub.f32 %v17231_v42, %v21877_v57  ;;  %v22673_v27 = vand.u32 4294901760, %v17243_v38  ;;  %v22674_v50 = vand.u32 4294901760, %v17248_v33  ;;  %v17324_v57 = vld [vmem:[%s15236_s15 + $0x58] sm:$0xff]  ;;  %v22679_v36 = vand.u32 4294901760, %v17272_v49 }
 0x878   : > { %v5055_v28 = vsub.f32 %v17215_v5, %v22669_v4  ;;  %v13760_v8 = vpack.c.bf16 %v22672_v44, %v22670_v31  ;;  %13799 = vmatpush3.bf16.msra.mxu1 %v16847_v45  ;;  %v13836_v4 = vpack.c.bf16 %v5035_v23, %v5028_v21  ;;  %v13838_v45 = vpack.c.bf16 %v4923_v0, %v4916_v26  ;;  %v17347_v26 = vld [vmem:[%s15236_s15 + $0xe8] sm:$0xff] }
 0x879   : > { %v4943_v59 = vsub.f32 %v17243_v38, %v22673_v27  ;;  %v4950_v44 = vsub.f32 %v17248_v33, %v22674_v50  ;;  %13801 = vmatprep.subr.bf16.mxu1 %v16859_v22  ;;  %v13840_v21 = vpack.c.bf16 %v5049_v60, %v5042_v40  ;;  %v22675_v23 = vand.u32 4294901760, %v17280_v32  ;;  %13759 = vmatpush3.bf16.msra.mxu0 %v13758_v61  ;;  %v17344_v40 = vld [vmem:[%s15236_s15 + $0xe0] sm:$0xff]  ;;  %v22692_v38 = vld [vmem:[#allocation55_spill] sm:$0xff] }
 0x87a   : > { %v22677_v27 = vand.u32 4294901760, %v17283_v19  ;;  %v13842_v50 = vpack.c.bf16 %v4937_v34, %v4930_v6  ;;  %v5056_v31 = vand.u32 4294901760, %v5055_v28  ;;  %v5069_v33 = vsub.f32 %v17272_v49, %v22679_v36  ;;  %13761 = vmatprep.subr.bf16.mxu0 %v13760_v8  ;;  %v17373_v34 = vld [vmem:[%s15236_s15 + $0x60] sm:$0xff] }
 0x87b   : > { %v17330_v16 = vsub.f32 %v17280_v32, %v22675_v23  ;;  %v22680_v22 = vand.u32 4294901760, %v17277_v52  ;;  %v5063_v0 = vand.u32 4294901760, %v5062_v3  ;;  %v22681_v61 = vand.u32 4294901760, %v17290_v14  ;;  %v22690_v49 = vld [vmem:[#allocation53_spill] sm:$0xff] }
 0x87c   : > { %v17335_v39 = vsub.f32 %v17283_v19, %v22677_v27  ;;  %13803 = vmatpush3.bf16.msra.mxu1 %v16870_v24  ;;  %v22683_v36 = vand.u32 4294901760, %v17015_v63  ;;  %v22684_v23 = vand.u32 4294901760, %v17031_v2  ;;  %v4944_v8 = vand.u32 4294901760, %v4943_v59  ;;  %v17376_v2 = vld [vmem:[%s15236_s15 + $0x68] sm:$0xff]  ;;  %v22687_v59 = vld [vmem:[#allocation52_spill] sm:$0xff] }
 0x87d   : > { %22676 = vst [vmem:[#allocation65_spill] sm:$0xff] %v17330_v16  ;;  %v5076_v60 = vsub.f32 %v17277_v52, %v22680_v22  ;;  %v17352_v6 = vsub.f32 %v17290_v14, %v22681_v61  ;;  %v4951_v22 = vand.u32 4294901760, %v4950_v44  ;;  %v22685_v3 = vand.u32 4294901760, %v17296_v12  ;;  %13837 = vmatprep.subr.bf16.mxu1 %v13836_v4  ;;  %13763 = vmatpush3.bf16.msra.mxu0 %v22687_v59  ;;  %v22693_v24 = vld [vmem:[#allocation22_spill] sm:$0xff] }
 0x87e   : > { %22678 = vst [vmem:[#allocation13_spill] sm:$0xff] %v17335_v39  ;;  %v17361_v27 = vpack.c.bf16 %v22684_v23, %v22683_v36  ;;  %v5070_v44 = vand.u32 4294901760, %v5069_v33  ;;  %v22688_v23 = vld [vmem:[#allocation51_spill] sm:$0xff]  ;;  %v22691_v61 = vand.u32 4294901760, %v22690_v49  ;;  %13765 = vmatprep.subr.bf16.mxu0 %v22692_v38  ;;  %v13844_v63 = vpack.c.bf16 %v5063_v0, %v5056_v31  ;;  %v22701_v0 = vld [vmem:[#allocation56_spill] sm:$0xff] }
 0x87f   : > { %22682 = vst [vmem:[#allocation14_spill] sm:$0xff] %v17352_v6  ;;  %v17366_v52 = vsub.f32 %v17296_v12, %v22685_v3  ;;  %v5077_v36 = vand.u32 4294901760, %v5076_v60  ;;  %v22689_v3 = vand.u32 4294901760, %v22688_v23  ;;  %4772 = vmatmul.mubr.f32.vlgmr.msra.gmra.mrb[50].mxu1 %v22693_v24  ;;  %v22694_v5 = vand.u32 4294901760, %v17321_v37 }
 0x880   : > { %v4964_v28 = vsub.f32 %v22690_v49, %v22691_v61  ;;  %v22695_v60 = vand.u32 4294901760, %v17324_v57  ;;  %13839 = vmatpush3.bf16.msra.mxu1 %v13838_v45  ;;  %v13846_v61 = vpack.c.bf16 %v4951_v22, %v4944_v8  ;;  %v22697_v42 = vand.u32 4294901760, %v17330_v16 }
 0x881   : > { %22686 = vst [vmem:[#allocation66_spill] sm:$0xff] %v17366_v52  ;;  %v4957_v4 = vsub.f32 %v22688_v23, %v22689_v3  ;;  %v17391_v33 = vsub.f32 %v17321_v37, %v22694_v5  ;;  %v22696_v3 = vld [vmem:[#allocation23_spill] sm:$0xff]  ;;  %13841 = vmatprep.subr.bf16.mxu1 %v13840_v21  ;;  %v22698_v49 = vand.u32 4294901760, %v17335_v39  ;;  %v22699_v23 = vand.u32 4294901760, %v17344_v40  ;;  %13767 = vmatpush3.bf16.msra.mxu0 %v22701_v0 }
 0x882   : > { %v17396_v59 = vsub.f32 %v17324_v57, %v22695_v60  ;;  %4777 = vmatprep.mubr.f32.mxu1 %v22696_v3  ;;  %v5083_v5 = vsub.f32 %v17330_v16, %v22697_v42  ;;  %v22700_v8 = vand.u32 4294901760, %v17347_v26  ;;  %v13848_v21 = vpack.c.bf16 %v5077_v36, %v5070_v44 }
 0x883   : > { %v5090_v60 = vsub.f32 %v17335_v39, %v22698_v49  ;;  %v17411_v45 = vsub.f32 %v17344_v40, %v22699_v23  ;;  %v4958_v31 = vand.u32 4294901760, %v4957_v4  ;;  %v4965_v38 = vand.u32 4294901760, %v4964_v28  ;;  %v22703_v49 = vld [vmem:[#allocation58_spill] sm:$0xff]  ;;  %v22704_v39 = vld [vmem:[#allocation29_spill] sm:$0xff] }
 0x884   : > { %v17416_v22 = vsub.f32 %v17347_v26, %v22700_v8  ;;  %v22702_v42 = vand.u32 4294901760, %v16941_v62  ;;  %13769 = vmatprep.subr.bf16.mxu0 %v22703_v49  ;;  %4779 = vmatmul.mubr.f32.gmra.mrb[52].mxu1 %v22704_v39  ;;  %v22705_v23 = vld [vmem:[#allocation54_spill] sm:$0xff]  ;;  %v22707_v8 = vand.u32 4294901760, %v17352_v6  ;;  %v22708_v36 = vand.u32 4294901760, %v17366_v52 }
 0x885   : > { %v22706_v41 = vand.u32 4294901760, %v22705_v23  ;;  %13843 = vmatpush3.bf16.msra.mxu1 %v13842_v50  ;;  %5136 = vmatprep.mubr.f32.mxu1 %v17053_v20  ;;  %v22709_v0 = vand.u32 4294901760, %v17373_v34  ;;  %v5091_v28 = vand.u32 4294901760, %v5090_v60  ;;  %v21914_v50 = vand.u32 4294901760, %v17411_v45  ;;  %v22711_v20 = vld [vmem:[#allocation61_spill] sm:$0xff] }
 0x886   : > { %v4971_v16 = vsub.f32 %v16941_v62, %v22702_v42  ;;  %v5097_v35 = vsub.f32 %v17352_v6, %v22707_v8  ;;  %v5104_v4 = vsub.f32 %v17366_v52, %v22708_v36  ;;  %13845 = vmatprep.subr.bf16.mxu1 %v13844_v63  ;;  %v5084_v8 = vand.u32 4294901760, %v5083_v5  ;;  %13771 = vmatpush3.bf16.msra.mxu0 %v22711_v20 }
 0x887   : > { %v4978_v11 = vsub.f32 %v22705_v23, %v22706_v41  ;;  %v17439_v42 = vsub.f32 %v17373_v34, %v22709_v0  ;;  %v22710_v41 = vand.u32 4294901760, %v17376_v2  ;;  %v22712_v36 = vand.u32 4294901760, %v17034_v55  ;;  %13805 = vmatprep.subr.bf16.mxu0 %v17361_v27 }
 0x888   : > { %v22713_v52 = vand.u32 4294901760, %v17048_v15  ;;  %v22714_v6 = vand.u32 4294901760, %v17051_v56  ;;  %v22716_v63 = vand.u32 4294901760, %v17130_v48  ;;  %v13850_v60 = vpack.c.bf16 %v4965_v38, %v4958_v31 }
 0x889   : > { %v17444_v49 = vsub.f32 %v17376_v2, %v22710_v41  ;;  %v22715_v41 = vand.u32 4294901760, %v17063_v29  ;;  %v4972_v20 = vand.u32 4294901760, %v4971_v16  ;;  %v4979_v44 = vand.u32 4294901760, %v4978_v11  ;;  %13847 = vmatpush3.bf16.msra.mxu1 %v13846_v61  ;;  %4661 = vmatmul.mubr.f32.vlgmr.msra.gmra.mrb[42].mxu0 %v22693_v24  ;;  %v22720_v61 = vld [vmem:[#allocation26_spill] sm:$0xff] }
 0x88a   : > { %v17453_v0 = vpack.c.bf16 %v22713_v52, %v22712_v36  ;;  %v4883_v5 = vsub.f32 %v17130_v48, %v22716_v63  ;;  %v22717_v55 = vand.u32 4294901760, %v17391_v33  ;;  %v22718_v52 = vand.u32 4294901760, %v17396_v59  ;;  %13849 = vmatprep.subr.bf16.mxu1 %v13848_v21  ;;  %4666 = vmatprep.mubr.f32.mxu0 %v22696_v3 }
 0x88b   : > { %v17459_v23 = vpack.c.bf16 %v22715_v41, %v22714_v6  ;;  %v5098_v29 = vand.u32 4294901760, %v5097_v35  ;;  %v5105_v6 = vand.u32 4294901760, %v5104_v4  ;;  %v21913_v36 = vand.u32 4294901760, %v17439_v42  ;;  %v22721_v4 = vld [vmem:[#allocation30_spill] sm:$0xff] }
 0x88c   : > { %v4985_v15 = vsub.f32 %v17391_v33, %v22717_v55  ;;  %v4992_v56 = vsub.f32 %v17396_v59, %v22718_v52  ;;  %v21912_v41 = vand.u32 4294901760, %v17444_v49  ;;  %v13852_v16 = vpack.c.bf16 %v5091_v28, %v5084_v8  ;;  %13807 = vmatpush3.bf16.msra.mxu0 %v17453_v0 }
 0x88d   : > { %v5111_v11 = vsub.f32 %v17411_v45, %v21914_v50  ;;  %v22719_v38 = vand.u32 4294901760, %v17416_v22  ;;  %v2522_v35 = vadd.f32 %v22720_v61, %v17127_v30  ;;  %v2530_v63 = vadd.f32 %v22721_v4, %v16967_v9  ;;  %13809 = vmatprep.subr.bf16.mxu0 %v17459_v23  ;;  %13851 = vmatpush3.bf16.msra.mxu1 %v13850_v60 }
 0x88e   : > { %v22722_v24 = vand.u32 4294901760, %v17066_v53  ;;  %v22723_v21 = vand.u32 4294901760, %v17073_v51  ;;  %v4884_v8 = vand.u32 4294901760, %v4883_v5  ;;  %v22724_v55 = vand.u32 4294901760, %v17123_v7  ;;  %4668 = vmatmul.mubr.f32.gmra.mrb[44].mxu0 %v22704_v39  ;;  %13853 = vmatprep.subr.bf16.mxu1 %v13852_v16 }
 0x88f   : > { %v5118_v31 = vsub.f32 %v17416_v22, %v22719_v38  ;;  %v22725_v52 = vand.u32 4294901760, %v17144_v10  ;;  %v4986_v9 = vand.u32 4294901760, %v4985_v15  ;;  %v4993_v61 = vand.u32 4294901760, %v4992_v56 }
 0x890   : > { %v17490_v28 = vpack.c.bf16 %v22723_v21, %v22722_v24  ;;  %v13854_v3 = vpack.c.bf16 %v4979_v44, %v4972_v20  ;;  %v13856_v4 = vpack.c.bf16 %v5105_v6, %v5098_v29  ;;  %v4999_v53 = vsub.f32 %v17439_v42, %v21913_v36  ;;  %4885 = vmatprep.mubr.f32.mxu0 %v4884_v8  ;;  %v22731_v6 = vld [vmem:[#allocation28_spill] sm:$0xff] }
 0x891   : > { %v17497_v38 = vpack.c.bf16 %v22725_v52, %v22724_v55  ;;  %v5006_v51 = vsub.f32 %v17444_v49, %v21912_v41  ;;  %v5112_v7 = vand.u32 4294901760, %v5111_v11  ;;  %v5119_v10 = vand.u32 4294901760, %v5118_v31 }
 0x892   : > { %v22726_v5 = vand.u32 4294901760, %v17020_v1  ;;  %v22727_v44 = vand.u32 4294901760, %v17025_v47  ;;  %13811 = vmatpush3.bf16.msra.mxu0 %v17490_v28  ;;  %v22728_v20 = vand.u32 4294901760, %v17163_v17  ;;  %v22729_v56 = vand.u32 4294901760, %v17166_v43  ;;  %13855 = vmatpush3.bf16.msra.mxu1 %v13854_v3 }
 0x893   : > { %v2609_v39 = vmax.f32 %v2522_v35, 0.0  ;;  %v2528_v16 = vadd.f32 %v22731_v6, %v17127_v30  ;;  %13813 = vmatprep.subr.bf16.mxu0 %v17497_v38  ;;  %v22732_v11 = vand.u32 4294901760, %v17188_v58  ;;  %v22733_v31 = vand.u32 4294901760, %v17191_v46  ;;  %13857 = vmatprep.subr.bf16.mxu1 %v13856_v4  ;;  %v22737_v46 = vld [vmem:[#allocation34_spill] sm:$0xff] }
 0x894   : > { %v5125_v15 = vsub.f32 %v17020_v1, %v22726_v5  ;;  %v5132_v60 = vsub.f32 %v17025_v47, %v22727_v44  ;;  %v17517_v29 = vpack.c.bf16 %v22729_v56, %v22728_v20  ;;  %v13858_v21 = vpack.c.bf16 %v4993_v61, %v4986_v9  ;;  %v22739_v61 = vld [vmem:[#allocation32_spill] sm:$0xff] }
 0x895   : > { %v17526_v24 = vpack.c.bf16 %v22733_v31, %v22732_v11  ;;  %v5000_v8 = vand.u32 4294901760, %v4999_v53  ;;  %v5007_v17 = vand.u32 4294901760, %v5006_v51  ;;  %v22735_v43 = vand.u32 4294901760, %v17039_v18 }
 0x896   : > { %22730 = vst [vmem:[#allocation17_spill] sm:$0xff] %v17517_v29  ;;  %v22736_v35 = vand.u32 4294901760, %v17044_v25  ;;  %v2614_v52 = vmax.f32 %v2530_v63, 0.0  ;;  %v13860_v5 = vpack.c.bf16 %v5119_v10, %v5112_v7  ;;  %v5126_v58 = vand.u32 4294901760, %v5125_v15  ;;  %13815 = vmatpush3.bf16.msra.mxu0 %v17517_v29  ;;  %13859 = vmatpush3.bf16.msra.mxu1 %v13858_v21 }
 0x897   : > { %22734 = vst [vmem:[#allocation18_spill] sm:$0xff] %v17526_v24  ;;  %v5013_v55 = vsub.f32 %v17039_v18, %v22735_v43  ;;  %v5133_v44 = vand.u32 4294901760, %v5132_v60  ;;  %v22738_v9 = vand.u32 4294901760, %v22737_v46  ;;  %v22740_v3 = vand.u32 4294901760, %v22739_v61  ;;  %13817 = vmatprep.subr.bf16.mxu0 %v17526_v24  ;;  %v17589_v46 = vld [vmem:[%s15236_s15 + $0x180] sm:$0xff] }
 0x898   : > { %v5020_v30 = vsub.f32 %v17044_v25, %v22736_v35  ;;  %v22741_v51 = vand.u32 4294901760, %v17280_v32  ;;  %v22742_v20 = vand.u32 4294901760, %v17283_v19  ;;  %v17548_v63 = vand.u32 4294901760, %v2609_v39  ;;  %13861 = vmatprep.subr.bf16.mxu1 %v13860_v5  ;;  %v22745_v32 = vld [vmem:[#allocation9_spill] sm:$0xff]  ;;  %v22747_v19 = vld [vmem:[#allocation10_spill] sm:$0xff]  ;;  %22758 = vst [vmem:[#allocation52_spill] sm:$0xff] %v17589_v46 }
 0x899   : > { %v17539_v53 = vpack.c.bf16 %v22740_v3, %v22738_v9  ;;  %v13862_v4 = vpack.c.bf16 %v5007_v17, %v5000_v8  ;;  %v5014_v7 = vand.u32 4294901760, %v5013_v55  ;;  %v2613_v15 = vmax.f32 %v2528_v16, 0.0  ;;  %v17595_v9 = vld [vmem:[%s15236_s15 + $0x100] sm:$0xff] }
 0x89a   : > { %v17546_v56 = vpack.c.bf16 %v22742_v20, %v22741_v51  ;;  %22743 = vst [vmem:[#allocation15_spill] sm:$0xff] %v17548_v63  ;;  %v5021_v10 = vand.u32 4294901760, %v5020_v30  ;;  %v17550_v60 = vand.u32 4294901760, %v2614_v52  ;;  %v13864_v6 = vpack.c.bf16 %v5133_v44, %v5126_v58  ;;  %22760 = vst [vmem:[#allocation22_spill] sm:$0xff] %v17595_v9 }
 0x89b   : > { %13819 = vmatpush3.bf16.msra.mxu0 %v17539_v53  ;;  %v22746_v11 = vand.u32 4294901760, %v22745_v32  ;;  %v22748_v31 = vand.u32 4294901760, %v22747_v19  ;;  %v22749_v21 = vand.u32 4294901760, %v17290_v14  ;;  %v22750_v16 = vand.u32 4294901760, %v17296_v12  ;;  %13863 = vmatpush3.bf16.msra.mxu1 %v13862_v4  ;;  %v17626_v32 = vld [vmem:[%s15236_s15 + $0x110] sm:$0xff]  ;;  %v17634_v19 = vld [vmem:[%s15236_s15 + $0x118] sm:$0xff] }
 0x89c   : > { %22744 = vst [vmem:[#allocation27_spill] sm:$0xff] %v17550_v60  ;;  %13821 = vmatprep.subr.bf16.mxu0 %v17546_v56  ;;  %v17567_v17 = vsub.f32 %v2609_v39, %v17548_v63  ;;  %v13866_v55 = vpack.c.bf16 %v5021_v10, %v5014_v7  ;;  %v17569_v35 = vand.u32 4294901760, %v2613_v15  ;;  %v17572_v30 = vsub.f32 %v2614_v52, %v17550_v60  ;;  %v17592_v52 = vld [vmem:[%s15236_s15 + $0x188] sm:$0xff] }
 0x89d   : > { %v17557_v43 = vpack.c.bf16 %v22748_v31, %v22746_v11  ;;  %v17564_v8 = vpack.c.bf16 %v22750_v16, %v22749_v21  ;;  %13865 = vmatprep.subr.bf16.mxu1 %v13864_v6  ;;  %v22752_v14 = vand.u32 4294901760, %v17321_v37  ;;  %v22753_v12 = vand.u32 4294901760, %v17324_v57  ;;  %22759 = vst [vmem:[#allocation55_spill] sm:$0xff] %v17592_v52  ;;  %v17599_v57 = vld [vmem:[%s15236_s15 + $0x108] sm:$0xff]  ;;  %22768 = vst [vmem:[#allocation58_spill] sm:$0xff] %v17626_v32  ;;  %v22772_v21 = vld [vmem:[#allocation16_spill] sm:$0xff] }
 0x89e   : > { %22751 = vst [vmem:[#allocation40_spill] sm:$0xff] %v17569_v35  ;;  %v22755_v39 = vand.u32 4294901760, %v17344_v40  ;;  %v22756_v58 = vand.u32 4294901760, %v17347_v26  ;;  %v21917_v37 = vand.u32 4294901760, %v17567_v17  ;;  %22761 = vst [vmem:[#allocation23_spill] sm:$0xff] %v17599_v57  ;;  %v17602_v61 = vsub.f32 %v2613_v15, %v17569_v35  ;;  %v22766_v15 = vld [vmem:[#allocation41_spill] sm:$0xff] }
 0x89f   : > { %13823 = vmatpush3.bf16.msra.mxu0 %v17557_v43  ;;  %v17579_v5 = vpack.c.bf16 %v22753_v12, %v22752_v14  ;;  %13867 = vmatpush3.bf16.msra.mxu1 %v13866_v55  ;;  %v21915_v40 = vand.u32 4294901760, %v17572_v30  ;;  %v22762_v26 = vand.u32 4294901760, %v17373_v34  ;;  %v22763_v3 = vand.u32 4294901760, %v17376_v2  ;;  %22769 = vst [vmem:[#allocation29_spill] sm:$0xff] %v17634_v19  ;;  %v17640_v31 = vld [vmem:[%s15236_s15 + $0x1a8] sm:$0xff]  ;;  %v22774_v55 = vld [vmem:[#allocation19_spill] sm:$0xff] }
 0x8a0   : > { %13825 = vmatprep.subr.bf16.mxu0 %v17564_v8  ;;  %v17586_v44 = vpack.c.bf16 %v22756_v58, %v22755_v39  ;;  %13901 = vmatprep.subr.bf16.mxu1 %v17361_v27  ;;  %v21910_v20 = vand.u32 4294901760, %v17589_v46  ;;  %v21909_v4 = vand.u32 4294901760, %v17592_v52  ;;  %v21911_v7 = vand.u32 4294901760, %v17595_v9  ;;  %22771 = vst [vmem:[#allocation26_spill] sm:$0xff] %v17640_v31  ;;  %v22776_v39 = vld [vmem:[#allocation46_spill] sm:$0xff] }
 0x8a1   : > { %22754 = vst [vmem:[#allocation21_spill] sm:$0xff] %v17579_v5  ;;  %v17611_v51 = vpack.c.bf16 %v22763_v3, %v22762_v26  ;;  %v22765_v10 = vand.u32 4294901760, %v16981_v13  ;;  %v22767_v6 = vand.u32 4294901760, %v22766_v15  ;;  %v21916_v2 = vand.u32 4294901760, %v17599_v57  ;;  %v17637_v13 = vld [vmem:[%s15236_s15 + $0x1a0] sm:$0xff]  ;;  %v17659_v15 = vld [vmem:[%s15236_s15 + $0x128] sm:$0xff] }
 0x8a2   : > { %22757 = vst [vmem:[#allocation20_spill] sm:$0xff] %v17586_v44  ;;  %5138 = vmatmul.mubr.f32.vlgmr.msra.gmra.mrb[54].mxu1 %v17548_v63  ;;  %v4889_v11 = vsub.f32 %v17567_v17, %v21917_v37  ;;  %22770 = vst [vmem:[#allocation61_spill] sm:$0xff] %v17637_v13  ;;  %v22773_v16 = vand.u32 4294901760, %v22772_v21  ;;  %v22775_v14 = vand.u32 4294901760, %v22774_v55  ;;  %v13868_v58 = vpack.c.bf16 %v22776_v39, %v17110_v54  ;;  %v22784_v37 = vld [vmem:[#allocation47_spill] sm:$0xff]  ;;  %v22787_v55 = vld [vmem:[#allocation50_spill] sm:$0xff] }
 0x8a3   : > { %13827 = vmatpush3.bf16.msra.mxu0 %v17579_v5  ;;  %22764 = vst [vmem:[#allocation56_spill] sm:$0xff] %v17611_v51  ;;  %v17622_v34 = vpack.c.bf16 %v22767_v6, %v22765_v10  ;;  %5143 = vmatprep.mubr.f32.mxu1 %v17550_v60  ;;  %v4898_v26 = vsub.f32 %v17572_v30, %v21915_v40  ;;  %v21923_v3 = vand.u32 4294901760, %v17602_v61  ;;  %v17656_v10 = vld [vmem:[%s15236_s15 + $0x120] sm:$0xff]  ;;  %22778 = vst [vmem:[#allocation28_spill] sm:$0xff] %v17659_v15 }
 0x8a4   : > { %13829 = vmatprep.subr.bf16.mxu0 %v17586_v44  ;;  %13903 = vmatpush3.bf16.msra.mxu1 %v17453_v0  ;;  %v17647_v12 = vpack.c.bf16 %v22775_v14, %v22773_v16  ;;  %22777 = vst [vmem:[#allocation30_spill] sm:$0xff] %v17656_v10  ;;  %v17665_v6 = vsub.f32 %v17589_v46, %v21910_v20  ;;  %v4890_v41 = vand.u32 4294901760, %v4889_v11  ;;  %v22783_v36 = vand.u32 4294901760, %v17130_v48  ;;  %v17720_v46 = vld [vmem:[%s15236_s15 + $0x138] sm:$0xff] }
 0x8a5   : > { %13905 = vmatprep.subr.bf16.mxu1 %v17459_v23  ;;  %v17670_v21 = vsub.f32 %v17592_v52, %v21909_v4  ;;  %v17675_v16 = vsub.f32 %v17595_v9, %v21911_v7  ;;  %v17683_v14 = vsub.f32 %v17599_v57, %v21916_v2  ;;  %v4899_v2 = vand.u32 4294901760, %v4898_v26  ;;  %v22785_v4 = vld [vmem:[#allocation48_spill] sm:$0xff]  ;;  %v22786_v7 = vld [vmem:[#allocation49_spill] sm:$0xff]  ;;  %v17702_v9 = vld [vmem:[%s15236_s15 + $0x1b0] sm:$0xff]  ;;  %22793 = vst [vmem:[#allocation47_spill] sm:$0xff] %v17720_v46 }
 0x8a6   : > { %22779 = vst [vmem:[#allocation34_spill] sm:$0xff] %v17665_v6  ;;  %5145 = vmatmul.mubr.f32.gmra.mrb[56].mxu1 %v17569_v35  ;;  %v13870_v20 = vpack.c.bf16 %v22785_v4, %v22784_v37  ;;  %v4904_v11 = vsub.f32 %v17602_v61, %v21923_v3  ;;  %v13872_v57 = vpack.c.bf16 %v22787_v55, %v22786_v7  ;;  %22788 = vst [vmem:[#allocation41_spill] sm:$0xff] %v17702_v9  ;;  %v17717_v3 = vld [vmem:[%s15236_s15 + $0x130] sm:$0xff]  ;;  %v17766_v55 = vld [vmem:[%s15236_s15 + $0x1c0] sm:$0xff] }
 0x8a7   : > { %13831 = vmatpush3.bf16.msra.mxu0 %v17611_v51  ;;  %22780 = vst [vmem:[#allocation32_spill] sm:$0xff] %v17670_v21  ;;  %22781 = vst [vmem:[#allocation9_spill] sm:$0xff] %v17675_v16  ;;  %5396 = vmatprep.mubr.f32.mxu1 %v22783_v36  ;;  %v17705_v36 = vld [vmem:[%s15236_s15 + $0x1b8] sm:$0xff]  ;;  %v22790_v35 = vand.u32 4294901760, %v17626_v32  ;;  %v22794_v63 = vand.u32 4294901760, %v17634_v19  ;;  %v22796_v26 = vand.u32 4294901760, %v17637_v13 }
 0x8a8   : > { %13833 = vmatprep.subr.bf16.mxu0 %v17622_v34  ;;  %22782 = vst [vmem:[#allocation10_spill] sm:$0xff] %v17683_v14  ;;  %13907 = vmatpush3.bf16.msra.mxu1 %v17490_v28  ;;  %22789 = vst [vmem:[#allocation16_spill] sm:$0xff] %v17705_v36 }
 0x8a9   : > { %13909 = vmatprep.subr.bf16.mxu1 %v17497_v38  ;;  %v17714_v52 = vsub.f32 %v17626_v32, %v22790_v35  ;;  %22792 = vst [vmem:[#allocation46_spill] sm:$0xff] %v17717_v3  ;;  %v17726_v40 = vsub.f32 %v17634_v19, %v22794_v63  ;;  %v17731_v50 = vsub.f32 %v17637_v13, %v22796_v26  ;;  %v22798_v35 = vand.u32 4294901760, %v17640_v31  ;;  %v22807_v13 = vld [vmem:[#allocation11_spill] sm:$0xff]  ;;  %v22809_v26 = vld [vmem:[#allocation57_spill] sm:$0xff] }
 0x8aa   : > { %v22802_v63 = vand.u32 4294901760, %v17659_v15  ;;  %22811 = vst [vmem:[#allocation11_spill] sm:$0xff] %v17766_v55 }
 0x8ab   : > { %13835 = vmatpush3.bf16.msra.mxu0 %v17647_v12  ;;  %22791 = vst [vmem:[#allocation19_spill] sm:$0xff] %v17714_v52  ;;  %22795 = vst [vmem:[#allocation48_spill] sm:$0xff] %v17726_v40  ;;  %v17736_v32 = vsub.f32 %v17640_v31, %v22798_v35  ;;  %v4905_v35 = vand.u32 4294901760, %v4904_v11  ;;  %v17783_v31 = vld [vmem:[%s15236_s15 + $0x140] sm:$0xff] }
 0x8ac   : > { %13869 = vmatprep.subr.bf16.mxu0 %v13868_v58  ;;  %22797 = vst [vmem:[#allocation49_spill] sm:$0xff] %v17731_v50  ;;  %13911 = vmatpush3.bf16.msra.mxu1 %v17517_v29  ;;  %v22800_v58 = vand.u32 4294901760, %v17656_v10  ;;  %v17747_v19 = vsub.f32 %v17659_v15, %v22802_v63  ;;  %v22805_v29 = vand.u32 4294901760, %v17670_v21  ;;  %v22810_v15 = vld [vmem:[#allocation59_spill] sm:$0xff] }
 0x8ad   : > { %22799 = vst [vmem:[#allocation67_spill] sm:$0xff] %v17736_v32  ;;  %13913 = vmatprep.subr.bf16.mxu1 %v17526_v24  ;;  %v13876_v24 = vpack.c.bf16 %v22810_v15, %v22809_v26  ;;  %v17780_v26 = vld [vmem:[%s15236_s15 + $0x1c8] sm:$0xff] }
 0x8ae   : > { %v17742_v60 = vsub.f32 %v17656_v10, %v22800_v58  ;;  %22803 = vst [vmem:[#allocation69_spill] sm:$0xff] %v17747_v19  ;;  %4891 = vmatmul.mubr.f32.vlgmr.msra.gmra.mrb[46].mxu0 %v4890_v41  ;;  %v22804_v10 = vand.u32 4294901760, %v17665_v6  ;;  %v22808_v41 = vld [vmem:[#allocation12_spill] sm:$0xff]  ;;  %v22812_v58 = vand.u32 4294901760, %v17675_v16  ;;  %v22813_v6 = vand.u32 4294901760, %v17683_v14 }
 0x8af   : > { %4900 = vmatprep.mubr.f32.mxu0 %v4899_v2  ;;  %13871 = vmatpush3.bf16.msra.mxu0 %v13870_v20  ;;  %v13874_v11 = vpack.c.bf16 %v22808_v41, %v22807_v13  ;;  %v22816_v2 = vld [vmem:[#allocation62_spill] sm:$0xff] }
 0x8b0   : > { %22801 = vst [vmem:[#allocation68_spill] sm:$0xff] %v17742_v60  ;;  %v17758_v63 = vpack.c.bf16 %v22805_v29, %v22804_v10  ;;  %v17772_v21 = vpack.c.bf16 %v22813_v6, %v22812_v58  ;;  %13873 = vmatprep.subr.bf16.mxu0 %v13872_v57  ;;  %v22815_v29 = vld [vmem:[#allocation60_spill] sm:$0xff]  ;;  %22818 = vst [vmem:[#allocation62_spill] sm:$0xff] %v17783_v31  ;;  %v17786_v41 = vld [vmem:[%s15236_s15 + $0x148] sm:$0xff]  ;;  %13915 = vmatpush3.bf16.msra.mxu1 %v17539_v53  ;;  %v22820_v58 = vand.u32 4294901760, %v17702_v9 }
 0x8b1   : > { %v13878_v20 = vpack.c.bf16 %v22816_v2, %v22815_v29  ;;  %22817 = vst [vmem:[#allocation60_spill] sm:$0xff] %v17780_v26  ;;  %22819 = vst [vmem:[#allocation72_spill] sm:$0xff] %v17786_v41  ;;  %13917 = vmatprep.subr.bf16.mxu1 %v17546_v56  ;;  %v22826_v57 = vand.u32 4294901760, %v17720_v46 }
 0x8b2   : > { %22806 = vst [vmem:[#allocation70_spill] sm:$0xff] %v17758_v63  ;;  %22814 = vst [vmem:[#allocation71_spill] sm:$0xff] %v17772_v21  ;;  %v17794_v10 = vsub.f32 %v17702_v9, %v22820_v58  ;;  %v22822_v63 = vand.u32 4294901760, %v17705_v36  ;;  %4906 = vmatmul.mubr.f32.gmra.mrb[48].mxu0 %v4905_v35  ;;  %v22824_v21 = vand.u32 4294901760, %v17717_v3  ;;  %v22828_v9 = vand.u32 4294901760, %v17714_v52 }
 0x8b3   : > { %v17810_v14 = vsub.f32 %v17720_v46, %v22826_v57  ;;  %13875 = vmatpush3.bf16.msra.mxu0 %v13874_v11  ;;  %5280 = vmatprep.mubr.f32.mxu0 %v17130_v48  ;;  %v22831_v57 = vand.u32 4294901760, %v17731_v50  ;;  %v22832_v58 = vand.u32 4294901760, %v17736_v32  ;;  %v22836_v11 = vand.u32 4294901760, %v17742_v60  ;;  %v17841_v32 = vld [vmem:[%s15236_s15 + $0x1d0] sm:$0xff] }
 0x8b4   : > { %22821 = vst [vmem:[#allocation73_spill] sm:$0xff] %v17794_v10  ;;  %v17799_v15 = vsub.f32 %v17705_v36, %v22822_v63  ;;  %v17805_v6 = vsub.f32 %v17717_v3, %v22824_v21  ;;  %v22829_v63 = vand.u32 4294901760, %v17726_v40  ;;  %13877 = vmatprep.subr.bf16.mxu0 %v13876_v24  ;;  %v22834_v40 = vld [vmem:[#allocation63_spill] sm:$0xff]  ;;  %v22837_v48 = vand.u32 4294901760, %v17747_v19  ;;  %13919 = vmatpush3.bf16.msra.mxu1 %v17557_v43  ;;  %v22840_v3 = vld [vmem:[#allocation53_spill] sm:$0xff] }
 0x8b5   : > { %22827 = vst [vmem:[#allocation76_spill] sm:$0xff] %v17810_v14  ;;  %v17827_v46 = vpack.c.bf16 %v22832_v58, %v22831_v57  ;;  %v22839_v21 = vld [vmem:[#allocation51_spill] sm:$0xff]  ;;  %v11515_v58 = vpop.f32.mrb[30].mxu1  ;;  %13921 = vmatprep.subr.bf16.mxu1 %v17564_v8  ;;  %v22845_v19 = vand.u32 4294901760, %v17780_v26  ;;  %v22846_v57 = vand.u32 4294901760, %v17783_v31 }
 0x8b6   : > { %22823 = vst [vmem:[#allocation74_spill] sm:$0xff] %v17799_v15  ;;  %22825 = vst [vmem:[#allocation75_spill] sm:$0xff] %v17805_v6  ;;  %v17817_v35 = vpack.c.bf16 %v22829_v63, %v22828_v9  ;;  %v22835_v9 = vld [vmem:[#allocation64_spill] sm:$0xff]  ;;  %v17835_v36 = vpack.c.bf16 %v22837_v48, %v22836_v11  ;;  %v22847_v11 = vand.u32 4294901760, %v17786_v41  ;;  %v17872_v24 = vld [vmem:[%s15236_s15 + $0x150] sm:$0xff] }
 0x8b7   : > { %22833 = vst [vmem:[#allocation78_spill] sm:$0xff] %v17827_v46  ;;  %v13880_v63 = vpack.c.bf16 %v22835_v9, %v22834_v40  ;;  %22841 = vst [vmem:[#allocation64_spill] sm:$0xff] %v17841_v32  ;;  %v17849_v48 = vld [vmem:[%s15236_s15 + $0x1d8] sm:$0xff]  ;;  %13879 = vmatpush3.bf16.msra.mxu0 %v13878_v20  ;;  %v17859_v60 = vsub.f32 %v17780_v26, %v22845_v19  ;;  %v17864_v46 = vsub.f32 %v17783_v31, %v22846_v57  ;;  %v22851_v19 = vld [vmem:[#allocation65_spill] sm:$0xff] }
 0x8b8   : > { %22830 = vst [vmem:[#allocation77_spill] sm:$0xff] %v17817_v35  ;;  %22838 = vst [vmem:[#allocation63_spill] sm:$0xff] %v17835_v36  ;;  %v13882_v35 = vpack.c.bf16 %v22840_v3, %v22839_v21  ;;  %v11516_v36 = vpop.f32.mrb[31].mxu1  ;;  %v22843_v3 = vand.u32 4294901760, %v17766_v55  ;;  %v17869_v20 = vsub.f32 %v17786_v41, %v22847_v11  ;;  %v22852_v26 = vld [vmem:[#allocation13_spill] sm:$0xff]  ;;  %13923 = vmatpush3.bf16.msra.mxu1 %v17579_v5  ;;  %v22853_v11 = vand.u32 4294901760, %v17794_v10 }
 0x8b9   : > { %22842 = vst [vmem:[#allocation51_spill] sm:$0xff] %v17849_v48  ;;  %22849 = vst [vmem:[#allocation80_spill] sm:$0xff] %v17872_v24  ;;  %13881 = vmatprep.subr.bf16.mxu0 %v13880_v63  ;;  %v13884_v50 = vpack.c.bf16 %v22852_v26, %v22851_v19  ;;  %v22854_v41 = vand.u32 4294901760, %v17799_v15  ;;  %v22856_v63 = vand.u32 4294901760, %v17805_v6  ;;  %v11518_v16 = vpop.f32.mrb[32].mxu1  ;;  %13925 = vmatprep.subr.bf16.mxu1 %v17586_v44  ;;  %v22859_v57 = vld [vmem:[#allocation54_spill] sm:$0xff] }
 0x8ba   : > { %v17854_v21 = vsub.f32 %v17766_v55, %v22843_v3  ;;  %22848 = vst [vmem:[#allocation79_spill] sm:$0xff] %v17869_v20  ;;  %v17875_v3 = vld [vmem:[%s15236_s15 + $0x158] sm:$0xff]  ;;  %v17877_v55 = vadd.f32 %v11516_v36, %v11515_v58  ;;  %v22857_v36 = vand.u32 4294901760, %v17810_v14  ;;  %v13886_v31 = vpack.c.bf16 %v22859_v57, %v16941_v62  ;;  %v17909_v57 = vld [vmem:[%s15236_s15 + $0x1e8] sm:$0xff]  ;;  %v17916_v6 = vld [vmem:[%s15236_s15 + $0x160] sm:$0xff] }
 0x8bb   : > { %22850 = vst [vmem:[#allocation81_spill] sm:$0xff] %v17875_v3  ;;  %v17888_v52 = vpack.c.bf16 %v22854_v41, %v22853_v11  ;;  %v17902_v11 = vld [vmem:[%s15236_s15 + $0x1e0] sm:$0xff]  ;;  %13883 = vmatpush3.bf16.msra.mxu0 %v13882_v35  ;;  %v22860_v41 = vld [vmem:[#allocation14_spill] sm:$0xff]  ;;  %v22876_v26 = vand.u32 4294901760, %v17875_v3 }
 0x8bc   : > { %22844 = vst [vmem:[#allocation53_spill] sm:$0xff] %v17854_v21  ;;  %v17894_v58 = vpack.c.bf16 %v22857_v36, %v22856_v63  ;;  %13885 = vmatprep.subr.bf16.mxu0 %v13884_v50  ;;  %v22861_v14 = vld [vmem:[#allocation66_spill] sm:$0xff]  ;;  %13927 = vmatpush3.bf16.msra.mxu1 %v17611_v51  ;;  %v22865_v50 = vand.u32 4294901760, %v17849_v48  ;;  %v22870_v51 = vand.u32 4294901760, %v17859_v60 }
 0x8bd   : > { %22855 = vst [vmem:[#allocation65_spill] sm:$0xff] %v17888_v52  ;;  %v11519_v52 = vpop.f32.mrb[33].mxu1  ;;  %v13888_v35 = vpack.c.bf16 %v22861_v14, %v22860_v41  ;;  %v17919_v15 = vld [vmem:[%s15236_s15 + $0x168] sm:$0xff]  ;;  %v17922_v63 = vld [vmem:[%s15236_s15 + $0x1f0] sm:$0xff]  ;;  %v17942_v14 = vld [vmem:[%s15236_s15 + $0x178] sm:$0xff]  ;;  %v22869_v41 = vand.u32 4294901760, %v17854_v21  ;;  %13929 = vmatprep.subr.bf16.mxu1 %v17622_v34  ;;  %v17965_v21 = vsub.f32 %v17875_v3, %v22876_v26 }
 0x8be   : > { %22858 = vst [vmem:[#allocation82_spill] sm:$0xff] %v17894_v58  ;;  %v17911_v10 = vadd.f32 %v11519_v52, %v11518_v16  ;;  %22862 = vst [vmem:[#allocation54_spill] sm:$0xff] %v17919_v15  ;;  %v22864_v58 = vand.u32 4294901760, %v17841_v32  ;;  %v17933_v52 = vsub.f32 %v17849_v48, %v22865_v50  ;;  %v17936_v16 = vld [vmem:[%s15236_s15 + $0x1f8] sm:$0xff]  ;;  %v17939_v36 = vld [vmem:[%s15236_s15 + $0x170] sm:$0xff]  ;;  %v22875_v50 = vand.u32 4294901760, %v17872_v24 }
 0x8bf   : > { %22863 = vst [vmem:[#allocation83_spill] sm:$0xff] %v17922_v63  ;;  %22866 = vst [vmem:[#allocation84_spill] sm:$0xff] %v17936_v16  ;;  %v17948_v44 = vpack.c.bf16 %v22870_v51, %v22869_v41  ;;  %13887 = vmatpush3.bf16.msra.mxu0 %v13886_v31  ;;  %v11477_v31 = vpop.f32.mrb[22].mxu0  ;;  %v22877_v26 = vand.u32 4294901760, %v17902_v11  ;;  %v22880_v51 = vand.u32 4294901760, %v17919_v15 }
 0x8c0   : > { %v17928_v62 = vsub.f32 %v17841_v32, %v22864_v58  ;;  %22867 = vst [vmem:[#allocation85_spill] sm:$0xff] %v17939_v36  ;;  %22868 = vst [vmem:[#allocation86_spill] sm:$0xff] %v17942_v14  ;;  %v22872_v58 = vand.u32 4294901760, %v17864_v46  ;;  %v22873_v32 = vand.u32 4294901760, %v17869_v20  ;;  %v17960_v48 = vsub.f32 %v17872_v24, %v22875_v50  ;;  %13889 = vmatprep.subr.bf16.mxu0 %v13888_v35  ;;  %v11478_v3 = vpop.f32.mrb[23].mxu0 }
 0x8c1   : > { %22871 = vst [vmem:[#allocation87_spill] sm:$0xff] %v17948_v44  ;;  %v13892_v44 = vpack.c.bf16 %v17416_v22, %v17411_v45  ;;  %13931 = vmatpush3.bf16.msra.mxu1 %v17647_v12  ;;  %v17992_v24 = vsub.f32 %v17902_v11, %v22877_v26  ;;  %v22878_v20 = vand.u32 4294901760, %v17909_v57  ;;  %v22879_v50 = vand.u32 4294901760, %v17916_v6 }
 0x8c2   : > { %v17954_v5 = vpack.c.bf16 %v22873_v32, %v22872_v58  ;;  %v13890_v32 = vpack.c.bf16 %v17396_v59, %v17391_v33  ;;  %v13894_v58 = vpack.c.bf16 %v17444_v49, %v17439_v42  ;;  %13965 = vmatprep.subr.bf16.mxu1 %v17361_v27  ;;  %v18007_v41 = vsub.f32 %v17919_v15, %v22880_v51 }
 0x8c3   : > { %v18002_v27 = vsub.f32 %v17916_v6, %v22879_v50  ;;  %v22881_v26 = vand.u32 4294901760, %v17922_v63  ;;  %v22885_v50 = vand.u32 4294901760, %v17939_v36  ;;  %v22887_v51 = vand.u32 4294901760, %v17942_v14 }
 0x8c4   : > { %22874 = vst [vmem:[#allocation88_spill] sm:$0xff] %v17954_v5  ;;  %v13896_v5 = vpack.c.bf16 %v17025_v47, %v17020_v1  ;;  %v17997_v1 = vsub.f32 %v17909_v57, %v22878_v20  ;;  %v11479_v47 = vadd.f32 %v11478_v3, %v11477_v31  ;;  %13891 = vmatpush3.bf16.msra.mxu0 %v13890_v32  ;;  %v22882_v20 = vand.u32 4294901760, %v17567_v17 }
 0x8c5   : > { %v18012_v35 = vsub.f32 %v17922_v63, %v22881_v26  ;;  %13893 = vmatprep.subr.bf16.mxu0 %v13892_v44  ;;  %v22883_v3 = vand.u32 4294901760, %v17936_v16  ;;  %v18024_v31 = vsub.f32 %v17939_v36, %v22885_v50  ;;  %v18029_v15 = vsub.f32 %v17942_v14, %v22887_v51  ;;  %v11480_v26 = vpop.f32.mrb[24].mxu0 }
 0x8c6   : > { %5400 = vmatmul.mubr.f32.vlgmr.msra.gmra.mrb[58].mxu1 %v22882_v20  ;;  %v18032_v44 = vadd.f32 %v17877_v55, %v11479_v47  ;;  %v22889_v20 = vand.u32 4294901760, %v17572_v30  ;;  %v22893_v36 = vand.u32 4294901760, %v17960_v48  ;;  %v22894_v51 = vand.u32 4294901760, %v17965_v21  ;;  %v11481_v55 = vpop.f32.mrb[25].mxu0 }
 0x8c7   : > { %v18019_v32 = vsub.f32 %v17936_v16, %v22883_v3  ;;  %22886 = vst [vmem:[#allocation90_spill] sm:$0xff] %v18024_v31  ;;  %22888 = vst [vmem:[#allocation91_spill] sm:$0xff] %v18029_v15  ;;  %13967 = vmatpush3.bf16.msra.mxu1 %v17453_v0  ;;  %v22890_v3 = vand.u32 4294901760, %v17928_v62  ;;  %v22891_v16 = vand.u32 4294901760, %v17933_v52  ;;  %v13898_v47 = vpack.c.bf16 %v17044_v25, %v17039_v18 }
 0x8c8   : > { %5407 = vmatprep.mubr.f32.mxu1 %v22889_v20  ;;  %v18047_v14 = vpack.c.bf16 %v22894_v51, %v22893_v36  ;;  %13969 = vmatprep.subr.bf16.mxu1 %v17459_v23  ;;  %v22896_v0 = vand.u32 4294901760, %v17110_v54  ;;  %v22897_v20 = vand.u32 4294901760, %v22776_v39  ;;  %v21992_v36 = vand.u32 4294901760, %v18002_v27 }
 0x8c9   : > { %22884 = vst [vmem:[#allocation89_spill] sm:$0xff] %v18019_v32  ;;  %v18041_v50 = vpack.c.bf16 %v22891_v16, %v22890_v3  ;;  %v21996_v16 = vand.u32 4294901760, %v17992_v24  ;;  %v11482_v3 = vadd.f32 %v11481_v55, %v11480_v26  ;;  %13895 = vmatpush3.bf16.msra.mxu0 %v13894_v58  ;;  %v21991_v51 = vand.u32 4294901760, %v18007_v41  ;;  %v22899_v26 = vld [vmem:[#allocation43_spill] sm:$0xff] }
 0x8ca   : > { %22895 = vst [vmem:[#allocation93_spill] sm:$0xff] %v18047_v14  ;;  %v13932_v63 = vpack.c.bf16 %v22897_v20, %v22896_v0  ;;  %13897 = vmatprep.subr.bf16.mxu0 %v13896_v5  ;;  %v22898_v23 = vand.u32 4294901760, %v17602_v61  ;;  %v21990_v18 = vand.u32 4294901760, %v18012_v35  ;;  %v21989_v25 = vand.u32 4294901760, %v18019_v32 }
 0x8cb   : > { %22892 = vst [vmem:[#allocation92_spill] sm:$0xff] %v18041_v50  ;;  %v21993_v50 = vand.u32 4294901760, %v17997_v1  ;;  %v21995_v54 = vand.u32 4294901760, %v18024_v31  ;;  %v21994_v39 = vand.u32 4294901760, %v18029_v15  ;;  %v18067_v58 = vadd.f32 %v17911_v10, %v11482_v3  ;;  %13971 = vmatpush3.bf16.msra.mxu1 %v17490_v28 }
 0x8cc   : > { %5411 = vmatmul.mubr.f32.gmra.mrb[60].mxu1 %v22898_v23  ;;  %v18081_v55 = vpack.c.bf16 %v21991_v51, %v21992_v36  ;;  %13973 = vmatprep.subr.bf16.mxu1 %v17497_v38  ;;  %v18088_v28 = vpack.c.bf16 %v21989_v25, %v21990_v18  ;;  %v22904_v0 = vand.u32 4294901760, %v22784_v37  ;;  %v22905_v20 = vand.u32 4294901760, %v22785_v4  ;;  %v18101_v23 = vld [vmem:[%s15236_s15 + $0x190] sm:$0xff]  ;;  %v18104_v38 = vld [vmem:[%s15236_s15 + $0x198] sm:$0xff] }
 0x8cd   : > { %5688 = vmatprep.mubr.f32.mxu1 %v22899_v26  ;;  %v18075_v5 = vpack.c.bf16 %v21993_v50, %v21996_v16  ;;  %v18094_v10 = vpack.c.bf16 %v21994_v39, %v21995_v54  ;;  %13899 = vmatpush3.bf16.msra.mxu0 %v13898_v47  ;;  %v22906_v25 = vand.u32 4294901760, %v22786_v7  ;;  %v22907_v18 = vld [vmem:[#allocation50_spill] sm:$0xff]  ;;  %v22909_v50 = vld [vmem:[#allocation17_spill] sm:$0xff]  ;;  %v21998_v37 = vand.u32 4294901760, %v18101_v23 }
 0x8ce   : > { %22901 = vst [vmem:[#allocation94_spill] sm:$0xff] %v18081_v55  ;;  %22902 = vst [vmem:[#allocation95_spill] sm:$0xff] %v18088_v28  ;;  %v13934_v3 = vpack.c.bf16 %v22905_v20, %v22904_v0  ;;  %13933 = vmatprep.subr.bf16.mxu0 %v13932_v63  ;;  %v22908_v51 = vand.u32 4294901760, %v22907_v18  ;;  %v22910_v47 = vld [vmem:[#allocation18_spill] sm:$0xff]  ;;  %v21997_v4 = vand.u32 4294901760, %v18104_v38  ;;  %v22911_v20 = vld [vmem:[#allocation36_spill] sm:$0xff] }
 0x8cf   : > { %22900 = vst [vmem:[#allocation43_spill] sm:$0xff] %v18075_v5  ;;  %22903 = vst [vmem:[#allocation96_spill] sm:$0xff] %v18094_v10  ;;  %13975 = vmatpush3.bf16.msra.mxu1 %v22909_v50  ;;  %v18116_v0 = vld [vmem:[%s15230_s0] sm:$0xf]  ;;  %v22912_v7 = vand.u32 4294901760, %v22807_v13  ;;  %v22946_v28 = vld [vmem:[#allocation19_spill] sm:$0xff] }
 0x8d0   : > { %v13936_v36 = vpack.c.bf16 %v22908_v51, %v22906_v25  ;;  %5283 = vmatmul.mubr.f32.vlgmr.msra.gmra.mrb[50].mxu0 %v17567_v17  ;;  %13977 = vmatprep.subr.bf16.mxu1 %v22910_v47  ;;  %v18120_v63 = vrot.slane %v18116_v0, %v22911_v20  ;;  %v22913_v50 = vld [vmem:[#allocation12_spill] sm:$0xff]  ;;  %v22915_v18 = vld [vmem:[#allocation57_spill] sm:$0xff]  ;;  %v22917_v47 = vld [vmem:[#allocation59_spill] sm:$0xff]  ;;  %v18142_v13 = vsub.f32 %v18104_v38, %v21997_v4  ;;  %v22947_v55 = vand.u32 4294901760, %v22946_v28 }
 0x8d1   : > { %5289 = vmatprep.mubr.f32.mxu0 %v17572_v30  ;;  %13935 = vmatpush3.bf16.msra.mxu0 %v13934_v3  ;;  %v22914_v51 = vand.u32 4294901760, %v22913_v50  ;;  %v22916_v25 = vand.u32 4294901760, %v22915_v18  ;;  %v22918_v39 = vand.u32 4294901760, %v22917_v47  ;;  %v18137_v30 = vsub.f32 %v18101_v23, %v21998_v37  ;;  %v22926_v18 = vld [vmem:[#allocation34_spill] sm:$0xff]  ;;  %v22937_v37 = vld [vmem:[#allocation21_spill] sm:$0xff]  ;;  %v22948_v5 = vld [vmem:[#allocation48_spill] sm:$0xff] }
 0x8d2   : > { %13937 = vmatprep.subr.bf16.mxu0 %v13936_v36  ;;  %22920 = vst [vmem:[#allocation17_spill] sm:$0xff] %v18142_v13  ;;  %v22921_v36 = vld [vmem:[#allocation33_spill] sm:$0xff]  ;;  %v22949_v14 = vand.u32 4294901760, %v22948_v5 }
 0x8d3   : > { %v13938_v17 = vpack.c.bf16 %v22914_v51, %v22912_v7  ;;  %v13940_v54 = vpack.c.bf16 %v22918_v39, %v22916_v25  ;;  %13979 = vmatpush3.bf16.msra.mxu1 %v17539_v53  ;;  %22919 = vst [vmem:[#allocation50_spill] sm:$0xff] %v18137_v30  ;;  %v2601_v3 = vadd.f32 %v22921_v36, %v18120_v63  ;;  %v22922_v53 = vand.u32 4294901760, %v22815_v29  ;;  %v11591_v51 = vpop.f32.mrb[34].mxu1  ;;  %v22928_v25 = vld [vmem:[#allocation32_spill] sm:$0xff] }
 0x8d4   : > { %5292 = vmatmul.mubr.f32.gmra.mrb[52].mxu0 %v17602_v61  ;;  %13981 = vmatprep.subr.bf16.mxu1 %v17546_v56  ;;  %v22923_v56 = vand.u32 4294901760, %v22816_v2  ;;  %v22924_v39 = vand.u32 4294901760, %v22834_v40  ;;  %v22925_v7 = vand.u32 4294901760, %v22835_v9  ;;  %v22929_v29 = vand.u32 4294901760, %v22928_v25  ;;  %v11592_v9 = vpop.f32.mrb[35].mxu1 }
 0x8d5   : > { %13939 = vmatpush3.bf16.msra.mxu0 %v13938_v17  ;;  %5577 = vmatprep.mubr.f32.mxu0 %v22899_v26  ;;  %v22927_v17 = vand.u32 4294901760, %v22926_v18  ;;  %v22000_v40 = vand.u32 4294901760, %v18142_v13  ;;  %v2612_v47 = vmax.f32 %v2601_v3, 0.0  ;;  %v18165_v36 = vadd.f32 %v11592_v9, %v11591_v51  ;;  %v11594_v3 = vpop.f32.mrb[36].mxu1 }
 0x8d6   : > { %v13942_v61 = vpack.c.bf16 %v22923_v56, %v22922_v53  ;;  %13941 = vmatprep.subr.bf16.mxu0 %v13940_v54  ;;  %v13944_v50 = vpack.c.bf16 %v22925_v7, %v22924_v39  ;;  %v5952_v2 = vsub.f32 %v22928_v25, %v22929_v29  ;;  %v21999_v54 = vand.u32 4294901760, %v18137_v30  ;;  %v22933_v39 = vld [vmem:[#allocation9_spill] sm:$0xff]  ;;  %v22935_v29 = vld [vmem:[#allocation10_spill] sm:$0xff] }
 0x8d7   : > { %13983 = vmatpush3.bf16.msra.mxu1 %v17557_v43  ;;  %v5945_v26 = vsub.f32 %v22926_v18, %v22927_v17  ;;  %v22930_v43 = vand.u32 4294901760, %v22851_v19  ;;  %v22934_v7 = vand.u32 4294901760, %v22933_v39  ;;  %v22936_v16 = vand.u32 4294901760, %v22935_v29 }
 0x8d8   : > { %13985 = vmatprep.subr.bf16.mxu1 %v17564_v8  ;;  %v22931_v8 = vld [vmem:[#allocation13_spill] sm:$0xff]  ;;  %v5959_v19 = vsub.f32 %v18137_v30, %v21999_v54  ;;  %v5966_v9 = vsub.f32 %v18142_v13, %v22000_v40  ;;  %v22945_v54 = vld [vmem:[#allocation56_spill] sm:$0xff]  ;;  %v5847_v40 = vsub.f32 %v22946_v28, %v22947_v55  ;;  %v22955_v55 = vand.u32 4294901760, %v17391_v33 }
 0x8d9   : > { %13943 = vmatpush3.bf16.msra.mxu0 %v13942_v61  ;;  %v22932_v53 = vand.u32 4294901760, %v22931_v8  ;;  %v5833_v17 = vsub.f32 %v22933_v39, %v22934_v7  ;;  %v5840_v4 = vsub.f32 %v22935_v29, %v22936_v16  ;;  %v22938_v61 = vld [vmem:[#allocation20_spill] sm:$0xff]  ;;  %v5946_v51 = vand.u32 4294901760, %v5945_v26  ;;  %v22940_v8 = vld [vmem:[#allocation39_spill] sm:$0xff]  ;;  %v11595_v16 = vpop.f32.mrb[37].mxu1  ;;  %v22943_v26 = vld [vmem:[#allocation66_spill] sm:$0xff] }
 0x8da   : > { %13945 = vmatprep.subr.bf16.mxu0 %v13944_v50  ;;  %v5953_v50 = vand.u32 4294901760, %v5952_v2  ;;  %v22944_v2 = vand.u32 4294901760, %v22943_v26  ;;  %v22954_v26 = vld [vmem:[#allocation42_spill] sm:$0xff] }
 0x8db   : > { %v13948_v56 = vpack.c.bf16 %v22932_v53, %v22930_v43  ;;  %13987 = vmatpush3.bf16.msra.mxu1 %v22937_v37  ;;  %v18185_v43 = vand.u32 4294901760, %v2612_v47  ;;  %v18188_v53 = vadd.f32 %v11595_v16, %v11594_v3  ;;  %v22941_v37 = vld [vmem:[#allocation14_spill] sm:$0xff]  ;;  %v5834_v20 = vand.u32 4294901760, %v5833_v17  ;;  %v22950_v3 = vld [vmem:[#allocation49_spill] sm:$0xff] }
 0x8dc   : > { %13989 = vmatprep.subr.bf16.mxu1 %v22938_v61  ;;  %v22942_v7 = vand.u32 4294901760, %v22941_v37  ;;  %v5841_v10 = vand.u32 4294901760, %v5840_v4  ;;  %v22951_v16 = vand.u32 4294901760, %v22950_v3  ;;  %v22952_v37 = vld [vmem:[#allocation67_spill] sm:$0xff]  ;;  %v14028_v4 = vpack.c.bf16 %v5953_v50, %v5946_v51 }
 0x8dd   : > { %22939 = vst [vmem:[#allocation18_spill] sm:$0xff] %v18185_v43  ;;  %13947 = vmatpush3.bf16.msra.mxu0 %v22940_v8  ;;  %v5854_v8 = vsub.f32 %v22948_v5, %v22949_v14  ;;  %v22953_v13 = vand.u32 4294901760, %v22952_v37  ;;  %v5967_v17 = vand.u32 4294901760, %v5966_v9  ;;  %v22957_v5 = vld [vmem:[#allocation68_spill] sm:$0xff]  ;;  %v22961_v51 = vand.u32 4294901760, %v17411_v45 }
 0x8de   : > { %13949 = vmatprep.subr.bf16.mxu0 %v13948_v56  ;;  %v13952_v61 = vpack.c.bf16 %v22944_v2, %v22942_v7  ;;  %v5973_v56 = vsub.f32 %v22950_v3, %v22951_v16  ;;  %v22956_v2 = vand.u32 4294901760, %v17396_v59  ;;  %v22958_v28 = vand.u32 4294901760, %v22957_v5  ;;  %v22959_v3 = vld [vmem:[#allocation69_spill] sm:$0xff]  ;;  %v11553_v59 = vpop.f32.mrb[26].mxu0 }
 0x8df   : > { %13991 = vmatpush3.bf16.msra.mxu1 %v22945_v54  ;;  %v5980_v7 = vsub.f32 %v22952_v37, %v22953_v13  ;;  %v5960_v54 = vand.u32 4294901760, %v5959_v19  ;;  %v22960_v30 = vand.u32 4294901760, %v22959_v3  ;;  %v22962_v50 = vand.u32 4294901760, %v17416_v22 }
 0x8e0   : > { %13993 = vmatprep.subr.bf16.mxu1 %v17622_v34  ;;  %v13954_v14 = vpack.c.bf16 %v22956_v2, %v22955_v55  ;;  %v5861_v16 = vsub.f32 %v22957_v5, %v22958_v28  ;;  %v18220_v34 = vsub.f32 %v2612_v47, %v18185_v43  ;;  %v14030_v19 = vpack.c.bf16 %v5841_v10, %v5834_v20  ;;  %v11554_v2 = vpop.f32.mrb[27].mxu0  ;;  %v22965_v5 = vld [vmem:[#allocation74_spill] sm:$0xff] }
 0x8e1   : > { %13951 = vmatpush3.bf16.msra.mxu0 %v22954_v26  ;;  %v5868_v13 = vsub.f32 %v22959_v3, %v22960_v30  ;;  %v13956_v33 = vpack.c.bf16 %v22962_v50, %v22961_v51  ;;  %v5848_v9 = vand.u32 4294901760, %v5847_v40  ;;  %v5855_v26 = vand.u32 4294901760, %v5854_v8  ;;  %v22963_v3 = vld [vmem:[#allocation73_spill] sm:$0xff] }
 0x8e2   : > { %13953 = vmatprep.subr.bf16.mxu0 %v13952_v61  ;;  %v5974_v28 = vand.u32 4294901760, %v5973_v56  ;;  %v5981_v55 = vand.u32 4294901760, %v5980_v7  ;;  %v14032_v30 = vpack.c.bf16 %v5967_v17, %v5960_v54  ;;  %v22964_v47 = vand.u32 4294901760, %v22963_v3  ;;  %v22969_v56 = vld [vmem:[#allocation15_spill] sm:$0xff]  ;;  %v22972_v17 = vld [vmem:[#allocation76_spill] sm:$0xff] }
 0x8e3   : > { %13995 = vmatpush3.bf16.msra.mxu1 %v17647_v12  ;;  %v22966_v45 = vand.u32 4294901760, %v22965_v5  ;;  %v11555_v51 = vadd.f32 %v11554_v2, %v11553_v59  ;;  %v22967_v10 = vand.u32 4294901760, %v17439_v42  ;;  %v22968_v12 = vand.u32 4294901760, %v17444_v49  ;;  %v22970_v7 = vld [vmem:[#allocation75_spill] sm:$0xff]  ;;  %v11556_v59 = vpop.f32.mrb[28].mxu0 }
 0x8e4   : > { %14029 = vmatprep.subr.bf16.mxu1 %v14028_v4  ;;  %v5987_v61 = vsub.f32 %v22963_v3, %v22964_v47  ;;  %v5862_v40 = vand.u32 4294901760, %v5861_v16  ;;  %v5869_v8 = vand.u32 4294901760, %v5868_v13  ;;  %v22971_v4 = vand.u32 4294901760, %v22970_v7  ;;  %v22974_v42 = vld [vmem:[#allocation27_spill] sm:$0xff] }
 0x8e5   : > { %v5994_v22 = vsub.f32 %v22965_v5, %v22966_v45  ;;  %13955 = vmatpush3.bf16.msra.mxu0 %v13954_v14  ;;  %v13958_v20 = vpack.c.bf16 %v22968_v12, %v22967_v10  ;;  %v22973_v50 = vand.u32 4294901760, %v22972_v17  ;;  %v3449_v14 = vadd.f32 %v11555_v51, %v18032_v44  ;;  %v22975_v10 = vld [vmem:[#allocation53_spill] sm:$0xff] }
 0x8e6   : > { %13957 = vmatprep.subr.bf16.mxu0 %v13956_v33  ;;  %5690 = vmatmul.mubr.f32.vlgmr.msra.gmra.mrb[62].mxu1 %v22969_v56  ;;  %v5875_v54 = vsub.f32 %v22970_v7, %v22971_v4  ;;  %v14034_v49 = vpack.c.bf16 %v5855_v26, %v5848_v9  ;;  %v14036_v16 = vpack.c.bf16 %v5981_v55, %v5974_v28  ;;  %v11557_v33 = vpop.f32.mrb[29].mxu0  ;;  %v5988_v2 = vand.u32 4294901760, %v5987_v61  ;;  %v22980_v9 = vld [vmem:[#allocation55_spill] sm:$0xff]  ;;  %v22982_v61 = vld [vmem:[#allocation44_spill] sm:$0xff] }
 0x8e7   : > { %v5882_v47 = vsub.f32 %v22972_v17, %v22973_v50  ;;  %5695 = vmatprep.mubr.f32.mxu1 %v22974_v42  ;;  %14031 = vmatpush3.bf16.msra.mxu1 %v14030_v19  ;;  %v5995_v45 = vand.u32 4294901760, %v5994_v22  ;;  %v22976_v12 = vand.u32 4294901760, %v22975_v10  ;;  %v22977_v50 = vand.u32 4294901760, %v17859_v60  ;;  %v22978_v17 = vld [vmem:[#allocation52_spill] sm:$0xff] }
 0x8e8   : > { %14033 = vmatprep.subr.bf16.mxu1 %v14032_v30  ;;  %v11558_v51 = vadd.f32 %v11557_v33, %v11556_v59  ;;  %v22979_v19 = vand.u32 4294901760, %v22978_v17  ;;  %v22981_v26 = vand.u32 4294901760, %v22980_v9  ;;  %v14038_v55 = vpack.c.bf16 %v5869_v8, %v5862_v40  ;;  %v22983_v22 = vld [vmem:[#allocation40_spill] sm:$0xff]  ;;  %v22985_v59 = vld [vmem:[#allocation79_spill] sm:$0xff] }
 0x8e9   : > { %v6001_v4 = vsub.f32 %v22975_v10, %v22976_v12  ;;  %v6008_v44 = vsub.f32 %v17859_v60, %v22977_v50  ;;  %13959 = vmatpush3.bf16.msra.mxu0 %v13958_v20  ;;  %v18260_v30 = vadd.f32 %v18165_v36, %v3449_v14  ;;  %v5876_v12 = vand.u32 4294901760, %v5875_v54 }
 0x8ea   : > { %v18257_v28 = vpack.c.bf16 %v22981_v26, %v22979_v19  ;;  %13961 = vmatprep.subr.bf16.mxu0 %v22982_v61  ;;  %5697 = vmatmul.mubr.f32.gmra.mrb[64].mxu1 %v22983_v22  ;;  %v5883_v13 = vand.u32 4294901760, %v5882_v47  ;;  %v22984_v50 = vand.u32 4294901760, %v17864_v46  ;;  %v22986_v17 = vand.u32 4294901760, %v22985_v59  ;;  %v22989_v26 = vld [vmem:[#allocation45_spill] sm:$0xff]  ;;  %v22990_v61 = vld [vmem:[#allocation22_spill] sm:$0xff] }
 0x8eb   : > { %v3458_v19 = vadd.f32 %v11558_v51, %v18067_v58  ;;  %14035 = vmatpush3.bf16.msra.mxu1 %v14034_v49  ;;  %6054 = vmatprep.mubr.f32.mxu1 %v18185_v43  ;;  %v22987_v36 = vand.u32 4294901760, %v17928_v62  ;;  %v22988_v8 = vand.u32 4294901760, %v17933_v52  ;;  %v14040_v47 = vpack.c.bf16 %v5995_v45, %v5988_v2  ;;  %v22992_v58 = vld [vmem:[#allocation23_spill] sm:$0xff] }
 0x8ec   : > { %v5889_v20 = vsub.f32 %v17864_v46, %v22984_v50  ;;  %v5896_v33 = vsub.f32 %v22985_v59, %v22986_v17  ;;  %14037 = vmatprep.subr.bf16.mxu1 %v14036_v16  ;;  %v6002_v14 = vand.u32 4294901760, %v6001_v4  ;;  %v6009_v9 = vand.u32 4294901760, %v6008_v44 }
 0x8ed   : > { %v6015_v40 = vsub.f32 %v17928_v62, %v22987_v36  ;;  %v6022_v54 = vsub.f32 %v17933_v52, %v22988_v8  ;;  %13963 = vmatpush3.bf16.msra.mxu0 %v22989_v26  ;;  %v22991_v50 = vand.u32 4294901760, %v22990_v61  ;;  %v22993_v49 = vand.u32 4294901760, %v22992_v58 }
 0x8ee   : > { %v22994_v17 = vand.u32 4294901760, %v18220_v34  ;;  %v18289_v43 = vadd.f32 %v18188_v53, %v3458_v19  ;;  %13997 = vmatprep.subr.bf16.mxu0 %v18257_v28  ;;  %v22995_v16 = vand.u32 4294901760, %v18101_v23  ;;  %v22996_v2 = vand.u32 4294901760, %v18104_v38 }
 0x8ef   : > { %v18283_v51 = vpack.c.bf16 %v22993_v49, %v22991_v50  ;;  %v14042_v4 = vpack.c.bf16 %v5883_v13, %v5876_v12  ;;  %v22997_v44 = vand.u32 4294901760, %v17960_v48  ;;  %v22998_v26 = vand.u32 4294901760, %v17965_v21  ;;  %14039 = vmatpush3.bf16.msra.mxu1 %v14038_v55  ;;  %v23002_v55 = vld [vmem:[#allocation58_spill] sm:$0xff] }
 0x8f0   : > { %v5801_v36 = vsub.f32 %v18220_v34, %v22994_v17  ;;  %v18296_v45 = vpack.c.bf16 %v22996_v2, %v22995_v16  ;;  %v5890_v53 = vand.u32 4294901760, %v5889_v20  ;;  %v5897_v19 = vand.u32 4294901760, %v5896_v33  ;;  %5579 = vmatmul.mubr.f32.vlgmr.msra.gmra.mrb[54].mxu0 %v22969_v56  ;;  %14041 = vmatprep.subr.bf16.mxu1 %v14040_v47  ;;  %v23001_v17 = vld [vmem:[#allocation35_spill] sm:$0xff]  ;;  %v23004_v56 = vld [vmem:[#allocation29_spill] sm:$0xff] }
 0x8f1   : > { %v5903_v8 = vsub.f32 %v17960_v48, %v22997_v44  ;;  %v5910_v61 = vsub.f32 %v17965_v21, %v22998_v26  ;;  %v6016_v50 = vand.u32 4294901760, %v6015_v40  ;;  %v6023_v58 = vand.u32 4294901760, %v6022_v54  ;;  %5584 = vmatprep.mubr.f32.mxu0 %v22974_v42  ;;  %13999 = vmatpush3.bf16.msra.mxu0 %v18283_v51  ;;  %v23006_v47 = vld [vmem:[#allocation61_spill] sm:$0xff] }
 0x8f2   : > { %v14044_v23 = vpack.c.bf16 %v6009_v9, %v6002_v14  ;;  %v22999_v38 = vand.u32 4294901760, %v17992_v24  ;;  %v23000_v12 = vand.u32 4294901760, %v17997_v1  ;;  %v2440_v16 = vrot.slane %v18116_v0, %v23001_v17  ;;  %14001 = vmatprep.subr.bf16.mxu0 %v18296_v45  ;;  %v23008_v9 = vld [vmem:[#allocation26_spill] sm:$0xff] }
 0x8f3   : > { %v23003_v20 = vand.u32 4294901760, %v23002_v55  ;;  %v23005_v33 = vand.u32 4294901760, %v23004_v56  ;;  %v5802_v54 = vand.u32 4294901760, %v5801_v36  ;;  %v23007_v14 = vand.u32 4294901760, %v23006_v47  ;;  %14043 = vmatpush3.bf16.msra.mxu1 %v14042_v4 }
 0x8f4   : > { %v6029_v13 = vsub.f32 %v17992_v24, %v22999_v38  ;;  %v6036_v49 = vsub.f32 %v17997_v1, %v23000_v12  ;;  %v23009_v2 = vand.u32 4294901760, %v23008_v9  ;;  %v5904_v0 = vand.u32 4294901760, %v5903_v8  ;;  %5586 = vmatmul.mubr.f32.gmra.mrb[56].mxu0 %v22983_v22  ;;  %14045 = vmatprep.subr.bf16.mxu1 %v14044_v23  ;;  %v23018_v22 = vld [vmem:[#allocation31_spill] sm:$0xff]  ;;  %v23020_v9 = vld [vmem:[#allocation41_spill] sm:$0xff] }
 0x8f5   : > { %v18319_v40 = vpack.c.bf16 %v23005_v33, %v23003_v20  ;;  %v5911_v26 = vand.u32 4294901760, %v5910_v61  ;;  %v14046_v42 = vpack.c.bf16 %v5897_v19, %v5890_v53  ;;  %v14048_v38 = vpack.c.bf16 %v6023_v58, %v6016_v50  ;;  %5803 = vmatprep.mubr.f32.mxu0 %v5802_v54  ;;  %v23014_v53 = vld [vmem:[#allocation30_spill] sm:$0xff]  ;;  %v23016_v50 = vld [vmem:[#allocation28_spill] sm:$0xff] }
 0x8f6   : > { %v18326_v44 = vpack.c.bf16 %v23009_v2, %v23007_v14  ;;  %v23010_v12 = vand.u32 4294901760, %v18002_v27  ;;  %v23011_v20 = vand.u32 4294901760, %v18007_v41  ;;  %v6030_v36 = vand.u32 4294901760, %v6029_v13  ;;  %v23019_v13 = vld [vmem:[#allocation38_spill] sm:$0xff] }
 0x8f7   : > { %v6037_v33 = vand.u32 4294901760, %v6036_v49  ;;  %v23012_v47 = vand.u32 4294901760, %v18012_v35  ;;  %v23013_v4 = vand.u32 4294901760, %v18019_v32  ;;  %14003 = vmatpush3.bf16.msra.mxu0 %v18319_v40  ;;  %v23015_v19 = vand.u32 4294901760, %v23014_v53  ;;  %14047 = vmatpush3.bf16.msra.mxu1 %v14046_v42 }
 0x8f8   : > { %v5917_v55 = vsub.f32 %v18002_v27, %v23010_v12  ;;  %v5924_v56 = vsub.f32 %v18007_v41, %v23011_v20  ;;  %v23017_v58 = vand.u32 4294901760, %v23016_v50  ;;  %v2599_v23 = vadd.f32 %v23018_v22, %v2440_v16  ;;  %14005 = vmatprep.subr.bf16.mxu0 %v18326_v44  ;;  %v23022_v12 = vld [vmem:[#allocation16_spill] sm:$0xff]  ;;  %14049 = vmatprep.subr.bf16.mxu1 %v14048_v38  ;;  %v23031_v38 = vld [vmem:[#allocation11_spill] sm:$0xff] }
 0x8f9   : > { %v6043_v8 = vsub.f32 %v18012_v35, %v23012_v47  ;;  %v6050_v61 = vsub.f32 %v18019_v32, %v23013_v4  ;;  %v2607_v49 = vadd.f32 %v23019_v13, %v18120_v63  ;;  %v23021_v2 = vand.u32 4294901760, %v23020_v9 }
 0x8fa   : > { %v18346_v14 = vpack.c.bf16 %v23017_v58, %v23015_v19  ;;  %v23023_v20 = vand.u32 4294901760, %v23022_v12  ;;  %v14050_v54 = vpack.c.bf16 %v5911_v26, %v5904_v0  ;;  %v5918_v4 = vand.u32 4294901760, %v5917_v55  ;;  %v23026_v12 = vld [vmem:[#allocation46_spill] sm:$0xff]  ;;  %v23028_v26 = vld [vmem:[#allocation47_spill] sm:$0xff] }
 0x8fb   : > { %v5925_v53 = vand.u32 4294901760, %v5924_v56  ;;  %v23024_v19 = vand.u32 4294901760, %v18024_v31  ;;  %v23025_v58 = vand.u32 4294901760, %v18029_v15  ;;  %v14052_v22 = vpack.c.bf16 %v6037_v33, %v6030_v36  ;;  %v23033_v33 = vld [vmem:[#allocation60_spill] sm:$0xff] }
 0x8fc   : > { %v18356_v47 = vpack.c.bf16 %v23023_v20, %v23021_v2  ;;  %v6044_v13 = vand.u32 4294901760, %v6043_v8  ;;  %v6051_v9 = vand.u32 4294901760, %v6050_v61  ;;  %14007 = vmatpush3.bf16.msra.mxu0 %v18346_v14  ;;  %v11667_v2 = vpop.f32.mrb[38].mxu1  ;;  %v23027_v0 = vand.u32 4294901760, %v23026_v12  ;;  %v23030_v20 = vld [vmem:[#allocation37_spill] sm:$0xff]  ;;  %14051 = vmatpush3.bf16.msra.mxu1 %v14050_v54 }
 0x8fd   : > { %v5931_v50 = vsub.f32 %v18024_v31, %v23024_v19  ;;  %v5938_v63 = vsub.f32 %v18029_v15, %v23025_v58  ;;  %v23029_v42 = vand.u32 4294901760, %v23028_v26  ;;  %v2611_v56 = vmax.f32 %v2599_v23, 0.0  ;;  %v11668_v31 = vpop.f32.mrb[39].mxu1  ;;  %14053 = vmatprep.subr.bf16.mxu1 %v14052_v22  ;;  %v23035_v23 = vld [vmem:[#allocation62_spill] sm:$0xff] }
 0x8fe   : > { %v2605_v19 = vadd.f32 %v23030_v20, %v2440_v16  ;;  %v2616_v17 = vmax.f32 %v2607_v49, 0.0  ;;  %14009 = vmatprep.subr.bf16.mxu0 %v18356_v47  ;;  %v23032_v36 = vand.u32 4294901760, %v23031_v38  ;;  %v23034_v8 = vand.u32 4294901760, %v23033_v33  ;;  %v11670_v16 = vpop.f32.mrb[40].mxu1 }
 0x8ff   : > { %v18369_v55 = vpack.c.bf16 %v23029_v42, %v23027_v0  ;;  %v11669_v58 = vadd.f32 %v11668_v31, %v11667_v2  ;;  %v14054_v12 = vpack.c.bf16 %v5925_v53, %v5918_v4  ;;  %v5932_v15 = vand.u32 4294901760, %v5931_v50  ;;  %v23037_v42 = vld [vmem:[#allocation72_spill] sm:$0xff]  ;;  %v11671_v33 = vpop.f32.mrb[41].mxu1  ;;  %v23041_v4 = vld [vmem:[#allocation51_spill] sm:$0xff] }
 0x900   : > { %v18377_v61 = vpack.c.bf16 %v23034_v8, %v23032_v36  ;;  %v5939_v26 = vand.u32 4294901760, %v5938_v63  ;;  %v14056_v0 = vpack.c.bf16 %v6051_v9, %v6044_v13  ;;  %v23036_v49 = vand.u32 4294901760, %v23035_v23  ;;  %v23039_v31 = vld [vmem:[#allocation64_spill] sm:$0xff] }
 0x901   : > { %14011 = vmatpush3.bf16.msra.mxu0 %v18369_v55  ;;  %v23038_v20 = vand.u32 4294901760, %v23037_v42  ;;  %v18386_v38 = vand.u32 4294901760, %v2611_v56  ;;  %v2615_v36 = vmax.f32 %v2605_v19, 0.0  ;;  %v23040_v54 = vand.u32 4294901760, %v23039_v31  ;;  %14055 = vmatpush3.bf16.msra.mxu1 %v14054_v12  ;;  %v23043_v9 = vld [vmem:[#allocation80_spill] sm:$0xff]  ;;  %v23045_v19 = vld [vmem:[#allocation81_spill] sm:$0xff] }
 0x902   : > { %14013 = vmatprep.subr.bf16.mxu0 %v18377_v61  ;;  %v23042_v53 = vand.u32 4294901760, %v23041_v4  ;;  %v18395_v63 = vand.u32 4294901760, %v2616_v17  ;;  %v11672_v22 = vadd.f32 %v11671_v33, %v11670_v16  ;;  %v14058_v13 = vpack.c.bf16 %v5939_v26, %v5932_v15  ;;  %14057 = vmatprep.subr.bf16.mxu1 %v14056_v0  ;;  %v11629_v0 = vpop.f32.mrb[30].mxu0  ;;  %v23050_v31 = vld [vmem:[#allocation54_spill] sm:$0xff] }
 0x903   : > { %v18384_v32 = vpack.c.bf16 %v23038_v20, %v23036_v49  ;;  %v23044_v2 = vand.u32 4294901760, %v23043_v9  ;;  %v23046_v8 = vand.u32 4294901760, %v23045_v19  ;;  %v18405_v49 = vsub.f32 %v2611_v56, %v18386_v38  ;;  %v11630_v20 = vpop.f32.mrb[31].mxu0 }
 0x904   : > { %v18393_v50 = vpack.c.bf16 %v23042_v53, %v23040_v54  ;;  %v18407_v42 = vand.u32 4294901760, %v2615_v36  ;;  %v23047_v16 = vand.u32 4294901760, %v17902_v11  ;;  %v23048_v15 = vand.u32 4294901760, %v17909_v57  ;;  %v11632_v19 = vpop.f32.mrb[32].mxu0 }
 0x905   : > { %14015 = vmatpush3.bf16.msra.mxu0 %v18384_v32  ;;  %v18402_v23 = vpack.c.bf16 %v23046_v8, %v23044_v2  ;;  %v18417_v26 = vsub.f32 %v2616_v17, %v18395_v63  ;;  %14059 = vmatpush3.bf16.msra.mxu1 %v14058_v13  ;;  %v11631_v56 = vadd.f32 %v11630_v20, %v11629_v0  ;;  %v23049_v33 = vand.u32 4294901760, %v17916_v6  ;;  %v23052_v17 = vld [vmem:[#allocation83_spill] sm:$0xff]  ;;  %v23054_v13 = vld [vmem:[#allocation84_spill] sm:$0xff]  ;;  %v11633_v8 = vpop.f32.mrb[33].mxu0  ;;  %v23058_v20 = vld [vmem:[#allocation86_spill] sm:$0xff] }
 0x906   : > { %14017 = vmatprep.subr.bf16.mxu0 %v18393_v50  ;;  %v18414_v12 = vpack.c.bf16 %v23048_v15, %v23047_v16  ;;  %14093 = vmatprep.subr.bf16.mxu1 %v18257_v28  ;;  %v23051_v54 = vand.u32 4294901760, %v23050_v31  ;;  %v5806_v57 = vand.u32 4294901760, %v18405_v49  ;;  %v18429_v4 = vsub.f32 %v2615_v36, %v18407_v42  ;;  %v23056_v15 = vld [vmem:[#allocation85_spill] sm:$0xff] }
 0x907   : > { %v23053_v53 = vand.u32 4294901760, %v23052_v17  ;;  %v23055_v9 = vand.u32 4294901760, %v23054_v13  ;;  %v3745_v6 = vadd.f32 %v11631_v56, %v18260_v30  ;;  %v5815_v36 = vand.u32 4294901760, %v18417_v26 }
 0x908   : > { %v18425_v11 = vpack.c.bf16 %v23051_v54, %v23049_v33  ;;  %6056 = vmatmul.mubr.f32.vlgmr.msra.gmra.mrb[66].mxu1 %v18386_v38  ;;  %v11634_v16 = vadd.f32 %v11633_v8, %v11632_v19  ;;  %v23057_v0 = vand.u32 4294901760, %v23056_v15  ;;  %v23059_v33 = vand.u32 4294901760, %v23058_v20  ;;  %v23062_v19 = vld [vmem:[#allocation17_spill] sm:$0xff] }
 0x909   : > { %14019 = vmatpush3.bf16.msra.mxu0 %v18402_v23  ;;  %v18437_v2 = vpack.c.bf16 %v23055_v9, %v23053_v53  ;;  %6061 = vmatprep.mubr.f32.mxu1 %v18395_v63  ;;  %v18451_v30 = vadd.f32 %v11669_v58, %v3745_v6  ;;  %v5807_v56 = vsub.f32 %v18405_v49, %v5806_v57  ;;  %v5821_v17 = vand.u32 4294901760, %v18429_v4  ;;  %v23061_v6 = vld [vmem:[#allocation50_spill] sm:$0xff] }
 0x90a   : > { %14021 = vmatprep.subr.bf16.mxu0 %v18414_v12  ;;  %14095 = vmatpush3.bf16.msra.mxu1 %v18283_v51  ;;  %v18449_v31 = vpack.c.bf16 %v23059_v33, %v23057_v0  ;;  %v14060_v54 = vpack.c.bf16 %v22928_v25, %v22926_v18  ;;  %v3752_v53 = vadd.f32 %v11634_v16, %v18289_v43  ;;  %v23060_v58 = vand.u32 4294901760, %v18220_v34  ;;  %v23065_v0 = vld [vmem:[#allocation49_spill] sm:$0xff]  ;;  %v23066_v33 = vld [vmem:[#allocation68_spill] sm:$0xff] }
 0x90b   : > { %14097 = vmatprep.subr.bf16.mxu1 %v18296_v45  ;;  %v5816_v13 = vsub.f32 %v18417_v26, %v5815_v36  ;;  %v14062_v18 = vpack.c.bf16 %v22935_v29, %v22933_v39  ;;  %v5808_v9 = vand.u32 4294901760, %v5807_v56  ;;  %v5822_v43 = vsub.f32 %v18429_v4, %v5821_v17  ;;  %v23063_v39 = vld [vmem:[#allocation19_spill] sm:$0xff]  ;;  %v23064_v29 = vld [vmem:[#allocation48_spill] sm:$0xff]  ;;  %v23067_v56 = vld [vmem:[#allocation69_spill] sm:$0xff] }
 0x90c   : > { %6063 = vmatmul.mubr.f32.gmra.mrb[68].mxu1 %v18407_v42  ;;  %v18472_v25 = vadd.f32 %v11672_v22, %v3752_v53  ;;  %v14064_v8 = vpack.c.bf16 %v23062_v19, %v23061_v6  ;;  %v14066_v22 = vpack.c.bf16 %v23064_v29, %v23063_v39  ;;  %v14068_v20 = vpack.c.bf16 %v22952_v37, %v23065_v0  ;;  %v11219_v0 = vld [vmem:[%s15224_s22 + $0xd0] sm:$0xff] }
 0x90d   : > { %14023 = vmatpush3.bf16.msra.mxu0 %v18425_v11  ;;  %6314 = vmatprep.mubr.f32.mxu1 %v23060_v58  ;;  %v5817_v16 = vand.u32 4294901760, %v5816_v13  ;;  %v5823_v15 = vand.u32 4294901760, %v5822_v43  ;;  %v14072_v53 = vpack.c.bf16 %v22965_v5, %v22963_v3  ;;  %v23068_v58 = vld [vmem:[#allocation76_spill] sm:$0xff]  ;;  %v14078_v3 = vpack.c.bf16 %v22985_v59, %v17864_v46 }
 0x90e   : > { %14025 = vmatprep.subr.bf16.mxu0 %v18437_v2  ;;  %14099 = vmatpush3.bf16.msra.mxu1 %v18319_v40  ;;  %v11743_v37 = vpop.f32.mrb[42].mxu1  ;;  %v14074_v13 = vpack.c.bf16 %v23068_v58, %v22970_v7  ;;  %v14080_v7 = vpack.c.bf16 %v17933_v52, %v17928_v62  ;;  %v14086_v52 = vpack.c.bf16 %v18007_v41, %v18002_v27  ;;  %v23070_v41 = vld [vmem:[#allocation90_spill] sm:$0xff]  ;;  %v23071_v27 = vld [vmem:[#allocation91_spill] sm:$0xff]  ;;  %v23075_v29 = vand.u32 4294901760, %v23062_v19 }
 0x90f   : > { %14101 = vmatprep.subr.bf16.mxu1 %v18326_v44  ;;  %v14090_v39 = vpack.c.bf16 %v23071_v27, %v23070_v41  ;;  %v11223_v58 = vld [vmem:[%s15224_s22 + $0x150] sm:$0xff] }
 0x910   : > { %v23091_v27 = vld [vmem:[#allocation7_spill] sm:$0xff] }
 0x911   : > { %14027 = vmatpush3.bf16.msra.mxu0 %v18449_v31 }
 0x912   : > { %14061 = vmatprep.subr.bf16.mxu0 %v14060_v54  ;;  %14103 = vmatpush3.bf16.msra.mxu1 %v18346_v14  ;;  %v14070_v54 = vpack.c.bf16 %v23067_v56, %v23066_v33  ;;  %v11228_v33 = vld [vmem:[%s15224_s22 + $0x1d8] sm:$0xff] }
 0x913   : > { %14105 = vmatprep.subr.bf16.mxu1 %v18356_v47  ;;  %v23084_v56 = vld [vmem:[#allocation92_spill] sm:$0xff] }
 0x914   : > { %5809 = vmatmul.mubr.f32.vlgmr.msra.gmra.mrb[58].mxu0 %v5808_v9 }
 0x915   : > { %5818 = vmatprep.mubr.f32.mxu0 %v5817_v16  ;;  %14063 = vmatpush3.bf16.msra.mxu0 %v14062_v18  ;;  %v11744_v18 = vpop.f32.mrb[43].mxu1 }
 0x916   : > { %14065 = vmatprep.subr.bf16.mxu0 %v14064_v8  ;;  %14107 = vmatpush3.bf16.msra.mxu1 %v18369_v55  ;;  %v11745_v9 = vadd.f32 %v11744_v18, %v11743_v37  ;;  %v11746_v5 = vpop.f32.mrb[44].mxu1  ;;  %v23085_v18 = vld [vmem:[#allocation93_spill] sm:$0xff] }
 0x917   : > { %14109 = vmatprep.subr.bf16.mxu1 %v18377_v61  ;;  %v11747_v43 = vpop.f32.mrb[45].mxu1 }
 0x918   : > { %5824 = vmatmul.mubr.f32.gmra.mrb[60].mxu0 %v5823_v15  ;;  %v11748_v8 = vadd.f32 %v11747_v43, %v11746_v5  ;;  %v11218_v43 = vld [vmem:[%s15224_s22 + $0xc8] sm:$0xff] }
 0x919   : > { %14067 = vmatpush3.bf16.msra.mxu0 %v14066_v22  ;;  %6198 = vmatprep.mubr.f32.mxu0 %v18220_v34  ;;  %v14076_v34 = vpack.c.bf16 %v17859_v60, %v22975_v10  ;;  %v14082_v60 = vpack.c.bf16 %v17965_v21, %v17960_v48  ;;  %v14084_v10 = vpack.c.bf16 %v17997_v1, %v17992_v24  ;;  %v23069_v48 = vld [vmem:[#allocation89_spill] sm:$0xff] }
 0x91a   : > { %14069 = vmatprep.subr.bf16.mxu0 %v14068_v20  ;;  %14111 = vmatpush3.bf16.msra.mxu1 %v18384_v32  ;;  %v11705_v16 = vpop.f32.mrb[34].mxu0  ;;  %v14088_v21 = vpack.c.bf16 %v23069_v48, %v18012_v35  ;;  %v23083_v20 = vld [vmem:[#allocation88_spill] sm:$0xff] }
 0x91b   : > { %14113 = vmatprep.subr.bf16.mxu1 %v18393_v50  ;;  %v11706_v46 = vpop.f32.mrb[35].mxu0 }
 0x91c   : > { %v11707_v62 = vadd.f32 %v11706_v46, %v11705_v16  ;;  %v23088_v16 = vld [vmem:[#allocation95_spill] sm:$0xff] }
 0x91d   : > { %14071 = vmatpush3.bf16.msra.mxu0 %v14070_v54 }
 0x91e   : > { %14073 = vmatprep.subr.bf16.mxu0 %v14072_v53  ;;  %14115 = vmatpush3.bf16.msra.mxu1 %v18402_v23  ;;  %v3975_v24 = vadd.f32 %v11707_v62, %v18451_v30  ;;  %v11708_v1 = vpop.f32.mrb[36].mxu0  ;;  %v23074_v30 = vand.u32 4294901760, %v23061_v6  ;;  %v23082_v6 = vld [vmem:[#allocation87_spill] sm:$0xff]  ;;  %v11213_v62 = vld [vmem:[%s15224_s22 + $0x40] sm:$0xff] }
 0x91f   : > { %14117 = vmatprep.subr.bf16.mxu1 %v18414_v12 }
 0x920   : > { %v14128_v22 = vpack.c.bf16 %v23075_v29, %v23074_v30 }
 0x921   : > { %14075 = vmatpush3.bf16.msra.mxu0 %v14074_v13 }
 0x922   : > { %14077 = vmatprep.subr.bf16.mxu0 %v14076_v34  ;;  %14119 = vmatpush3.bf16.msra.mxu1 %v18425_v11  ;;  %v23086_v34 = vld [vmem:[#allocation43_spill] sm:$0xff] }
 0x923   : > { %14121 = vmatprep.subr.bf16.mxu1 %v18437_v2 }
 0x925   : > { %14079 = vmatpush3.bf16.msra.mxu0 %v14078_v3  ;;  %v11214_v3 = vld [vmem:[%s15224_s22 + $0x48] sm:$0xff] }
 0x926   : > { %14081 = vmatprep.subr.bf16.mxu0 %v14080_v7  ;;  %14123 = vmatpush3.bf16.msra.mxu1 %v18449_v31  ;;  %v14188_v46 = vpack.c.bf16 %v11218_v43, %v11214_v3 }
 0x927   : > { %14157 = vmatprep.subr.bf16.mxu1 %v18257_v28  ;;  %v11709_v28 = vpop.f32.mrb[37].mxu0 }
 0x928   : > { %v11710_v59 = vadd.f32 %v11709_v28, %v11708_v1  ;;  %v11226_v1 = vld [vmem:[%s15224_s22 + $0x1c8] sm:$0xff]  ;;  %v23090_v28 = vld [vmem:[#allocation96_spill] sm:$0xff] }
 0x929   : > { %14083 = vmatpush3.bf16.msra.mxu0 %v14082_v60  ;;  %6318 = vmatmul.mubr.f32.vlgmr.msra.gmra.mrb[70].mxu1 %v5806_v57  ;;  %v4222_v57 = vadd.f32 %v11745_v9, %v3975_v24  ;;  %v23087_v60 = vld [vmem:[#allocation94_spill] sm:$0xff] }
 0x92a   : > { %14085 = vmatprep.subr.bf16.mxu0 %v14084_v10  ;;  %6325 = vmatprep.mubr.f32.mxu1 %v5815_v36  ;;  %v3990_v35 = vadd.f32 %v11710_v59, %v18472_v25  ;;  %v23072_v36 = vld [vmem:[#allocation18_spill] sm:$0xff] }
 0x92b   : > { %14159 = vmatpush3.bf16.msra.mxu1 %v18283_v51  ;;  %v11222_v24 = vld [vmem:[%s15224_s22 + $0x148] sm:$0xff] }
 0x92c   : > { %14161 = vmatprep.subr.bf16.mxu1 %v18296_v45  ;;  %v18531_v51 = vadd.f32 %v11748_v8, %v3990_v35  ;;  %v23073_v45 = vld [vmem:[#allocation70_spill] sm:$0xff]  ;;  %v11225_v35 = vld [vmem:[%s15224_s22 + $0x1c0] sm:$0xff] }
 0x92d   : > { %14087 = vmatpush3.bf16.msra.mxu0 %v14086_v52  ;;  %6329 = vmatmul.mubr.f32.gmra.mrb[72].mxu1 %v5821_v17  ;;  %v11216_v17 = vld [vmem:[%s15224_s22 + $0x58] sm:$0xff]  ;;  %v11217_v52 = vld [vmem:[%s15224_s22 + $0xc0] sm:$0xff] }
 0x92e   : > { %14089 = vmatprep.subr.bf16.mxu0 %v14088_v21  ;;  %6606 = vmatprep.mubr.f32.mxu1 %v23072_v36  ;;  %v23089_v21 = vmov 0.0   ;;  %v14190_v59 = vpack.c.bf16 %v11217_v52, %v11213_v62 }
 0x92f   : > { %14163 = vmatpush3.bf16.msra.mxu1 %v18319_v40  ;;  %v23076_v40 = vld [vmem:[#allocation71_spill] sm:$0xff] }
 0x930   : > { %14165 = vmatprep.subr.bf16.mxu1 %v18326_v44  ;;  %v23077_v44 = vld [vmem:[#allocation77_spill] sm:$0xff] }
 0x931   : > { %14091 = vmatpush3.bf16.msra.mxu0 %v14090_v39  ;;  %v14192_v39 = vpack.c.bf16 %v11226_v1, %v11222_v24 }
 0x932   : > { %14125 = vmatprep.subr.bf16.mxu0 %v23073_v45 }
 0x933   : > { %14167 = vmatpush3.bf16.msra.mxu1 %v18346_v14  ;;  %v23078_v14 = vld [vmem:[#allocation78_spill] sm:$0xff] }
 0x934   : > { %6201 = vmatmul.mubr.f32.vlgmr.msra.gmra.mrb[62].mxu0 %v18405_v49  ;;  %14169 = vmatprep.subr.bf16.mxu1 %v18356_v47  ;;  %v23079_v47 = vld [vmem:[#allocation63_spill] sm:$0xff]  ;;  %v11819_v49 = vpop.f32.mrb[46].mxu1 }
 0x935   : > { %6207 = vmatprep.mubr.f32.mxu0 %v18417_v26  ;;  %14127 = vmatpush3.bf16.msra.mxu0 %v23076_v40  ;;  %v23080_v26 = vld [vmem:[#allocation65_spill] sm:$0xff] }
 0x936   : > { %14129 = vmatprep.subr.bf16.mxu0 %v14128_v22 }
 0x937   : > { %14171 = vmatpush3.bf16.msra.mxu1 %v18369_v55  ;;  %v11820_v55 = vpop.f32.mrb[47].mxu1 }
 0x938   : > { %6210 = vmatmul.mubr.f32.gmra.mrb[64].mxu0 %v18429_v4  ;;  %14173 = vmatprep.subr.bf16.mxu1 %v18377_v61  ;;  %v11821_v61 = vadd.f32 %v11820_v55, %v11819_v49  ;;  %v23081_v4 = vld [vmem:[#allocation82_spill] sm:$0xff] }
 0x939   : > { %14131 = vmatpush3.bf16.msra.mxu0 %v23077_v44  ;;  %6495 = vmatprep.mubr.f32.mxu0 %v23072_v36 }
 0x93a   : > { %14133 = vmatprep.subr.bf16.mxu0 %v23078_v14  ;;  %v11781_v54 = vpop.f32.mrb[38].mxu0 }
 0x93b   : > { %14175 = vmatpush3.bf16.msra.mxu1 %v18384_v32  ;;  %v11822_v32 = vpop.f32.mrb[48].mxu1  ;;  %v11782_v37 = vpop.f32.mrb[39].mxu0 }
 0x93c   : > { %14177 = vmatprep.subr.bf16.mxu1 %v18393_v50  ;;  %v11220_v50 = vld [vmem:[%s15224_s22 + $0xd8] sm:$0xff]  ;;  %v11823_v25 = vpop.f32.mrb[49].mxu1  ;;  %v11783_v13 = vadd.f32 %v11782_v37, %v11781_v54  ;;  %v11250_v37 = vld [vmem:[%s15236_s15 + $0x480] sm:$0xff] }
 0x93d   : > { %14135 = vmatpush3.bf16.msra.mxu0 %v23079_v47  ;;  %v11824_v19 = vadd.f32 %v11823_v25, %v11822_v32  ;;  %v14196_v15 = vpack.c.bf16 %v11220_v50, %v11216_v17 }
 0x93e   : > { %14137 = vmatprep.subr.bf16.mxu0 %v23080_v26  ;;  %v4367_v9 = vadd.f32 %v11783_v13, %v4222_v57  ;;  %v11784_v5 = vpop.f32.mrb[40].mxu0  ;;  %v11221_v57 = vld [vmem:[%s15224_s22 + $0x140] sm:$0xff] }
 0x93f   : > { %14179 = vmatpush3.bf16.msra.mxu1 %v18402_v23  ;;  %v11215_v23 = vld [vmem:[%s15224_s22 + $0x50] sm:$0xff]  ;;  %v11785_v7 = vpop.f32.mrb[41].mxu0  ;;  %v14194_v36 = vpack.c.bf16 %v11225_v35, %v11221_v57 }
 0x940   : > { %14181 = vmatprep.subr.bf16.mxu1 %v18414_v12  ;;  %v11224_v12 = vld [vmem:[%s15224_s22 + $0x158] sm:$0xff]  ;;  %v14198_v53 = vpack.c.bf16 %v11219_v0, %v11215_v23  ;;  %v11786_v8 = vadd.f32 %v11785_v7, %v11784_v5  ;;  %v4484_v10 = vadd.f32 %v11821_v61, %v4367_v9  ;;  %v18612_v9 = vld [vmem:[%s15236_s15 + $0x490] sm:$0xff] }
 0x941   : > { %14139 = vmatpush3.bf16.msra.mxu0 %v23081_v4  ;;  %v18615_v5 = vld [vmem:[%s15236_s15 + $0x498] sm:$0xff]  ;;  %v6942_v43 = vand.u32 4294901760, %v18612_v9 }
 0x942   : > { %14141 = vmatprep.subr.bf16.mxu0 %v23082_v6  ;;  %v4376_v48 = vadd.f32 %v11786_v8, %v18531_v51  ;;  %v23092_v51 = vld [vmem:[#allocation8_spill] sm:$0xff]  ;;  %v6945_v7 = vand.u32 4294901760, %v18615_v5  ;;  %v18622_v8 = vld [vmem:[%s15236_s15 + $0x410] sm:$0xff] }
 0x943   : > { %14183 = vmatpush3.bf16.msra.mxu1 %v18425_v11  ;;  %v14200_v11 = vpack.c.bf16 %v11228_v33, %v11224_v12  ;;  %v6894_v62 = vand.u32 4294901760, %v18622_v8 }
 0x944   : > { %14185 = vmatprep.subr.bf16.mxu1 %v18437_v2  ;;  %v11227_v2 = vld [vmem:[%s15224_s22 + $0x1d0] sm:$0xff]  ;;  %v4495_v41 = vadd.f32 %v11824_v19, %v4376_v48  ;;  %v18640_v48 = vsub.f32 %v18612_v9, %v6942_v43  ;;  %v18645_v24 = vsub.f32 %v18615_v5, %v6945_v7 }
 0x945   : > { %14143 = vmatpush3.bf16.msra.mxu0 %v23083_v20 }
 0x946   : > { %14145 = vmatprep.subr.bf16.mxu0 %v23084_v56  ;;  %23094 = vst [vmem:[#allocation57_spill] sm:$0xff] %v18640_v48  ;;  %23095 = vst [vmem:[#allocation59_spill] sm:$0xff] %v18645_v24  ;;  %v22025_v35 = vand.u32 4294901760, %v18640_v48 }
 0x947   : > { %14187 = vmatpush3.bf16.msra.mxu1 %v18449_v31  ;;  %v14202_v31 = vpack.c.bf16 %v11227_v2, %v11223_v58  ;;  %v18607_v58 = vld [vmem:[%s15236_s15 + $0x400] sm:$0xff]  ;;  %v6936_v2 = vand.u32 4294901760, %v11250_v37 }
 0x948   : > { %14197 = vmatprep.subr.bf16.mxu1 %v14196_v15 }
 0x949   : > { %14147 = vmatpush3.bf16.msra.mxu0 %v23085_v18  ;;  %v11235_v18 = vld [vmem:[%s15236_s15 + $0x408] sm:$0xff] }
 0x94a   : > { %14149 = vmatprep.subr.bf16.mxu0 %v23086_v34  ;;  %6608 = vmatmul.mubr.f32.vlgmr.msra.gmra.mrb[74].mxu1 %v18386_v38  ;;  %v6888_v34 = vand.u32 4294901760, %v18607_v58  ;;  %v6891_v3 = vand.u32 4294901760, %v11235_v18 }
 0x94b   : > { %6613 = vmatprep.mubr.f32.mxu1 %v18395_v63  ;;  %14199 = vmatpush1.bf16.msra.mxu1 %v14198_v53 }
 0x94c   : > { %14201 = vmatprep.subr.bf16.mxu1 %v14200_v11  ;;  %v11251_v11 = vld [vmem:[%s15236_s15 + $0x488] sm:$0xff]  ;;  %v18635_v52 = vsub.f32 %v11235_v18, %v6891_v3 }
 0x94d   : > { %14151 = vmatpush3.bf16.msra.mxu0 %v23087_v60  ;;  %v6939_v13 = vand.u32 4294901760, %v11251_v11  ;;  %v18625_v60 = vld [vmem:[%s15236_s15 + $0x418] sm:$0xff] }
 0x94e   : > { %14153 = vmatprep.subr.bf16.mxu0 %v23088_v16  ;;  %6615 = vmatmul.mubr.f32.gmra.mrb[76].mxu1 %v18407_v42  ;;  %23093 = vst [vmem:[#allocation12_spill] sm:$0xff] %v18635_v52  ;;  %v6897_v1 = vand.u32 4294901760, %v18625_v60  ;;  %v22026_v57 = vand.u32 4294901760, %v18635_v52 }
 0x94f   : > { %14203 = vmatpush1.bf16.msra.mxu1 %v14202_v31  ;;  %6801 = vmatprep.mubr.f32.mxu1 %v23089_v21  ;;  %v18629_v16 = vsub.f32 %v11251_v11, %v6939_v13  ;;  %v18703_v11 = vpack.c.bf16 %v6891_v3, %v6888_v34  ;;  %v18728_v3 = vpack.c.bf16 %v6945_v7, %v6942_v43 }
 0x951   : > { %14155 = vmatpush3.bf16.msra.mxu0 %v23090_v28  ;;  %23096 = vst [vmem:[#allocation33_spill] sm:$0xff] %v18728_v3 }
 0x952   : > { %14189 = vmatprep.subr.bf16.mxu0 %v14188_v46  ;;  %11232 = vmatmul.mubr.msk.f32.vlgmr.msra.gmra.mrb[78].mxu1 %vm624_vm1, %v23091_v27  ;;  %v11895_v45 = vpop.f32.mrb[50].mxu1  ;;  %v18632_v46 = vsub.f32 %v18607_v58, %v6888_v34  ;;  %v18706_v58 = vld [vmem:[%s15236_s15 + $0x420] sm:$0xff] }
 0x953   : > { %6807 = vmatprep.mubr.f32.mxu1 %v23089_v21 }
 0x954   : > { %6497 = vmatmul.mubr.f32.vlgmr.msra.gmra.mrb[66].mxu0 %v18386_v38  ;;  %v11896_v38 = vpop.f32.mrb[51].mxu1 }
 0x955   : > { %6502 = vmatprep.mubr.f32.mxu0 %v18395_v63  ;;  %14191 = vmatpush1.bf16.msra.mxu0 %v14190_v59  ;;  %v11897_v30 = vadd.f32 %v11896_v38, %v11895_v45  ;;  %v22028_v59 = vand.u32 4294901760, %v18629_v16  ;;  %v18662_v45 = vsub.f32 %v18625_v60, %v6897_v1 }
 0x956   : > { %14193 = vmatprep.subr.bf16.mxu0 %v14192_v39  ;;  %11233 = vmatmul.mubr.msk.f32.gmra.mrb[80].mxu1 %vm624_vm1, %v23092_v51  ;;  %v18654_v39 = vsub.f32 %v18622_v8, %v6894_v62 }
 0x957   : > { %v11898_v63 = vpop.f32.mrb[52].mxu1 }
 0x958   : > { %6504 = vmatmul.mubr.f32.gmra.mrb[68].mxu0 %v18407_v42  ;;  %v11899_v29 = vpop.f32.mrb[53].mxu1 }
 0x959   : > { %14195 = vmatpush1.bf16.msra.mxu0 %v14194_v36  ;;  %6724 = vmatprep.mubr.f32.mxu0 %v23089_v21  ;;  %v11900_v22 = vadd.f32 %v11899_v29, %v11898_v63  ;;  %v22024_v36 = vand.u32 4294901760, %v18645_v24  ;;  %v22023_v29 = vand.u32 4294901760, %v18654_v39 }
 0x95c   : > { %11230 = vmatmul.mubr.msk.f32.vlgmr.msra.gmra.mrb[70].mxu0 %vm624_vm1, %v23091_v27  ;;  %v11857_v40 = vpop.f32.mrb[42].mxu0 }
 0x95d   : > { %6730 = vmatprep.mubr.f32.mxu0 %v23089_v21  ;;  %v11858_v44 = vpop.f32.mrb[43].mxu0 }
 0x95e   : > { %v11859_v42 = vadd.f32 %v11858_v44, %v11857_v40  ;;  %v7144_v40 = vsub.f32 %v18640_v48, %v22025_v35  ;;  %v7151_v44 = vsub.f32 %v18645_v24, %v22024_v36 }
 0x960   : > { %11231 = vmatmul.mubr.msk.f32.gmra.mrb[72].mxu0 %vm624_vm1, %v23092_v51  ;;  %v4663_v14 = vadd.f32 %v11859_v42, %v4484_v10  ;;  %v18627_v10 = vsub.f32 %v11250_v37, %v6936_v2  ;;  %v22020_v42 = vand.u32 4294901760, %v18662_v45 }
 0x961   : > { %v11860_v47 = vpop.f32.mrb[44].mxu0 }
 0x962   : > { %v11861_v49 = vpop.f32.mrb[45].mxu0  ;;  %v4774_v26 = vadd.f32 %v11897_v30, %v4663_v14  ;;  %v22029_v28 = vand.u32 4294901760, %v18627_v10  ;;  %v7137_v30 = vsub.f32 %v18629_v16, %v22028_v59 }
 0x963   : > { %v11862_v55 = vadd.f32 %v11861_v49, %v11860_v47 }
 0x964   : > { %v7130_v38 = vsub.f32 %v18627_v10, %v22029_v28  ;;  %v7138_v47 = vand.u32 4294901760, %v7137_v30 }
 0x965   : > { %v4670_v61 = vadd.f32 %v11862_v55, %v4495_v41  ;;  %v22027_v41 = vand.u32 4294901760, %v18632_v46  ;;  %v7032_v55 = vsub.f32 %v18654_v39, %v22023_v29 }
 0x966   : > { %v7131_v14 = vand.u32 4294901760, %v7130_v38  ;;  %v6900_v38 = vand.u32 4294901760, %v18706_v58 }
 0x967   : > { %v4781_v4 = vadd.f32 %v11900_v22, %v4670_v61  ;;  %v7018_v63 = vsub.f32 %v18632_v46, %v22027_v41  ;;  %v7025_v22 = vsub.f32 %v18635_v52, %v22026_v57  ;;  %v7145_v61 = vand.u32 4294901760, %v7144_v40 }
 0x969   : > { %v7019_v49 = vand.u32 4294901760, %v7018_v63  ;;  %v18731_v63 = vld [vmem:[%s15236_s15 + $0x4b0] sm:$0xff] }
 0x96a   : > { %v6954_v43 = vand.u32 4294901760, %v18731_v63 }
 0x96c   : > { %v18772_v60 = vsub.f32 %v18731_v63, %v6954_v43 }
 0x975   : > { %v11971_v32 = vpop.f32.mrb[54].mxu1 }
 0x976   : > { %v11972_v17 = vpop.f32.mrb[55].mxu1 }
 0x977   : > { %v11973_v50 = vadd.f32 %v11972_v17, %v11971_v32  ;;  %v7039_v32 = vsub.f32 %v18662_v45, %v22020_v42  ;;  %v14236_v17 = vpack.c.bf16 %v7138_v47, %v7131_v14  ;;  %v18741_v47 = vsub.f32 %v18706_v58, %v6900_v38 }
 0x979   : > { %v11974_v25 = vpop.f32.mrb[56].mxu1  ;;  %14237 = vmatprep.subr.bf16.mxu1 %v14236_v17 }
 0x97a   : > { %v11975_v6 = vpop.f32.mrb[57].mxu1 }
 0x97b   : > { %v11976_v19 = vadd.f32 %v11975_v6, %v11974_v25 }
 0x981   : > { %v11933_v15 = vpop.f32.mrb[46].mxu0 }
 0x982   : > { %v11934_v23 = vpop.f32.mrb[47].mxu0 }
 0x983   : > { %v11935_v0 = vadd.f32 %v11934_v23, %v11933_v15 }
 0x985   : > { %v4893_v20 = vadd.f32 %v11935_v0, %v4774_v26  ;;  %v11936_v12 = vpop.f32.mrb[48].mxu0  ;;  %v7026_v26 = vand.u32 4294901760, %v7025_v22  ;;  %v18690_v0 = vpack.c.bf16 %v6939_v13, %v6936_v2  ;;  %v18709_v2 = vld [vmem:[%s15236_s15 + $0x428] sm:$0xff]  ;;  %v18734_v22 = vld [vmem:[%s15236_s15 + $0x4b8] sm:$0xff] }
 0x986   : > { %v11937_v33 = vpop.f32.mrb[49].mxu0  ;;  %v6903_v30 = vand.u32 4294901760, %v18709_v2  ;;  %v6957_v7 = vand.u32 4294901760, %v18734_v22 }
 0x987   : > { %v11938_v56 = vadd.f32 %v11937_v33, %v11936_v12  ;;  %v18602_v54 = vadd.f32 %v11973_v50, %v4893_v20  ;;  %v7033_v50 = vand.u32 4294901760, %v7032_v55  ;;  %v14238_v25 = vpack.c.bf16 %v7026_v26, %v7019_v49  ;;  %v18693_v20 = vld [vmem:[%s15236_s15 + $0x4a0] sm:$0xff]  ;;  %v18696_v12 = vld [vmem:[%s15236_s15 + $0x4a8] sm:$0xff]  ;;  %14205 = vmatprep.subr.bf16.mxu0 %v18690_v0  ;;  %v18758_v55 = vld [vmem:[%s15236_s15 + $0x430] sm:$0xff] }
 0x988   : > { %14207 = vmatpush3.bf16.msra.mxu0 %v18703_v11  ;;  %v18746_v9 = vsub.f32 %v18709_v2, %v6903_v30  ;;  %v18755_v49 = vpack.c.bf16 %v6897_v1, %v6894_v62  ;;  %v18761_v26 = vld [vmem:[%s15236_s15 + $0x438] sm:$0xff]  ;;  %v18775_v62 = vsub.f32 %v18734_v22, %v6957_v7  ;;  %v6906_v1 = vand.u32 4294901760, %v18758_v55 }
 0x989   : > { %v4908_v53 = vadd.f32 %v11938_v56, %v4781_v4  ;;  %v7152_v4 = vand.u32 4294901760, %v7151_v44  ;;  %14239 = vmatpush3.bf16.msra.mxu1 %v14238_v25  ;;  %v6948_v56 = vand.u32 4294901760, %v18693_v20  ;;  %14209 = vmatprep.subr.bf16.mxu0 %v18728_v3  ;;  %v6909_v17 = vand.u32 4294901760, %v18761_v26 }
 0x98a   : > { %23097 = vst [vmem:[#allocation34_spill] sm:$0xff] %v18755_v49  ;;  %v22017_v8 = vand.u32 4294901760, %v18746_v9 }
 0x98b   : > { %v18617_v31 = vadd.f32 %v11976_v19, %v4908_v53  ;;  %v14240_v6 = vpack.c.bf16 %v7152_v4, %v7145_v61  ;;  %v7040_v19 = vand.u32 4294901760, %v7039_v32  ;;  %v6951_v53 = vand.u32 4294901760, %v18696_v12 }
 0x98c   : > { %v18714_v13 = vsub.f32 %v18693_v20, %v6948_v56  ;;  %v22016_v32 = vand.u32 4294901760, %v18741_v47  ;;  %14211 = vmatpush3.bf16.msra.mxu0 %v18755_v49  ;;  %v18792_v63 = vsub.f32 %v18761_v26, %v6909_v17 }
 0x98d   : > { %v14242_v23 = vpack.c.bf16 %v7040_v19, %v7033_v50  ;;  %14241 = vmatprep.subr.bf16.mxu1 %v14240_v6  ;;  %v18719_v18 = vsub.f32 %v18696_v12, %v6951_v53  ;;  %v7053_v19 = vsub.f32 %v18746_v9, %v22017_v8 }
 0x98e   : > { %v22019_v44 = vand.u32 4294901760, %v18714_v13  ;;  %v7046_v6 = vsub.f32 %v18741_v47, %v22016_v32  ;;  %v22033_v26 = vand.u32 4294901760, %v18792_v63 }
 0x98f   : > { %14243 = vmatpush3.bf16.msra.mxu1 %v14242_v23  ;;  %v22018_v14 = vand.u32 4294901760, %v18719_v18  ;;  %v22022_v23 = vand.u32 4294901760, %v18772_v60 }
 0x990   : > { %v7158_v61 = vsub.f32 %v18714_v13, %v22019_v44 }
 0x991   : > { %v7165_v4 = vsub.f32 %v18719_v18, %v22018_v14  ;;  %v7172_v8 = vsub.f32 %v18772_v60, %v22022_v23 }
 0x992   : > { %v7159_v50 = vand.u32 4294901760, %v7158_v61  ;;  %v7047_v61 = vand.u32 4294901760, %v7046_v6 }
 0x993   : > { %v7166_v25 = vand.u32 4294901760, %v7165_v4  ;;  %v7054_v4 = vand.u32 4294901760, %v7053_v19 }
 0x999   : > { %v12047_v15 = vpop.f32.mrb[58].mxu1 }
 0x99a   : > { %v12048_v33 = vpop.f32.mrb[59].mxu1 }
 0x99b   : > { %v18700_v37 = vadd.f32 %v12048_v33, %v12047_v15  ;;  %v22021_v33 = vand.u32 4294901760, %v18775_v62 }
 0x99d   : > { %v7179_v14 = vsub.f32 %v18775_v62, %v22021_v33 }
 0x99f   : > { %v12050_v34 = vpop.f32.mrb[60].mxu1  ;;  %v7180_v6 = vand.u32 4294901760, %v7179_v14 }
 0x9a0   : > { %v12051_v40 = vpop.f32.mrb[61].mxu1 }
 0x9a1   : > { %v12052_v5 = vadd.f32 %v12051_v40, %v12050_v34  ;;  %v18789_v34 = vsub.f32 %v18758_v55, %v6906_v1  ;;  %v14244_v40 = vpack.c.bf16 %v7166_v25, %v7159_v50  ;;  %v14246_v55 = vpack.c.bf16 %v7054_v4, %v7047_v61 }
 0x9a2   : > { %v7173_v25 = vand.u32 4294901760, %v7172_v8 }
 0x9a3   : > { %v12009_v15 = vpop.f32.mrb[50].mxu0  ;;  %v22034_v44 = vand.u32 4294901760, %v18789_v34  ;;  %14245 = vmatprep.subr.bf16.mxu1 %v14244_v40 }
 0x9a4   : > { %v12010_v22 = vpop.f32.mrb[51].mxu0  ;;  %14247 = vmatpush3.bf16.msra.mxu1 %v14246_v55 }
 0x9a5   : > { %v12011_v32 = vadd.f32 %v12010_v22, %v12009_v15  ;;  %v7060_v19 = vsub.f32 %v18789_v34, %v22034_v44  ;;  %v7067_v22 = vsub.f32 %v18792_v63, %v22033_v26 }
 0x9a7   : > { %v5285_v42 = vadd.f32 %v12011_v32, %v18602_v54  ;;  %v12012_v50 = vpop.f32.mrb[52].mxu0  ;;  %v14248_v54 = vpack.c.bf16 %v7180_v6, %v7173_v25  ;;  %v7061_v14 = vand.u32 4294901760, %v7060_v19  ;;  %v7068_v32 = vand.u32 4294901760, %v7067_v22  ;;  %v18830_v25 = vld [vmem:[%s15236_s15 + $0x440] sm:$0xff]  ;;  %v18835_v19 = vld [vmem:[%s15236_s15 + $0x448] sm:$0xff] }
 0x9a8   : > { %v12013_v15 = vpop.f32.mrb[53].mxu0  ;;  %v22043_v12 = vand.u32 4294901760, %v18830_v25  ;;  %v22041_v58 = vand.u32 4294901760, %v18835_v19 }
 0x9a9   : > { %v12014_v40 = vadd.f32 %v12013_v15, %v12012_v50  ;;  %v18810_v61 = vadd.f32 %v18700_v37, %v5285_v42  ;;  %14249 = vmatprep.subr.bf16.mxu1 %v14248_v54  ;;  %v14250_v4 = vpack.c.bf16 %v7068_v32, %v7061_v14  ;;  %v18819_v50 = vpack.c.bf16 %v6951_v53, %v6948_v56  ;;  %v11258_v42 = vld [vmem:[%s15236_s15 + $0x4c0] sm:$0xff]  ;;  %v11259_v37 = vld [vmem:[%s15236_s15 + $0x4c8] sm:$0xff]  ;;  %v18839_v56 = vld [vmem:[%s15236_s15 + $0x4d0] sm:$0xff] }
 0x9aa   : > { %v6960_v6 = vand.u32 4294901760, %v11258_v42  ;;  %v6963_v20 = vand.u32 4294901760, %v11259_v37  ;;  %v18842_v53 = vld [vmem:[%s15236_s15 + $0x4d8] sm:$0xff]  ;;  %v22039_v2 = vand.u32 4294901760, %v18839_v56 }
 0x9ab   : > { %v5294_v8 = vadd.f32 %v12014_v40, %v18617_v31  ;;  %14251 = vmatpush3.bf16.msra.mxu1 %v14250_v4  ;;  %23098 = vst [vmem:[#allocation32_spill] sm:$0xff] %v18819_v50  ;;  %v18827_v31 = vpack.c.bf16 %v6903_v30, %v6900_v38  ;;  %14213 = vmatprep.subr.bf16.mxu0 %v18819_v50  ;;  %v22037_v38 = vand.u32 4294901760, %v18842_v53 }
 0x9ac   : > { %v18848_v30 = vpack.c.bf16 %v6909_v17, %v6906_v1  ;;  %v18856_v15 = vsub.f32 %v11258_v42, %v6960_v6  ;;  %v18858_v22 = vsub.f32 %v11259_v37, %v6963_v20  ;;  %v18864_v40 = vsub.f32 %v18830_v25, %v22043_v12 }
 0x9ad   : > { %v18813_v55 = vadd.f32 %v12052_v5, %v5294_v8  ;;  %23099 = vst [vmem:[#allocation13_spill] sm:$0xff] %v18827_v31  ;;  %v18832_v5 = vpack.c.bf16 %v6957_v7, %v6954_v43  ;;  %v18851_v43 = vld [vmem:[%s15236_s15 + $0x450] sm:$0xff]  ;;  %v18854_v7 = vld [vmem:[%s15236_s15 + $0x458] sm:$0xff]  ;;  %14215 = vmatpush3.bf16.msra.mxu0 %v18827_v31  ;;  %v18870_v1 = vsub.f32 %v18835_v19, %v22041_v58  ;;  %v18928_v58 = vld [vmem:[%s15236_s15 + $0x4e0] sm:$0xff] }
 0x9ae   : > { %23101 = vst [vmem:[#allocation10_spill] sm:$0xff] %v18848_v30  ;;  %v22036_v54 = vand.u32 4294901760, %v18851_v43  ;;  %v18876_v17 = vsub.f32 %v18839_v56, %v22039_v2  ;;  %v18881_v14 = vsub.f32 %v18842_v53, %v22037_v38  ;;  %v22035_v32 = vand.u32 4294901760, %v18854_v7 }
 0x9af   : > { %23100 = vst [vmem:[#allocation9_spill] sm:$0xff] %v18832_v5  ;;  %14217 = vmatprep.subr.bf16.mxu0 %v18832_v5  ;;  %v22030_v8 = vand.u32 4294901760, %v18856_v15  ;;  %v22031_v4 = vand.u32 4294901760, %v18858_v22  ;;  %v22032_v42 = vand.u32 4294901760, %v18864_v40  ;;  %v22038_v33 = vand.u32 4294901760, %v18870_v1 }
 0x9b0   : > { %v18890_v37 = vsub.f32 %v18851_v43, %v22036_v54  ;;  %v22040_v23 = vand.u32 4294901760, %v18876_v17  ;;  %v22042_v29 = vand.u32 4294901760, %v18881_v14  ;;  %v18898_v36 = vsub.f32 %v18854_v7, %v22035_v32 }
 0x9b1   : > { %v7186_v35 = vsub.f32 %v18856_v15, %v22030_v8  ;;  %v7193_v57 = vsub.f32 %v18858_v22, %v22031_v4  ;;  %v7074_v41 = vsub.f32 %v18864_v40, %v22032_v42  ;;  %14219 = vmatpush3.bf16.msra.mxu0 %v18848_v30  ;;  %v7081_v28 = vsub.f32 %v18870_v1, %v22038_v33  ;;  %v18944_v30 = vld [vmem:[%s15236_s15 + $0x4f0] sm:$0xff] }
 0x9b2   : > { %v22045_v59 = vand.u32 4294901760, %v18890_v37  ;;  %v7200_v8 = vsub.f32 %v18876_v17, %v22040_v23  ;;  %v7207_v4 = vsub.f32 %v18881_v14, %v22042_v29  ;;  %v22047_v42 = vand.u32 4294901760, %v18898_v36  ;;  %v18931_v29 = vld [vmem:[%s15236_s15 + $0x4e8] sm:$0xff] }
 0x9b3   : > { %v7187_v26 = vand.u32 4294901760, %v7186_v35  ;;  %v7194_v44 = vand.u32 4294901760, %v7193_v57  ;;  %v7075_v32 = vand.u32 4294901760, %v7074_v41  ;;  %v7082_v38 = vand.u32 4294901760, %v7081_v28  ;;  %v18934_v35 = vld [vmem:[%s15236_s15 + $0x460] sm:$0xff] }
 0x9b4   : > { %v7088_v54 = vsub.f32 %v18890_v37, %v22045_v59  ;;  %v7201_v33 = vand.u32 4294901760, %v7200_v8  ;;  %v7208_v2 = vand.u32 4294901760, %v7207_v4  ;;  %v7095_v23 = vsub.f32 %v18898_v36, %v22047_v42  ;;  %v18940_v8 = vld [vmem:[%s15236_s15 + $0x468] sm:$0xff] }
 0x9b5   : > { %v14252_v41 = vpack.c.bf16 %v7194_v44, %v7187_v26  ;;  %v18936_v51 = vpack.c.bf16 %v6963_v20, %v6960_v6  ;;  %v6972_v28 = vand.u32 4294901760, %v18928_v58  ;;  %v14254_v59 = vpack.c.bf16 %v7082_v38, %v7075_v32  ;;  %v11265_v6 = vld [vmem:[%s15236_s15 + $0x4f8] sm:$0xff] }
 0x9b6   : > { %v7089_v12 = vand.u32 4294901760, %v7088_v54  ;;  %v14256_v27 = vpack.c.bf16 %v7208_v2, %v7201_v33  ;;  %v7096_v42 = vand.u32 4294901760, %v7095_v23  ;;  %v6975_v21 = vand.u32 4294901760, %v18931_v29 }
 0x9b7   : > { %23102 = vst [vmem:[#allocation21_spill] sm:$0xff] %v18936_v51  ;;  %14253 = vmatprep.subr.bf16.mxu1 %v14252_v41  ;;  %14221 = vmatprep.subr.bf16.mxu0 %v18936_v51  ;;  %v18950_v44 = vsub.f32 %v18928_v58, %v6972_v28  ;;  %v6924_v26 = vand.u32 4294901760, %v18934_v35  ;;  %v23103_v33 = vand.u32 4294901760, %v18830_v25  ;;  %v23104_v2 = vand.u32 4294901760, %v18835_v19  ;;  %v11248_v19 = vld [vmem:[%s15236_s15 + $0x470] sm:$0xff] }
 0x9b8   : > { %14255 = vmatpush3.bf16.msra.mxu1 %v14254_v59  ;;  %v14258_v20 = vpack.c.bf16 %v7096_v42, %v7089_v12  ;;  %v18955_v23 = vsub.f32 %v18931_v29, %v6975_v21  ;;  %v6927_v54 = vand.u32 4294901760, %v18940_v8  ;;  %v23106_v59 = vand.u32 4294901760, %v18839_v56 }
 0x9b9   : > { %v12123_v57 = vpop.f32.mrb[62].mxu1  ;;  %v18961_v38 = vpack.c.bf16 %v23104_v2, %v23103_v33  ;;  %14257 = vmatprep.subr.bf16.mxu1 %v14256_v27  ;;  %v22053_v58 = vand.u32 4294901760, %v18950_v44  ;;  %v23107_v29 = vand.u32 4294901760, %v18842_v53  ;;  %v6978_v25 = vand.u32 4294901760, %v18944_v30  ;;  %v11249_v53 = vld [vmem:[%s15236_s15 + $0x478] sm:$0xff] }
 0x9ba   : > { %v12124_v4 = vpop.f32.mrb[63].mxu1  ;;  %v22056_v41 = vand.u32 4294901760, %v18955_v23  ;;  %v18979_v27 = vsub.f32 %v18940_v8, %v6927_v54  ;;  %v23110_v56 = vand.u32 4294901760, %v18854_v7  ;;  %v19020_v31 = vpack.c.bf16 %v6975_v21, %v6972_v28 }
 0x9bb   : > { %v18946_v5 = vadd.f32 %v12124_v4, %v12123_v57  ;;  %23105 = vst [vmem:[#allocation20_spill] sm:$0xff] %v18961_v38  ;;  %v18966_v57 = vsub.f32 %v18934_v35, %v6924_v26  ;;  %v18972_v12 = vpack.c.bf16 %v23107_v29, %v23106_v59  ;;  %14223 = vmatpush3.bf16.msra.mxu0 %v18961_v38  ;;  %v6981_v4 = vand.u32 4294901760, %v11265_v6 }
 0x9bc   : > { %v23109_v35 = vand.u32 4294901760, %v18851_v43  ;;  %v7214_v59 = vsub.f32 %v18950_v44, %v22053_v58  ;;  %v18996_v8 = vsub.f32 %v18944_v30, %v6978_v25  ;;  %14259 = vmatpush3.bf16.msra.mxu1 %v14258_v20  ;;  %v7221_v43 = vsub.f32 %v18955_v23, %v22056_v41 }
 0x9bd   : > { %v12126_v32 = vpop.f32.mrb[64].mxu1  ;;  %23108 = vst [vmem:[#allocation39_spill] sm:$0xff] %v18972_v12  ;;  %v22059_v29 = vand.u32 4294901760, %v18966_v57  ;;  %14225 = vmatprep.subr.bf16.mxu0 %v18972_v12  ;;  %v22068_v7 = vand.u32 4294901760, %v18979_v27  ;;  %v6933_v12 = vand.u32 4294901760, %v11249_v53 }
 0x9be   : > { %v12127_v42 = vpop.f32.mrb[65].mxu1  ;;  %v18985_v33 = vpack.c.bf16 %v23110_v56, %v23109_v35  ;;  %v7215_v35 = vand.u32 4294901760, %v7214_v59  ;;  %v22073_v58 = vand.u32 4294901760, %v18996_v8  ;;  %v7222_v30 = vand.u32 4294901760, %v7221_v43 }
 0x9bf   : > { %v18988_v2 = vadd.f32 %v12127_v42, %v12126_v32  ;;  %v19002_v32 = vsub.f32 %v11265_v6, %v6981_v4  ;;  %v6930_v42 = vand.u32 4294901760, %v11248_v19  ;;  %v7102_v56 = vsub.f32 %v18966_v57, %v22059_v29 }
 0x9c0   : > { %23111 = vst [vmem:[#allocation14_spill] sm:$0xff] %v18985_v33  ;;  %v7109_v20 = vsub.f32 %v18979_v27, %v22068_v7  ;;  %14227 = vmatpush3.bf16.msra.mxu0 %v18985_v33  ;;  %v7228_v29 = vsub.f32 %v18996_v8, %v22073_v58  ;;  %v19018_v51 = vsub.f32 %v11249_v53, %v6933_v12 }
 0x9c1   : > { %v7234_v41 = vand.u32 4294901760, %v19002_v32  ;;  %v19013_v6 = vsub.f32 %v11248_v19, %v6930_v42  ;;  %v7103_v59 = vand.u32 4294901760, %v7102_v56  ;;  %v14260_v50 = vpack.c.bf16 %v7222_v30, %v7215_v35  ;;  %14229 = vmatprep.subr.bf16.mxu0 %v19020_v31 }
 0x9c2   : > { %23113 = vst [vmem:[#allocation56_spill] sm:$0xff] %v19018_v51  ;;  %v7110_v49 = vand.u32 4294901760, %v7109_v20  ;;  %v7229_v3 = vand.u32 4294901760, %v7228_v29  ;;  %v7122_v56 = vand.u32 4294901760, %v19018_v51  ;;  %v19028_v58 = vpack.c.bf16 %v6927_v54, %v6924_v26 }
 0x9c3   : > { %23112 = vst [vmem:[#allocation66_spill] sm:$0xff] %v19013_v6  ;;  %v12085_v38 = vpop.f32.mrb[54].mxu0  ;;  %v7235_v7 = vsub.f32 %v19002_v32, %v7234_v41  ;;  %v7115_v19 = vand.u32 4294901760, %v19013_v6  ;;  %14261 = vmatprep.subr.bf16.mxu1 %v14260_v50  ;;  %v19033_v35 = vpack.c.bf16 %v6981_v4, %v6978_v25  ;;  %v19040_v26 = vpack.c.bf16 %v6933_v12, %v6930_v42 }
 0x9c4   : > { %v12086_v43 = vpop.f32.mrb[55].mxu0  ;;  %v14262_v21 = vpack.c.bf16 %v7110_v49, %v7103_v59  ;;  %14231 = vmatpush3.bf16.msra.mxu0 %v19028_v58  ;;  %v14268_v49 = vpack.c.bf16 %v18629_v16, %v18627_v10 }
 0x9c5   : > { %v12087_v33 = vadd.f32 %v12086_v43, %v12085_v38  ;;  %v7236_v28 = vand.u32 4294901760, %v7235_v7  ;;  %v7116_v53 = vsub.f32 %v19013_v6, %v7115_v19  ;;  %v7123_v38 = vsub.f32 %v19018_v51, %v7122_v56  ;;  %14233 = vmatprep.subr.bf16.mxu0 %v19033_v35 }
 0x9c6   : > { %14263 = vmatpush3.bf16.msra.mxu1 %v14262_v21  ;;  %v23114_v43 = vand.u32 4294901760, %v18789_v34 }
 0x9c7   : > { %v5581_v30 = vadd.f32 %v12087_v33, %v18810_v61  ;;  %v12088_v20 = vpop.f32.mrb[56].mxu0  ;;  %v14264_v54 = vpack.c.bf16 %v7236_v28, %v7229_v3  ;;  %v7117_v29 = vand.u32 4294901760, %v7116_v53  ;;  %v7124_v12 = vand.u32 4294901760, %v7123_v38 }
 0x9c8   : > { %v12089_v50 = vpop.f32.mrb[57].mxu0  ;;  %14235 = vmatpush3.bf16.msra.mxu0 %v19040_v26  ;;  %v23117_v3 = vand.u32 4294901760, %v18856_v15 }
 0x9c9   : > { %v12090_v4 = vadd.f32 %v12089_v50, %v12088_v20  ;;  %v5692_v33 = vadd.f32 %v18946_v5, %v5581_v30  ;;  %14265 = vmatprep.subr.bf16.mxu1 %v14264_v54  ;;  %v14266_v5 = vpack.c.bf16 %v7124_v12, %v7117_v29  ;;  %14269 = vmatprep.subr.bf16.mxu0 %v14268_v49  ;;  %v23115_v50 = vand.u32 4294901760, %v18792_v63 }
 0x9cb   : > { %v5588_v21 = vadd.f32 %v12090_v4, %v18813_v55  ;;  %14267 = vmatpush3.bf16.msra.mxu1 %v14266_v5  ;;  %v19084_v59 = vpack.c.bf16 %v23115_v50, %v23114_v43  ;;  %v23123_v43 = vand.u32 4294901760, %v18876_v17  ;;  %v23124_v50 = vand.u32 4294901760, %v18881_v14 }
 0x9cc   : > { %14301 = vmatprep.subr.bf16.mxu1 %v18690_v0 }
 0x9cd   : > { %v5699_v30 = vadd.f32 %v18988_v2, %v5588_v21  ;;  %23116 = vst [vmem:[#allocation67_spill] sm:$0xff] %v19084_v59 }
 0x9db   : > { %v12199_v54 = vpop.f32.mrb[66].mxu1 }
 0x9dc   : > { %v12200_v29 = vpop.f32.mrb[67].mxu1 }
 0x9dd   : > { %v12201_v4 = vadd.f32 %v12200_v29, %v12199_v54  ;;  %v23118_v54 = vand.u32 4294901760, %v18858_v22 }
 0x9df   : > { %v12202_v12 = vpop.f32.mrb[68].mxu1  ;;  %v19090_v29 = vpack.c.bf16 %v23118_v54, %v23117_v3 }
 0x9e0   : > { %v12203_v21 = vpop.f32.mrb[69].mxu1 }
 0x9e1   : > { %v12204_v5 = vadd.f32 %v12203_v21, %v12202_v12  ;;  %23119 = vst [vmem:[#allocation42_spill] sm:$0xff] %v19090_v29  ;;  %v23132_v21 = vand.u32 4294901760, %v18966_v57 }
 0x9e7   : > { %v12161_v20 = vpop.f32.mrb[58].mxu0 }
 0x9e8   : > { %v12162_v55 = vpop.f32.mrb[59].mxu0 }
 0x9e9   : > { %v12163_v53 = vadd.f32 %v12162_v55, %v12161_v20  ;;  %v23120_v20 = vand.u32 4294901760, %v18864_v40 }
 0x9eb   : > { %v5811_v28 = vadd.f32 %v12163_v53, %v5692_v33  ;;  %v12164_v38 = vpop.f32.mrb[60].mxu0  ;;  %v23121_v33 = vand.u32 4294901760, %v18870_v1 }
 0x9ec   : > { %v12165_v49 = vpop.f32.mrb[61].mxu0 }
 0x9ed   : > { %v12166_v42 = vadd.f32 %v12165_v49, %v12164_v38  ;;  %v6058_v2 = vadd.f32 %v12201_v4, %v5811_v28  ;;  %v19096_v53 = vpack.c.bf16 %v23121_v33, %v23120_v20  ;;  %v19102_v38 = vpack.c.bf16 %v23124_v50, %v23123_v43 }
 0x9ee   : > { %v23126_v28 = vand.u32 4294901760, %v18890_v37  ;;  %v23127_v49 = vand.u32 4294901760, %v18898_v36  ;;  %v19132_v43 = vpack.c.bf16 %v7122_v56, %v7115_v19  ;;  %v11229_v56 = vld [vmem:[%s15230_s0 + $0x8] sm:$0xf] }
 0x9ef   : > { %v5826_v12 = vadd.f32 %v12166_v42, %v5699_v30  ;;  %23122 = vst [vmem:[#allocation73_spill] sm:$0xff] %v19096_v53  ;;  %23125 = vst [vmem:[#allocation74_spill] sm:$0xff] %v19102_v38  ;;  %v23129_v42 = vand.u32 4294901760, %v18950_v44  ;;  %v23130_v30 = vand.u32 4294901760, %v18955_v23 }
 0x9f0   : > { %v19108_v3 = vpack.c.bf16 %v23127_v49, %v23126_v28  ;;  %23137 = vst [vmem:[#allocation52_spill] sm:$0xff] %v19132_v43 }
 0x9f1   : > { %v6065_v55 = vadd.f32 %v12204_v5, %v5826_v12  ;;  %v19114_v4 = vpack.c.bf16 %v23130_v30, %v23129_v42  ;;  %v23133_v5 = vand.u32 4294901760, %v18979_v27  ;;  %v23135_v12 = vand.u32 4294901760, %v18996_v8 }
 0x9f2   : > { %23128 = vst [vmem:[#allocation15_spill] sm:$0xff] %v19108_v3 }
 0x9f3   : > { %23131 = vst [vmem:[#allocation75_spill] sm:$0xff] %v19114_v4  ;;  %v19120_v54 = vpack.c.bf16 %v23133_v5, %v23132_v21  ;;  %v19126_v20 = vpack.c.bf16 %v7234_v41, %v23135_v12 }
 0x9f5   : > { %23134 = vst [vmem:[#allocation27_spill] sm:$0xff] %v19120_v54  ;;  %23136 = vst [vmem:[#allocation53_spill] sm:$0xff] %v19126_v20 }
 0x9fc   : > { %v12275_v33 = vpop.f32.mrb[70].mxu1 }
 0x9fd   : > { %v12276_v50 = vpop.f32.mrb[71].mxu1 }
 0x9fe   : > { %v12277_v28 = vadd.f32 %v12276_v50, %v12275_v33  ;;  %v23138_v50 = vld [vmem:[#allocation35_spill] sm:$0xff] }
 0x9ff   : > { %v6651_v53 = vrot.slane %v11229_v56, %v23138_v50 }
 0xa00   : > { %v12278_v49 = vpop.f32.mrb[72].mxu1 }
 0xa01   : > { %v12279_v42 = vpop.f32.mrb[73].mxu1 }
 0xa02   : > { %v12280_v30 = vadd.f32 %v12279_v42, %v12278_v49  ;;  %v23139_v49 = vld [vmem:[#allocation36_spill] sm:$0xff] }
 0xa03   : > { %v6655_v42 = vrot.slane %v11229_v56, %v23139_v49 }
 0xa07   : > { %v12237_v21 = vpop.f32.mrb[62].mxu0 }
 0xa08   : > { %v12238_v5 = vpop.f32.mrb[63].mxu0 }
 0xa09   : > { %v12239_v7 = vadd.f32 %v12238_v5, %v12237_v21 }
 0xa0b   : > { %v6203_v25 = vadd.f32 %v12239_v7, %v6058_v2  ;;  %v12240_v61 = vpop.f32.mrb[64].mxu0 }
 0xa0c   : > { %v12241_v41 = vpop.f32.mrb[65].mxu0 }
 0xa0d   : > { %v12242_v12 = vadd.f32 %v12241_v41, %v12240_v61  ;;  %v6320_v20 = vadd.f32 %v12277_v28, %v6203_v25  ;;  %v23144_v41 = vld [vmem:[#allocation24_spill] sm:$0xff] }
 0xa0f   : > { %v6212_v54 = vadd.f32 %v12242_v12, %v6065_v55  ;;  %v6643_v12 = vrot.slane %v11229_v56, %v23144_v41 }
 0xa11   : > { %v6331_v4 = vadd.f32 %v12280_v30, %v6212_v54 }
 0xa1d   : > { %v12351_v3 = vpop.f32.mrb[74].mxu1 }
 0xa1e   : > { %v12352_v38 = vpop.f32.mrb[75].mxu1 }
 0xa1f   : > { %v12353_v19 = vadd.f32 %v12352_v38, %v12351_v3 }
 0xa21   : > { %v12354_v43 = vpop.f32.mrb[76].mxu1 }
 0xa22   : > { %v12355_v33 = vpop.f32.mrb[77].mxu1 }
 0xa23   : > { %v12356_v29 = vadd.f32 %v12355_v33, %v12354_v43 }
 0xa25   : > { %v6803_v59 = vpop.f32.mrb[78].mxu1 }
 0xa26   : > { %v19137_v21 = vadd.f32 %v6803_v59, %v6651_v53  ;;  %v6805_v7 = vpop.f32.mrb[79].mxu1 }
 0xa27   : > { %v12313_v2 = vpop.f32.mrb[66].mxu0  ;;  %v19139_v61 = vadd.f32 %v6805_v7, %v6655_v42  ;;  %v23146_v7 = vld [vmem:[#allocation25_spill] sm:$0xff] }
 0xa28   : > { %23140 = vst [vmem:[#allocation55_spill] sm:$0xff] %v19137_v21  ;;  %v12314_v25 = vpop.f32.mrb[67].mxu0  ;;  %v6647_v49 = vrot.slane %v11229_v56, %v23146_v7  ;;  %v19157_v56 = vld [vmem:[%s15236_s15 + $0x598] sm:$0xff]  ;;  %v19204_v7 = vld [vmem:[%s15236_s15 + $0x528] sm:$0xff] }
 0xa29   : > { %23141 = vst [vmem:[#allocation44_spill] sm:$0xff] %v19139_v61  ;;  %v12315_v55 = vadd.f32 %v12314_v25, %v12313_v2  ;;  %v6809_v54 = vpop.f32.mrb[80].mxu1  ;;  %23150 = vst [vmem:[#allocation29_spill] sm:$0xff] %v19157_v56 }
 0xa2a   : > { %v19141_v28 = vadd.f32 %v6809_v54, %v6651_v53  ;;  %v6811_v38 = vpop.f32.mrb[81].mxu1  ;;  %23160 = vst [vmem:[#allocation46_spill] sm:$0xff] %v19204_v7 }
 0xa2b   : > { %v6499_v3 = vadd.f32 %v12315_v55, %v6320_v20  ;;  %v12316_v30 = vpop.f32.mrb[68].mxu0  ;;  %v19143_v5 = vadd.f32 %v6811_v38, %v6655_v42 }
 0xa2c   : > { %23142 = vst [vmem:[#allocation40_spill] sm:$0xff] %v19141_v28  ;;  %v12317_v43 = vpop.f32.mrb[69].mxu0 }
 0xa2d   : > { %23143 = vst [vmem:[#allocation79_spill] sm:$0xff] %v19143_v5  ;;  %v19146_v59 = vadd.f32 %v12353_v19, %v6499_v3  ;;  %v12318_v33 = vadd.f32 %v12317_v43, %v12316_v30  ;;  %v19154_v30 = vld [vmem:[%s15236_s15 + $0x590] sm:$0xff] }
 0xa2e   : > { %23149 = vst [vmem:[#allocation58_spill] sm:$0xff] %v19154_v30 }
 0xa2f   : > { %23145 = vst [vmem:[#allocation45_spill] sm:$0xff] %v19146_v59  ;;  %v6506_v50 = vadd.f32 %v12318_v33, %v6331_v4  ;;  %v6726_v2 = vpop.f32.mrb[70].mxu0  ;;  %v19162_v33 = vld [vmem:[%s15236_s15 + $0x510] sm:$0xff]  ;;  %v23158_v59 = vld [vmem:[#allocation33_spill] sm:$0xff] }
 0xa30   : > { %v6727_v53 = vadd.f32 %v6726_v2, %v6643_v12  ;;  %v6728_v25 = vpop.f32.mrb[71].mxu0  ;;  %23152 = vst [vmem:[#allocation26_spill] sm:$0xff] %v19162_v33  ;;  %v23166_v61 = vand.u32 4294901760, %v19162_v33 }
 0xa31   : > { %v19149_v20 = vadd.f32 %v12356_v29, %v6506_v50  ;;  %v6729_v42 = vadd.f32 %v6728_v25, %v6647_v49  ;;  %v19165_v29 = vld [vmem:[%s15236_s15 + $0x518] sm:$0xff] }
 0xa32   : > { %v6814_v55 = vmax.f32 %v6727_v53, 0.0  ;;  %23153 = vst [vmem:[#allocation30_spill] sm:$0xff] %v19165_v29 }
 0xa33   : > { %23147 = vst [vmem:[#allocation22_spill] sm:$0xff] %v19149_v20  ;;  %v6815_v54 = vmax.f32 %v6729_v42, 0.0  ;;  %v6732_v38 = vpop.f32.mrb[72].mxu0  ;;  %v19177_v42 = vld [vmem:[%s15236_s15 + $0x5a0] sm:$0xff] }
 0xa34   : > { %v19151_v41 = vand.u32 4294901760, %v6814_v55  ;;  %v6733_v19 = vadd.f32 %v6732_v38, %v6643_v12  ;;  %v6734_v3 = vpop.f32.mrb[73].mxu0  ;;  %23154 = vst [vmem:[#allocation28_spill] sm:$0xff] %v19177_v42 }
 0xa35   : > { %v19159_v4 = vand.u32 4294901760, %v6815_v54  ;;  %v6735_v43 = vadd.f32 %v6734_v3, %v6647_v49 }
 0xa36   : > { %23148 = vst [vmem:[#allocation23_spill] sm:$0xff] %v19151_v41  ;;  %v19168_v50 = vsub.f32 %v6814_v55, %v19151_v41  ;;  %v6818_v2 = vmax.f32 %v6733_v19, 0.0  ;;  %v19186_v19 = vld [vmem:[%s15236_s15 + $0x5a8] sm:$0xff]  ;;  %v19201_v55 = vld [vmem:[%s15236_s15 + $0x520] sm:$0xff] }
 0xa37   : > { %23151 = vst [vmem:[#allocation61_spill] sm:$0xff] %v19159_v4  ;;  %v19171_v53 = vsub.f32 %v6815_v54, %v19159_v4  ;;  %v6819_v12 = vmax.f32 %v6735_v43, 0.0  ;;  %7239 = vmatprep.mubr.f32.mxu1 %v19159_v4  ;;  %23156 = vst [vmem:[#allocation38_spill] sm:$0xff] %v19186_v19  ;;  %v19218_v54 = vld [vmem:[%s15236_s15 + $0x5b0] sm:$0xff]  ;;  %v19230_v4 = vsub.f32 %v19162_v33, %v23166_v61  ;;  %v19248_v33 = vld [vmem:[%s15236_s15 + $0x538] sm:$0xff] }
 0xa38   : > { %v22074_v38 = vand.u32 4294901760, %v19168_v50  ;;  %v19180_v3 = vand.u32 4294901760, %v6818_v2  ;;  %7241 = vmatmul.mubr.f32.vlgmr.msra.gmra.mrb[82].mxu1 %v19151_v41  ;;  %23159 = vst [vmem:[#allocation16_spill] sm:$0xff] %v19201_v55  ;;  %23163 = vst [vmem:[#allocation37_spill] sm:$0xff] %v19218_v54  ;;  %v23171_v41 = vld [vmem:[#allocation34_spill] sm:$0xff] }
 0xa39   : > { %v19188_v43 = vand.u32 4294901760, %v6819_v12  ;;  %14303 = vmatpush3.bf16.msra.mxu1 %v18703_v11  ;;  %v6985_v49 = vand.u32 4294901760, %v19171_v53  ;;  %23172 = vst [vmem:[#allocation64_spill] sm:$0xff] %v19248_v33 }
 0xa3a   : > { %23155 = vst [vmem:[#allocation31_spill] sm:$0xff] %v19180_v3  ;;  %v6992_v25 = vsub.f32 %v19168_v50, %v22074_v38  ;;  %v19196_v20 = vsub.f32 %v6818_v2, %v19180_v3  ;;  %14305 = vmatprep.subr.bf16.mxu1 %v23158_v59  ;;  %v23161_v2 = vand.u32 4294901760, %v19154_v30 }
 0xa3b   : > { %23157 = vst [vmem:[#allocation41_spill] sm:$0xff] %v19188_v43  ;;  %v19207_v28 = vsub.f32 %v6819_v12, %v19188_v43  ;;  %7246 = vmatprep.mubr.f32.mxu1 %v19188_v43  ;;  %v6986_v38 = vsub.f32 %v19171_v53, %v6985_v49  ;;  %v23164_v12 = vand.u32 4294901760, %v19157_v56 }
 0xa3c   : > { %v19214_v5 = vsub.f32 %v19154_v30, %v23161_v2  ;;  %7248 = vmatmul.mubr.f32.gmra.mrb[84].mxu1 %v19180_v3  ;;  %v23167_v2 = vand.u32 4294901760, %v19165_v29  ;;  %v19238_v30 = vld [vmem:[%s15236_s15 + $0x5b8] sm:$0xff]  ;;  %v19241_v3 = vld [vmem:[%s15236_s15 + $0x530] sm:$0xff]  ;;  %v6993_v51 = vand.u32 4294901760, %v6992_v25  ;;  %v23177_v25 = vand.u32 4294901760, %v19186_v19 }
 0xa3d   : > { %v19225_v43 = vsub.f32 %v19157_v56, %v23164_v12  ;;  %23169 = vst [vmem:[#allocation62_spill] sm:$0xff] %v19238_v30  ;;  %23170 = vst [vmem:[#allocation72_spill] sm:$0xff] %v19241_v3  ;;  %14307 = vmatpush3.bf16.msra.mxu1 %v23171_v41  ;;  %7499 = vmatprep.mubr.f32.mxu1 %v6985_v49  ;;  %v6987_v6 = vand.u32 4294901760, %v6986_v38  ;;  %v22090_v12 = vand.u32 4294901760, %v19207_v28  ;;  %v23175_v41 = vand.u32 4294901760, %v19177_v42 }
 0xa3e   : > { %23162 = vst [vmem:[#allocation47_spill] sm:$0xff] %v19214_v5  ;;  %v19235_v21 = vsub.f32 %v19165_v29, %v23167_v2  ;;  %v23173_v2 = vld [vmem:[#allocation32_spill] sm:$0xff]  ;;  %v23174_v29 = vand.u32 4294901760, %v19196_v20  ;;  %v19266_v56 = vsub.f32 %v19186_v19, %v23177_v25  ;;  %v23181_v25 = vld [vmem:[#allocation13_spill] sm:$0xff]  ;;  %v23184_v38 = vand.u32 4294901760, %v19204_v7 }
 0xa3f   : > { %23165 = vst [vmem:[#allocation11_spill] sm:$0xff] %v19225_v43  ;;  %14309 = vmatprep.subr.bf16.mxu1 %v23173_v2  ;;  %v19257_v49 = vsub.f32 %v19177_v42, %v23175_v41  ;;  %6988 = vmatprep.mubr.f32.mxu0 %v6987_v6  ;;  %v7001_v61 = vsub.f32 %v19207_v28, %v22090_v12  ;;  %v19274_v42 = vld [vmem:[%s15236_s15 + $0x5c0] sm:$0xff]  ;;  %v19292_v19 = vld [vmem:[%s15236_s15 + $0x5c8] sm:$0xff]  ;;  %v23195_v2 = vand.u32 4294901760, %v19241_v3 }
 0xa40   : > { %23168 = vst [vmem:[#allocation60_spill] sm:$0xff] %v19235_v21  ;;  %v7007_v59 = vsub.f32 %v19196_v20, %v23174_v29  ;;  %23178 = vst [vmem:[#allocation80_spill] sm:$0xff] %v19266_v56  ;;  %6994 = vmatmul.mubr.f32.vlgmr.msra.gmra.mrb[74].mxu0 %v6993_v51  ;;  %v23180_v12 = vpack.c.bf16 %v18635_v52, %v18632_v46  ;;  %v23182_v51 = vand.u32 4294901760, %v19201_v55  ;;  %v19309_v52 = vld [vmem:[%s15236_s15 + $0x548] sm:$0xff] }
 0xa41   : > { %23176 = vst [vmem:[#allocation51_spill] sm:$0xff] %v19257_v49  ;;  %23179 = vst [vmem:[#allocation81_spill] sm:$0xff] %v19274_v42  ;;  %14311 = vmatpush3.bf16.msra.mxu1 %v23181_v25  ;;  %v7002_v29 = vand.u32 4294901760, %v7001_v61  ;;  %v19289_v6 = vsub.f32 %v19204_v7, %v23184_v38  ;;  %v23188_v25 = vld [vmem:[#allocation9_spill] sm:$0xff] }
 0xa42   : > { %14271 = vmatpush3.bf16.msra.mxu0 %v23180_v12  ;;  %v19284_v41 = vsub.f32 %v19201_v55, %v23182_v51  ;;  %23186 = vst [vmem:[#allocation84_spill] sm:$0xff] %v19292_v19  ;;  %v23187_v12 = vpack.c.bf16 %v18645_v24, %v18640_v48  ;;  %14313 = vmatprep.subr.bf16.mxu1 %v23188_v25  ;;  %v7008_v61 = vand.u32 4294901760, %v7007_v59  ;;  %v23189_v55 = vand.u32 4294901760, %v19218_v54  ;;  %v19306_v7 = vld [vmem:[%s15236_s15 + $0x540] sm:$0xff]  ;;  %v19330_v24 = vld [vmem:[%s15236_s15 + $0x5d0] sm:$0xff] }
 0xa43   : > { %23185 = vst [vmem:[#allocation83_spill] sm:$0xff] %v19289_v6  ;;  %23191 = vst [vmem:[#allocation86_spill] sm:$0xff] %v19306_v7  ;;  %7003 = vmatprep.mubr.f32.mxu0 %v7002_v29  ;;  %v23193_v25 = vand.u32 4294901760, %v19238_v30  ;;  %v19320_v51 = vsub.f32 %v19241_v3, %v23195_v2  ;;  %v23201_v2 = vand.u32 4294901760, %v19225_v43  ;;  %v23214_v43 = vld [vmem:[#allocation21_spill] sm:$0xff] }
 0xa44   : > { %23183 = vst [vmem:[#allocation54_spill] sm:$0xff] %v19284_v41  ;;  %14273 = vmatprep.subr.bf16.mxu0 %v23187_v12  ;;  %v19303_v38 = vsub.f32 %v19218_v54, %v23189_v55  ;;  %23192 = vst [vmem:[#allocation50_spill] sm:$0xff] %v19309_v52  ;;  %7009 = vmatmul.mubr.f32.gmra.mrb[76].mxu0 %v7008_v61  ;;  %v23196_v54 = vand.u32 4294901760, %v19248_v33  ;;  %v23203_v61 = vand.u32 4294901760, %v19230_v4  ;;  %v23204_v55 = vand.u32 4294901760, %v19235_v21  ;;  %v23207_v12 = vld [vmem:[#allocation10_spill] sm:$0xff] }
 0xa45   : > { %v19315_v59 = vsub.f32 %v19238_v30, %v23193_v25  ;;  %23198 = vst [vmem:[#allocation48_spill] sm:$0xff] %v19330_v24  ;;  %v19333_v25 = vld [vmem:[%s15236_s15 + $0x5d8] sm:$0xff]  ;;  %v23200_v30 = vand.u32 4294901760, %v19214_v5  ;;  %14315 = vmatpush3.bf16.msra.mxu1 %v23207_v12  ;;  %7383 = vmatprep.mubr.f32.mxu0 %v19171_v53  ;;  %v23212_v5 = vand.u32 4294901760, %v19266_v56  ;;  %v23221_v53 = vpack.c.bf16 %v18746_v9, %v18741_v47 }
 0xa46   : > { %23190 = vst [vmem:[#allocation85_spill] sm:$0xff] %v19303_v38  ;;  %v19326_v29 = vsub.f32 %v19248_v33, %v23196_v54  ;;  %23199 = vst [vmem:[#allocation49_spill] sm:$0xff] %v19333_v25  ;;  %v19345_v48 = vpack.c.bf16 %v23204_v55, %v23203_v61  ;;  %v23206_v54 = vpack.c.bf16 %v18662_v45, %v18654_v39  ;;  %v19361_v61 = vld [vmem:[%s15236_s15 + $0x550] sm:$0xff]  ;;  %v23211_v33 = vand.u32 4294901760, %v19257_v49  ;;  %v19450_v49 = vld [vmem:[%s15236_s15 + $0x568] sm:$0xff] }
 0xa47   : > { %23194 = vst [vmem:[#allocation17_spill] sm:$0xff] %v19315_v59  ;;  %v19339_v3 = vpack.c.bf16 %v23201_v2, %v23200_v30  ;;  %v23208_v55 = vpack.c.bf16 %v18719_v18, %v18714_v13  ;;  %23209 = vst [vmem:[#allocation76_spill] sm:$0xff] %v19361_v61  ;;  %14317 = vmatprep.subr.bf16.mxu1 %v23214_v43  ;;  %v23215_v30 = vand.u32 4294901760, %v19284_v41  ;;  %v23224_v56 = vand.u32 4294901760, %v19309_v52 }
 0xa48   : > { %23197 = vst [vmem:[#allocation19_spill] sm:$0xff] %v19326_v29  ;;  %23205 = vst [vmem:[#allocation69_spill] sm:$0xff] %v19345_v48  ;;  %14275 = vmatpush3.bf16.msra.mxu0 %v23206_v54  ;;  %v19364_v54 = vld [vmem:[%s15236_s15 + $0x558] sm:$0xff]  ;;  %v19370_v48 = vpack.c.bf16 %v23212_v5, %v23211_v33  ;;  %v23218_v33 = vand.u32 4294901760, %v19274_v42 }
 0xa49   : > { %23202 = vst [vmem:[#allocation68_spill] sm:$0xff] %v19339_v3  ;;  %14277 = vmatprep.subr.bf16.mxu0 %v23208_v55  ;;  %23210 = vst [vmem:[#allocation89_spill] sm:$0xff] %v19364_v54  ;;  %v23216_v3 = vand.u32 4294901760, %v19289_v6  ;;  %v23220_v55 = vand.u32 4294901760, %v19292_v19  ;;  %v23231_v6 = vand.u32 4294901760, %v19333_v25 }
 0xa4a   : > { %23213 = vst [vmem:[#allocation90_spill] sm:$0xff] %v19370_v48  ;;  %v19387_v48 = vsub.f32 %v19274_v42, %v23218_v33  ;;  %v19406_v33 = vsub.f32 %v19309_v52, %v23224_v56  ;;  %v23225_v42 = vpack.c.bf16 %v18775_v62, %v18772_v60  ;;  %v23228_v56 = vand.u32 4294901760, %v19315_v59 }
 0xa4b   : > { %v19380_v21 = vpack.c.bf16 %v23216_v3, %v23215_v30  ;;  %v19392_v2 = vsub.f32 %v19292_v19, %v23220_v55  ;;  %v23222_v3 = vld [vmem:[#allocation20_spill] sm:$0xff]  ;;  %v23223_v30 = vand.u32 4294901760, %v19306_v7  ;;  %v23230_v55 = vand.u32 4294901760, %v19330_v24 }
 0xa4c   : > { %23219 = vst [vmem:[#allocation18_spill] sm:$0xff] %v19387_v48  ;;  %14279 = vmatpush3.bf16.msra.mxu0 %v23221_v53  ;;  %14319 = vmatpush3.bf16.msra.mxu1 %v23222_v3  ;;  %v19411_v19 = vld [vmem:[%s15236_s15 + $0x5e0] sm:$0xff]  ;;  %v19414_v53 = vld [vmem:[%s15236_s15 + $0x5e8] sm:$0xff]  ;;  %v19434_v41 = vsub.f32 %v19333_v25, %v23231_v6  ;;  %v23235_v59 = vand.u32 4294901760, %v19326_v29  ;;  %v23237_v6 = vpack.c.bf16 %v18792_v63, %v18789_v34  ;;  %v19469_v34 = vld [vmem:[%s15236_s15 + $0x5f0] sm:$0xff] }
 0xa4d   : > { %23217 = vst [vmem:[#allocation91_spill] sm:$0xff] %v19380_v21  ;;  %v19401_v5 = vsub.f32 %v19306_v7, %v23223_v30  ;;  %14281 = vmatprep.subr.bf16.mxu0 %v23225_v42  ;;  %v23226_v30 = vld [vmem:[#allocation39_spill] sm:$0xff]  ;;  %v23227_v7 = vand.u32 4294901760, %v19303_v38  ;;  %v19429_v21 = vsub.f32 %v19330_v24, %v23230_v55  ;;  %v19437_v42 = vld [vmem:[%s15236_s15 + $0x560] sm:$0xff]  ;;  %v23234_v38 = vand.u32 4294901760, %v19320_v51  ;;  %v23238_v25 = vld [vmem:[#allocation14_spill] sm:$0xff] }
 0xa4e   : > { %14321 = vmatprep.subr.bf16.mxu1 %v23226_v30  ;;  %23232 = vst [vmem:[#allocation71_spill] sm:$0xff] %v19434_v41  ;;  %23233 = vst [vmem:[#allocation77_spill] sm:$0xff] %v19437_v42  ;;  %v23241_v55 = vand.u32 4294901760, %v19364_v54  ;;  %v19472_v63 = vld [vmem:[%s15236_s15 + $0x5f8] sm:$0xff] }
 0xa4f   : > { %v19424_v52 = vpack.c.bf16 %v23228_v56, %v23227_v7  ;;  %v19443_v7 = vpack.c.bf16 %v23235_v59, %v23234_v38  ;;  %v22129_v56 = vand.u32 4294901760, %v19387_v48  ;;  %v23239_v59 = vand.u32 4294901760, %v19361_v61 }
 0xa50   : > { %14283 = vmatpush3.bf16.msra.mxu0 %v23237_v6  ;;  %14323 = vmatpush3.bf16.msra.mxu1 %v23238_v25  ;;  %v19466_v24 = vsub.f32 %v19364_v54, %v23241_v55  ;;  %v23242_v6 = vpack.c.bf16 %v18858_v22, %v18856_v15  ;;  %v23243_v38 = vand.u32 4294901760, %v19392_v2  ;;  %v23246_v15 = vand.u32 4294901760, %v19406_v33  ;;  %v19507_v55 = vld [vmem:[%s15236_s15 + $0x570] sm:$0xff] }
 0xa51   : > { %23229 = vst [vmem:[#allocation70_spill] sm:$0xff] %v19424_v52  ;;  %23236 = vst [vmem:[#allocation78_spill] sm:$0xff] %v19443_v7  ;;  %v19461_v52 = vsub.f32 %v19361_v61, %v23239_v59  ;;  %14325 = vmatprep.subr.bf16.mxu1 %v19020_v31  ;;  %v23245_v61 = vand.u32 4294901760, %v19401_v5  ;;  %v23252_v54 = vand.u32 4294901760, %v19437_v42 }
 0xa52   : > { %14285 = vmatprep.subr.bf16.mxu0 %v23242_v6  ;;  %v19483_v29 = vpack.c.bf16 %v23243_v38, %v22129_v56  ;;  %v23248_v6 = vand.u32 4294901760, %v19411_v19  ;;  %v23249_v38 = vand.u32 4294901760, %v19414_v53 }
 0xa53   : > { %23240 = vst [vmem:[#allocation63_spill] sm:$0xff] %v19461_v52  ;;  %v19492_v22 = vpack.c.bf16 %v23246_v15, %v23245_v61  ;;  %v23250_v61 = vpack.c.bf16 %v18870_v1, %v18864_v40  ;;  %v19525_v7 = vsub.f32 %v19437_v42, %v23252_v54  ;;  %v23253_v40 = vand.u32 4294901760, %v19429_v21 }
 0xa54   : > { %23244 = vst [vmem:[#allocation65_spill] sm:$0xff] %v19483_v29  ;;  %v19497_v59 = vsub.f32 %v19411_v19, %v23248_v6  ;;  %v19502_v56 = vsub.f32 %v19414_v53, %v23249_v38  ;;  %v19510_v29 = vld [vmem:[%s15236_s15 + $0x578] sm:$0xff]  ;;  %14327 = vmatpush3.bf16.msra.mxu1 %v19028_v58  ;;  %v23251_v38 = vpack.c.bf16 %v18881_v14, %v18876_v17  ;;  %v23254_v1 = vand.u32 4294901760, %v19434_v41 }
 0xa55   : > { %23247 = vst [vmem:[#allocation82_spill] sm:$0xff] %v19492_v22  ;;  %14287 = vmatpush3.bf16.msra.mxu0 %v23250_v61  ;;  %14329 = vmatprep.subr.bf16.mxu1 %v19033_v35  ;;  %v23256_v15 = vand.u32 4294901760, %v19450_v49  ;;  %v23259_v54 = vand.u32 4294901760, %v19466_v24  ;;  %v23265_v14 = vpack.c.bf16 %v18898_v36, %v18890_v37  ;;  %v23268_v37 = vand.u32 4294901760, %v19507_v55 }
 0xa56   : > { %14289 = vmatprep.subr.bf16.mxu0 %v23251_v38  ;;  %v19531_v61 = vpack.c.bf16 %v23254_v1, %v23253_v40  ;;  %v23258_v38 = vand.u32 4294901760, %v19461_v52  ;;  %v22132_v42 = vand.u32 4294901760, %v19497_v59  ;;  %v22131_v40 = vand.u32 4294901760, %v19502_v56 }
 0xa57   : > { %v19536_v6 = vsub.f32 %v19450_v49, %v23256_v15  ;;  %v23261_v1 = vand.u32 4294901760, %v19469_v34  ;;  %v23263_v15 = vand.u32 4294901760, %v19472_v63 }
 0xa58   : > { %23255 = vst [vmem:[#allocation87_spill] sm:$0xff] %v19531_v61  ;;  %v19544_v22 = vpack.c.bf16 %v23259_v54, %v23258_v38  ;;  %14331 = vmatpush3.bf16.msra.mxu1 %v19040_v26  ;;  %v23266_v38 = vpack.c.bf16 %v18955_v23, %v18950_v44  ;;  %v19570_v54 = vpack.c.bf16 %v22131_v40, %v22132_v42  ;;  %v23270_v44 = vand.u32 4294901760, %v19510_v29 }
 0xa59   : > { %23257 = vst [vmem:[#allocation88_spill] sm:$0xff] %v19536_v6  ;;  %v19551_v61 = vsub.f32 %v19469_v34, %v23261_v1  ;;  %v19556_v17 = vsub.f32 %v19472_v63, %v23263_v15  ;;  %14291 = vmatpush3.bf16.msra.mxu0 %v23265_v14  ;;  %14365 = vmatprep.subr.bf16.mxu1 %v18690_v0  ;;  %v22136_v1 = vand.u32 4294901760, %v19525_v7  ;;  %v22133_v36 = vand.u32 4294901760, %v19536_v6 }
 0xa5a   : > { %23260 = vst [vmem:[#allocation92_spill] sm:$0xff] %v19544_v22  ;;  %14293 = vmatprep.subr.bf16.mxu0 %v23266_v38  ;;  %23267 = vst [vmem:[#allocation94_spill] sm:$0xff] %v19570_v54  ;;  %v19577_v14 = vsub.f32 %v19507_v55, %v23268_v37  ;;  %v19582_v0 = vsub.f32 %v19510_v29, %v23270_v44  ;;  %v23272_v23 = vand.u32 4294901760, %v19168_v50  ;;  %v23274_v37 = vand.u32 4294901760, %v19207_v28 }
 0xa5b   : > { %23262 = vst [vmem:[#allocation93_spill] sm:$0xff] %v19551_v61  ;;  %23264 = vst [vmem:[#allocation43_spill] sm:$0xff] %v19556_v17  ;;  %v22135_v15 = vand.u32 4294901760, %v19551_v61  ;;  %v22134_v38 = vand.u32 4294901760, %v19556_v17  ;;  %v23273_v40 = vpack.c.bf16 %v18979_v27, %v18966_v57  ;;  %v19597_v44 = vpack.c.bf16 %v22133_v36, %v22136_v1  ;;  %v19615_v36 = vld [vmem:[%s15236_s15 + $0x580] sm:$0xff] }
 0xa5c   : > { %23269 = vst [vmem:[#allocation95_spill] sm:$0xff] %v19577_v14  ;;  %23271 = vst [vmem:[#allocation96_spill] sm:$0xff] %v19582_v0  ;;  %7503 = vmatmul.mubr.f32.vlgmr.msra.gmra.mrb[86].mxu1 %v23272_v23  ;;  %v23276_v23 = vpack.c.bf16 %v19002_v32, %v18996_v8  ;;  %v23277_v42 = vand.u32 4294901760, %v18627_v10  ;;  %v23278_v57 = vand.u32 4294901760, %v18629_v16  ;;  %v22141_v8 = vand.u32 4294901760, %v19582_v0  ;;  %v19622_v16 = vld [vmem:[%s15236_s15 + $0x588] sm:$0xff] }
 0xa5d   : > { %14295 = vmatpush3.bf16.msra.mxu0 %v23273_v40  ;;  %7510 = vmatprep.mubr.f32.mxu1 %v23274_v37  ;;  %23275 = vst [vmem:[#allocation10_spill] sm:$0xff] %v19597_v44  ;;  %v19611_v40 = vpack.c.bf16 %v22134_v38, %v22135_v15  ;;  %v23280_v37 = vld [vmem:[#allocation33_spill] sm:$0xff]  ;;  %v23281_v10 = vand.u32 4294901760, %v19196_v20  ;;  %v23282_v32 = vld [vmem:[#allocation56_spill] sm:$0xff]  ;;  %v22146_v22 = vand.u32 4294901760, %v19615_v36 }
 0xa5e   : > { %14367 = vmatpush3.bf16.msra.mxu1 %v18703_v11  ;;  %14297 = vmatprep.subr.bf16.mxu0 %v23276_v23  ;;  %v14332_v27 = vpack.c.bf16 %v23278_v57, %v23277_v42  ;;  %v22142_v11 = vand.u32 4294901760, %v19577_v14  ;;  %v23283_v42 = vld [vmem:[#allocation66_spill] sm:$0xff]  ;;  %v23285_v57 = vld [vmem:[#allocation61_spill] sm:$0xff]  ;;  %v23287_v38 = vld [vmem:[#allocation12_spill] sm:$0xff] }
 0xa5f   : > { %23279 = vst [vmem:[#allocation21_spill] sm:$0xff] %v19611_v40  ;;  %14369 = vmatprep.subr.bf16.mxu1 %v23280_v37  ;;  %v23284_v23 = vpack.c.bf16 %v23282_v32, %v23283_v42  ;;  %v23286_v37 = vand.u32 4294901760, %v18632_v46  ;;  %v23288_v15 = vand.u32 4294901760, %v23287_v38  ;;  %v23291_v44 = vld [vmem:[#allocation57_spill] sm:$0xff]  ;;  %v23293_v32 = vld [vmem:[#allocation59_spill] sm:$0xff]  ;;  %v23295_v46 = vld [vmem:[#allocation32_spill] sm:$0xff] }
 0xa60   : > { %7514 = vmatmul.mubr.f32.gmra.mrb[88].mxu1 %v23281_v10  ;;  %v19636_v40 = vpack.c.bf16 %v22141_v8, %v22142_v11  ;;  %v23290_v10 = vld [vmem:[#allocation34_spill] sm:$0xff]  ;;  %v23292_v54 = vand.u32 4294901760, %v23291_v44  ;;  %v23294_v42 = vand.u32 4294901760, %v23293_v32  ;;  %v19647_v38 = vld [vmem:[%s15236_s15 + $0x500] sm:$0xff]  ;;  %v23296_v44 = vand.u32 4294901760, %v18654_v39 }
 0xa61   : > { %14299 = vmatpush3.bf16.msra.mxu0 %v23284_v23  ;;  %7791 = vmatprep.mubr.f32.mxu1 %v23285_v57  ;;  %v14334_v1 = vpack.c.bf16 %v23288_v15, %v23286_v37  ;;  %v22145_v15 = vand.u32 4294901760, %v19622_v16  ;;  %v19650_v37 = vld [vmem:[%s15236_s15 + $0x508] sm:$0xff]  ;;  %v23299_v32 = vand.u32 4294901760, %v18714_v13  ;;  %v23302_v13 = vand.u32 4294901760, %v18741_v47  ;;  %v23320_v8 = vld [vmem:[#allocation80_spill] sm:$0xff] }
 0xa62   : > { %23289 = vst [vmem:[#allocation20_spill] sm:$0xff] %v19636_v40  ;;  %14371 = vmatpush3.bf16.msra.mxu1 %v23290_v10  ;;  %14333 = vmatprep.subr.bf16.mxu0 %v14332_v27  ;;  %v14336_v23 = vpack.c.bf16 %v23294_v42, %v23292_v54  ;;  %v23297_v27 = vand.u32 4294901760, %v18662_v45  ;;  %v23298_v10 = vld [vmem:[#allocation13_spill] sm:$0xff]  ;;  %v23300_v42 = vand.u32 4294901760, %v18719_v18  ;;  %v22143_v39 = vand.u32 4294901760, %v19650_v37 }
 0xa63   : > { %14373 = vmatprep.subr.bf16.mxu1 %v23295_v46  ;;  %v19674_v45 = vsub.f32 %v19622_v16, %v22145_v15  ;;  %v23303_v18 = vand.u32 4294901760, %v18746_v9 }
 0xa64   : > { %7386 = vmatmul.mubr.f32.vlgmr.msra.gmra.mrb[78].mxu0 %v19168_v50  ;;  %v14338_v54 = vpack.c.bf16 %v23297_v27, %v23296_v44  ;;  %v14340_v46 = vpack.c.bf16 %v23300_v42, %v23299_v32  ;;  %v19666_v50 = vsub.f32 %v19615_v36, %v22146_v22  ;;  %v23304_v44 = vand.u32 4294901760, %v18772_v60 }
 0xa65   : > { %7392 = vmatprep.mubr.f32.mxu0 %v19207_v28  ;;  %14335 = vmatpush3.bf16.msra.mxu0 %v14334_v1  ;;  %v22144_v28 = vand.u32 4294901760, %v19647_v38  ;;  %v23301_v1 = vld [vmem:[#allocation9_spill] sm:$0xff]  ;;  %v23305_v27 = vand.u32 4294901760, %v18775_v62  ;;  %v19696_v47 = vsub.f32 %v19650_v37, %v22143_v39  ;;  %v22139_v9 = vand.u32 4294901760, %v19674_v45 }
 0xa66   : > { %14375 = vmatpush3.bf16.msra.mxu1 %v23298_v10  ;;  %14337 = vmatprep.subr.bf16.mxu0 %v14336_v23  ;;  %v14342_v23 = vpack.c.bf16 %v23303_v18, %v23302_v13  ;;  %v22140_v32 = vand.u32 4294901760, %v19666_v50  ;;  %v23309_v18 = vld [vmem:[#allocation47_spill] sm:$0xff] }
 0xa67   : > { %14377 = vmatprep.subr.bf16.mxu1 %v23301_v1  ;;  %v14344_v10 = vpack.c.bf16 %v23305_v27, %v23304_v44  ;;  %v23311_v44 = vld [vmem:[#allocation11_spill] sm:$0xff] }
 0xa68   : > { %7395 = vmatmul.mubr.f32.gmra.mrb[80].mxu0 %v19196_v20  ;;  %v19691_v20 = vsub.f32 %v19647_v38, %v22144_v28  ;;  %v8048_v60 = vsub.f32 %v19666_v50, %v22140_v32  ;;  %v23312_v27 = vand.u32 4294901760, %v23311_v44 }
 0xa69   : > { %14339 = vmatpush3.bf16.msra.mxu0 %v14338_v54  ;;  %7680 = vmatprep.mubr.f32.mxu0 %v23285_v57  ;;  %v23306_v57 = vld [vmem:[#allocation67_spill] sm:$0xff] }
 0xa6a   : > { %14379 = vmatpush3.bf16.msra.mxu1 %v23207_v12  ;;  %14341 = vmatprep.subr.bf16.mxu0 %v14340_v46  ;;  %v22138_v62 = vand.u32 4294901760, %v19691_v20  ;;  %v22137_v12 = vand.u32 4294901760, %v19696_v47  ;;  %v8049_v54 = vand.u32 4294901760, %v8048_v60  ;;  %v23313_v60 = vld [vmem:[#allocation73_spill] sm:$0xff] }
 0xa6b   : > { %14381 = vmatprep.subr.bf16.mxu1 %v23214_v43  ;;  %v8055_v43 = vsub.f32 %v19674_v45, %v22139_v9  ;;  %v23318_v9 = vld [vmem:[#allocation51_spill] sm:$0xff] }
 0xa6c   : > { %v7936_v42 = vsub.f32 %v19691_v20, %v22138_v62  ;;  %v7943_v46 = vsub.f32 %v19696_v47, %v22137_v12  ;;  %v23315_v12 = vld [vmem:[#allocation60_spill] sm:$0xff]  ;;  %v23319_v32 = vand.u32 4294901760, %v23318_v9 }
 0xa6d   : > { %14343 = vmatpush3.bf16.msra.mxu0 %v14342_v23  ;;  %v8056_v13 = vand.u32 4294901760, %v8055_v43  ;;  %v23310_v23 = vand.u32 4294901760, %v23309_v18  ;;  %v23316_v62 = vand.u32 4294901760, %v23315_v12 }
 0xa6e   : > { %14383 = vmatpush3.bf16.msra.mxu1 %v23222_v3  ;;  %14345 = vmatprep.subr.bf16.mxu0 %v14344_v10  ;;  %v23307_v3 = vld [vmem:[#allocation42_spill] sm:$0xff]  ;;  %v8069_v10 = vsub.f32 %v23311_v44, %v23312_v27  ;;  %v7937_v43 = vand.u32 4294901760, %v7936_v42  ;;  %v8076_v27 = vsub.f32 %v23318_v9, %v23319_v32  ;;  %v23326_v32 = vld [vmem:[#allocation83_spill] sm:$0xff] }
 0xa6f   : > { %14385 = vmatprep.subr.bf16.mxu1 %v23226_v30  ;;  %v23308_v30 = vld [vmem:[#allocation44_spill] sm:$0xff]  ;;  %v23327_v40 = vand.u32 4294901760, %v23326_v32 }
 0xa70   : > { %v6817_v1 = vmax.f32 %v23308_v30, 0.0  ;;  %v7957_v30 = vsub.f32 %v23315_v12, %v23316_v62  ;;  %v8070_v28 = vand.u32 4294901760, %v8069_v10 }
 0xa71   : > { %14347 = vmatpush3.bf16.msra.mxu0 %v23306_v57  ;;  %v23314_v57 = vand.u32 4294901760, %v19230_v4  ;;  %v7971_v9 = vsub.f32 %v23326_v32, %v23327_v40  ;;  %v23333_v32 = vld [vmem:[#allocation23_spill] sm:$0xff] }
 0xa72   : > { %14387 = vmatpush3.bf16.msra.mxu1 %v23238_v25  ;;  %14349 = vmatprep.subr.bf16.mxu0 %v23307_v3  ;;  %v8062_v25 = vsub.f32 %v23309_v18, %v23310_v23  ;;  %v7944_v23 = vand.u32 4294901760, %v7943_v46  ;;  %v19742_v39 = vand.u32 4294901760, %v6817_v1  ;;  %v7958_v42 = vand.u32 4294901760, %v7957_v30  ;;  %v23324_v46 = vld [vmem:[#allocation54_spill] sm:$0xff] }
 0xa73   : > { %14389 = vmatprep.subr.bf16.mxu1 %v19020_v31  ;;  %v7950_v3 = vsub.f32 %v19230_v4, %v23314_v57  ;;  %v23317_v31 = vld [vmem:[#allocation74_spill] sm:$0xff]  ;;  %v14428_v57 = vpack.c.bf16 %v8056_v13, %v8049_v54  ;;  %v23325_v15 = vand.u32 4294901760, %v23324_v46  ;;  %v8077_v54 = vand.u32 4294901760, %v8076_v27 }
 0xa74   : > { %23322 = vst [vmem:[#allocation39_spill] sm:$0xff] %v19742_v39  ;;  %v8063_v62 = vand.u32 4294901760, %v8062_v25  ;;  %v23329_v25 = vld [vmem:[#allocation85_spill] sm:$0xff]  ;;  %v19758_v30 = vsub.f32 %v6817_v1, %v19742_v39  ;;  %v7972_v1 = vand.u32 4294901760, %v7971_v9  ;;  %v23342_v9 = vand.u32 4294901760, %v19387_v48 }
 0xa75   : > { %14351 = vmatpush3.bf16.msra.mxu0 %v23313_v60  ;;  %v23321_v60 = vand.u32 4294901760, %v23320_v8  ;;  %v7964_v22 = vsub.f32 %v23324_v46, %v23325_v15  ;;  %v23330_v10 = vand.u32 4294901760, %v23329_v25 }
 0xa76   : > { %14391 = vmatpush3.bf16.msra.mxu1 %v19028_v58  ;;  %14353 = vmatprep.subr.bf16.mxu0 %v23317_v31  ;;  %v23323_v58 = vld [vmem:[#allocation15_spill] sm:$0xff]  ;;  %v7951_v31 = vand.u32 4294901760, %v7950_v3  ;;  %v14432_v15 = vpack.c.bf16 %v8070_v28, %v8063_v62  ;;  %v23338_v62 = vand.u32 4294901760, %v19320_v51 }
 0xa77   : > { %v8083_v11 = vsub.f32 %v23320_v8, %v23321_v60  ;;  %14393 = vmatprep.subr.bf16.mxu1 %v19033_v35  ;;  %v23328_v60 = vld [vmem:[#allocation75_spill] sm:$0xff]  ;;  %v14430_v35 = vpack.c.bf16 %v7944_v23, %v7937_v43  ;;  %v8090_v3 = vsub.f32 %v23329_v25, %v23330_v10  ;;  %v23336_v23 = vand.u32 4294901760, %v19622_v16  ;;  %v23337_v10 = vld [vmem:[#allocation41_spill] sm:$0xff] }
 0xa78   : > { %v14434_v43 = vpack.c.bf16 %v7958_v42, %v7951_v31  ;;  %v8104_v42 = vsub.f32 %v19387_v48, %v23342_v9  ;;  %v23352_v48 = vand.u32 4294901760, %v19401_v5 }
 0xa79   : > { %14355 = vmatpush3.bf16.msra.mxu0 %v23323_v58  ;;  %v8084_v13 = vand.u32 4294901760, %v8083_v11  ;;  %v23331_v58 = vld [vmem:[#allocation17_spill] sm:$0xff]  ;;  %v23335_v11 = vand.u32 4294901760, %v19615_v36 }
 0xa7a   : > { %14395 = vmatpush3.bf16.msra.mxu1 %v19040_v26  ;;  %14357 = vmatprep.subr.bf16.mxu0 %v23328_v60  ;;  %v23332_v46 = vand.u32 4294901760, %v23331_v58  ;;  %v23334_v26 = vld [vmem:[#allocation27_spill] sm:$0xff]  ;;  %v7965_v60 = vand.u32 4294901760, %v7964_v22  ;;  %v23341_v36 = vld [vmem:[#allocation53_spill] sm:$0xff]  ;;  %v23351_v22 = vld [vmem:[#allocation52_spill] sm:$0xff] }
 0xa7b   : > { %14429 = vmatprep.subr.bf16.mxu1 %v14428_v57  ;;  %v19769_v27 = vpack.c.bf16 %v23336_v23, %v23335_v11  ;;  %v14436_v28 = vpack.c.bf16 %v8084_v13, %v8077_v54  ;;  %v8091_v57 = vand.u32 4294901760, %v8090_v3  ;;  %v23344_v13 = vand.u32 4294901760, %v19647_v38  ;;  %v23346_v23 = vld [vmem:[#allocation58_spill] sm:$0xff] }
 0xa7c   : > { %v8097_v40 = vsub.f32 %v23331_v58, %v23332_v46  ;;  %v7978_v46 = vsub.f32 %v19320_v51, %v23338_v62  ;;  %v23339_v58 = vld [vmem:[#allocation19_spill] sm:$0xff]  ;;  %v23345_v3 = vand.u32 4294901760, %v19650_v37  ;;  %v23347_v62 = vand.u32 4294901760, %v23346_v23 }
 0xa7d   : > { %7793 = vmatmul.mubr.f32.vlgmr.msra.gmra.mrb[90].mxu1 %v23333_v32  ;;  %14359 = vmatpush3.bf16.msra.mxu0 %v23334_v26  ;;  %v23340_v26 = vand.u32 4294901760, %v23339_v58  ;;  %v14438_v9 = vpack.c.bf16 %v7972_v1, %v7965_v60  ;;  %v23353_v38 = vand.u32 4294901760, %v19406_v33  ;;  %v23354_v23 = vand.u32 4294901760, %v19429_v21 }
 0xa7e   : > { %7798 = vmatprep.mubr.f32.mxu1 %v23337_v10  ;;  %14431 = vmatpush3.bf16.msra.mxu1 %v14430_v35  ;;  %v8098_v16 = vand.u32 4294901760, %v8097_v40  ;;  %v23343_v35 = vand.u32 4294901760, %v19392_v2  ;;  %v19790_v11 = vpack.c.bf16 %v23345_v3, %v23344_v13  ;;  %v7979_v13 = vand.u32 4294901760, %v7978_v46  ;;  %v23357_v46 = vld [vmem:[#allocation26_spill] sm:$0xff] }
 0xa7f   : > { %v7985_v31 = vsub.f32 %v23339_v58, %v23340_v26  ;;  %14361 = vmatprep.subr.bf16.mxu0 %v23341_v36  ;;  %14433 = vmatprep.subr.bf16.mxu1 %v14432_v15  ;;  %v23348_v15 = vld [vmem:[#allocation29_spill] sm:$0xff]  ;;  %v23350_v36 = vld [vmem:[#allocation31_spill] sm:$0xff]  ;;  %v7999_v37 = vsub.f32 %v19406_v33, %v23353_v38  ;;  %v23356_v1 = vand.u32 4294901760, %v19758_v30  ;;  %v23359_v38 = vld [vmem:[#allocation30_spill] sm:$0xff] }
 0xa80   : > { %v8111_v54 = vsub.f32 %v19392_v2, %v23343_v35  ;;  %v23349_v40 = vand.u32 4294901760, %v23348_v15  ;;  %v7992_v35 = vsub.f32 %v19401_v5, %v23352_v48  ;;  %v14440_v48 = vpack.c.bf16 %v8098_v16, %v8091_v57 }
 0xa81   : > { %7800 = vmatmul.mubr.f32.gmra.mrb[92].mxu1 %v23350_v36  ;;  %14363 = vmatpush3.bf16.msra.mxu0 %v23351_v22  ;;  %v7986_v3 = vand.u32 4294901760, %v7985_v31  ;;  %v23355_v22 = vand.u32 4294901760, %v19434_v41  ;;  %v8105_v15 = vand.u32 4294901760, %v8104_v42  ;;  %v23358_v31 = vand.u32 4294901760, %v23357_v46 }
 0xa82   : > { %v19796_v26 = vpack.c.bf16 %v23349_v40, %v23347_v62  ;;  %14435 = vmatpush3.bf16.msra.mxu1 %v14434_v43  ;;  %8157 = vmatprep.mubr.f32.mxu1 %v19742_v39  ;;  %v8118_v62 = vsub.f32 %v19429_v21, %v23354_v23  ;;  %v7904_v43 = vsub.f32 %v19758_v30, %v23356_v1  ;;  %v8112_v40 = vand.u32 4294901760, %v8111_v54  ;;  %v23363_v1 = vld [vmem:[#allocation28_spill] sm:$0xff] }
 0xa83   : > { %v8125_v60 = vsub.f32 %v19434_v41, %v23355_v22  ;;  %14397 = vmatprep.subr.bf16.mxu0 %v19769_v27  ;;  %14437 = vmatprep.subr.bf16.mxu1 %v14436_v28  ;;  %v23360_v23 = vand.u32 4294901760, %v23359_v38  ;;  %v7993_v28 = vand.u32 4294901760, %v7992_v35  ;;  %v8000_v57 = vand.u32 4294901760, %v7999_v37 }
 0xa84   : > { %7682 = vmatmul.mubr.f32.vlgmr.msra.gmra.mrb[82].mxu0 %v23333_v32  ;;  %v23361_v16 = vand.u32 4294901760, %v19461_v52  ;;  %v23362_v42 = vand.u32 4294901760, %v19466_v24  ;;  %v14442_v54 = vpack.c.bf16 %v7986_v3, %v7979_v13  ;;  %v23364_v46 = vand.u32 4294901760, %v23363_v1  ;;  %v23369_v13 = vld [vmem:[#allocation16_spill] sm:$0xff]  ;;  %v23371_v1 = vld [vmem:[#allocation46_spill] sm:$0xff] }
 0xa85   : > { %v19822_v39 = vpack.c.bf16 %v23360_v23, %v23358_v31  ;;  %7687 = vmatprep.mubr.f32.mxu0 %v23337_v10  ;;  %14399 = vmatpush3.bf16.msra.mxu0 %v19790_v11  ;;  %v23365_v31 = vld [vmem:[#allocation38_spill] sm:$0xff]  ;;  %v8119_v35 = vand.u32 4294901760, %v8118_v62  ;;  %v8126_v37 = vand.u32 4294901760, %v8125_v60  ;;  %v7905_v23 = vand.u32 4294901760, %v7904_v43  ;;  %v23373_v60 = vld [vmem:[#allocation37_spill] sm:$0xff] }
 0xa86   : > { %v8006_v22 = vsub.f32 %v19461_v52, %v23361_v16  ;;  %v8013_v32 = vsub.f32 %v19466_v24, %v23362_v42  ;;  %14439 = vmatpush3.bf16.msra.mxu1 %v14438_v9  ;;  %14401 = vmatprep.subr.bf16.mxu0 %v19796_v26  ;;  %v23366_v10 = vand.u32 4294901760, %v23365_v31  ;;  %v14444_v41 = vpack.c.bf16 %v8112_v40, %v8105_v15  ;;  %v23375_v43 = vld [vmem:[#allocation62_spill] sm:$0xff] }
 0xa87   : > { %14441 = vmatprep.subr.bf16.mxu1 %v14440_v48  ;;  %v23367_v16 = vand.u32 4294901760, %v19497_v59  ;;  %v23368_v9 = vand.u32 4294901760, %v19502_v56  ;;  %v23370_v3 = vand.u32 4294901760, %v23369_v13  ;;  %v14446_v62 = vpack.c.bf16 %v8000_v57, %v7993_v28 }
 0xa88   : > { %v19837_v38 = vpack.c.bf16 %v23366_v10, %v23364_v46  ;;  %7689 = vmatmul.mubr.f32.gmra.mrb[84].mxu0 %v23350_v36  ;;  %v23372_v46 = vand.u32 4294901760, %v23371_v1  ;;  %v23374_v48 = vand.u32 4294901760, %v23373_v60  ;;  %v23376_v15 = vand.u32 4294901760, %v23375_v43 }
 0xa89   : > { %v8132_v52 = vsub.f32 %v19497_v59, %v23367_v16  ;;  %v8139_v42 = vsub.f32 %v19502_v56, %v23368_v9  ;;  %14403 = vmatpush3.bf16.msra.mxu0 %v19822_v39  ;;  %7906 = vmatprep.mubr.f32.mxu0 %v7905_v23  ;;  %v8007_v10 = vand.u32 4294901760, %v8006_v22  ;;  %v8014_v16 = vand.u32 4294901760, %v8013_v32 }
 0xa8a   : > { %v19850_v31 = vpack.c.bf16 %v23372_v46, %v23370_v3  ;;  %v19857_v40 = vpack.c.bf16 %v23376_v15, %v23374_v48  ;;  %14443 = vmatpush3.bf16.msra.mxu1 %v14442_v54  ;;  %14405 = vmatprep.subr.bf16.mxu0 %v19837_v38  ;;  %v14448_v36 = vpack.c.bf16 %v8126_v37, %v8119_v35  ;;  %v23377_v9 = vand.u32 4294901760, %v19525_v7  ;;  %v23381_v35 = vld [vmem:[#allocation55_spill] sm:$0xff]  ;;  %v23382_v46 = vld [vmem:[#allocation72_spill] sm:$0xff] }
 0xa8b   : > { %v23378_v3 = vand.u32 4294901760, %v19536_v6  ;;  %14445 = vmatprep.subr.bf16.mxu1 %v14444_v41  ;;  %v8133_v57 = vand.u32 4294901760, %v8132_v52  ;;  %v8140_v23 = vand.u32 4294901760, %v8139_v42  ;;  %v23379_v1 = vand.u32 4294901760, %v19551_v61  ;;  %v23384_v48 = vld [vmem:[#allocation64_spill] sm:$0xff]  ;;  %v23386_v41 = vld [vmem:[#allocation81_spill] sm:$0xff] }
 0xa8c   : > { %v8020_v13 = vsub.f32 %v19525_v7, %v23377_v9  ;;  %v23380_v32 = vand.u32 4294901760, %v19556_v17  ;;  %v6816_v37 = vmax.f32 %v23381_v35, 0.0  ;;  %v23383_v60 = vand.u32 4294901760, %v23382_v46  ;;  %v23388_v9 = vld [vmem:[#allocation84_spill] sm:$0xff] }
 0xa8d   : > { %v8027_v28 = vsub.f32 %v19536_v6, %v23378_v3  ;;  %v8146_v22 = vsub.f32 %v19551_v61, %v23379_v1  ;;  %14407 = vmatpush3.bf16.msra.mxu0 %v19850_v31  ;;  %v23385_v43 = vand.u32 4294901760, %v23384_v48  ;;  %v14450_v52 = vpack.c.bf16 %v8014_v16, %v8007_v10  ;;  %v23392_v10 = vld [vmem:[#allocation79_spill] sm:$0xff]  ;;  %v23399_v6 = vld [vmem:[#allocation49_spill] sm:$0xff] }
 0xa8e   : > { %v8153_v54 = vsub.f32 %v19556_v17, %v23380_v32  ;;  %v23387_v42 = vand.u32 4294901760, %v23386_v41  ;;  %v23389_v3 = vand.u32 4294901760, %v23388_v9  ;;  %14447 = vmatpush3.bf16.msra.mxu1 %v14446_v62  ;;  %14409 = vmatprep.subr.bf16.mxu0 %v19857_v40  ;;  %v8021_v32 = vand.u32 4294901760, %v8020_v13  ;;  %v23393_v62 = vld [vmem:[#allocation86_spill] sm:$0xff] }
 0xa8f   : > { %v19878_v15 = vpack.c.bf16 %v23385_v43, %v23383_v60  ;;  %v8028_v35 = vand.u32 4294901760, %v8027_v28  ;;  %v23390_v17 = vand.u32 4294901760, %v19577_v14  ;;  %v23391_v48 = vand.u32 4294901760, %v19582_v0  ;;  %14449 = vmatprep.subr.bf16.mxu1 %v14448_v36  ;;  %v23395_v28 = vld [vmem:[#allocation50_spill] sm:$0xff]  ;;  %v23401_v36 = vld [vmem:[#allocation40_spill] sm:$0xff] }
 0xa90   : > { %v19884_v1 = vpack.c.bf16 %v23389_v3, %v23387_v42  ;;  %v6821_v16 = vmax.f32 %v23392_v10, 0.0  ;;  %v14452_v43 = vpack.c.bf16 %v8140_v23, %v8133_v57  ;;  %v8147_v41 = vand.u32 4294901760, %v8146_v22 }
 0xa91   : > { %v8034_v46 = vsub.f32 %v19577_v14, %v23390_v17  ;;  %v8041_v60 = vsub.f32 %v19582_v0, %v23391_v48  ;;  %v8154_v42 = vand.u32 4294901760, %v8153_v54  ;;  %v19894_v9 = vand.u32 4294901760, %v6816_v37  ;;  %14411 = vmatpush3.bf16.msra.mxu0 %v19878_v15  ;;  %v23397_v17 = vld [vmem:[#allocation48_spill] sm:$0xff] }
 0xa92   : > { %v23394_v13 = vand.u32 4294901760, %v23393_v62  ;;  %v23396_v3 = vand.u32 4294901760, %v23395_v28  ;;  %v23398_v14 = vand.u32 4294901760, %v23397_v17  ;;  %v23400_v48 = vand.u32 4294901760, %v23399_v6  ;;  %14451 = vmatpush3.bf16.msra.mxu1 %v14450_v52  ;;  %14413 = vmatprep.subr.bf16.mxu0 %v19884_v1 }
 0xa93   : > { %v6820_v57 = vmax.f32 %v23401_v36, 0.0  ;;  %v14454_v23 = vpack.c.bf16 %v8028_v35, %v8021_v32  ;;  %v8035_v22 = vand.u32 4294901760, %v8034_v46  ;;  %v8042_v54 = vand.u32 4294901760, %v8041_v60  ;;  %14453 = vmatprep.subr.bf16.mxu1 %v14452_v43 }
 0xa94   : > { %v19901_v61 = vpack.c.bf16 %v23396_v3, %v23394_v13  ;;  %v19907_v0 = vpack.c.bf16 %v23400_v48, %v23398_v14  ;;  %v19911_v10 = vand.u32 4294901760, %v6821_v16  ;;  %v14456_v62 = vpack.c.bf16 %v8154_v42, %v8147_v41  ;;  %v23402_v13 = vld [vmem:[#allocation76_spill] sm:$0xff]  ;;  %v23404_v3 = vld [vmem:[#allocation89_spill] sm:$0xff] }
 0xa95   : > { %v23403_v28 = vand.u32 4294901760, %v23402_v13  ;;  %v23405_v6 = vand.u32 4294901760, %v23404_v3  ;;  %v19921_v17 = vsub.f32 %v6816_v37, %v19894_v9  ;;  %v19923_v52 = vand.u32 4294901760, %v6820_v57  ;;  %v23408_v37 = vld [vmem:[#allocation77_spill] sm:$0xff] }
 0xa96   : > { %14415 = vmatpush3.bf16.msra.mxu0 %v19901_v61  ;;  %14455 = vmatpush3.bf16.msra.mxu1 %v14454_v23  ;;  %v14458_v32 = vpack.c.bf16 %v8042_v54, %v8035_v22  ;;  %v23406_v35 = vand.u32 4294901760, %v19411_v19  ;;  %v23407_v46 = vand.u32 4294901760, %v19414_v53  ;;  %v19933_v43 = vsub.f32 %v6821_v16, %v19911_v10 }
 0xa97   : > { %v19918_v14 = vpack.c.bf16 %v23405_v6, %v23403_v28  ;;  %14417 = vmatprep.subr.bf16.mxu0 %v19907_v0  ;;  %14457 = vmatprep.subr.bf16.mxu1 %v14456_v62  ;;  %v23409_v41 = vand.u32 4294901760, %v23408_v37  ;;  %v23410_v42 = vand.u32 4294901760, %v19450_v49  ;;  %v7909_v36 = vand.u32 4294901760, %v19921_v17  ;;  %v23416_v37 = vld [vmem:[#allocation51_spill] sm:$0xff] }
 0xa98   : > { %v19930_v60 = vpack.c.bf16 %v23407_v46, %v23406_v35  ;;  %v19944_v19 = vsub.f32 %v6820_v57, %v19923_v52  ;;  %v23411_v53 = vand.u32 4294901760, %v19469_v34  ;;  %v23412_v16 = vand.u32 4294901760, %v19472_v63 }
 0xa99   : > { %v19940_v48 = vpack.c.bf16 %v23410_v42, %v23409_v41  ;;  %v7918_v49 = vand.u32 4294901760, %v19933_v43  ;;  %v23413_v57 = vand.u32 4294901760, %v19507_v55  ;;  %v23414_v22 = vand.u32 4294901760, %v19510_v29 }
 0xa9a   : > { %14419 = vmatpush3.bf16.msra.mxu0 %v19918_v14  ;;  %14459 = vmatpush3.bf16.msra.mxu1 %v14458_v32  ;;  %v19952_v23 = vpack.c.bf16 %v23412_v16, %v23411_v53  ;;  %v7910_v34 = vsub.f32 %v19921_v17, %v7909_v36  ;;  %v7924_v63 = vand.u32 4294901760, %v19944_v19  ;;  %v14460_v55 = vpack.c.bf16 %v19674_v45, %v19666_v50  ;;  %v23420_v53 = vld [vmem:[#allocation18_spill] sm:$0xff] }
 0xa9b   : > { %14421 = vmatprep.subr.bf16.mxu0 %v19930_v60  ;;  %14493 = vmatprep.subr.bf16.mxu1 %v19769_v27  ;;  %v19961_v54 = vpack.c.bf16 %v23414_v22, %v23413_v57  ;;  %v7919_v29 = vsub.f32 %v19933_v43, %v7918_v49  ;;  %v14462_v62 = vpack.c.bf16 %v19696_v47, %v19691_v20  ;;  %v23415_v28 = vand.u32 4294901760, %v19758_v30  ;;  %v23425_v22 = vld [vmem:[#allocation43_spill] sm:$0xff] }
 0xa9c   : > { %v7911_v13 = vand.u32 4294901760, %v7910_v34  ;;  %v7925_v3 = vsub.f32 %v19944_v19, %v7924_v63  ;;  %v14464_v6 = vpack.c.bf16 %v23311_v44, %v23309_v18  ;;  %v14466_v35 = vpack.c.bf16 %v23315_v12, %v19230_v4  ;;  %v23417_v18 = vld [vmem:[#allocation54_spill] sm:$0xff]  ;;  %v23418_v44 = vld [vmem:[#allocation83_spill] sm:$0xff]  ;;  %v23419_v4 = vld [vmem:[#allocation17_spill] sm:$0xff] }
 0xa9d   : > { %8159 = vmatmul.mubr.f32.vlgmr.msra.gmra.mrb[94].mxu1 %v19894_v9  ;;  %v7920_v32 = vand.u32 4294901760, %v7919_v29  ;;  %v14468_v41 = vpack.c.bf16 %v23320_v8, %v23416_v37  ;;  %v14470_v42 = vpack.c.bf16 %v23418_v44, %v23417_v18  ;;  %v14472_v12 = vpack.c.bf16 %v23419_v4, %v23329_v25  ;;  %v23421_v25 = vld [vmem:[#allocation71_spill] sm:$0xff]  ;;  %v11307_v37 = vld [vmem:[%s15224_s22 + $0x168] sm:$0xff]  ;;  %v23446_v18 = vld [vmem:[#allocation20_spill] sm:$0xff] }
 0xa9e   : > { %14423 = vmatpush3.bf16.msra.mxu0 %v19940_v48  ;;  %8164 = vmatprep.mubr.f32.mxu1 %v19911_v10  ;;  %v7926_v46 = vand.u32 4294901760, %v7925_v3  ;;  %v14474_v8 = vpack.c.bf16 %v23339_v58, %v19320_v51  ;;  %v14478_v16 = vpack.c.bf16 %v19406_v33, %v19401_v5  ;;  %v14480_v57 = vpack.c.bf16 %v23421_v25, %v19429_v21  ;;  %v23422_v51 = vld [vmem:[#allocation63_spill] sm:$0xff]  ;;  %v23423_v5 = vld [vmem:[#allocation88_spill] sm:$0xff]  ;;  %v23424_v21 = vld [vmem:[#allocation93_spill] sm:$0xff] }
 0xa9f   : > { %14495 = vmatpush3.bf16.msra.mxu1 %v19790_v11  ;;  %14425 = vmatprep.subr.bf16.mxu0 %v19952_v23  ;;  %v14482_v58 = vpack.c.bf16 %v19466_v24, %v23422_v51  ;;  %v14486_v33 = vpack.c.bf16 %v23423_v5, %v19525_v7  ;;  %v14488_v24 = vpack.c.bf16 %v23425_v22, %v23424_v21  ;;  %v23426_v34 = vld [vmem:[#allocation95_spill] sm:$0xff]  ;;  %v23428_v7 = vand.u32 4294901760, %v19666_v50  ;;  %v23433_v50 = vld [vmem:[#allocation68_spill] sm:$0xff]  ;;  %v23444_v3 = vld [vmem:[#allocation10_spill] sm:$0xff] }
 0xaa0   : > { %14497 = vmatprep.subr.bf16.mxu1 %v19796_v26  ;;  %v23431_v29 = vand.u32 4294901760, %v19696_v47  ;;  %v23437_v47 = vld [vmem:[#allocation70_spill] sm:$0xff]  ;;  %v23447_v44 = vmov 0.0  }
 0xaa1   : > { %8166 = vmatmul.mubr.f32.gmra.mrb[96].mxu1 %v19923_v52 }
 0xaa2   : > { %14427 = vmatpush3.bf16.msra.mxu0 %v19961_v54  ;;  %8417 = vmatprep.mubr.f32.mxu1 %v23415_v28  ;;  %v11303_v28 = vld [vmem:[%s15224_s22 + $0xe8] sm:$0xff] }
 0xaa3   : > { %14499 = vmatpush3.bf16.msra.mxu1 %v19822_v39  ;;  %14461 = vmatprep.subr.bf16.mxu0 %v14460_v55 }
 0xaa4   : > { %14501 = vmatprep.subr.bf16.mxu1 %v19837_v38 }
 0xaa5   : > { %7912 = vmatmul.mubr.f32.vlgmr.msra.gmra.mrb[86].mxu0 %v7911_v13  ;;  %v11299_v13 = vld [vmem:[%s15224_s22 + $0x68] sm:$0xff] }
 0xaa6   : > { %7921 = vmatprep.mubr.f32.mxu0 %v7920_v32  ;;  %14463 = vmatpush3.bf16.msra.mxu0 %v14462_v62  ;;  %v14588_v32 = vpack.c.bf16 %v11303_v28, %v11299_v13 }
 0xaa7   : > { %14503 = vmatpush3.bf16.msra.mxu1 %v19850_v31  ;;  %14465 = vmatprep.subr.bf16.mxu0 %v14464_v6  ;;  %v23445_v6 = vld [vmem:[#allocation21_spill] sm:$0xff] }
 0xaa8   : > { %14505 = vmatprep.subr.bf16.mxu1 %v19857_v40 }
 0xaa9   : > { %7927 = vmatmul.mubr.f32.gmra.mrb[88].mxu0 %v7926_v46  ;;  %v11302_v46 = vld [vmem:[%s15224_s22 + $0xe0] sm:$0xff] }
 0xaaa   : > { %14467 = vmatpush3.bf16.msra.mxu0 %v14466_v35  ;;  %8301 = vmatprep.mubr.f32.mxu0 %v19758_v30  ;;  %v14476_v30 = vpack.c.bf16 %v19392_v2, %v23420_v53  ;;  %v14484_v2 = vpack.c.bf16 %v19502_v56, %v19497_v59  ;;  %v23427_v56 = vld [vmem:[#allocation96_spill] sm:$0xff]  ;;  %v23448_v53 = vld [vmem:[#allocation7_spill] sm:$0xff] }
 0xaab   : > { %14507 = vmatpush3.bf16.msra.mxu1 %v19878_v15  ;;  %14469 = vmatprep.subr.bf16.mxu0 %v14468_v41  ;;  %v14490_v59 = vpack.c.bf16 %v23427_v56, %v23426_v34  ;;  %v11298_v35 = vld [vmem:[%s15224_s22 + $0x60] sm:$0xff]  ;;  %v11311_v41 = vld [vmem:[%s15224_s22 + $0x1e8] sm:$0xff] }
 0xaac   : > { %14509 = vmatprep.subr.bf16.mxu1 %v19884_v1  ;;  %v14592_v4 = vpack.c.bf16 %v11311_v41, %v11307_v37  ;;  %v11335_v56 = vld [vmem:[%s15236_s15 + $0x680] sm:$0xff] }
 0xaae   : > { %14471 = vmatpush3.bf16.msra.mxu0 %v14470_v42  ;;  %v14590_v42 = vpack.c.bf16 %v11302_v46, %v11298_v35 }
 0xaaf   : > { %14511 = vmatpush3.bf16.msra.mxu1 %v19901_v61  ;;  %14473 = vmatprep.subr.bf16.mxu0 %v14472_v12  ;;  %v11306_v12 = vld [vmem:[%s15224_s22 + $0x160] sm:$0xff] }
 0xab0   : > { %14513 = vmatprep.subr.bf16.mxu1 %v19907_v0 }
 0xab2   : > { %14475 = vmatpush3.bf16.msra.mxu0 %v14474_v8  ;;  %v11310_v8 = vld [vmem:[%s15224_s22 + $0x1e0] sm:$0xff] }
 0xab3   : > { %14515 = vmatpush3.bf16.msra.mxu1 %v19918_v14  ;;  %14477 = vmatprep.subr.bf16.mxu0 %v14476_v30  ;;  %v14594_v30 = vpack.c.bf16 %v11310_v8, %v11306_v12 }
 0xab4   : > { %14517 = vmatprep.subr.bf16.mxu1 %v19930_v60 }
 0xab6   : > { %14479 = vmatpush3.bf16.msra.mxu0 %v14478_v16  ;;  %v23449_v16 = vld [vmem:[#allocation8_spill] sm:$0xff] }
 0xab7   : > { %14519 = vmatpush3.bf16.msra.mxu1 %v19940_v48  ;;  %14481 = vmatprep.subr.bf16.mxu0 %v14480_v57 }
 0xab8   : > { %14521 = vmatprep.subr.bf16.mxu1 %v19952_v23 }
 0xaba   : > { %14483 = vmatpush3.bf16.msra.mxu0 %v14482_v58 }
 0xabb   : > { %14523 = vmatpush3.bf16.msra.mxu1 %v19961_v54  ;;  %14485 = vmatprep.subr.bf16.mxu0 %v14484_v2 }
 0xabc   : > { %14557 = vmatprep.subr.bf16.mxu1 %v19769_v27  ;;  %v23429_v27 = vand.u32 4294901760, %v19674_v45  ;;  %v23435_v45 = vld [vmem:[#allocation90_spill] sm:$0xff] }
 0xabe   : > { %8421 = vmatmul.mubr.f32.vlgmr.msra.gmra.mrb[98].mxu1 %v7909_v36  ;;  %14487 = vmatpush3.bf16.msra.mxu0 %v14486_v33  ;;  %v14524_v55 = vpack.c.bf16 %v23429_v27, %v23428_v7  ;;  %v23430_v36 = vand.u32 4294901760, %v19691_v20  ;;  %v23436_v20 = vld [vmem:[#allocation91_spill] sm:$0xff]  ;;  %v20117_v7 = vld [vmem:[%s15236_s15 + $0x600] sm:$0xff]  ;;  %v9041_v27 = vand.u32 4294901760, %v11335_v56 }
 0xabf   : > { %8428 = vmatprep.mubr.f32.mxu1 %v7918_v49  ;;  %14559 = vmatpush3.bf16.msra.mxu1 %v19790_v11  ;;  %v23432_v11 = vld [vmem:[#allocation39_spill] sm:$0xff] }
 0xac0   : > { %14489 = vmatprep.subr.bf16.mxu0 %v14488_v24  ;;  %14561 = vmatprep.subr.bf16.mxu1 %v19796_v26  ;;  %v14526_v62 = vpack.c.bf16 %v23431_v29, %v23430_v36  ;;  %v23438_v26 = vld [vmem:[#allocation78_spill] sm:$0xff]  ;;  %v8993_v29 = vand.u32 4294901760, %v20117_v7 }
 0xac1   : > { %v11320_v36 = vld [vmem:[%s15236_s15 + $0x608] sm:$0xff] }
 0xac2   : > { %8432 = vmatmul.mubr.f32.gmra.mrb[100].mxu1 %v7924_v63  ;;  %14491 = vmatpush3.bf16.msra.mxu0 %v14490_v59  ;;  %v11308_v63 = vld [vmem:[%s15224_s22 + $0x170] sm:$0xff]  ;;  %v11336_v59 = vld [vmem:[%s15236_s15 + $0x688] sm:$0xff] }
 0xac3   : > { %14563 = vmatpush3.bf16.msra.mxu1 %v19822_v39  ;;  %8709 = vmatprep.mubr.f32.mxu1 %v23432_v11  ;;  %v23434_v39 = vld [vmem:[#allocation69_spill] sm:$0xff] }
 0xac4   : > { %14525 = vmatprep.subr.bf16.mxu0 %v14524_v55  ;;  %14565 = vmatprep.subr.bf16.mxu1 %v19837_v38  ;;  %v23439_v38 = vld [vmem:[#allocation65_spill] sm:$0xff]  ;;  %v9044_v55 = vand.u32 4294901760, %v11336_v59 }
 0xac5   : > { %8304 = vmatmul.mubr.f32.vlgmr.msra.gmra.mrb[90].mxu0 %v19921_v17  ;;  %v11309_v17 = vld [vmem:[%s15224_s22 + $0x178] sm:$0xff] }
 0xac6   : > { %8310 = vmatprep.mubr.f32.mxu0 %v19933_v43  ;;  %14527 = vmatpush3.bf16.msra.mxu0 %v14526_v62  ;;  %v11313_v43 = vld [vmem:[%s15224_s22 + $0x1f8] sm:$0xff]  ;;  %v20122_v62 = vld [vmem:[%s15236_s15 + $0x690] sm:$0xff] }
 0xac7   : > { %14567 = vmatpush3.bf16.msra.mxu1 %v19850_v31  ;;  %14529 = vmatprep.subr.bf16.mxu0 %v23433_v50  ;;  %v11301_v31 = vld [vmem:[%s15224_s22 + $0x78] sm:$0xff]  ;;  %v8996_v50 = vand.u32 4294901760, %v11320_v36 }
 0xac8   : > { %14569 = vmatprep.subr.bf16.mxu1 %v19857_v40  ;;  %v11305_v40 = vld [vmem:[%s15224_s22 + $0xf8] sm:$0xff] }
 0xac9   : > { %8313 = vmatmul.mubr.f32.gmra.mrb[92].mxu0 %v19944_v19  ;;  %v23443_v19 = vld [vmem:[#allocation94_spill] sm:$0xff] }
 0xaca   : > { %14531 = vmatpush3.bf16.msra.mxu0 %v23434_v39  ;;  %8598 = vmatprep.mubr.f32.mxu0 %v23432_v11  ;;  %v20125_v11 = vld [vmem:[%s15236_s15 + $0x698] sm:$0xff]  ;;  %v9047_v39 = vand.u32 4294901760, %v20122_v62 }
 0xacb   : > { %14571 = vmatpush3.bf16.msra.mxu1 %v19878_v15  ;;  %14533 = vmatprep.subr.bf16.mxu0 %v23435_v45  ;;  %v23440_v15 = vld [vmem:[#allocation82_spill] sm:$0xff]  ;;  %v9050_v45 = vand.u32 4294901760, %v20125_v11 }
 0xacc   : > { %14573 = vmatprep.subr.bf16.mxu1 %v19884_v1  ;;  %v11300_v1 = vld [vmem:[%s15224_s22 + $0x70] sm:$0xff] }
 0xace   : > { %14535 = vmatpush3.bf16.msra.mxu0 %v23436_v20  ;;  %v20130_v20 = vld [vmem:[%s15236_s15 + $0x610] sm:$0xff] }
 0xacf   : > { %14575 = vmatpush3.bf16.msra.mxu1 %v19901_v61  ;;  %14537 = vmatprep.subr.bf16.mxu0 %v23437_v47  ;;  %v23441_v61 = vld [vmem:[#allocation87_spill] sm:$0xff] }
 0xad0   : > { %14577 = vmatprep.subr.bf16.mxu1 %v19907_v0  ;;  %v14596_v0 = vpack.c.bf16 %v11305_v40, %v11301_v31  ;;  %v20133_v47 = vld [vmem:[%s15236_s15 + $0x618] sm:$0xff]  ;;  %v20140_v31 = vsub.f32 %v20117_v7, %v8993_v29  ;;  %v8999_v40 = vand.u32 4294901760, %v20130_v20  ;;  %v20215_v7 = vld [vmem:[%s15236_s15 + $0x628] sm:$0xff] }
 0xad2   : > { %14539 = vmatpush3.bf16.msra.mxu0 %v23438_v26  ;;  %v20135_v26 = vsub.f32 %v11335_v56, %v9041_v27  ;;  %v20209_v56 = vpack.c.bf16 %v8996_v50, %v8993_v29  ;;  %v9008_v29 = vand.u32 4294901760, %v20215_v7 }
 0xad3   : > { %14579 = vmatpush3.bf16.msra.mxu1 %v19918_v14  ;;  %14541 = vmatprep.subr.bf16.mxu0 %v23439_v38  ;;  %v11304_v14 = vld [vmem:[%s15224_s22 + $0xf0] sm:$0xff]  ;;  %v20137_v38 = vsub.f32 %v11336_v59, %v9044_v55  ;;  %v20212_v59 = vld [vmem:[%s15236_s15 + $0x620] sm:$0xff] }
 0xad4   : > { %14581 = vmatprep.subr.bf16.mxu1 %v19930_v60  ;;  %v23442_v60 = vld [vmem:[#allocation92_spill] sm:$0xff]  ;;  %v14598_v49 = vpack.c.bf16 %v11304_v14, %v11300_v1  ;;  %v9002_v1 = vand.u32 4294901760, %v20133_v47  ;;  %v22168_v14 = vand.u32 4294901760, %v20135_v26  ;;  %23453 = vst [vmem:[#allocation66_spill] sm:$0xff] %v20209_v56 }
 0xad5   : > { %23450 = vst [vmem:[#allocation14_spill] sm:$0xff] %v20137_v38 }
 0xad6   : > { %14543 = vmatpush3.bf16.msra.mxu0 %v23440_v15  ;;  %v20143_v15 = vsub.f32 %v11320_v36, %v8996_v50 }
 0xad7   : > { %14583 = vmatpush3.bf16.msra.mxu1 %v19940_v48  ;;  %14545 = vmatprep.subr.bf16.mxu0 %v23441_v61  ;;  %v14600_v48 = vpack.c.bf16 %v11313_v43, %v11309_v17  ;;  %v20148_v61 = vsub.f32 %v20122_v62, %v9047_v39  ;;  %v22167_v17 = vand.u32 4294901760, %v20137_v38  ;;  %v22166_v43 = vand.u32 4294901760, %v20140_v31 }
 0xad8   : > { %14585 = vmatprep.subr.bf16.mxu1 %v19952_v23  ;;  %v11312_v23 = vld [vmem:[%s15224_s22 + $0x1f0] sm:$0xff]  ;;  %v20252_v62 = vsub.f32 %v20215_v7, %v9008_v29 }
 0xad9   : > { %23451 = vst [vmem:[#allocation33_spill] sm:$0xff] %v20148_v61  ;;  %v9242_v13 = vsub.f32 %v20137_v38, %v22167_v17  ;;  %v9123_v28 = vsub.f32 %v20140_v31, %v22166_v43 }
 0xada   : > { %14547 = vmatpush3.bf16.msra.mxu0 %v23442_v60  ;;  %v20162_v60 = vsub.f32 %v20130_v20, %v8999_v40 }
 0xadb   : > { %14587 = vmatpush3.bf16.msra.mxu1 %v19961_v54  ;;  %14549 = vmatprep.subr.bf16.mxu0 %v23443_v19  ;;  %v14602_v54 = vpack.c.bf16 %v11312_v23, %v11308_v63  ;;  %v22165_v19 = vand.u32 4294901760, %v20143_v15  ;;  %v20170_v63 = vsub.f32 %v20133_v47, %v9002_v1  ;;  %v9235_v23 = vsub.f32 %v20135_v26, %v22168_v14  ;;  %v20332_v14 = vld [vmem:[%s15236_s15 + $0x648] sm:$0xff] }
 0xadc   : > { %14597 = vmatprep.subr.bf16.mxu1 %v14596_v0  ;;  %v20153_v0 = vsub.f32 %v20125_v11, %v9050_v45  ;;  %v9243_v37 = vand.u32 4294901760, %v9242_v13  ;;  %v9124_v41 = vand.u32 4294901760, %v9123_v28  ;;  %v20234_v13 = vpack.c.bf16 %v9050_v45, %v9047_v39  ;;  %v20237_v28 = vld [vmem:[%s15236_s15 + $0x6b0] sm:$0xff] }
 0xadd   : > { %v22161_v35 = vand.u32 4294901760, %v20170_v63  ;;  %v9236_v46 = vand.u32 4294901760, %v9235_v23  ;;  %v9005_v23 = vand.u32 4294901760, %v20212_v59  ;;  %v9059_v11 = vand.u32 4294901760, %v20237_v28 }
 0xade   : > { %8711 = vmatmul.mubr.f32.vlgmr.msra.gmra.mrb[102].mxu1 %v19894_v9  ;;  %14551 = vmatpush3.bf16.msra.mxu0 %v23444_v3  ;;  %23452 = vst [vmem:[#allocation56_spill] sm:$0xff] %v20153_v0  ;;  %v22162_v3 = vand.u32 4294901760, %v20162_v60  ;;  %23454 = vst [vmem:[#allocation61_spill] sm:$0xff] %v20234_v13  ;;  %v20261_v45 = vpack.c.bf16 %v9002_v1, %v8999_v40  ;;  %v22176_v40 = vand.u32 4294901760, %v20252_v62 }
 0xadf   : > { %8716 = vmatprep.mubr.f32.mxu1 %v19911_v10  ;;  %14599 = vmatpush1.bf16.msra.mxu1 %v14598_v49  ;;  %v22164_v49 = vand.u32 4294901760, %v20148_v61  ;;  %v9144_v12 = vsub.f32 %v20170_v63, %v22161_v35  ;;  %v14636_v8 = vpack.c.bf16 %v9243_v37, %v9236_v46  ;;  %v20247_v37 = vsub.f32 %v20212_v59, %v9005_v23 }
 0xae0   : > { %14553 = vmatprep.subr.bf16.mxu0 %v23445_v6  ;;  %14601 = vmatprep.subr.bf16.mxu1 %v14600_v48  ;;  %v22163_v48 = vand.u32 4294901760, %v20153_v0  ;;  %23455 = vst [vmem:[#allocation12_spill] sm:$0xff] %v20261_v45  ;;  %v20281_v1 = vsub.f32 %v20237_v28, %v9059_v11 }
 0xae1   : > { %v9249_v6 = vsub.f32 %v20148_v61, %v22164_v49 }
 0xae2   : > { %8718 = vmatmul.mubr.f32.gmra.mrb[104].mxu1 %v19923_v52  ;;  %14555 = vmatpush3.bf16.msra.mxu0 %v23446_v18  ;;  %v9137_v18 = vsub.f32 %v20162_v60, %v22162_v3 }
 0xae3   : > { %14603 = vmatpush1.bf16.msra.mxu1 %v14602_v54  ;;  %8906 = vmatprep.mubr.f32.mxu1 %v23447_v44  ;;  %v9130_v54 = vsub.f32 %v20143_v15, %v22165_v19 }
 0xae4   : > { %14589 = vmatprep.subr.bf16.mxu0 %v14588_v32  ;;  %v9256_v32 = vsub.f32 %v20153_v0, %v22163_v48  ;;  %14637 = vmatprep.subr.bf16.mxu1 %v14636_v8 }
 0xae5   : > { %8600 = vmatmul.mubr.f32.vlgmr.msra.gmra.mrb[94].mxu0 %v19894_v9 }
 0xae6   : > { %11317 = vmatmul.mubr.msk.f32.vlgmr.msra.gmra.mrb[106].mxu1 %vm624_vm1, %v23448_v53  ;;  %8605 = vmatprep.mubr.f32.mxu0 %v19911_v10 }
 0xae7   : > { %14591 = vmatpush1.bf16.msra.mxu0 %v14590_v42  ;;  %8912 = vmatprep.mubr.f32.mxu1 %v23447_v44  ;;  %v9250_v42 = vand.u32 4294901760, %v9249_v6 }
 0xae8   : > { %14593 = vmatprep.subr.bf16.mxu0 %v14592_v4  ;;  %v9257_v4 = vand.u32 4294901760, %v9256_v32 }
 0xae9   : > { %8607 = vmatmul.mubr.f32.gmra.mrb[96].mxu0 %v19923_v52 }
 0xaea   : > { %11318 = vmatmul.mubr.msk.f32.gmra.mrb[108].mxu1 %vm624_vm1, %v23449_v16  ;;  %8829 = vmatprep.mubr.f32.mxu0 %v23447_v44 }
 0xaeb   : > { %14595 = vmatpush1.bf16.msra.mxu0 %v14594_v30  ;;  %v9138_v30 = vand.u32 4294901760, %v9137_v18  ;;  %v20267_v18 = vld [vmem:[%s15236_s15 + $0x638] sm:$0xff] }
 0xaee   : > { %11315 = vmatmul.mubr.msk.f32.vlgmr.msra.gmra.mrb[98].mxu0 %vm624_vm1, %v23448_v53 }
 0xaef   : > { %8835 = vmatprep.mubr.f32.mxu0 %v23447_v44  ;;  %v9131_v44 = vand.u32 4294901760, %v9130_v54  ;;  %v20240_v54 = vld [vmem:[%s15236_s15 + $0x6b8] sm:$0xff] }
 0xaf0   : > { %v9062_v39 = vand.u32 4294901760, %v20240_v54 }
 0xaf2   : > { %11316 = vmatmul.mubr.msk.f32.gmra.mrb[100].mxu0 %vm624_vm1, %v23449_v16  ;;  %v20286_v8 = vsub.f32 %v20240_v54, %v9062_v39 }
 0xb0b   : > { %v12427_v9 = vpop.f32.mrb[82].mxu1 }
 0xb0c   : > { %v12428_v10 = vpop.f32.mrb[83].mxu1 }
 0xb0d   : > { %v12429_v52 = vadd.f32 %v12428_v10, %v12427_v9  ;;  %v14638_v9 = vpack.c.bf16 %v9131_v44, %v9124_v41  ;;  %v14640_v10 = vpack.c.bf16 %v9257_v4, %v9250_v42  ;;  %v20264_v41 = vld [vmem:[%s15236_s15 + $0x630] sm:$0xff] }
 0xb0e   : > { %v9011_v20 = vand.u32 4294901760, %v20264_v41 }
 0xb0f   : > { %v12430_v25 = vpop.f32.mrb[84].mxu1  ;;  %14639 = vmatpush3.bf16.msra.mxu1 %v14638_v9 }
 0xb10   : > { %v12431_v57 = vpop.f32.mrb[85].mxu1  ;;  %14641 = vmatprep.subr.bf16.mxu1 %v14640_v10 }
 0xb11   : > { %v12432_v51 = vadd.f32 %v12431_v57, %v12430_v25 }
 0xb13   : > { %v12389_v58 = vpop.f32.mrb[74].mxu0 }
 0xb14   : > { %v12390_v2 = vpop.f32.mrb[75].mxu0 }
 0xb15   : > { %v12391_v5 = vadd.f32 %v12390_v2, %v12389_v58  ;;  %v20198_v58 = vpack.c.bf16 %v9044_v55, %v9041_v27  ;;  %v20201_v2 = vld [vmem:[%s15236_s15 + $0x6a0] sm:$0xff] }
 0xb17   : > { %v20110_v33 = vadd.f32 %v12429_v52, %v12391_v5  ;;  %v12392_v21 = vpop.f32.mrb[76].mxu0  ;;  %v9145_v52 = vand.u32 4294901760, %v9144_v12  ;;  %v20204_v5 = vld [vmem:[%s15236_s15 + $0x6a8] sm:$0xff]  ;;  %14605 = vmatprep.subr.bf16.mxu0 %v20198_v58  ;;  %v22177_v12 = vand.u32 4294901760, %v20247_v37 }
 0xb18   : > { %v12393_v22 = vpop.f32.mrb[77].mxu0  ;;  %14607 = vmatpush3.bf16.msra.mxu0 %v20209_v56 }
 0xb19   : > { %v12394_v24 = vadd.f32 %v12393_v22, %v12392_v21  ;;  %v14642_v25 = vpack.c.bf16 %v9145_v52, %v9138_v30  ;;  %v9053_v22 = vand.u32 4294901760, %v20201_v2  ;;  %14609 = vmatprep.subr.bf16.mxu0 %v20234_v13  ;;  %v9014_v30 = vand.u32 4294901760, %v20267_v18 }
 0xb1b   : > { %v20112_v34 = vadd.f32 %v12432_v51, %v12394_v24  ;;  %14643 = vmatpush3.bf16.msra.mxu1 %v14642_v25  ;;  %v9056_v24 = vand.u32 4294901760, %v20204_v5  ;;  %v20220_v55 = vsub.f32 %v20201_v2, %v9053_v22  ;;  %v9151_v25 = vsub.f32 %v20247_v37, %v22177_v12 }
 0xb1c   : > { %14611 = vmatpush3.bf16.msra.mxu0 %v20261_v45  ;;  %v20305_v35 = vsub.f32 %v20267_v18, %v9014_v30 }
 0xb1d   : > { %v20225_v36 = vsub.f32 %v20204_v5, %v9056_v24  ;;  %v22180_v32 = vand.u32 4294901760, %v20220_v55  ;;  %v9020_v5 = vand.u32 4294901760, %v20332_v14 }
 0xb1e   : > { %v22171_v18 = vand.u32 4294901760, %v20305_v35 }
 0xb1f   : > { %v22179_v46 = vand.u32 4294901760, %v20225_v36  ;;  %v9263_v42 = vsub.f32 %v20220_v55, %v22180_v32 }
 0xb21   : > { %v9270_v4 = vsub.f32 %v20225_v36, %v22179_v46  ;;  %v9264_v10 = vand.u32 4294901760, %v9263_v42 }
 0xb23   : > { %v9271_v52 = vand.u32 4294901760, %v9270_v4 }
 0xb25   : > { %v14644_v4 = vpack.c.bf16 %v9271_v52, %v9264_v10 }
 0xb27   : > { %14645 = vmatprep.subr.bf16.mxu1 %v14644_v4  ;;  %v11344_v4 = vld [vmem:[%s15236_s15 + $0x6c8] sm:$0xff] }
 0xb2f   : > { %v12503_v57 = vpop.f32.mrb[86].mxu1 }
 0xb30   : > { %v12504_v51 = vpop.f32.mrb[87].mxu1 }
 0xb31   : > { %v12505_v21 = vadd.f32 %v12504_v51, %v12503_v57  ;;  %v9158_v57 = vsub.f32 %v20252_v62, %v22176_v40  ;;  %v22175_v51 = vand.u32 4294901760, %v20281_v1 }
 0xb33   : > { %v12506_v27 = vpop.f32.mrb[88].mxu1  ;;  %v9159_v48 = vand.u32 4294901760, %v9158_v57  ;;  %v9277_v49 = vsub.f32 %v20281_v1, %v22175_v51 }
 0xb34   : > { %v12507_v50 = vpop.f32.mrb[89].mxu1 }
 0xb35   : > { %v12508_v6 = vadd.f32 %v12507_v50, %v12506_v27  ;;  %v22173_v27 = vand.u32 4294901760, %v20286_v8  ;;  %v20301_v50 = vsub.f32 %v20264_v41, %v9011_v20  ;;  %v9278_v10 = vand.u32 4294901760, %v9277_v49 }
 0xb37   : > { %v12465_v44 = vpop.f32.mrb[78].mxu0  ;;  %v9284_v19 = vsub.f32 %v20286_v8, %v22173_v27  ;;  %v22172_v43 = vand.u32 4294901760, %v20301_v50 }
 0xb38   : > { %v12466_v47 = vpop.f32.mrb[79].mxu0 }
 0xb39   : > { %v12467_v9 = vadd.f32 %v12466_v47, %v12465_v44  ;;  %v9152_v47 = vand.u32 4294901760, %v9151_v25  ;;  %v9285_v52 = vand.u32 4294901760, %v9284_v19  ;;  %v9165_v25 = vsub.f32 %v20301_v50, %v22172_v43 }
 0xb3b   : > { %v7388_v44 = vadd.f32 %v12467_v9, %v20110_v33  ;;  %v12468_v42 = vpop.f32.mrb[80].mxu0  ;;  %v14646_v9 = vpack.c.bf16 %v9159_v48, %v9152_v47 }
 0xb3c   : > { %v12469_v3 = vpop.f32.mrb[81].mxu0 }
 0xb3d   : > { %v12470_v17 = vadd.f32 %v12469_v3, %v12468_v42  ;;  %v20314_v33 = vadd.f32 %v12505_v21, %v7388_v44  ;;  %v9172_v3 = vsub.f32 %v20305_v35, %v22171_v18  ;;  %14647 = vmatpush3.bf16.msra.mxu1 %v14646_v9  ;;  %v14648_v21 = vpack.c.bf16 %v9285_v52, %v9278_v10  ;;  %v11343_v42 = vld [vmem:[%s15236_s15 + $0x6c0] sm:$0xff]  ;;  %v20348_v52 = vld [vmem:[%s15236_s15 + $0x6d0] sm:$0xff] }
 0xb3e   : > { %v9166_v44 = vand.u32 4294901760, %v9165_v25  ;;  %v9065_v47 = vand.u32 4294901760, %v11343_v42  ;;  %v20344_v9 = vpack.c.bf16 %v9008_v29, %v9005_v23  ;;  %v20351_v25 = vld [vmem:[%s15236_s15 + $0x6d8] sm:$0xff]  ;;  %v22186_v7 = vand.u32 4294901760, %v20348_v52 }
 0xb3f   : > { %v7397_v57 = vadd.f32 %v12470_v17, %v20112_v34  ;;  %v9173_v19 = vand.u32 4294901760, %v9172_v3  ;;  %14649 = vmatprep.subr.bf16.mxu1 %v14648_v21  ;;  %v9068_v34 = vand.u32 4294901760, %v11344_v4  ;;  %v20329_v17 = vld [vmem:[%s15236_s15 + $0x640] sm:$0xff]  ;;  %v22185_v23 = vand.u32 4294901760, %v20351_v25 }
 0xb40   : > { %23457 = vst [vmem:[#allocation57_spill] sm:$0xff] %v20344_v9  ;;  %v22187_v10 = vand.u32 4294901760, %v20329_v17  ;;  %v20356_v3 = vsub.f32 %v11343_v42, %v9065_v47  ;;  %v20380_v29 = vpack.c.bf16 %v9014_v30, %v9011_v20  ;;  %v20394_v41 = vsub.f32 %v20348_v52, %v22186_v7 }
 0xb41   : > { %v20324_v48 = vadd.f32 %v12508_v6, %v7397_v57  ;;  %v14650_v49 = vpack.c.bf16 %v9173_v19, %v9166_v44  ;;  %v20338_v6 = vpack.c.bf16 %v9056_v24, %v9053_v22  ;;  %v20354_v57 = vld [vmem:[%s15236_s15 + $0x650] sm:$0xff]  ;;  %v20358_v2 = vsub.f32 %v11344_v4, %v9068_v34  ;;  %v20368_v24 = vld [vmem:[%s15236_s15 + $0x658] sm:$0xff] }
 0xb42   : > { %v20365_v22 = vpack.c.bf16 %v9062_v39, %v9059_v11  ;;  %v20374_v59 = vsub.f32 %v20329_v17, %v22187_v10  ;;  %23459 = vst [vmem:[#allocation32_spill] sm:$0xff] %v20380_v29  ;;  %v22169_v28 = vand.u32 4294901760, %v20356_v3  ;;  %v20386_v11 = vsub.f32 %v20332_v14, %v9020_v5 }
 0xb43   : > { %14651 = vmatpush3.bf16.msra.mxu1 %v14650_v49  ;;  %23456 = vst [vmem:[#allocation34_spill] sm:$0xff] %v20338_v6  ;;  %14613 = vmatprep.subr.bf16.mxu0 %v20338_v6  ;;  %v22170_v54 = vand.u32 4294901760, %v20358_v2  ;;  %v22184_v39 = vand.u32 4294901760, %v20354_v57  ;;  %v20399_v20 = vsub.f32 %v20351_v25, %v22185_v23  ;;  %v22181_v30 = vand.u32 4294901760, %v20368_v24  ;;  %v20451_v23 = vld [vmem:[%s15236_s15 + $0x660] sm:$0xff] }
 0xb44   : > { %23458 = vst [vmem:[#allocation59_spill] sm:$0xff] %v20365_v22  ;;  %14615 = vmatpush3.bf16.msra.mxu0 %v20344_v9  ;;  %v22174_v21 = vand.u32 4294901760, %v20374_v59  ;;  %v9291_v14 = vsub.f32 %v20356_v3, %v22169_v28  ;;  %v22178_v19 = vand.u32 4294901760, %v20386_v11  ;;  %v22182_v4 = vand.u32 4294901760, %v20394_v41 }
 0xb45   : > { %14617 = vmatprep.subr.bf16.mxu0 %v20365_v22  ;;  %v9298_v44 = vsub.f32 %v20358_v2, %v22170_v54  ;;  %v20412_v49 = vsub.f32 %v20354_v57, %v22184_v39  ;;  %v22183_v28 = vand.u32 4294901760, %v20399_v20  ;;  %v20422_v54 = vsub.f32 %v20368_v24, %v22181_v30 }
 0xb46   : > { %v9179_v42 = vsub.f32 %v20374_v59, %v22174_v21  ;;  %v9292_v18 = vand.u32 4294901760, %v9291_v14  ;;  %v9186_v27 = vsub.f32 %v20386_v11, %v22178_v19  ;;  %v9305_v40 = vsub.f32 %v20394_v41, %v22182_v4  ;;  %v20440_v19 = vld [vmem:[%s15236_s15 + $0x6e8] sm:$0xff] }
 0xb47   : > { %v9299_v43 = vand.u32 4294901760, %v9298_v44  ;;  %v22188_v21 = vand.u32 4294901760, %v20412_v49  ;;  %v9312_v12 = vsub.f32 %v20399_v20, %v22183_v28  ;;  %v22189_v14 = vand.u32 4294901760, %v20422_v54  ;;  %v20437_v44 = vld [vmem:[%s15236_s15 + $0x6e0] sm:$0xff] }
 0xb48   : > { %14619 = vmatpush3.bf16.msra.mxu0 %v20380_v29  ;;  %v9180_v51 = vand.u32 4294901760, %v9179_v42  ;;  %v9187_v32 = vand.u32 4294901760, %v9186_v27  ;;  %v9306_v30 = vand.u32 4294901760, %v9305_v40  ;;  %v20448_v39 = vpack.c.bf16 %v9068_v34, %v9065_v47  ;;  %v20456_v40 = vld [vmem:[%s15236_s15 + $0x668] sm:$0xff] }
 0xb49   : > { %v14652_v46 = vpack.c.bf16 %v9299_v43, %v9292_v18  ;;  %v9193_v42 = vsub.f32 %v20412_v49, %v22188_v21  ;;  %v9313_v4 = vand.u32 4294901760, %v9312_v12  ;;  %v9200_v28 = vsub.f32 %v20422_v54, %v22189_v14  ;;  %v20459_v12 = vld [vmem:[%s15236_s15 + $0x6f0] sm:$0xff] }
 0xb4a   : > { %23460 = vst [vmem:[#allocation13_spill] sm:$0xff] %v20448_v39  ;;  %v14654_v10 = vpack.c.bf16 %v9187_v32, %v9180_v51  ;;  %v22192_v27 = vand.u32 4294901760, %v20437_v44  ;;  %v22191_v18 = vand.u32 4294901760, %v20440_v19  ;;  %14621 = vmatprep.subr.bf16.mxu0 %v20448_v39  ;;  %v23461_v47 = vand.u32 4294901760, %v20329_v17  ;;  %v20467_v32 = vld [vmem:[%s15236_s15 + $0x6f8] sm:$0xff]  ;;  %v20481_v17 = vld [vmem:[%s15236_s15 + $0x670] sm:$0xff] }
 0xb4b   : > { %14653 = vmatprep.subr.bf16.mxu1 %v14652_v46  ;;  %v9194_v43 = vand.u32 4294901760, %v9193_v42  ;;  %v14656_v14 = vpack.c.bf16 %v9313_v4, %v9306_v30  ;;  %v9201_v16 = vand.u32 4294901760, %v9200_v28  ;;  %v9029_v30 = vand.u32 4294901760, %v20451_v23 }
 0xb4c   : > { %v20464_v34 = vpack.c.bf16 %v9020_v5, %v23461_v47  ;;  %14655 = vmatpush3.bf16.msra.mxu1 %v14654_v10  ;;  %v20472_v51 = vsub.f32 %v20437_v44, %v22192_v27  ;;  %v20477_v28 = vsub.f32 %v20440_v19, %v22191_v18  ;;  %v9032_v10 = vand.u32 4294901760, %v20456_v40 }
 0xb4d   : > { %14657 = vmatprep.subr.bf16.mxu1 %v14656_v14  ;;  %v14658_v5 = vpack.c.bf16 %v9201_v16, %v9194_v43  ;;  %v9083_v42 = vand.u32 4294901760, %v20459_v12  ;;  %v20495_v14 = vsub.f32 %v20451_v23, %v9029_v30  ;;  %v9086_v16 = vand.u32 4294901760, %v20467_v32  ;;  %v11334_v43 = vld [vmem:[%s15236_s15 + $0x678] sm:$0xff] }
 0xb4e   : > { %23462 = vst [vmem:[#allocation9_spill] sm:$0xff] %v20464_v34  ;;  %14623 = vmatpush3.bf16.msra.mxu0 %v20464_v34  ;;  %v9035_v23 = vand.u32 4294901760, %v20481_v17  ;;  %v23469_v34 = vand.u32 4294901760, %v20472_v51  ;;  %v23470_v39 = vand.u32 4294901760, %v20477_v28 }
 0xb50   : > { %v12579_v7 = vpop.f32.mrb[90].mxu1  ;;  %14659 = vmatpush3.bf16.msra.mxu1 %v14658_v5 }
 0xb51   : > { %v12580_v21 = vpop.f32.mrb[91].mxu1 }
 0xb52   : > { %v12581_v46 = vadd.f32 %v12580_v21, %v12579_v7  ;;  %v23463_v7 = vand.u32 4294901760, %v20348_v52  ;;  %v23464_v21 = vand.u32 4294901760, %v20351_v25  ;;  %v20500_v52 = vsub.f32 %v20456_v40, %v9032_v10 }
 0xb53   : > { %v20504_v25 = vsub.f32 %v20459_v12, %v9083_v42  ;;  %v9319_v40 = vsub.f32 %v20472_v51, %v23469_v34  ;;  %v22212_v12 = vand.u32 4294901760, %v20495_v14 }
 0xb54   : > { %v20489_v4 = vpack.c.bf16 %v23464_v21, %v23463_v7  ;;  %v12582_v47 = vpop.f32.mrb[92].mxu1  ;;  %v23466_v7 = vand.u32 4294901760, %v20354_v57  ;;  %v23467_v21 = vand.u32 4294901760, %v20368_v24  ;;  %v22213_v57 = vand.u32 4294901760, %v20500_v52 }
 0xb55   : > { %v12583_v53 = vpop.f32.mrb[93].mxu1 }
 0xb56   : > { %23465 = vst [vmem:[#allocation67_spill] sm:$0xff] %v20489_v4  ;;  %14625 = vmatprep.subr.bf16.mxu0 %v20489_v4  ;;  %v20510_v27 = vpack.c.bf16 %v23467_v21, %v23466_v7  ;;  %v12584_v18 = vadd.f32 %v12583_v53, %v12582_v47  ;;  %v9326_v4 = vsub.f32 %v20477_v28, %v23470_v39  ;;  %v9038_v53 = vand.u32 4294901760, %v11334_v43 }
 0xb57   : > { %v12541_v29 = vpop.f32.mrb[82].mxu0  ;;  %v20523_v7 = vsub.f32 %v20467_v32, %v9086_v16  ;;  %v9320_v47 = vand.u32 4294901760, %v9319_v40  ;;  %v9207_v39 = vsub.f32 %v20495_v14, %v22212_v12  ;;  %v20530_v21 = vsub.f32 %v20481_v17, %v9035_v23 }
 0xb58   : > { %23468 = vst [vmem:[#allocation42_spill] sm:$0xff] %v20510_v27  ;;  %14627 = vmatpush3.bf16.msra.mxu0 %v20510_v27  ;;  %v12542_v5 = vpop.f32.mrb[83].mxu0  ;;  %v9327_v34 = vand.u32 4294901760, %v9326_v4  ;;  %v9214_v24 = vsub.f32 %v20500_v52, %v22213_v57  ;;  %v23472_v32 = vand.u32 4294901760, %v20504_v25  ;;  %v20540_v45 = vsub.f32 %v11334_v43, %v9038_v53 }
 0xb59   : > { %23471 = vst [vmem:[#allocation44_spill] sm:$0xff] %v20530_v21  ;;  %v12543_v22 = vadd.f32 %v12542_v5, %v12541_v29  ;;  %v22216_v9 = vand.u32 4294901760, %v20523_v7  ;;  %v9208_v4 = vand.u32 4294901760, %v9207_v39  ;;  %v22219_v6 = vand.u32 4294901760, %v20530_v21 }
 0xb5a   : > { %v9333_v27 = vsub.f32 %v20504_v25, %v23472_v32  ;;  %v14660_v40 = vpack.c.bf16 %v9327_v34, %v9320_v47  ;;  %23473 = vst [vmem:[#allocation47_spill] sm:$0xff] %v20540_v45  ;;  %v9215_v29 = vand.u32 4294901760, %v9214_v24  ;;  %v9227_v34 = vand.u32 4294901760, %v20540_v45 }
 0xb5b   : > { %v7684_v17 = vadd.f32 %v12543_v22, %v20314_v33  ;;  %v12544_v12 = vpop.f32.mrb[84].mxu0  ;;  %v9340_v57 = vsub.f32 %v20523_v7, %v22216_v9  ;;  %v9221_v47 = vsub.f32 %v20530_v21, %v22219_v6  ;;  %v23474_v43 = vand.u32 4294901760, %v20437_v44 }
 0xb5c   : > { %v9334_v5 = vand.u32 4294901760, %v9333_v27  ;;  %v12545_v13 = vpop.f32.mrb[85].mxu0  ;;  %14661 = vmatprep.subr.bf16.mxu1 %v14660_v40  ;;  %v23475_v39 = vand.u32 4294901760, %v20440_v19  ;;  %v20556_v22 = vpack.c.bf16 %v9032_v10, %v9029_v30  ;;  %v14662_v32 = vpack.c.bf16 %v9215_v29, %v9208_v4 }
 0xb5d   : > { %v12546_v27 = vadd.f32 %v12545_v13, %v12544_v12  ;;  %v7795_v24 = vadd.f32 %v12581_v46, %v7684_v17  ;;  %v9341_v9 = vand.u32 4294901760, %v9340_v57  ;;  %v9222_v56 = vand.u32 4294901760, %v9221_v47 }
 0xb5e   : > { %v20554_v33 = vpack.c.bf16 %v23475_v39, %v23474_v43  ;;  %v9228_v40 = vsub.f32 %v20540_v45, %v9227_v34  ;;  %v20562_v6 = vpack.c.bf16 %v9086_v16, %v9083_v42  ;;  %v20564_v44 = vpack.c.bf16 %v9038_v53, %v9035_v23  ;;  %14663 = vmatpush3.bf16.msra.mxu1 %v14662_v32 }
 0xb5f   : > { %v7691_v19 = vadd.f32 %v12546_v27, %v20324_v48  ;;  %v14664_v30 = vpack.c.bf16 %v9341_v9, %v9334_v5  ;;  %v14668_v13 = vpack.c.bf16 %v20137_v38, %v20135_v26  ;;  %v23479_v29 = vand.u32 4294901760, %v20247_v37 }
 0xb60   : > { %14629 = vmatprep.subr.bf16.mxu0 %v20554_v33  ;;  %v9229_v46 = vand.u32 4294901760, %v9228_v40  ;;  %v23480_v47 = vand.u32 4294901760, %v20252_v62  ;;  %v23494_v9 = vand.u32 4294901760, %v20394_v41 }
 0xb61   : > { %14631 = vmatpush3.bf16.msra.mxu0 %v20556_v22  ;;  %v7802_v48 = vadd.f32 %v12584_v18, %v7691_v19  ;;  %14665 = vmatprep.subr.bf16.mxu1 %v14664_v30 }
 0xb62   : > { %14633 = vmatprep.subr.bf16.mxu0 %v20562_v6  ;;  %v14666_v57 = vpack.c.bf16 %v9229_v46, %v9222_v56  ;;  %v23476_v46 = vand.u32 4294901760, %v20220_v55  ;;  %v20613_v17 = vpack.c.bf16 %v23480_v47, %v23479_v29 }
 0xb64   : > { %14667 = vmatpush3.bf16.msra.mxu1 %v14666_v57  ;;  %v23477_v57 = vand.u32 4294901760, %v20225_v36  ;;  %23481 = vst [vmem:[#allocation73_spill] sm:$0xff] %v20613_v17 }
 0xb65   : > { %14635 = vmatpush3.bf16.msra.mxu0 %v20564_v44  ;;  %14701 = vmatprep.subr.bf16.mxu1 %v20198_v58 }
 0xb66   : > { %14669 = vmatprep.subr.bf16.mxu0 %v14668_v13  ;;  %v20607_v56 = vpack.c.bf16 %v23477_v57, %v23476_v46  ;;  %v23485_v46 = vand.u32 4294901760, %v20301_v50  ;;  %v23486_v57 = vand.u32 4294901760, %v20305_v35 }
 0xb68   : > { %23478 = vst [vmem:[#allocation11_spill] sm:$0xff] %v20607_v56  ;;  %v20625_v53 = vpack.c.bf16 %v23486_v57, %v23485_v46  ;;  %v23495_v46 = vand.u32 4294901760, %v20399_v20 }
 0xb6a   : > { %23487 = vst [vmem:[#allocation74_spill] sm:$0xff] %v20625_v53 }
 0xb70   : > { %v12655_v39 = vpop.f32.mrb[94].mxu1 }
 0xb71   : > { %v12656_v27 = vpop.f32.mrb[95].mxu1 }
 0xb72   : > { %v12657_v32 = vadd.f32 %v12656_v27, %v12655_v39  ;;  %v23482_v27 = vand.u32 4294901760, %v20281_v1 }
 0xb74   : > { %v12658_v40 = vpop.f32.mrb[96].mxu1 }
 0xb75   : > { %v12659_v19 = vpop.f32.mrb[97].mxu1 }
 0xb76   : > { %v12660_v30 = vadd.f32 %v12659_v19, %v12658_v40  ;;  %v23483_v40 = vand.u32 4294901760, %v20286_v8 }
 0xb78   : > { %v12617_v13 = vpop.f32.mrb[86].mxu0  ;;  %v20619_v19 = vpack.c.bf16 %v23483_v40, %v23482_v27 }
 0xb79   : > { %v12618_v5 = vpop.f32.mrb[87].mxu0 }
 0xb7a   : > { %v12619_v43 = vadd.f32 %v12618_v5, %v12617_v13  ;;  %23484 = vst [vmem:[#allocation60_spill] sm:$0xff] %v20619_v19  ;;  %v23488_v5 = vand.u32 4294901760, %v20356_v3  ;;  %v23492_v13 = vand.u32 4294901760, %v20386_v11 }
 0xb7c   : > { %v7914_v18 = vadd.f32 %v12619_v43, %v7795_v24  ;;  %v12620_v39 = vpop.f32.mrb[88].mxu0  ;;  %v23489_v24 = vand.u32 4294901760, %v20358_v2  ;;  %v23491_v43 = vand.u32 4294901760, %v20374_v59 }
 0xb7d   : > { %v12621_v4 = vpop.f32.mrb[89].mxu0 }
 0xb7e   : > { %v12622_v12 = vadd.f32 %v12621_v4, %v12620_v39  ;;  %v8161_v23 = vadd.f32 %v12657_v32, %v7914_v18  ;;  %v20631_v47 = vpack.c.bf16 %v23489_v24, %v23488_v5  ;;  %v20637_v27 = vpack.c.bf16 %v23492_v13, %v23491_v43 }
 0xb7f   : > { %v20643_v4 = vpack.c.bf16 %v23495_v46, %v23494_v9  ;;  %v23500_v32 = vand.u32 4294901760, %v20472_v51  ;;  %v23501_v39 = vand.u32 4294901760, %v20477_v28  ;;  %v23506_v9 = vand.u32 4294901760, %v20504_v25 }
 0xb80   : > { %v7929_v29 = vadd.f32 %v12622_v12, %v7802_v48  ;;  %23490 = vst [vmem:[#allocation80_spill] sm:$0xff] %v20631_v47  ;;  %23493 = vst [vmem:[#allocation15_spill] sm:$0xff] %v20637_v27  ;;  %v23497_v48 = vand.u32 4294901760, %v20412_v49  ;;  %v23498_v12 = vand.u32 4294901760, %v20422_v54  ;;  %v23507_v24 = vand.u32 4294901760, %v20523_v7 }
 0xb81   : > { %23496 = vst [vmem:[#allocation75_spill] sm:$0xff] %v20643_v4  ;;  %v20655_v57 = vpack.c.bf16 %v23501_v39, %v23500_v32  ;;  %v23509_v13 = vand.u32 4294901760, %v20530_v21  ;;  %v20788_v21 = vld [vmem:[%s15236_s15 + $0x738] sm:$0xff] }
 0xb82   : > { %v8168_v40 = vadd.f32 %v12660_v30, %v7929_v29  ;;  %v20649_v18 = vpack.c.bf16 %v23498_v12, %v23497_v48  ;;  %v23503_v30 = vand.u32 4294901760, %v20495_v14  ;;  %v23504_v29 = vand.u32 4294901760, %v20500_v52  ;;  %23547 = vst [vmem:[#allocation76_spill] sm:$0xff] %v20788_v21 }
 0xb83   : > { %23502 = vst [vmem:[#allocation23_spill] sm:$0xff] %v20655_v57  ;;  %v20667_v43 = vpack.c.bf16 %v23507_v24, %v23506_v9  ;;  %v20673_v46 = vpack.c.bf16 %v9227_v34, %v23509_v13 }
 0xb84   : > { %23499 = vst [vmem:[#allocation85_spill] sm:$0xff] %v20649_v18  ;;  %v20661_v5 = vpack.c.bf16 %v23504_v29, %v23503_v30 }
 0xb85   : > { %23508 = vst [vmem:[#allocation41_spill] sm:$0xff] %v20667_v43  ;;  %23510 = vst [vmem:[#allocation19_spill] sm:$0xff] %v20673_v46  ;;  %v11314_v46 = vld [vmem:[%s15230_s0 + $0xc] sm:$0xf] }
 0xb86   : > { %23505 = vst [vmem:[#allocation27_spill] sm:$0xff] %v20661_v5 }
 0xb91   : > { %v12731_v48 = vpop.f32.mrb[98].mxu1 }
 0xb92   : > { %v12732_v12 = vpop.f32.mrb[99].mxu1 }
 0xb93   : > { %v12733_v32 = vadd.f32 %v12732_v12, %v12731_v48  ;;  %v23511_v12 = vld [vmem:[#allocation35_spill] sm:$0xff] }
 0xb94   : > { %v8756_v53 = vrot.slane %v11314_v46, %v23511_v12 }
 0xb95   : > { %v12734_v39 = vpop.f32.mrb[100].mxu1 }
 0xb96   : > { %v12735_v16 = vpop.f32.mrb[101].mxu1 }
 0xb97   : > { %v12736_v30 = vadd.f32 %v12735_v16, %v12734_v39  ;;  %v23512_v16 = vld [vmem:[#allocation36_spill] sm:$0xff] }
 0xb98   : > { %v12693_v29 = vpop.f32.mrb[90].mxu0  ;;  %v8760_v39 = vrot.slane %v11314_v46, %v23512_v16  ;;  %v23518_v16 = vld [vmem:[#allocation25_spill] sm:$0xff] }
 0xb99   : > { %v12694_v42 = vpop.f32.mrb[91].mxu0 }
 0xb9a   : > { %v12695_v10 = vadd.f32 %v12694_v42, %v12693_v29 }
 0xb9c   : > { %v8306_v5 = vadd.f32 %v12695_v10, %v8161_v23  ;;  %v12696_v57 = vpop.f32.mrb[92].mxu0 }
 0xb9d   : > { %v12697_v9 = vpop.f32.mrb[93].mxu0 }
 0xb9e   : > { %v12698_v24 = vadd.f32 %v12697_v9, %v12696_v57  ;;  %v8423_v43 = vadd.f32 %v12733_v32, %v8306_v5 }
 0xba0   : > { %v8315_v18 = vadd.f32 %v12698_v24, %v8168_v40 }
 0xba2   : > { %v8434_v4 = vadd.f32 %v12736_v30, %v8315_v18 }
 0xbb1   : > { %v12807_v27 = vpop.f32.mrb[102].mxu1 }
 0xbb2   : > { %v12808_v34 = vpop.f32.mrb[103].mxu1 }
 0xbb3   : > { %v12809_v13 = vadd.f32 %v12808_v34, %v12807_v27  ;;  %v23516_v34 = vld [vmem:[#allocation24_spill] sm:$0xff] }
 0xbb5   : > { %v12810_v47 = vpop.f32.mrb[104].mxu1 }
 0xbb6   : > { %v12811_v48 = vpop.f32.mrb[105].mxu1 }
 0xbb7   : > { %v12812_v19 = vadd.f32 %v12811_v48, %v12810_v47  ;;  %v8748_v48 = vrot.slane %v11314_v46, %v23516_v34 }
 0xbb8   : > { %v12769_v17 = vpop.f32.mrb[94].mxu0 }
 0xbb9   : > { %v8908_v42 = vpop.f32.mrb[106].mxu1  ;;  %v12770_v10 = vpop.f32.mrb[95].mxu0 }
 0xbba   : > { %v20678_v23 = vadd.f32 %v8908_v42, %v8756_v53  ;;  %v12771_v57 = vadd.f32 %v12770_v10, %v12769_v17  ;;  %v8910_v5 = vpop.f32.mrb[107].mxu1  ;;  %v8752_v42 = vrot.slane %v11314_v46, %v23518_v16  ;;  %v23519_v17 = vld [vmem:[#allocation45_spill] sm:$0xff] }
 0xbbb   : > { %v20680_v40 = vadd.f32 %v8910_v5, %v8760_v39 }
 0xbbc   : > { %23513 = vst [vmem:[#allocation53_spill] sm:$0xff] %v20678_v23  ;;  %v8602_v18 = vadd.f32 %v12771_v57, %v8423_v43  ;;  %v12772_v32 = vpop.f32.mrb[96].mxu0 }
 0xbbd   : > { %23514 = vst [vmem:[#allocation58_spill] sm:$0xff] %v20680_v40  ;;  %v8914_v27 = vpop.f32.mrb[108].mxu1  ;;  %v12773_v30 = vpop.f32.mrb[97].mxu0 }
 0xbbe   : > { %v8713_v29 = vadd.f32 %v12809_v13, %v8602_v18  ;;  %v20682_v9 = vadd.f32 %v8914_v27, %v8756_v53  ;;  %v12774_v24 = vadd.f32 %v12773_v30, %v12772_v32  ;;  %v8916_v47 = vpop.f32.mrb[109].mxu1  ;;  %v23521_v32 = vld [vmem:[#allocation22_spill] sm:$0xff] }
 0xbbf   : > { %v20685_v12 = vadd.f32 %v8916_v47, %v8760_v39 }
 0xbc0   : > { %23515 = vst [vmem:[#allocation29_spill] sm:$0xff] %v20682_v9  ;;  %v20689_v10 = vadd.f32 %v8713_v29, %v23519_v17  ;;  %v8609_v43 = vadd.f32 %v12774_v24, %v8434_v4  ;;  %v20697_v4 = vld [vmem:[%s15236_s15 + $0x790] sm:$0xff]  ;;  %v20700_v24 = vld [vmem:[%s15236_s15 + $0x798] sm:$0xff] }
 0xbc1   : > { %23517 = vst [vmem:[#allocation31_spill] sm:$0xff] %v20685_v12  ;;  %v8831_v57 = vpop.f32.mrb[98].mxu0  ;;  %23524 = vst [vmem:[#allocation28_spill] sm:$0xff] %v20697_v4  ;;  %v20705_v17 = vld [vmem:[%s15236_s15 + $0x710] sm:$0xff]  ;;  %v20748_v12 = vld [vmem:[%s15236_s15 + $0x728] sm:$0xff] }
 0xbc2   : > { %23520 = vst [vmem:[#allocation52_spill] sm:$0xff] %v20689_v10  ;;  %v8720_v5 = vadd.f32 %v12812_v19, %v8609_v43  ;;  %v8832_v53 = vadd.f32 %v8831_v57, %v8748_v48  ;;  %v8833_v13 = vpop.f32.mrb[99].mxu0  ;;  %23525 = vst [vmem:[#allocation38_spill] sm:$0xff] %v20700_v24  ;;  %v20708_v43 = vld [vmem:[%s15236_s15 + $0x718] sm:$0xff]  ;;  %v20766_v9 = vld [vmem:[%s15236_s15 + $0x7b0] sm:$0xff] }
 0xbc3   : > { %v8834_v18 = vadd.f32 %v8833_v13, %v8752_v42  ;;  %23527 = vst [vmem:[#allocation46_spill] sm:$0xff] %v20705_v17  ;;  %23528 = vst [vmem:[#allocation37_spill] sm:$0xff] %v20708_v43 }
 0xbc4   : > { %v20692_v27 = vadd.f32 %v8720_v5, %v23521_v32  ;;  %v8919_v39 = vmax.f32 %v8832_v53, 0.0  ;;  %v20714_v53 = vld [vmem:[%s15236_s15 + $0x7a0] sm:$0xff]  ;;  %v20723_v32 = vld [vmem:[%s15236_s15 + $0x7a8] sm:$0xff]  ;;  %23536 = vst [vmem:[#allocation84_spill] sm:$0xff] %v20748_v12  ;;  %23541 = vst [vmem:[#allocation50_spill] sm:$0xff] %v20766_v9 }
 0xbc5   : > { %v8920_v30 = vmax.f32 %v8834_v18, 0.0  ;;  %v8837_v47 = vpop.f32.mrb[100].mxu0  ;;  %23529 = vst [vmem:[#allocation62_spill] sm:$0xff] %v20714_v53  ;;  %23530 = vst [vmem:[#allocation55_spill] sm:$0xff] %v20723_v32 }
 0xbc6   : > { %23522 = vst [vmem:[#allocation26_spill] sm:$0xff] %v20692_v27  ;;  %v20694_v46 = vand.u32 4294901760, %v8919_v39  ;;  %v8838_v34 = vadd.f32 %v8837_v47, %v8748_v48  ;;  %v8839_v29 = vpop.f32.mrb[101].mxu0  ;;  %v20737_v27 = vld [vmem:[%s15236_s15 + $0x720] sm:$0xff] }
 0xbc7   : > { %v20702_v19 = vand.u32 4294901760, %v8920_v30  ;;  %v8840_v16 = vadd.f32 %v8839_v29, %v8752_v42  ;;  %23534 = vst [vmem:[#allocation81_spill] sm:$0xff] %v20737_v27 }
 0xbc8   : > { %23523 = vst [vmem:[#allocation30_spill] sm:$0xff] %v20694_v46  ;;  %v20711_v57 = vsub.f32 %v8919_v39, %v20694_v46  ;;  %v8923_v5 = vmax.f32 %v8838_v34, 0.0 }
 0xbc9   : > { %23526 = vst [vmem:[#allocation16_spill] sm:$0xff] %v20702_v19  ;;  %v20717_v48 = vsub.f32 %v8920_v30, %v20702_v19  ;;  %v8924_v13 = vmax.f32 %v8840_v16, 0.0  ;;  %9344 = vmatprep.mubr.f32.mxu1 %v20702_v19  ;;  %v23533_v16 = vld [vmem:[#allocation66_spill] sm:$0xff]  ;;  %v23535_v30 = vld [vmem:[#allocation61_spill] sm:$0xff]  ;;  %v23543_v19 = vand.u32 4294901760, %v20708_v43 }
 0xbca   : > { %v22220_v39 = vand.u32 4294901760, %v20711_v57  ;;  %v20726_v47 = vand.u32 4294901760, %v8923_v5  ;;  %9346 = vmatmul.mubr.f32.vlgmr.msra.gmra.mrb[110].mxu1 %v20694_v46  ;;  %v23539_v46 = vand.u32 4294901760, %v20700_v24 }
 0xbcb   : > { %v20731_v29 = vand.u32 4294901760, %v8924_v13  ;;  %14703 = vmatpush3.bf16.msra.mxu1 %v23533_v16  ;;  %v9090_v42 = vand.u32 4294901760, %v20717_v48 }
 0xbcc   : > { %23531 = vst [vmem:[#allocation72_spill] sm:$0xff] %v20726_v47  ;;  %v9097_v10 = vsub.f32 %v20711_v57, %v22220_v39  ;;  %v20743_v34 = vsub.f32 %v8923_v5, %v20726_v47  ;;  %14705 = vmatprep.subr.bf16.mxu1 %v23535_v30  ;;  %v23537_v39 = vand.u32 4294901760, %v20697_v4  ;;  %v20763_v40 = vsub.f32 %v20700_v24, %v23539_v46  ;;  %v20782_v46 = vld [vmem:[%s15236_s15 + $0x7b8] sm:$0xff]  ;;  %v20785_v24 = vld [vmem:[%s15236_s15 + $0x730] sm:$0xff] }
 0xbcd   : > { %23532 = vst [vmem:[#allocation64_spill] sm:$0xff] %v20731_v29  ;;  %v20751_v18 = vsub.f32 %v8924_v13, %v20731_v29  ;;  %9351 = vmatprep.mubr.f32.mxu1 %v20731_v29  ;;  %v9091_v23 = vsub.f32 %v20717_v48, %v9090_v42  ;;  %v23542_v29 = vand.u32 4294901760, %v20705_v17  ;;  %23545 = vst [vmem:[#allocation49_spill] sm:$0xff] %v20782_v46 }
 0xbce   : > { %v20758_v5 = vsub.f32 %v20697_v4, %v23537_v39  ;;  %23540 = vst [vmem:[#allocation86_spill] sm:$0xff] %v20763_v40  ;;  %9353 = vmatmul.mubr.f32.gmra.mrb[112].mxu1 %v20726_v47  ;;  %v20778_v39 = vsub.f32 %v20708_v43, %v23543_v19  ;;  %23546 = vst [vmem:[#allocation40_spill] sm:$0xff] %v20785_v24  ;;  %v23548_v47 = vld [vmem:[#allocation12_spill] sm:$0xff]  ;;  %v9098_v4 = vand.u32 4294901760, %v9097_v10  ;;  %v23551_v43 = vld [vmem:[#allocation34_spill] sm:$0xff]  ;;  %v23552_v30 = vand.u32 4294901760, %v20743_v34 }
 0xbcf   : > { %v20773_v56 = vsub.f32 %v20705_v17, %v23542_v29  ;;  %14707 = vmatpush3.bf16.msra.mxu1 %v23548_v47  ;;  %9604 = vmatprep.mubr.f32.mxu1 %v9090_v42  ;;  %v9092_v13 = vand.u32 4294901760, %v9091_v23  ;;  %v22237_v29 = vand.u32 4294901760, %v20751_v18  ;;  %v23549_v17 = vand.u32 4294901760, %v20714_v53 }
 0xbd0   : > { %23538 = vst [vmem:[#allocation79_spill] sm:$0xff] %v20758_v5  ;;  %23544 = vst [vmem:[#allocation48_spill] sm:$0xff] %v20778_v39  ;;  %14709 = vmatprep.subr.bf16.mxu1 %v23551_v43  ;;  %v9112_v38 = vsub.f32 %v20743_v34, %v23552_v30  ;;  %v23553_v47 = vand.u32 4294901760, %v20723_v32  ;;  %v23555_v42 = vpack.c.bf16 %v20143_v15, %v20140_v31  ;;  %v23557_v19 = vand.u32 4294901760, %v20737_v27  ;;  %v20852_v43 = vld [vmem:[%s15236_s15 + $0x748] sm:$0xff] }
 0xbd1   : > { %v20795_v45 = vsub.f32 %v20714_v53, %v23549_v17  ;;  %9093 = vmatprep.mubr.f32.mxu0 %v9092_v13  ;;  %v9106_v10 = vsub.f32 %v20751_v18, %v22237_v29  ;;  %v23556_v13 = vld [vmem:[#allocation57_spill] sm:$0xff]  ;;  %23565 = vst [vmem:[#allocation17_spill] sm:$0xff] %v20852_v43 }
 0xbd2   : > { %v20805_v23 = vsub.f32 %v20723_v32, %v23553_v47  ;;  %9099 = vmatmul.mubr.f32.vlgmr.msra.gmra.mrb[102].mxu0 %v9098_v4  ;;  %v20824_v30 = vsub.f32 %v20737_v27, %v23557_v19  ;;  %v23558_v4 = vand.u32 4294901760, %v20748_v12  ;;  %v20832_v47 = vld [vmem:[%s15236_s15 + $0x7c0] sm:$0xff]  ;;  %v20835_v32 = vld [vmem:[%s15236_s15 + $0x7c8] sm:$0xff]  ;;  %v9113_v17 = vand.u32 4294901760, %v9112_v38 }
 0xbd3   : > { %23550 = vst [vmem:[#allocation89_spill] sm:$0xff] %v20795_v45  ;;  %14671 = vmatpush3.bf16.msra.mxu0 %v23555_v42  ;;  %14711 = vmatpush3.bf16.msra.mxu1 %v23556_v13  ;;  %v9107_v29 = vand.u32 4294901760, %v9106_v10  ;;  %23559 = vst [vmem:[#allocation51_spill] sm:$0xff] %v20832_v47  ;;  %v23561_v42 = vpack.c.bf16 %v20153_v0, %v20148_v61  ;;  %v23562_v10 = vld [vmem:[#allocation59_spill] sm:$0xff]  ;;  %v20849_v13 = vld [vmem:[%s15236_s15 + $0x740] sm:$0xff]  ;;  %v23568_v19 = vand.u32 4294901760, %v20785_v24 }
 0xbd4   : > { %23554 = vst [vmem:[#allocation77_spill] sm:$0xff] %v20805_v23  ;;  %v20829_v53 = vsub.f32 %v20748_v12, %v23558_v4  ;;  %23560 = vst [vmem:[#allocation54_spill] sm:$0xff] %v20835_v32  ;;  %14713 = vmatprep.subr.bf16.mxu1 %v23562_v10  ;;  %v23563_v4 = vand.u32 4294901760, %v20766_v9  ;;  %v23566_v10 = vand.u32 4294901760, %v20782_v46  ;;  %v20873_v0 = vld [vmem:[%s15236_s15 + $0x7d0] sm:$0xff]  ;;  %v23585_v61 = vand.u32 4294901760, %v20795_v45 }
 0xbd5   : > { %14673 = vmatprep.subr.bf16.mxu0 %v23561_v42  ;;  %23564 = vst [vmem:[#allocation83_spill] sm:$0xff] %v20849_v13  ;;  %9108 = vmatprep.mubr.f32.mxu0 %v9107_v29  ;;  %v20863_v27 = vsub.f32 %v20785_v24, %v23568_v19  ;;  %23572 = vst [vmem:[#allocation88_spill] sm:$0xff] %v20873_v0  ;;  %v23575_v19 = vand.u32 4294901760, %v20763_v40  ;;  %v23580_v29 = vpack.c.bf16 %v20170_v63, %v20162_v60  ;;  %v23581_v42 = vld [vmem:[#allocation32_spill] sm:$0xff]  ;;  %v23588_v40 = vld [vmem:[#allocation13_spill] sm:$0xff] }
 0xbd6   : > { %v20846_v12 = vsub.f32 %v20766_v9, %v23563_v4  ;;  %v20858_v38 = vsub.f32 %v20782_v46, %v23566_v10  ;;  %v23570_v4 = vand.u32 4294901760, %v20788_v21  ;;  %9114 = vmatmul.mubr.f32.gmra.mrb[104].mxu0 %v9113_v17  ;;  %v20876_v10 = vld [vmem:[%s15236_s15 + $0x7d8] sm:$0xff]  ;;  %v23574_v46 = vand.u32 4294901760, %v20758_v5 }
 0xbd7   : > { %23569 = vst [vmem:[#allocation71_spill] sm:$0xff] %v20863_v27  ;;  %23573 = vst [vmem:[#allocation93_spill] sm:$0xff] %v20876_v10  ;;  %v23578_v17 = vand.u32 4294901760, %v20778_v39  ;;  %14675 = vmatpush3.bf16.msra.mxu0 %v23580_v29  ;;  %14715 = vmatpush3.bf16.msra.mxu1 %v23581_v42  ;;  %v20907_v29 = vld [vmem:[%s15236_s15 + $0x758] sm:$0xff]  ;;  %v23586_v5 = vand.u32 4294901760, %v20805_v23 }
 0xbd8   : > { %23567 = vst [vmem:[#allocation18_spill] sm:$0xff] %v20858_v38  ;;  %v20868_v9 = vsub.f32 %v20788_v21, %v23570_v4  ;;  %v20882_v24 = vpack.c.bf16 %v23575_v19, %v23574_v46  ;;  %v23577_v4 = vand.u32 4294901760, %v20773_v56  ;;  %9488 = vmatprep.mubr.f32.mxu0 %v20717_v48  ;;  %v23582_v19 = vpack.c.bf16 %v20225_v36, %v20220_v55 }
 0xbd9   : > { %23584 = vst [vmem:[#allocation39_spill] sm:$0xff] %v20907_v29  ;;  %14717 = vmatprep.subr.bf16.mxu1 %v23588_v40  ;;  %v23594_v55 = vand.u32 4294901760, %v20835_v32  ;;  %v23595_v48 = vpack.c.bf16 %v20252_v62, %v20247_v37  ;;  %v20957_v37 = vld [vmem:[%s15236_s15 + $0x7e8] sm:$0xff]  ;;  %v23599_v62 = vpack.c.bf16 %v20286_v8, %v20281_v1  ;;  %v20980_v8 = vld [vmem:[%s15236_s15 + $0x760] sm:$0xff] }
 0xbda   : > { %23571 = vst [vmem:[#allocation63_spill] sm:$0xff] %v20868_v9  ;;  %23576 = vst [vmem:[#allocation43_spill] sm:$0xff] %v20882_v24  ;;  %v20888_v21 = vpack.c.bf16 %v23578_v17, %v23577_v4  ;;  %14677 = vmatprep.subr.bf16.mxu0 %v23582_v19  ;;  %v20904_v17 = vld [vmem:[%s15236_s15 + $0x750] sm:$0xff]  ;;  %v23589_v19 = vand.u32 4294901760, %v20824_v30  ;;  %v23590_v4 = vand.u32 4294901760, %v20829_v53  ;;  %v23598_v24 = vand.u32 4294901760, %v20852_v43 }
 0xbdb   : > { %23583 = vst [vmem:[#allocation96_spill] sm:$0xff] %v20904_v17  ;;  %v20935_v36 = vsub.f32 %v20835_v32, %v23594_v55  ;;  %14679 = vmatpush3.bf16.msra.mxu0 %v23595_v48  ;;  %v20954_v32 = vld [vmem:[%s15236_s15 + $0x7e0] sm:$0xff]  ;;  %v23600_v48 = vld [vmem:[#allocation67_spill] sm:$0xff]  ;;  %v23604_v55 = vand.u32 4294901760, %v20873_v0  ;;  %23607 = vst [vmem:[#allocation78_spill] sm:$0xff] %v20980_v8 }
 0xbdc   : > { %23579 = vst [vmem:[#allocation95_spill] sm:$0xff] %v20888_v21  ;;  %v20913_v21 = vpack.c.bf16 %v23586_v5, %v23585_v61  ;;  %v20923_v46 = vpack.c.bf16 %v23590_v4, %v23589_v19  ;;  %v23592_v5 = vand.u32 4294901760, %v20832_v47  ;;  %v23596_v4 = vld [vmem:[#allocation9_spill] sm:$0xff]  ;;  %v23597_v19 = vand.u32 4294901760, %v20849_v13  ;;  %14681 = vmatprep.subr.bf16.mxu0 %v23599_v62 }
 0xbdd   : > { %14719 = vmatpush3.bf16.msra.mxu1 %v23596_v4  ;;  %v23608_v62 = vand.u32 4294901760, %v20863_v27 }
 0xbde   : > { %23587 = vst [vmem:[#allocation68_spill] sm:$0xff] %v20913_v21  ;;  %23591 = vst [vmem:[#allocation69_spill] sm:$0xff] %v20923_v46  ;;  %v20930_v21 = vsub.f32 %v20832_v47, %v23592_v5  ;;  %v20944_v61 = vsub.f32 %v20849_v13, %v23597_v19  ;;  %v20949_v5 = vsub.f32 %v20852_v43, %v23598_v24  ;;  %14721 = vmatprep.subr.bf16.mxu1 %v23600_v48 }
 0xbdf   : > { %v23601_v19 = vand.u32 4294901760, %v20846_v12  ;;  %v23602_v24 = vand.u32 4294901760, %v20858_v38  ;;  %v20972_v46 = vsub.f32 %v20873_v0, %v23604_v55  ;;  %v23605_v13 = vand.u32 4294901760, %v20876_v10  ;;  %v20993_v38 = vld [vmem:[%s15236_s15 + $0x768] sm:$0xff] }
 0xbe0   : > { %23593 = vst [vmem:[#allocation90_spill] sm:$0xff] %v20930_v21  ;;  %v23609_v47 = vand.u32 4294901760, %v20868_v9  ;;  %v23614_v55 = vand.u32 4294901760, %v20907_v29 }
 0xbe1   : > { %v20967_v43 = vpack.c.bf16 %v23602_v24, %v23601_v19  ;;  %v20977_v1 = vsub.f32 %v20876_v10, %v23605_v13  ;;  %v22263_v24 = vand.u32 4294901760, %v20930_v21  ;;  %v23611_v13 = vpack.c.bf16 %v20305_v35, %v20301_v50  ;;  %v23612_v10 = vld [vmem:[#allocation42_spill] sm:$0xff]  ;;  %v21015_v50 = vld [vmem:[%s15236_s15 + $0x7f8] sm:$0xff] }
 0xbe2   : > { %v20986_v19 = vpack.c.bf16 %v23609_v47, %v23608_v62  ;;  %14723 = vmatpush3.bf16.msra.mxu1 %v23612_v10  ;;  %v23613_v62 = vand.u32 4294901760, %v20904_v17  ;;  %v21009_v0 = vsub.f32 %v20907_v29, %v23614_v55  ;;  %v21012_v35 = vld [vmem:[%s15236_s15 + $0x7f0] sm:$0xff]  ;;  %v23616_v47 = vand.u32 4294901760, %v20935_v36 }
 0xbe3   : > { %23603 = vst [vmem:[#allocation91_spill] sm:$0xff] %v20967_v43  ;;  %23606 = vst [vmem:[#allocation70_spill] sm:$0xff] %v20977_v1  ;;  %14683 = vmatpush3.bf16.msra.mxu0 %v23611_v13  ;;  %v23615_v13 = vpack.c.bf16 %v20358_v2, %v20356_v3  ;;  %14725 = vmatprep.subr.bf16.mxu1 %v20554_v33  ;;  %v23619_v3 = vand.u32 4294901760, %v20949_v5  ;;  %v21050_v55 = vld [vmem:[%s15236_s15 + $0x770] sm:$0xff]  ;;  %v23626_v29 = vand.u32 4294901760, %v20980_v8 }
 0xbe4   : > { %23610 = vst [vmem:[#allocation65_spill] sm:$0xff] %v20986_v19  ;;  %v21004_v43 = vsub.f32 %v20904_v17, %v23613_v62  ;;  %v21026_v9 = vpack.c.bf16 %v23616_v47, %v22263_v24  ;;  %v23618_v17 = vand.u32 4294901760, %v20944_v61  ;;  %v23622_v47 = vand.u32 4294901760, %v20957_v37 }
 0xbe5   : > { %14685 = vmatprep.subr.bf16.mxu0 %v23615_v13  ;;  %v23621_v13 = vand.u32 4294901760, %v20954_v32  ;;  %v21068_v19 = vsub.f32 %v20980_v8, %v23626_v29  ;;  %v23634_v29 = vand.u32 4294901760, %v21009_v0 }
 0xbe6   : > { %23617 = vst [vmem:[#allocation82_spill] sm:$0xff] %v21026_v9  ;;  %v21035_v2 = vpack.c.bf16 %v23619_v3, %v23618_v17  ;;  %v21045_v24 = vsub.f32 %v20957_v37, %v23622_v47  ;;  %v21053_v9 = vld [vmem:[%s15236_s15 + $0x778] sm:$0xff]  ;;  %v23624_v17 = vpack.c.bf16 %v20386_v11, %v20374_v59  ;;  %14727 = vmatpush3.bf16.msra.mxu1 %v20556_v22  ;;  %v23628_v59 = vand.u32 4294901760, %v20972_v46 }
 0xbe7   : > { %v21040_v62 = vsub.f32 %v20954_v32, %v23621_v13  ;;  %v23625_v47 = vpack.c.bf16 %v20399_v20, %v20394_v41  ;;  %14729 = vmatprep.subr.bf16.mxu1 %v20562_v6  ;;  %23627 = vst [vmem:[#allocation94_spill] sm:$0xff] %v21068_v19  ;;  %v23629_v11 = vand.u32 4294901760, %v20977_v1  ;;  %v23631_v3 = vand.u32 4294901760, %v20993_v38 }
 0xbe8   : > { %23620 = vst [vmem:[#allocation87_spill] sm:$0xff] %v21035_v2  ;;  %23623 = vst [vmem:[#allocation92_spill] sm:$0xff] %v21045_v24  ;;  %14687 = vmatpush3.bf16.msra.mxu0 %v23624_v17  ;;  %v23640_v20 = vpack.c.bf16 %v20422_v54, %v20412_v49  ;;  %v23643_v49 = vand.u32 4294901760, %v21050_v55 }
 0xbe9   : > { %14689 = vmatprep.subr.bf16.mxu0 %v23625_v47  ;;  %v21074_v17 = vpack.c.bf16 %v23629_v11, %v23628_v59  ;;  %v21079_v13 = vsub.f32 %v20993_v38, %v23631_v3  ;;  %v23633_v47 = vand.u32 4294901760, %v21004_v43  ;;  %v22266_v8 = vand.u32 4294901760, %v21040_v62 }
 0xbea   : > { %v22265_v59 = vand.u32 4294901760, %v21045_v24  ;;  %v23636_v11 = vand.u32 4294901760, %v21012_v35  ;;  %v23638_v3 = vand.u32 4294901760, %v21015_v50  ;;  %14731 = vmatpush3.bf16.msra.mxu1 %v20564_v44 }
 0xbeb   : > { %23630 = vst [vmem:[#allocation10_spill] sm:$0xff] %v21074_v17  ;;  %23632 = vst [vmem:[#allocation21_spill] sm:$0xff] %v21079_v13  ;;  %v21087_v2 = vpack.c.bf16 %v23634_v29, %v23633_v47  ;;  %v23641_v47 = vpack.c.bf16 %v20477_v28, %v20472_v51  ;;  %14765 = vmatprep.subr.bf16.mxu1 %v20198_v58  ;;  %v22267_v54 = vand.u32 4294901760, %v21079_v13  ;;  %v23645_v51 = vand.u32 4294901760, %v21053_v9 }
 0xbec   : > { %v21094_v17 = vsub.f32 %v21012_v35, %v23636_v11  ;;  %v21099_v41 = vsub.f32 %v21015_v50, %v23638_v3  ;;  %14691 = vmatpush3.bf16.msra.mxu0 %v23640_v20  ;;  %v21113_v29 = vpack.c.bf16 %v22265_v59, %v22266_v8  ;;  %v22269_v11 = vand.u32 4294901760, %v21068_v19 }
 0xbed   : > { %23635 = vst [vmem:[#allocation20_spill] sm:$0xff] %v21087_v2  ;;  %14693 = vmatprep.subr.bf16.mxu0 %v23641_v47  ;;  %v21120_v20 = vsub.f32 %v21050_v55, %v23643_v49  ;;  %v21125_v58 = vsub.f32 %v21053_v9, %v23645_v51  ;;  %v23646_v28 = vand.u32 4294901760, %v20711_v57  ;;  %v23647_v59 = vpack.c.bf16 %v20500_v52, %v20495_v14  ;;  %v23652_v47 = vld [vmem:[#allocation14_spill] sm:$0xff] }
 0xbee   : > { %23637 = vst [vmem:[#allocation35_spill] sm:$0xff] %v21094_v17  ;;  %23639 = vst [vmem:[#allocation36_spill] sm:$0xff] %v21099_v41  ;;  %v22268_v3 = vand.u32 4294901760, %v21094_v17  ;;  %v23648_v49 = vand.u32 4294901760, %v20751_v18  ;;  %v21140_v51 = vpack.c.bf16 %v22267_v54, %v22269_v11  ;;  %v23651_v8 = vand.u32 4294901760, %v20135_v26  ;;  %v23656_v54 = vld [vmem:[#allocation61_spill] sm:$0xff] }
 0xbef   : > { %23642 = vst [vmem:[#allocation24_spill] sm:$0xff] %v21113_v29  ;;  %23644 = vst [vmem:[#allocation25_spill] sm:$0xff] %v21120_v20  ;;  %9608 = vmatmul.mubr.f32.vlgmr.msra.gmra.mrb[114].mxu1 %v23646_v28  ;;  %v23650_v28 = vpack.c.bf16 %v20523_v7, %v20504_v25  ;;  %v23653_v14 = vand.u32 4294901760, %v23652_v47  ;;  %v22273_v25 = vand.u32 4294901760, %v21120_v20  ;;  %v22272_v7 = vand.u32 4294901760, %v21125_v58  ;;  %v23658_v47 = vld [vmem:[#allocation47_spill] sm:$0xff] }
 0xbf0   : > { %14695 = vmatpush3.bf16.msra.mxu0 %v23647_v59  ;;  %9615 = vmatprep.mubr.f32.mxu1 %v23648_v49  ;;  %23649 = vst [vmem:[#allocation45_spill] sm:$0xff] %v21140_v51  ;;  %v23654_v59 = vand.u32 4294901760, %v21099_v41  ;;  %v23657_v26 = vand.u32 4294901760, %v20743_v34  ;;  %v23666_v51 = vld [vmem:[#allocation33_spill] sm:$0xff] }
 0xbf1   : > { %14767 = vmatpush3.bf16.msra.mxu1 %v23533_v16  ;;  %14697 = vmatprep.subr.bf16.mxu0 %v23650_v28  ;;  %v14732_v52 = vpack.c.bf16 %v23653_v14, %v23651_v8  ;;  %v21158_v16 = vld [vmem:[%s15236_s15 + $0x780] sm:$0xff]  ;;  %v21165_v8 = vld [vmem:[%s15236_s15 + $0x788] sm:$0xff]  ;;  %v23667_v29 = vand.u32 4294901760, %v23666_v51  ;;  %v23671_v51 = vand.u32 4294901760, %v20162_v60 }
 0xbf2   : > { %v21154_v49 = vpack.c.bf16 %v23654_v59, %v22268_v3  ;;  %14769 = vmatprep.subr.bf16.mxu1 %v23656_v54  ;;  %v23659_v28 = vld [vmem:[#allocation44_spill] sm:$0xff]  ;;  %v23662_v3 = vand.u32 4294901760, %v20140_v31  ;;  %v23663_v54 = vand.u32 4294901760, %v20143_v15  ;;  %v22279_v2 = vand.u32 4294901760, %v21158_v16  ;;  %v21191_v15 = vld [vmem:[%s15236_s15 + $0x708] sm:$0xff] }
 0xbf3   : > { %9619 = vmatmul.mubr.f32.gmra.mrb[116].mxu1 %v23657_v26  ;;  %v23660_v14 = vpack.c.bf16 %v23658_v47, %v23659_v28  ;;  %v23661_v59 = vld [vmem:[#allocation16_spill] sm:$0xff] }
 0xbf4   : > { %23655 = vst [vmem:[#allocation22_spill] sm:$0xff] %v21154_v49  ;;  %9896 = vmatprep.mubr.f32.mxu1 %v23661_v59  ;;  %v14734_v11 = vpack.c.bf16 %v23663_v54, %v23662_v3  ;;  %v21179_v49 = vpack.c.bf16 %v22272_v7, %v22273_v25  ;;  %v23665_v26 = vld [vmem:[#allocation12_spill] sm:$0xff]  ;;  %v23670_v3 = vld [vmem:[#allocation34_spill] sm:$0xff]  ;;  %v22278_v54 = vand.u32 4294901760, %v21165_v8 }
 0xbf5   : > { %14699 = vmatpush3.bf16.msra.mxu0 %v23660_v14  ;;  %14771 = vmatpush3.bf16.msra.mxu1 %v23665_v26  ;;  %v23668_v47 = vld [vmem:[#allocation56_spill] sm:$0xff]  ;;  %v23683_v25 = vld [vmem:[#allocation86_spill] sm:$0xff] }
 0xbf6   : > { %23664 = vst [vmem:[#allocation66_spill] sm:$0xff] %v21179_v49  ;;  %14733 = vmatprep.subr.bf16.mxu0 %v14732_v52  ;;  %v23669_v28 = vand.u32 4294901760, %v23668_v47  ;;  %v21188_v31 = vld [vmem:[%s15236_s15 + $0x700] sm:$0xff]  ;;  %14773 = vmatprep.subr.bf16.mxu1 %v23670_v3  ;;  %v23672_v52 = vand.u32 4294901760, %v20170_v63  ;;  %v22275_v47 = vand.u32 4294901760, %v21191_v15  ;;  %v21207_v3 = vsub.f32 %v21158_v16, %v22279_v2 }
 0xbf7   : > { %v22276_v26 = vand.u32 4294901760, %v21188_v31  ;;  %v21213_v60 = vsub.f32 %v21165_v8, %v22278_v54 }
 0xbf8   : > { %v14736_v14 = vpack.c.bf16 %v23669_v28, %v23667_v29  ;;  %9491 = vmatmul.mubr.f32.vlgmr.msra.gmra.mrb[106].mxu0 %v20711_v57  ;;  %v14738_v29 = vpack.c.bf16 %v23672_v52, %v23671_v51  ;;  %v23673_v28 = vld [vmem:[#allocation57_spill] sm:$0xff]  ;;  %v23674_v57 = vld [vmem:[#allocation59_spill] sm:$0xff] }
 0xbf9   : > { %9497 = vmatprep.mubr.f32.mxu0 %v20751_v18  ;;  %14735 = vmatpush3.bf16.msra.mxu0 %v14734_v11  ;;  %v21220_v63 = vsub.f32 %v21188_v31, %v22276_v26  ;;  %v21225_v18 = vsub.f32 %v21191_v15, %v22275_v47  ;;  %v23675_v11 = vld [vmem:[#allocation11_spill] sm:$0xff] }
 0xbfa   : > { %14775 = vmatpush3.bf16.msra.mxu1 %v23673_v28  ;;  %14737 = vmatprep.subr.bf16.mxu0 %v14736_v14  ;;  %v22271_v14 = vand.u32 4294901760, %v21207_v3  ;;  %v23678_v28 = vld [vmem:[#allocation74_spill] sm:$0xff]  ;;  %v23685_v26 = vld [vmem:[#allocation15_spill] sm:$0xff] }
 0xbfb   : > { %14777 = vmatprep.subr.bf16.mxu1 %v23674_v57  ;;  %v22274_v51 = vand.u32 4294901760, %v21220_v63  ;;  %v22277_v52 = vand.u32 4294901760, %v21225_v18 }
 0xbfc   : > { %9500 = vmatmul.mubr.f32.gmra.mrb[108].mxu0 %v20743_v34  ;;  %v22270_v34 = vand.u32 4294901760, %v21213_v60 }
 0xbfd   : > { %14739 = vmatpush3.bf16.msra.mxu0 %v14738_v29  ;;  %9785 = vmatprep.mubr.f32.mxu0 %v23661_v59  ;;  %v23676_v59 = vld [vmem:[#allocation73_spill] sm:$0xff]  ;;  %v23677_v29 = vld [vmem:[#allocation60_spill] sm:$0xff]  ;;  %v10041_v57 = vsub.f32 %v21220_v63, %v22274_v51  ;;  %v23684_v51 = vand.u32 4294901760, %v23683_v25 }
 0xbfe   : > { %14779 = vmatpush3.bf16.msra.mxu1 %v23581_v42  ;;  %14741 = vmatprep.subr.bf16.mxu0 %v23675_v11  ;;  %v10153_v42 = vsub.f32 %v21207_v3, %v22271_v14  ;;  %v23679_v11 = vld [vmem:[#allocation80_spill] sm:$0xff]  ;;  %v23681_v14 = vld [vmem:[#allocation79_spill] sm:$0xff] }
 0xbff   : > { %14781 = vmatprep.subr.bf16.mxu1 %v23588_v40  ;;  %v10160_v40 = vsub.f32 %v21213_v60, %v22270_v34  ;;  %v10174_v47 = vsub.f32 %v23683_v25, %v23684_v51 }
 0xc01   : > { %14743 = vmatpush3.bf16.msra.mxu0 %v23676_v59  ;;  %v10154_v59 = vand.u32 4294901760, %v10153_v42  ;;  %v10161_v34 = vand.u32 4294901760, %v10160_v40  ;;  %v23688_v40 = vld [vmem:[#allocation75_spill] sm:$0xff]  ;;  %v10175_v2 = vand.u32 4294901760, %v10174_v47  ;;  %v23696_v47 = vand.u32 4294901760, %v20846_v12 }
 0xc02   : > { %14783 = vmatpush3.bf16.msra.mxu1 %v23596_v4  ;;  %14745 = vmatprep.subr.bf16.mxu0 %v23677_v29  ;;  %v10048_v4 = vsub.f32 %v21225_v18, %v22277_v52  ;;  %v10042_v52 = vand.u32 4294901760, %v10041_v57 }
 0xc03   : > { %14785 = vmatprep.subr.bf16.mxu1 %v23600_v48  ;;  %v23680_v48 = vld [vmem:[#allocation58_spill] sm:$0xff] }
 0xc04   : > { %v8922_v29 = vmax.f32 %v23680_v48, 0.0  ;;  %v23687_v48 = vand.u32 4294901760, %v20778_v39 }
 0xc05   : > { %14747 = vmatpush3.bf16.msra.mxu0 %v23678_v28  ;;  %v23682_v28 = vand.u32 4294901760, %v23681_v14 }
 0xc06   : > { %14787 = vmatpush3.bf16.msra.mxu1 %v23612_v10  ;;  %14749 = vmatprep.subr.bf16.mxu0 %v23679_v11  ;;  %v10049_v10 = vand.u32 4294901760, %v10048_v4  ;;  %v23686_v11 = vand.u32 4294901760, %v20773_v56  ;;  %v21276_v4 = vand.u32 4294901760, %v8922_v29 }
 0xc07   : > { %14789 = vmatprep.subr.bf16.mxu1 %v20554_v33  ;;  %v10167_v7 = vsub.f32 %v23681_v14, %v23682_v28  ;;  %v10062_v33 = vsub.f32 %v20778_v39, %v23687_v48  ;;  %v23689_v28 = vand.u32 4294901760, %v20795_v45  ;;  %v23692_v48 = vld [vmem:[#allocation85_spill] sm:$0xff]  ;;  %v23693_v39 = vand.u32 4294901760, %v20824_v30 }
 0xc08   : > { %v10055_v42 = vsub.f32 %v20773_v56, %v23686_v11  ;;  %23691 = vst [vmem:[#allocation32_spill] sm:$0xff] %v21276_v4  ;;  %v14828_v11 = vpack.c.bf16 %v10161_v34, %v10154_v59  ;;  %v10195_v34 = vsub.f32 %v20846_v12, %v23696_v47  ;;  %v23706_v47 = vld [vmem:[#allocation64_spill] sm:$0xff] }
 0xc09   : > { %14751 = vmatpush3.bf16.msra.mxu0 %v23685_v26  ;;  %v10181_v51 = vsub.f32 %v20795_v45, %v23689_v28  ;;  %v23690_v26 = vand.u32 4294901760, %v20805_v23  ;;  %v10168_v54 = vand.u32 4294901760, %v10167_v7  ;;  %v10069_v28 = vsub.f32 %v20824_v30, %v23693_v39  ;;  %v23694_v45 = vld [vmem:[#allocation23_spill] sm:$0xff]  ;;  %v23697_v39 = vld [vmem:[#allocation18_spill] sm:$0xff] }
 0xc0a   : > { %14791 = vmatpush3.bf16.msra.mxu1 %v20556_v22  ;;  %14753 = vmatprep.subr.bf16.mxu0 %v23688_v40  ;;  %v14830_v22 = vpack.c.bf16 %v10049_v10, %v10042_v52  ;;  %v10056_v49 = vand.u32 4294901760, %v10055_v42  ;;  %v10063_v40 = vand.u32 4294901760, %v10062_v33  ;;  %v21292_v52 = vsub.f32 %v8922_v29, %v21276_v4 }
 0xc0b   : > { %v10188_v57 = vsub.f32 %v20805_v23, %v23690_v26  ;;  %14793 = vmatprep.subr.bf16.mxu1 %v20562_v6  ;;  %v10182_v26 = vand.u32 4294901760, %v10181_v51  ;;  %v23695_v6 = vand.u32 4294901760, %v20829_v53  ;;  %v14832_v59 = vpack.c.bf16 %v10175_v2, %v10168_v54  ;;  %v23701_v51 = vld [vmem:[#allocation30_spill] sm:$0xff]  ;;  %v23704_v2 = vld [vmem:[#allocation63_spill] sm:$0xff] }
 0xc0c   : > { %v23698_v10 = vand.u32 4294901760, %v23697_v39  ;;  %v23700_v42 = vand.u32 4294901760, %v21165_v8  ;;  %v23703_v29 = vand.u32 4294901760, %v20863_v27  ;;  %v23705_v54 = vand.u32 4294901760, %v23704_v2 }
 0xc0d   : > { %14755 = vmatpush3.bf16.msra.mxu0 %v23692_v48  ;;  %v10189_v23 = vand.u32 4294901760, %v10188_v57  ;;  %v10076_v7 = vsub.f32 %v20829_v53, %v23695_v6  ;;  %v23702_v57 = vld [vmem:[#allocation27_spill] sm:$0xff]  ;;  %v14834_v48 = vpack.c.bf16 %v10063_v40, %v10056_v49  ;;  %v10070_v8 = vand.u32 4294901760, %v10069_v28 }
 0xc0e   : > { %14795 = vmatpush3.bf16.msra.mxu1 %v20564_v44  ;;  %14757 = vmatprep.subr.bf16.mxu0 %v23694_v45  ;;  %v10202_v44 = vsub.f32 %v23697_v39, %v23698_v10  ;;  %v23699_v45 = vand.u32 4294901760, %v21158_v16  ;;  %v10090_v6 = vsub.f32 %v23704_v2, %v23705_v54  ;;  %v23708_v40 = vand.u32 4294901760, %v20930_v21  ;;  %v23717_v49 = vld [vmem:[#allocation19_spill] sm:$0xff] }
 0xc0f   : > { %14829 = vmatprep.subr.bf16.mxu1 %v14828_v11  ;;  %v10083_v11 = vsub.f32 %v20863_v27, %v23703_v29  ;;  %v14836_v16 = vpack.c.bf16 %v10189_v23, %v10182_v26  ;;  %v10077_v10 = vand.u32 4294901760, %v10076_v7  ;;  %v23709_v27 = vand.u32 4294901760, %v20935_v36  ;;  %v23712_v26 = vld [vmem:[#allocation28_spill] sm:$0xff] }
 0xc10   : > { %v21301_v33 = vpack.c.bf16 %v23700_v42, %v23699_v45  ;;  %v10196_v45 = vand.u32 4294901760, %v10195_v34  ;;  %v23707_v42 = vld [vmem:[#allocation41_spill] sm:$0xff]  ;;  %v10209_v29 = vsub.f32 %v20930_v21, %v23708_v40  ;;  %v23711_v23 = vand.u32 4294901760, %v21191_v15  ;;  %v23714_v34 = vld [vmem:[#allocation38_spill] sm:$0xff] }
 0xc11   : > { %9898 = vmatmul.mubr.f32.vlgmr.msra.gmra.mrb[118].mxu1 %v23701_v51  ;;  %14759 = vmatpush3.bf16.msra.mxu0 %v23702_v57  ;;  %v10203_v57 = vand.u32 4294901760, %v10202_v44  ;;  %v10216_v54 = vsub.f32 %v20935_v36, %v23709_v27  ;;  %v23713_v7 = vand.u32 4294901760, %v23712_v26  ;;  %v10084_v40 = vand.u32 4294901760, %v10083_v11 }
 0xc12   : > { %9903 = vmatprep.mubr.f32.mxu1 %v23706_v47  ;;  %14831 = vmatpush3.bf16.msra.mxu1 %v14830_v22  ;;  %v23710_v22 = vand.u32 4294901760, %v21188_v31  ;;  %v10091_v21 = vand.u32 4294901760, %v10090_v6  ;;  %v23718_v27 = vand.u32 4294901760, %v20944_v61  ;;  %v23719_v15 = vand.u32 4294901760, %v20949_v5 }
 0xc13   : > { %14761 = vmatprep.subr.bf16.mxu0 %v23707_v42  ;;  %14833 = vmatprep.subr.bf16.mxu1 %v14832_v59  ;;  %v23715_v59 = vand.u32 4294901760, %v23714_v34  ;;  %v23716_v42 = vld [vmem:[#allocation72_spill] sm:$0xff]  ;;  %v23720_v26 = vand.u32 4294901760, %v20972_v46  ;;  %v14840_v6 = vpack.c.bf16 %v10203_v57, %v10196_v45  ;;  %v23722_v34 = vand.u32 4294901760, %v21292_v52  ;;  %v23727_v45 = vld [vmem:[#allocation62_spill] sm:$0xff] }
 0xc14   : > { %v21324_v28 = vpack.c.bf16 %v23711_v23, %v23710_v22  ;;  %v10097_v31 = vsub.f32 %v20944_v61, %v23718_v27  ;;  %v10104_v22 = vsub.f32 %v20949_v5, %v23719_v15  ;;  %v14838_v23 = vpack.c.bf16 %v10077_v10, %v10070_v8  ;;  %v23723_v8 = vld [vmem:[#allocation46_spill] sm:$0xff]  ;;  %v23725_v15 = vld [vmem:[#allocation37_spill] sm:$0xff] }
 0xc15   : > { %v21330_v44 = vpack.c.bf16 %v23715_v59, %v23713_v7  ;;  %9905 = vmatmul.mubr.f32.gmra.mrb[120].mxu1 %v23716_v42  ;;  %14763 = vmatpush3.bf16.msra.mxu0 %v23717_v49  ;;  %v10223_v7 = vsub.f32 %v20972_v46, %v23720_v26  ;;  %v23721_v49 = vand.u32 4294901760, %v20977_v1  ;;  %v10009_v59 = vsub.f32 %v21292_v52, %v23722_v34 }
 0xc16   : > { %14835 = vmatpush3.bf16.msra.mxu1 %v14834_v48  ;;  %10262 = vmatprep.mubr.f32.mxu1 %v21276_v4  ;;  %v10210_v48 = vand.u32 4294901760, %v10209_v29  ;;  %v10217_v27 = vand.u32 4294901760, %v10216_v54  ;;  %v23724_v10 = vand.u32 4294901760, %v23723_v8  ;;  %v23726_v26 = vand.u32 4294901760, %v23725_v15 }
 0xc17   : > { %v10230_v11 = vsub.f32 %v20977_v1, %v23721_v49  ;;  %14797 = vmatprep.subr.bf16.mxu0 %v21301_v33  ;;  %14837 = vmatprep.subr.bf16.mxu1 %v14836_v16  ;;  %v14842_v16 = vpack.c.bf16 %v10091_v21, %v10084_v40  ;;  %v23728_v57 = vand.u32 4294901760, %v23727_v45  ;;  %v23729_v49 = vld [vmem:[#allocation55_spill] sm:$0xff]  ;;  %v10098_v29 = vand.u32 4294901760, %v10097_v31  ;;  %v23737_v45 = vld [vmem:[#allocation84_spill] sm:$0xff] }
 0xc18   : > { %9787 = vmatmul.mubr.f32.vlgmr.msra.gmra.mrb[110].mxu0 %v23701_v51  ;;  %v21356_v4 = vpack.c.bf16 %v23726_v26, %v23724_v10  ;;  %v23730_v1 = vand.u32 4294901760, %v23729_v49  ;;  %v10105_v54 = vand.u32 4294901760, %v10104_v22  ;;  %v10224_v51 = vand.u32 4294901760, %v10223_v7  ;;  %v23735_v7 = vld [vmem:[#allocation81_spill] sm:$0xff] }
 0xc19   : > { %9792 = vmatprep.mubr.f32.mxu0 %v23706_v47  ;;  %14799 = vmatpush3.bf16.msra.mxu0 %v21324_v28  ;;  %v10231_v8 = vand.u32 4294901760, %v10230_v11  ;;  %v23731_v10 = vand.u32 4294901760, %v21004_v43  ;;  %v23732_v15 = vand.u32 4294901760, %v21009_v0  ;;  %v10010_v40 = vand.u32 4294901760, %v10009_v59 }
 0xc1a   : > { %v21364_v34 = vpack.c.bf16 %v23730_v1, %v23728_v57  ;;  %14839 = vmatpush3.bf16.msra.mxu1 %v14838_v23  ;;  %14801 = vmatprep.subr.bf16.mxu0 %v21330_v44  ;;  %v14844_v26 = vpack.c.bf16 %v10217_v27, %v10210_v48  ;;  %v23733_v1 = vand.u32 4294901760, %v21040_v62  ;;  %v23734_v22 = vand.u32 4294901760, %v21045_v24  ;;  %v23741_v48 = vld [vmem:[#allocation49_spill] sm:$0xff] }
 0xc1b   : > { %v10111_v47 = vsub.f32 %v21004_v43, %v23731_v10  ;;  %v10118_v21 = vsub.f32 %v21009_v0, %v23732_v15  ;;  %14841 = vmatprep.subr.bf16.mxu1 %v14840_v6  ;;  %v23736_v11 = vand.u32 4294901760, %v23735_v7  ;;  %v23738_v57 = vand.u32 4294901760, %v23737_v45  ;;  %v23739_v6 = vld [vmem:[#allocation50_spill] sm:$0xff] }
 0xc1c   : > { %v10237_v31 = vsub.f32 %v21040_v62, %v23733_v1  ;;  %v10244_v23 = vsub.f32 %v21045_v24, %v23734_v22  ;;  %9794 = vmatmul.mubr.f32.gmra.mrb[112].mxu0 %v23716_v42  ;;  %v23740_v59 = vand.u32 4294901760, %v23739_v6  ;;  %v23742_v27 = vand.u32 4294901760, %v23741_v48 }
 0xc1d   : > { %v21384_v49 = vpack.c.bf16 %v23738_v57, %v23736_v11  ;;  %14803 = vmatpush3.bf16.msra.mxu0 %v21356_v4  ;;  %10011 = vmatprep.mubr.f32.mxu0 %v10010_v40  ;;  %v23743_v15 = vand.u32 4294901760, %v21068_v19  ;;  %v23744_v42 = vand.u32 4294901760, %v21079_v13  ;;  %v14846_v7 = vpack.c.bf16 %v10105_v54, %v10098_v29 }
 0xc1e   : > { %v21391_v10 = vpack.c.bf16 %v23742_v27, %v23740_v59  ;;  %14843 = vmatpush3.bf16.msra.mxu1 %v14842_v16  ;;  %14805 = vmatprep.subr.bf16.mxu0 %v21364_v34  ;;  %v14848_v11 = vpack.c.bf16 %v10231_v8, %v10224_v51  ;;  %v10112_v40 = vand.u32 4294901760, %v10111_v47  ;;  %v10119_v45 = vand.u32 4294901760, %v10118_v21  ;;  %v23747_v16 = vld [vmem:[#allocation40_spill] sm:$0xff]  ;;  %v23751_v51 = vld [vmem:[#allocation51_spill] sm:$0xff]  ;;  %v23753_v47 = vld [vmem:[#allocation54_spill] sm:$0xff] }
 0xc1f   : > { %v10125_v1 = vsub.f32 %v21068_v19, %v23743_v15  ;;  %v10132_v22 = vsub.f32 %v21079_v13, %v23744_v42  ;;  %14845 = vmatprep.subr.bf16.mxu1 %v14844_v26  ;;  %v10238_v57 = vand.u32 4294901760, %v10237_v31  ;;  %v10245_v6 = vand.u32 4294901760, %v10244_v23  ;;  %v23749_v13 = vld [vmem:[#allocation76_spill] sm:$0xff]  ;;  %v23765_v19 = vld [vmem:[#allocation93_spill] sm:$0xff] }
 0xc20   : > { %v23745_v59 = vand.u32 4294901760, %v21094_v17  ;;  %v23746_v27 = vand.u32 4294901760, %v21099_v41  ;;  %v23748_v42 = vand.u32 4294901760, %v23747_v16  ;;  %v23750_v29 = vand.u32 4294901760, %v23749_v13 }
 0xc21   : > { %14807 = vmatpush3.bf16.msra.mxu0 %v21384_v49  ;;  %v23752_v8 = vand.u32 4294901760, %v23751_v51  ;;  %v23754_v21 = vand.u32 4294901760, %v23753_v47  ;;  %v10126_v31 = vand.u32 4294901760, %v10125_v1  ;;  %v10133_v23 = vand.u32 4294901760, %v10132_v22  ;;  %v23758_v51 = vld [vmem:[#allocation31_spill] sm:$0xff] }
 0xc22   : > { %v10251_v48 = vsub.f32 %v21094_v17, %v23745_v59  ;;  %v10258_v15 = vsub.f32 %v21099_v41, %v23746_v27  ;;  %v21411_v54 = vpack.c.bf16 %v23750_v29, %v23748_v42  ;;  %v23755_v59 = vld [vmem:[#allocation53_spill] sm:$0xff]  ;;  %14847 = vmatpush3.bf16.msra.mxu1 %v14846_v7  ;;  %14809 = vmatprep.subr.bf16.mxu0 %v21391_v10  ;;  %v23756_v16 = vand.u32 4294901760, %v21120_v20  ;;  %v23759_v7 = vld [vmem:[#allocation83_spill] sm:$0xff] }
 0xc23   : > { %v21417_v26 = vpack.c.bf16 %v23754_v21, %v23752_v8  ;;  %v8921_v17 = vmax.f32 %v23755_v59, 0.0  ;;  %v14850_v27 = vpack.c.bf16 %v10119_v45, %v10112_v40  ;;  %v23757_v42 = vand.u32 4294901760, %v21125_v58  ;;  %14849 = vmatprep.subr.bf16.mxu1 %v14848_v11  ;;  %v23761_v59 = vld [vmem:[#allocation17_spill] sm:$0xff] }
 0xc24   : > { %v10139_v13 = vsub.f32 %v21120_v20, %v23756_v16  ;;  %v8926_v47 = vmax.f32 %v23758_v51, 0.0  ;;  %v14852_v8 = vpack.c.bf16 %v10245_v6, %v10238_v57  ;;  %v10252_v1 = vand.u32 4294901760, %v10251_v48  ;;  %v23763_v16 = vld [vmem:[#allocation88_spill] sm:$0xff]  ;;  %v23767_v11 = vld [vmem:[#allocation29_spill] sm:$0xff] }
 0xc25   : > { %v10146_v29 = vsub.f32 %v21125_v58, %v23757_v42  ;;  %v10259_v22 = vand.u32 4294901760, %v10258_v15  ;;  %14811 = vmatpush3.bf16.msra.mxu0 %v21411_v54  ;;  %v23760_v21 = vand.u32 4294901760, %v23759_v7  ;;  %v23762_v40 = vand.u32 4294901760, %v23761_v59 }
 0xc26   : > { %v14854_v41 = vpack.c.bf16 %v10133_v23, %v10126_v31  ;;  %v23764_v20 = vand.u32 4294901760, %v23763_v16  ;;  %v23766_v24 = vand.u32 4294901760, %v23765_v19  ;;  %v21441_v51 = vand.u32 4294901760, %v8921_v17  ;;  %14851 = vmatpush3.bf16.msra.mxu1 %v14850_v27  ;;  %14813 = vmatprep.subr.bf16.mxu0 %v21417_v26  ;;  %v23768_v31 = vld [vmem:[#allocation96_spill] sm:$0xff]  ;;  %v23770_v19 = vld [vmem:[#allocation39_spill] sm:$0xff] }
 0xc27   : > { %v21433_v45 = vpack.c.bf16 %v23762_v40, %v23760_v21  ;;  %v8925_v57 = vmax.f32 %v23767_v11, 0.0  ;;  %v10140_v6 = vand.u32 4294901760, %v10139_v13  ;;  %v10147_v48 = vand.u32 4294901760, %v10146_v29  ;;  %14853 = vmatprep.subr.bf16.mxu1 %v14852_v8 }
 0xc28   : > { %v21439_v42 = vpack.c.bf16 %v23766_v24, %v23764_v20  ;;  %v21445_v15 = vand.u32 4294901760, %v8926_v47  ;;  %v14856_v7 = vpack.c.bf16 %v10259_v22, %v10252_v1  ;;  %v23769_v23 = vand.u32 4294901760, %v23768_v31 }
 0xc29   : > { %14815 = vmatpush3.bf16.msra.mxu0 %v21433_v45  ;;  %v23771_v24 = vand.u32 4294901760, %v23770_v19  ;;  %v21455_v21 = vsub.f32 %v8921_v17, %v21441_v51  ;;  %v21457_v27 = vand.u32 4294901760, %v8925_v57  ;;  %v14858_v13 = vpack.c.bf16 %v10147_v48, %v10140_v6  ;;  %v23774_v17 = vld [vmem:[#allocation78_spill] sm:$0xff] }
 0xc2a   : > { %14855 = vmatpush3.bf16.msra.mxu1 %v14854_v41  ;;  %14817 = vmatprep.subr.bf16.mxu0 %v21439_v42  ;;  %v23772_v29 = vand.u32 4294901760, %v20954_v32  ;;  %v23773_v8 = vand.u32 4294901760, %v20957_v37  ;;  %v21467_v22 = vsub.f32 %v8926_v47, %v21445_v15  ;;  %v23775_v59 = vand.u32 4294901760, %v23774_v17 }
 0xc2b   : > { %v21452_v20 = vpack.c.bf16 %v23771_v24, %v23769_v23  ;;  %14857 = vmatprep.subr.bf16.mxu1 %v14856_v7  ;;  %v23776_v40 = vand.u32 4294901760, %v20993_v38  ;;  %v10014_v16 = vand.u32 4294901760, %v21455_v21  ;;  %v21478_v32 = vsub.f32 %v8925_v57, %v21457_v27 }
 0xc2c   : > { %v21464_v1 = vpack.c.bf16 %v23773_v8, %v23772_v29  ;;  %v23777_v37 = vand.u32 4294901760, %v21012_v35  ;;  %v23778_v47 = vand.u32 4294901760, %v21015_v50  ;;  %v10023_v38 = vand.u32 4294901760, %v21467_v22  ;;  %v23782_v29 = vld [vmem:[#allocation48_spill] sm:$0xff] }
 0xc2d   : > { %14819 = vmatpush3.bf16.msra.mxu0 %v21452_v20  ;;  %v21474_v41 = vpack.c.bf16 %v23776_v40, %v23775_v59  ;;  %v23779_v57 = vand.u32 4294901760, %v21050_v55  ;;  %v23780_v6 = vand.u32 4294901760, %v21053_v9  ;;  %v10015_v35 = vsub.f32 %v21455_v21, %v10014_v16  ;;  %v23783_v59 = vld [vmem:[#allocation89_spill] sm:$0xff] }
 0xc2e   : > { %14859 = vmatpush3.bf16.msra.mxu1 %v14858_v13  ;;  %14821 = vmatprep.subr.bf16.mxu0 %v21464_v1  ;;  %v21486_v11 = vpack.c.bf16 %v23778_v47, %v23777_v37  ;;  %v10029_v50 = vand.u32 4294901760, %v21478_v32  ;;  %v14860_v55 = vpack.c.bf16 %v21213_v60, %v21207_v3  ;;  %v10024_v9 = vsub.f32 %v21467_v22, %v10023_v38  ;;  %v23784_v40 = vld [vmem:[#allocation77_spill] sm:$0xff] }
 0xc2f   : > { %14893 = vmatprep.subr.bf16.mxu1 %v21301_v33  ;;  %v21495_v48 = vpack.c.bf16 %v23780_v6, %v23779_v57  ;;  %v14862_v7 = vpack.c.bf16 %v21225_v18, %v21220_v63  ;;  %v10016_v31 = vand.u32 4294901760, %v10015_v35  ;;  %v23781_v23 = vand.u32 4294901760, %v21292_v52  ;;  %v23786_v57 = vld [vmem:[#allocation90_spill] sm:$0xff]  ;;  %v23792_v35 = vld [vmem:[#allocation36_spill] sm:$0xff] }
 0xc30   : > { %v10030_v19 = vsub.f32 %v21478_v32, %v10029_v50  ;;  %v14864_v24 = vpack.c.bf16 %v23683_v25, %v23681_v14  ;;  %v10025_v13 = vand.u32 4294901760, %v10024_v9  ;;  %v14866_v8 = vpack.c.bf16 %v23782_v29, %v20773_v56  ;;  %v23785_v14 = vld [vmem:[#allocation71_spill] sm:$0xff] }
 0xc31   : > { %10264 = vmatmul.mubr.f32.vlgmr.msra.gmra.mrb[122].mxu1 %v21441_v51  ;;  %14823 = vmatpush3.bf16.msra.mxu0 %v21474_v41  ;;  %v14868_v37 = vpack.c.bf16 %v23784_v40, %v23783_v59  ;;  %v14870_v25 = vpack.c.bf16 %v20829_v53, %v20824_v30  ;;  %v14872_v56 = vpack.c.bf16 %v23697_v39, %v20846_v12  ;;  %v23787_v12 = vld [vmem:[#allocation70_spill] sm:$0xff] }
 0xc32   : > { %10269 = vmatprep.mubr.f32.mxu1 %v21445_v15  ;;  %14895 = vmatpush3.bf16.msra.mxu1 %v21324_v28  ;;  %v10031_v17 = vand.u32 4294901760, %v10030_v19  ;;  %v14874_v47 = vpack.c.bf16 %v23704_v2, %v23785_v14  ;;  %v14878_v53 = vpack.c.bf16 %v20949_v5, %v20944_v61  ;;  %v14880_v30 = vpack.c.bf16 %v23787_v12, %v20972_v46  ;;  %v23789_v61 = vld [vmem:[#allocation94_spill] sm:$0xff]  ;;  %v23790_v5 = vld [vmem:[#allocation21_spill] sm:$0xff]  ;;  %v23791_v46 = vld [vmem:[#allocation35_spill] sm:$0xff] }
 0xc33   : > { %14825 = vmatprep.subr.bf16.mxu0 %v21486_v11  ;;  %14897 = vmatprep.subr.bf16.mxu1 %v21330_v44  ;;  %v14882_v39 = vpack.c.bf16 %v21009_v0, %v21004_v43  ;;  %v14886_v6 = vpack.c.bf16 %v23790_v5, %v23789_v61  ;;  %v14888_v0 = vpack.c.bf16 %v23792_v35, %v23791_v46  ;;  %v23793_v43 = vld [vmem:[#allocation25_spill] sm:$0xff] }
 0xc35   : > { %10271 = vmatmul.mubr.f32.gmra.mrb[124].mxu1 %v21457_v27  ;;  %14827 = vmatpush3.bf16.msra.mxu0 %v21495_v48 }
 0xc36   : > { %14899 = vmatpush3.bf16.msra.mxu1 %v21356_v4  ;;  %10522 = vmatprep.mubr.f32.mxu1 %v23781_v23 }
 0xc37   : > { %14861 = vmatprep.subr.bf16.mxu0 %v14860_v55  ;;  %14901 = vmatprep.subr.bf16.mxu1 %v21364_v34  ;;  %v23795_v55 = vand.u32 4294901760, %v21213_v60  ;;  %v23800_v60 = vld [vmem:[#allocation95_spill] sm:$0xff] }
 0xc38   : > { %10017 = vmatmul.mubr.f32.vlgmr.msra.gmra.mrb[114].mxu0 %v10016_v31 }
 0xc39   : > { %10026 = vmatprep.mubr.f32.mxu0 %v10025_v13  ;;  %14863 = vmatpush3.bf16.msra.mxu0 %v14862_v7 }
 0xc3a   : > { %14903 = vmatpush3.bf16.msra.mxu1 %v21384_v49  ;;  %14865 = vmatprep.subr.bf16.mxu0 %v14864_v24 }
 0xc3b   : > { %14905 = vmatprep.subr.bf16.mxu1 %v21391_v10 }
 0xc3c   : > { %10032 = vmatmul.mubr.f32.gmra.mrb[116].mxu0 %v10031_v17 }
 0xc3d   : > { %14867 = vmatpush3.bf16.msra.mxu0 %v14866_v8  ;;  %10406 = vmatprep.mubr.f32.mxu0 %v21292_v52  ;;  %v14876_v52 = vpack.c.bf16 %v20935_v36, %v23786_v57  ;;  %v23788_v36 = vld [vmem:[#allocation92_spill] sm:$0xff] }
 0xc3e   : > { %14907 = vmatpush3.bf16.msra.mxu1 %v21411_v54  ;;  %14869 = vmatprep.subr.bf16.mxu0 %v14868_v37  ;;  %v14884_v2 = vpack.c.bf16 %v23788_v36, %v21040_v62  ;;  %v14890_v62 = vpack.c.bf16 %v21125_v58, %v23793_v43  ;;  %v23797_v58 = vand.u32 4294901760, %v21225_v18  ;;  %v23802_v18 = vld [vmem:[#allocation69_spill] sm:$0xff] }
 0xc3f   : > { %14909 = vmatprep.subr.bf16.mxu1 %v21417_v26 }
 0xc41   : > { %14871 = vmatpush3.bf16.msra.mxu0 %v14870_v25 }
 0xc42   : > { %14911 = vmatpush3.bf16.msra.mxu1 %v21433_v45  ;;  %14873 = vmatprep.subr.bf16.mxu0 %v14872_v56 }
 0xc43   : > { %14913 = vmatprep.subr.bf16.mxu1 %v21439_v42 }
 0xc45   : > { %14875 = vmatpush3.bf16.msra.mxu0 %v14874_v47 }
 0xc46   : > { %14915 = vmatpush3.bf16.msra.mxu1 %v21452_v20  ;;  %14877 = vmatprep.subr.bf16.mxu0 %v14876_v52 }
 0xc47   : > { %14917 = vmatprep.subr.bf16.mxu1 %v21464_v1 }
 0xc49   : > { %14879 = vmatpush3.bf16.msra.mxu0 %v14878_v53 }
 0xc4a   : > { %14919 = vmatpush3.bf16.msra.mxu1 %v21474_v41  ;;  %14881 = vmatprep.subr.bf16.mxu0 %v14880_v30 }
 0xc4b   : > { %14921 = vmatprep.subr.bf16.mxu1 %v21486_v11 }
 0xc4d   : > { %14883 = vmatpush3.bf16.msra.mxu0 %v14882_v39 }
 0xc4e   : > { %14923 = vmatpush3.bf16.msra.mxu1 %v21495_v48  ;;  %14885 = vmatprep.subr.bf16.mxu0 %v14884_v2 }
 0xc4f   : > { %14957 = vmatprep.subr.bf16.mxu1 %v21301_v33  ;;  %v23794_v33 = vand.u32 4294901760, %v21207_v3  ;;  %v23799_v3 = vld [vmem:[#allocation43_spill] sm:$0xff] }
 0xc51   : > { %10526 = vmatmul.mubr.f32.vlgmr.msra.gmra.mrb[126].mxu1 %v10014_v16  ;;  %14887 = vmatpush3.bf16.msra.mxu0 %v14886_v6  ;;  %v14924_v9 = vpack.c.bf16 %v23795_v55, %v23794_v33  ;;  %v23796_v16 = vand.u32 4294901760, %v21220_v63  ;;  %v23801_v63 = vld [vmem:[#allocation68_spill] sm:$0xff] }
 0xc52   : > { %10533 = vmatprep.mubr.f32.mxu1 %v10023_v38  ;;  %14959 = vmatpush3.bf16.msra.mxu1 %v21324_v28  ;;  %v23798_v28 = vld [vmem:[#allocation32_spill] sm:$0xff] }
 0xc53   : > { %14889 = vmatprep.subr.bf16.mxu0 %v14888_v0  ;;  %14961 = vmatprep.subr.bf16.mxu1 %v21330_v44  ;;  %v14926_v7 = vpack.c.bf16 %v23797_v58, %v23796_v16  ;;  %v23804_v44 = vld [vmem:[#allocation65_spill] sm:$0xff] }
 0xc55   : > { %10537 = vmatmul.mubr.f32.gmra.mrb[128].mxu1 %v10029_v50  ;;  %14891 = vmatpush3.bf16.msra.mxu0 %v14890_v62 }
 0xc56   : > { %14963 = vmatpush3.bf16.msra.mxu1 %v21356_v4  ;;  %10814 = vmatprep.mubr.f32.mxu1 %v23798_v28  ;;  %v23803_v4 = vld [vmem:[#allocation91_spill] sm:$0xff] }
 0xc57   : > { %14925 = vmatprep.subr.bf16.mxu0 %v14924_v9  ;;  %14965 = vmatprep.subr.bf16.mxu1 %v21364_v34  ;;  %v23805_v34 = vld [vmem:[#allocation82_spill] sm:$0xff] }
 0xc58   : > { %10409 = vmatmul.mubr.f32.vlgmr.msra.gmra.mrb[118].mxu0 %v21455_v21 }
 0xc59   : > { %10415 = vmatprep.mubr.f32.mxu0 %v21467_v22  ;;  %14927 = vmatpush3.bf16.msra.mxu0 %v14926_v7 }
 0xc5a   : > { %14967 = vmatpush3.bf16.msra.mxu1 %v21384_v49  ;;  %14929 = vmatprep.subr.bf16.mxu0 %v23799_v3  ;;  %v23806_v49 = vld [vmem:[#allocation87_spill] sm:$0xff] }
 0xc5b   : > { %14969 = vmatprep.subr.bf16.mxu1 %v21391_v10  ;;  %v23807_v10 = vld [vmem:[#allocation10_spill] sm:$0xff] }
 0xc5c   : > { %10418 = vmatmul.mubr.f32.gmra.mrb[120].mxu0 %v21478_v32 }
 0xc5d   : > { %14931 = vmatpush3.bf16.msra.mxu0 %v23800_v60  ;;  %10703 = vmatprep.mubr.f32.mxu0 %v23798_v28 }
 0xc5e   : > { %14971 = vmatpush3.bf16.msra.mxu1 %v21411_v54  ;;  %14933 = vmatprep.subr.bf16.mxu0 %v23801_v63  ;;  %v23808_v54 = vld [vmem:[#allocation20_spill] sm:$0xff] }
 0xc5f   : > { %14973 = vmatprep.subr.bf16.mxu1 %v21417_v26  ;;  %v23809_v26 = vld [vmem:[#allocation24_spill] sm:$0xff] }
 0xc61   : > { %14935 = vmatpush3.bf16.msra.mxu0 %v23802_v18 }
 0xc62   : > { %14975 = vmatpush3.bf16.msra.mxu1 %v21433_v45  ;;  %14937 = vmatprep.subr.bf16.mxu0 %v23803_v4  ;;  %v23810_v45 = vld [vmem:[#allocation45_spill] sm:$0xff] }
 0xc63   : > { %14977 = vmatprep.subr.bf16.mxu1 %v21439_v42  ;;  %v23811_v42 = vld [vmem:[#allocation22_spill] sm:$0xff] }
 0xc65   : > { %14939 = vmatpush3.bf16.msra.mxu0 %v23804_v44 }
 0xc66   : > { %14979 = vmatpush3.bf16.msra.mxu1 %v21452_v20  ;;  %14941 = vmatprep.subr.bf16.mxu0 %v23805_v34  ;;  %v23812_v20 = vld [vmem:[#allocation66_spill] sm:$0xff] }
 0xc67   : > { %14981 = vmatprep.subr.bf16.mxu1 %v21464_v1 }
 0xc69   : > { %14943 = vmatpush3.bf16.msra.mxu0 %v23806_v49 }
 0xc6a   : > { %14983 = vmatpush3.bf16.msra.mxu1 %v21474_v41  ;;  %14945 = vmatprep.subr.bf16.mxu0 %v23807_v10 }
 0xc6b   : > { %14985 = vmatprep.subr.bf16.mxu1 %v21486_v11 }
 0xc6d   : > { %14947 = vmatpush3.bf16.msra.mxu0 %v23808_v54 }
 0xc6e   : > { %14987 = vmatpush3.bf16.msra.mxu1 %v21495_v48  ;;  %14949 = vmatprep.subr.bf16.mxu0 %v23809_v26 }
 0xc71   : > { %10816 = vmatmul.mubr.f32.vlgmr.msra.gmra.mrb[130].mxu1 %v21441_v51  ;;  %14951 = vmatpush3.bf16.msra.mxu0 %v23810_v45 }
 0xc72   : > { %10821 = vmatprep.mubr.f32.mxu1 %v21445_v15  ;;  %14953 = vmatprep.subr.bf16.mxu0 %v23811_v42 }
 0xc75   : > { %10823 = vmatmul.mubr.f32.gmra.mrb[132].mxu1 %v21457_v27  ;;  %14955 = vmatpush3.bf16.msra.mxu0 %v23812_v20 }
 0xc78   : > { %10705 = vmatmul.mubr.f32.vlgmr.msra.gmra.mrb[122].mxu0 %v21441_v51 }
 0xc79   : > { %10710 = vmatprep.mubr.f32.mxu0 %v21445_v15 }
 0xc7c   : > { %10712 = vmatmul.mubr.f32.gmra.mrb[124].mxu0 %v21457_v27 }
 0xc9d   : > { %v12883_v21 = vpop.f32.mrb[110].mxu1 }
 0xc9e   : > { %v12884_v1 = vpop.f32.mrb[111].mxu1 }
 0xc9f   : > { %v12885_v22 = vadd.f32 %v12884_v1, %v12883_v21 }
 0xca1   : > { %v12886_v41 = vpop.f32.mrb[112].mxu1 }
 0xca2   : > { %v12887_v32 = vpop.f32.mrb[113].mxu1 }
 0xca3   : > { %v12888_v11 = vadd.f32 %v12887_v32, %v12886_v41 }
 0xca5   : > { %v12845_v38 = vpop.f32.mrb[102].mxu0 }
 0xca6   : > { %v12846_v48 = vpop.f32.mrb[103].mxu0 }
 0xca7   : > { %v12847_v50 = vadd.f32 %v12846_v48, %v12845_v38 }
 0xca9   : > { %v9348_v31 = vadd.f32 %v12885_v22, %v12847_v50  ;;  %v12848_v23 = vpop.f32.mrb[104].mxu0 }
 0xcaa   : > { %v12849_v19 = vpop.f32.mrb[105].mxu0 }
 0xcab   : > { %v12850_v24 = vadd.f32 %v12849_v19, %v12848_v23 }
 0xcad   : > { %v9355_v13 = vadd.f32 %v12888_v11, %v12850_v24 }
 0xcc2   : > { %v12959_v29 = vpop.f32.mrb[114].mxu1 }
 0xcc3   : > { %v12960_v51 = vpop.f32.mrb[115].mxu1 }
 0xcc4   : > { %v12961_v8 = vadd.f32 %v12960_v51, %v12959_v29 }
 0xcc6   : > { %v12962_v15 = vpop.f32.mrb[116].mxu1 }
 0xcc7   : > { %v12963_v17 = vpop.f32.mrb[117].mxu1 }
 0xcc8   : > { %v12964_v27 = vadd.f32 %v12963_v17, %v12962_v15 }
 0xccb   : > { %v12921_v59 = vpop.f32.mrb[106].mxu0 }
 0xccc   : > { %v12922_v40 = vpop.f32.mrb[107].mxu0 }
 0xccd   : > { %v12923_v37 = vadd.f32 %v12922_v40, %v12921_v59 }
 0xccf   : > { %v9493_v25 = vadd.f32 %v12923_v37, %v9348_v31  ;;  %v12924_v56 = vpop.f32.mrb[108].mxu0 }
 0xcd0   : > { %v12925_v14 = vpop.f32.mrb[109].mxu0 }
 0xcd1   : > { %v12926_v47 = vadd.f32 %v12925_v14, %v12924_v56  ;;  %v9610_v57 = vadd.f32 %v12961_v8, %v9493_v25 }
 0xcd3   : > { %v9502_v52 = vadd.f32 %v12926_v47, %v9355_v13 }
 0xcd5   : > { %v9621_v53 = vadd.f32 %v12964_v27, %v9502_v52  ;;  %v11383_v52 = vld [vmem:[%s601_s28] ss:$0 sm:$0xff] }
 0xce4   : > { %v13035_v12 = vpop.f32.mrb[118].mxu1 }
 0xce5   : > { %v13036_v30 = vpop.f32.mrb[119].mxu1 }
 0xce6   : > { %v13037_v39 = vadd.f32 %v13036_v30, %v13035_v12  ;;  %v23813_v12 = vld [vmem:[#allocation52_spill] sm:$0xff] }
 0xce8   : > { %v13038_v36 = vpop.f32.mrb[120].mxu1 }
 0xce9   : > { %v13039_v2 = vpop.f32.mrb[121].mxu1 }
 0xcea   : > { %v13040_v61 = vadd.f32 %v13039_v2, %v13038_v36  ;;  %v23814_v2 = vld [vmem:[#allocation7_spill] sm:$0xff] }
 0xceb   : > { %v12997_v5 = vpop.f32.mrb[110].mxu0 }
 0xcec   : > { %v12998_v6 = vpop.f32.mrb[111].mxu0 }
 0xced   : > { %v12999_v46 = vadd.f32 %v12998_v6, %v12997_v5  ;;  %v23815_v5 = vld [vmem:[#allocation26_spill] sm:$0xff] }
 0xcef   : > { %v9789_v35 = vadd.f32 %v12999_v46, %v9610_v57  ;;  %v13000_v0 = vpop.f32.mrb[112].mxu0 }
 0xcf0   : > { %v13001_v43 = vpop.f32.mrb[113].mxu0 }
 0xcf1   : > { %v13002_v62 = vadd.f32 %v13001_v43, %v13000_v0  ;;  %v9900_v33 = vadd.f32 %v13037_v39, %v9789_v35  ;;  %v23816_v0 = vld [vmem:[#allocation8_spill] sm:$0xff] }
 0xcf3   : > { %v9796_v55 = vadd.f32 %v13002_v62, %v9621_v53 }
 0xcf5   : > { %v9907_v9 = vadd.f32 %v13040_v61, %v9796_v55 }
 0xd04   : > { %v13111_v16 = vpop.f32.mrb[122].mxu1 }
 0xd05   : > { %v13112_v58 = vpop.f32.mrb[123].mxu1 }
 0xd06   : > { %v13113_v7 = vadd.f32 %v13112_v58, %v13111_v16 }
 0xd08   : > { %v13114_v28 = vpop.f32.mrb[124].mxu1 }
 0xd09   : > { %v13115_v3 = vpop.f32.mrb[125].mxu1 }
 0xd0a   : > { %v13116_v60 = vadd.f32 %v13115_v3, %v13114_v28 }
 0xd0b   : > { %v13073_v63 = vpop.f32.mrb[114].mxu0 }
 0xd0c   : > { %v13074_v18 = vpop.f32.mrb[115].mxu0 }
 0xd0d   : > { %v13075_v4 = vadd.f32 %v13074_v18, %v13073_v63 }
 0xd0f   : > { %v10019_v44 = vadd.f32 %v13075_v4, %v9900_v33  ;;  %v13076_v34 = vpop.f32.mrb[116].mxu0 }
 0xd10   : > { %v13077_v49 = vpop.f32.mrb[117].mxu0 }
 0xd11   : > { %v13078_v10 = vadd.f32 %v13077_v49, %v13076_v34  ;;  %v10266_v54 = vadd.f32 %v13113_v7, %v10019_v44 }
 0xd13   : > { %v10034_v26 = vadd.f32 %v13078_v10, %v9907_v9 }
 0xd15   : > { %v10273_v45 = vadd.f32 %v13116_v60, %v10034_v26  ;;  %v11384_v26 = vld [vmem:[%s581_s16] ss:$0 sm:$0xff] }
 0xd24   : > { %v13187_v42 = vpop.f32.mrb[126].mxu1 }
 0xd25   : > { %v13188_v20 = vpop.f32.mrb[127].mxu1 }
 0xd26   : > { %v13189_v21 = vadd.f32 %v13188_v20, %v13187_v42  ;;  %v11385_v42 = vld [vmem:[%s23817_s1] ss:$0 sm:$0xff] }
 0xd28   : > { %v13190_v1 = vpop.f32.mrb[128].mxu1 }
 0xd29   : > { %v13191_v22 = vpop.f32.mrb[129].mxu1 }
 0xd2a   : > { %v13192_v41 = vadd.f32 %v13191_v22, %v13190_v1 }
 0xd2b   : > { %v13149_v32 = vpop.f32.mrb[118].mxu0 }
 0xd2c   : > { %v13150_v11 = vpop.f32.mrb[119].mxu0 }
 0xd2d   : > { %v13151_v38 = vadd.f32 %v13150_v11, %v13149_v32 }
 0xd2f   : > { %v10411_v48 = vadd.f32 %v13151_v38, %v10266_v54  ;;  %v13152_v50 = vpop.f32.mrb[120].mxu0 }
 0xd30   : > { %v13153_v31 = vpop.f32.mrb[121].mxu0 }
 0xd31   : > { %v13154_v23 = vadd.f32 %v13153_v31, %v13152_v50  ;;  %v10528_v19 = vadd.f32 %v13189_v21, %v10411_v48 }
 0xd33   : > { %v10420_v24 = vadd.f32 %v13154_v23, %v10273_v45 }
 0xd35   : > { %v10539_v13 = vadd.f32 %v13192_v41, %v10420_v24 }
 0xd44   : > { %v13263_v29 = vpop.f32.mrb[130].mxu1 }
 0xd45   : > { %v13264_v51 = vpop.f32.mrb[131].mxu1 }
 0xd46   : > { %v13265_v8 = vadd.f32 %v13264_v51, %v13263_v29 }
 0xd48   : > { %v13266_v15 = vpop.f32.mrb[132].mxu1 }
 0xd49   : > { %v13267_v17 = vpop.f32.mrb[133].mxu1 }
 0xd4a   : > { %v13268_v27 = vadd.f32 %v13267_v17, %v13266_v15 }
 0xd4b   : > { %v13225_v59 = vpop.f32.mrb[122].mxu0 }
 0xd4c   : > { %v13226_v40 = vpop.f32.mrb[123].mxu0 }
 0xd4d   : > { %v13227_v37 = vadd.f32 %v13226_v40, %v13225_v59 }
 0xd4f   : > { %v10707_v25 = vadd.f32 %v13227_v37, %v10528_v19  ;;  %v13228_v56 = vpop.f32.mrb[124].mxu0 }
 0xd50   : > { %v13229_v14 = vpop.f32.mrb[125].mxu0 }
 0xd51   : > { %v10818_v47 = vadd.f32 %v13265_v8, %v10707_v25  ;;  %v13230_v57 = vadd.f32 %v13229_v14, %v13228_v56 }
 0xd53   : > { %v10714_v53 = vadd.f32 %v13230_v57, %v10539_v13  ;;  %v10828_v30 = vadd.f32 %v10818_v47, %v23813_v12 }
 0xd55   : > { %v10825_v39 = vadd.f32 %v13268_v27, %v10714_v53  ;;  %v10837_v36 = vadd.f32 %v11383_v52, %v10828_v30 }
 0xd57   : > { %v10839_v61 = vadd.f32 %v10837_v36, %v23814_v2  ;;  %v10829_v6 = vadd.f32 %v10825_v39, %v23815_v5 }
 0xd59   : > { %v10843_v46 = vsel %vm624_vm1, %v10839_v61, 0.0  ;;  %v10838_v35 = vadd.f32 %v11383_v52, %v10829_v6 }
 0xd5a   : > { %10844 = vadd.xlane.f32.xlu1 %v10843_v46 }
 0xd5b   : > { %v10840_v43 = vadd.f32 %v10838_v35, %v23816_v0 }
 0xd5d   : > { %v10846_v62 = vsel %vm624_vm1, %v10840_v43, 0.0 }
 0xd5e   : > { %10847 = vadd.xlane.f32.xlu0 %v10846_v62 }
 0xde7   : > { %v10845_v33 = vpop.xlane.xlu1 %10844 }
 0xde8   : > { %v10849_v55 = vmul.f32 0.03125, %v10845_v33 }
 0xdea   : > { %v10851_v9 = vsub.f32 %v10839_v61, %v10849_v55 }
 0xdeb   : > { %v10848_v16 = vpop.xlane.xlu0 %10847 }
 0xdec   : > { %v10850_v58 = vmul.f32 0.03125, %v10848_v16  ;;  %v10853_v7 = vmul.f32 %v10851_v9, %v10851_v9 }
 0xdee   : > { %v10852_v28 = vsub.f32 %v10840_v43, %v10850_v58  ;;  %v10855_v3 = vsel %vm624_vm1, %v10853_v7, 0.0 }
 0xdef   : > { %10856 = vadd.xlane.f32.xlu1 %v10855_v3 }
 0xdf0   : > { %v10854_v60 = vmul.f32 %v10852_v28, %v10852_v28 }
 0xdf2   : > { %v10858_v63 = vsel %vm624_vm1, %v10854_v60, 0.0 }
 0xdf3   : > { %10859 = vadd.xlane.f32.xlu0 %v10858_v63 }
 0xe7c   : > { %v10857_v18 = vpop.xlane.xlu1 %10856 }
 0xe7d   : > { %v10861_v4 = vmul.f32 0.03125, %v10857_v18 }
 0xe7f   : > { %v10863_v44 = vadd.f32 1e-05, %v10861_v4 }
 0xe80   : > { %v10860_v34 = vpop.xlane.xlu0 %10859 }
 0xe81   : > { %15052 = vrsqrt.f32 %v10863_v44  ;;  %v10862_v49 = vmul.f32 0.03125, %v10860_v34 }
 0xe83   : > { %v10864_v10 = vadd.f32 1e-05, %v10862_v49 }
 0xe85   : > { %15054 = vrsqrt.f32 %v10864_v10 }
 0xe8b   : > { %v15053_v54 = vpop.eup %15052 }
 0xe8c   : > { %v10867_v45 = vmul.f32 %v15053_v54, %v10851_v9 }
 0xe8e   : > { %v10875_v20 = vmul.f32 %v11384_v26, %v10867_v45 }
 0xe8f   : > { %v15055_v21 = vpop.eup %15054 }
 0xe90   : > { %v10883_v1 = vadd.f32 %v11385_v42, %v10875_v20  ;;  %v10868_v22 = vmul.f32 %v15055_v21, %v10852_v28  ;;  %10890 = sbr.rel (%p11386_p5) target bundleno = 3751 (0xea7), region = 80 }
 0xe92   : > { %10885 = vst.msk [vmem:[#allocation2] sm:$0xff] %vm624_vm1, %v10883_v1  ;;  %v10876_v41 = vmul.f32 %v11384_v26, %v10868_v22  ;;  %v10891_v11 = vsel (!%p11386_p5), %vm624_vm1, %v10883_v1, 0.0 }
 0xe93   : > { %v10892_v48 = vrot.slane (!%p11386_p5), %v10891_v11, 4 }
 0xe94   : > { %v10884_v32 = vadd.f32 %v11385_v42, %v10876_v41 }
 0xe95   : > { %v10893_v31 = vadd.f32 (!%p11386_p5), %v10892_v48, %v10891_v11 }
 0xe96   : > { %10886 = vst.msk [vmem:[#allocation2 + $0x8] sm:$0xff] %vm624_vm1, %v10884_v32  ;;  %v10898_v38 = vsel (!%p11386_p5), %vm624_vm1, %v10884_v32, 0.0 }
 0xe97   : > { %v10899_v50 = vrot.slane %v10898_v38, 4  ;;  %v10894_v19 = vrot.slane %v10893_v31, 2 }
 0xe99   : > { %v10900_v23 = vadd.f32 %v10899_v50, %v10898_v38  ;;  %v10895_v13 = vadd.f32 %v10894_v19, %v10893_v31 }
 0xe9b   : > { %v10901_v24 = vrot.slane %v10900_v23, 2  ;;  %v10896_v51 = vrot.slane %v10895_v13, 1 }
 0xe9d   : > { %v10902_v29 = vadd.f32 %v10901_v24, %v10900_v23  ;;  %v10897_v15 = vadd.f32 %v10896_v51, %v10895_v13 }
 0xe9f   : > { %v10903_v8 = vrot.slane %v10902_v29, 1  ;;  %v10906_v27 = vmul.f32 0.125, %v10897_v15 }
 0xea1   : > { %v10904_v17 = vadd.f32 %v10903_v8, %v10902_v29 }
 0xea3   : > { %v10907_v59 = vmul.f32 0.125, %v10904_v17 }
 0xea5   : > { %v10911_v40 = vsel %vm10910_vm4, %v10907_v59, %v10906_v27 }
 0xea6   : > { %10914 = vst.msk [vmem:[#allocation3] sm:$0x3] %vm10913_vm5, %v10911_v40 }
 0xea7 PF: > { %p14998_p6 = scmp.eq.s32.totalorder %s15179_s26, 1  ;;  %s15102_s27 = smov [#allocation3]  }
 0xea8   : > { %s10922_s16 = sshll.u32 %s15102_s27, 4  ;;  %s10923_s16 = int_to_ptr.vmem [resolvable:$true] %s10922_s16 }
 0xea9   : > { %s15057_s18 = scalar_lea.vmem %s10923_s16, 32  ;;  %p15064_p10 = scmp.lt.s32.totalorder %s10923_s16, %s10923_s16 }
 0xeaa   : > { %p15058_p7 = scmp.ne.s32.totalorder %s10923_s16, %s15057_s18  ;;  %p15065_p11 = scmp.lt.s32.totalorder %s15057_s18, %s15057_s18 }
 0xeac   : > { %p15059_p8 = pnand %p15058_p7, %p14998_p6  ;;  %p15066_p12 = por %p15065_p11, %p15064_p10 }
 0xeae   : > { %p15060_p9 = pneg %p15059_p8 }
 0xeb0   : > { %p15067_p13 = pnand %p15066_p12, %p15060_p9 }
 0xeb2   : > { %15070 = shalt.err (!%p15067_p13)
}
 0xeb3   : > { %s23818_s13 = sld [smem:[#allocation100_spill]] }
 0xeb9   : > { %s15071_s20 = scalar_lea.hbm %s23818_s13, 32 }
 0xeba   : > { %p15072_p0 = scmp.ne.s32.totalorder %s23818_s13, %s15071_s20  ;;  %p15077_p3 = scmp.lt.u32.totalorder %s15071_s20, %s23818_s13 }
 0xebc   : > { %p15073_p1 = pnand %p15072_p0, %p14998_p6 }
 0xebe   : > { %p15074_p2 = pneg %p15073_p1 }
 0xec0   : > { %p15079_p4 = pnand %p15077_p3, %p15074_p2 }
 0xec2   : > { %15082 = shalt.err (!%p15079_p4)
}
 0xec3   : > { %14995 = dma.vmem_to_hbm [thread:$0]  (%p14998_p6), %s10923_s16, 32, %s23818_s13, [#allocation4]  }
 0xec4   : > { %15088 = dma.done.wait (%p14998_p6), [#allocation4], 32  }
 0xec5   : > { %15090 = vsyncadd (%p14998_p6), [#allocation4], 4294967264 }
 0xec6 PF: > { %s23819_s0 = sld [smem:[#allocation6_spill]] }
 0xecc   : > { %s24_s25 = sadd.s32 1, %s23819_s0  }
 0xecd   : > { %p21_p5 = scmp.ge.s32.totalorder %s24_s25, 4  }
 0xecf   :  { %23 = sbr.rel (!%p21_p5) target bundleno = 6 (0x6), region = 149 }
 0xed6   :  { %10935 = vsyncpa [#allocation4], 1 }
 0xed7   :  { %10937 = vsyncpa [#allocation4 + $0x1], 1 }

</bundles_post_ra>
